<compile_context>
chip_gen: v6e
topology: v6e:2x2x1
jax: 0.10.0
libtpu: 0.0.40
codegen_flags: <defaults>
</compile_context>

<pallas_src>
import functools

import jax
import jax.numpy as jnp
from jax.experimental import pallas as pl
from jax.experimental.pallas import tpu as pltpu


def _double_conv_kernel(x_ref, w1_ref, s1_ref, t1_ref, w2_ref, s2_ref, t2_ref,
                        o_ref, y1p_ref, *, cin, mid, cout, h, w):
    """x_ref: (1, cin, h+4, w+4) VMEM; w*/s*/t* refs: 1-D SMEM scalars;
    o_ref: (1, cout, h, w); y1p_ref: (mid, h+2, w+2) VMEM scratch."""
    f32 = jnp.float32
    ph, pw = h + 2, w + 2  # conv1 is computed on a 1-pixel-wider grid

    # ---- conv1 (3x3, pad=1), over-computed on the (h+2, w+2) grid ---------
    acc1 = [jnp.zeros((ph, pw), f32) for _ in range(mid)]
    for ci in range(cin):
        for dh in range(3):
            for dw in range(3):
                v = x_ref[0, ci, dh:dh + ph, dw:dw + pw].astype(f32)
                for co in range(mid):
                    wk = w1_ref[((co * cin + ci) * 3 + dh) * 3 + dw]
                    acc1[co] = acc1[co] + wk * v

    # Fused BN1 (folded scale/shift, bias included) + ReLU; zero the outer
    # ring so the scratch is exactly conv2's zero-padded (padding=1) input.
    row_id = jax.lax.broadcasted_iota(jnp.int32, (ph, pw), 0)
    col_id = jax.lax.broadcasted_iota(jnp.int32, (ph, pw), 1)
    interior = (row_id >= 1) & (row_id <= h) & (col_id >= 1) & (col_id <= w)
    y1 = [jnp.where(interior,
                    jnp.maximum(acc1[co] * s1_ref[co] + t1_ref[co], 0.0),
                    0.0)
          for co in range(mid)]
    y1p_ref[...] = jnp.stack(y1, axis=0)

    # ---- conv2 (3x3, pad=1) + BN2 + ReLU ----------------------------------
    acc2 = [jnp.zeros((h, w), f32) for _ in range(cout)]
    for ci in range(mid):
        for dh in range(3):
            for dw in range(3):
                v = y1p_ref[ci, dh:dh + h, dw:dw + w]
                for co in range(cout):
                    wk = w2_ref[((co * mid + ci) * 3 + dh) * 3 + dw]
                    acc2[co] = acc2[co] + wk * v

    y2 = [jnp.maximum(acc2[co] * s2_ref[co] + t2_ref[co], 0.0)
          for co in range(cout)]
    o_ref[...] = jnp.stack(y2, axis=0)[None].astype(o_ref.dtype)


def double_conv_forward(x, params, eps=1e-5):
    """DoubleConv forward. x: (N, Cin, H, W) NCHW. BN uses running stats."""
    n, cin, h, w = x.shape
    w1 = params["w1"].astype(jnp.float32)   # (mid, cin, 3, 3)
    w2 = params["w2"].astype(jnp.float32)   # (cout, mid, 3, 3)
    mid, cout = w1.shape[0], w2.shape[0]

    # Fold conv bias + BatchNorm (inference) into per-channel scale & shift:
    #   BN(conv(x) + b) = s * conv(x) + t,  s = g/sqrt(v+eps), t = (b-m)*s + beta
    s1 = (params["gamma1"] / jnp.sqrt(params["var1"] + eps)).astype(jnp.float32)
    t1 = ((params["b1"] - params["mean1"]) * s1 + params["beta1"]).astype(jnp.float32)
    s2 = (params["gamma2"] / jnp.sqrt(params["var2"] + eps)).astype(jnp.float32)
    t2 = ((params["b2"] - params["mean2"]) * s2 + params["beta2"]).astype(jnp.float32)

    # Pad spatially by 2 once (conv1 is evaluated on an (h+2, w+2) grid so the
    # fused conv2 sees a zero-padded intermediate without unaligned stores).
    xpp = jnp.pad(x, ((0, 0), (0, 0), (2, 2), (2, 2)))

    kernel = functools.partial(_double_conv_kernel,
                               cin=cin, mid=mid, cout=cout, h=h, w=w)

    itemsize = jnp.dtype(x.dtype).itemsize
    flops = int(2 * n * h * w * 9 * (cin * mid + mid * cout))
    bytes_accessed = int(n * cin * h * w * itemsize
                         + n * cout * h * w * itemsize
                         + (w1.size + w2.size + 2 * (mid + cout)) * 4)

    smem_spec = pl.BlockSpec(memory_space=pltpu.MemorySpace.SMEM)

    return pl.pallas_call(
        kernel,
        out_shape=jax.ShapeDtypeStruct((n, cout, h, w), x.dtype),
        grid_spec=pltpu.PrefetchScalarGridSpec(
            num_scalar_prefetch=0,
            grid=(n,),
            in_specs=[
                pl.BlockSpec((1, cin, h + 4, w + 4), lambda i: (i, 0, 0, 0)),
                smem_spec,  # w1 (flattened)
                smem_spec,  # s1
                smem_spec,  # t1
                smem_spec,  # w2 (flattened)
                smem_spec,  # s2
                smem_spec,  # t2
            ],
            out_specs=pl.BlockSpec((1, cout, h, w), lambda i: (i, 0, 0, 0)),
            scratch_shapes=[pltpu.VMEM((mid, h + 2, w + 2), jnp.float32)],
        ),
        compiler_params=pltpu.CompilerParams(
            dimension_semantics=("parallel",)),
        cost_estimate=pl.CostEstimate(
            flops=flops, transcendentals=0, bytes_accessed=bytes_accessed),
    )(xpp, w1.reshape(-1), s1, t1, w2.reshape(-1), s2, t2)


def make_params(key, in_channels, out_channels, mid_channels=None,
                dtype=jnp.float32):
    """Deterministic Conv2d(3x3) + BatchNorm2d params (torch-like init bounds;
    BN running stats are randomized so the inference-BN path is exercised)."""
    if mid_channels is None:
        mid_channels = out_channels
    keys = jax.random.split(key, 6)

    def conv_init(k, co, ci):
        kw, kb = jax.random.split(k)
        bound = 1.0 / (ci * 9) ** 0.5
        wgt = jax.random.uniform(kw, (co, ci, 3, 3), dtype, -bound, bound)
        b = jax.random.uniform(kb, (co,), dtype, -bound, bound)
        return wgt, b

    def bn_init(k, c):
        kg, kb, km, kv = jax.random.split(k, 4)
        gamma = jax.random.uniform(kg, (c,), dtype, 0.5, 1.5)
        beta = jax.random.normal(kb, (c,), dtype) * 0.1
        mean = jax.random.normal(km, (c,), dtype) * 0.1
        var = jax.random.uniform(kv, (c,), dtype, 0.5, 1.5)
        return gamma, beta, mean, var

    w1, b1 = conv_init(keys[0], mid_channels, in_channels)
    w2, b2 = conv_init(keys[1], out_channels, mid_channels)
    g1, bt1, m1, v1 = bn_init(keys[2], mid_channels)
    g2, bt2, m2, v2 = bn_init(keys[3], out_channels)
    return dict(w1=w1, b1=b1, gamma1=g1, beta1=bt1, mean1=m1, var1=v1,
                w2=w2, b2=b2, gamma2=g2, beta2=bt2, mean2=m2, var2=v2)


def _reference_double_conv(x, p, eps=1e-5):
    """Pure-JAX reference with identical (inference-BN) semantics."""
    def conv_bn_relu(inp, wgt, b, gamma, beta, mean, var):
        y = jax.lax.conv_general_dilated(
            inp, wgt, window_strides=(1, 1), padding=((1, 1), (1, 1)),
            dimension_numbers=("NCHW", "OIHW", "NCHW"),
            precision=jax.lax.Precision.HIGHEST)
        y = y + b[None, :, None, None]
        y = (gamma[None, :, None, None] * (y - mean[None, :, None, None])
             / jnp.sqrt(var[None, :, None, None] + eps)
             + beta[None, :, None, None])
        return jnp.maximum(y, 0.0)

    y = conv_bn_relu(x, p["w1"], p["b1"], p["gamma1"], p["beta1"],
                     p["mean1"], p["var1"])
    return conv_bn_relu(y, p["w2"], p["b2"], p["gamma2"], p["beta2"],
                        p["mean2"], p["var2"])


if __name__ == "__main__":
    key = jax.random.PRNGKey(0)
    k_x, k_p = jax.random.split(key)

    N, CIN, COUT, H, W = 2, 4, 4, 16, 16
    x = jax.random.normal(k_x, (N, CIN, H, W), dtype=jnp.float32)
    params = make_params(k_p, CIN, COUT)

    y = double_conv_forward(x, params)
    y = jax.block_until_ready(y)

    y_ref = _reference_double_conv(x, params)
    assert y.shape == (N, COUT, H, W)
    err = float(jnp.max(jnp.abs(y - y_ref)))
    assert jnp.allclose(y, y_ref, atol=1e-4, rtol=1e-3), f"max abs err {err}"

    print("KERNEL_OK")
</pallas_src>

<mosaic_0001>
module attributes {stable_mosaic.version = 11 : i64} {
  func.func @_double_conv_kernel(%arg0: i32, %arg1: memref<1x4x20x20xf32, #tpu.memory_space<vmem>>, %arg2: memref<144xf32, #tpu.memory_space<smem>>, %arg3: memref<4xf32, #tpu.memory_space<smem>>, %arg4: memref<4xf32, #tpu.memory_space<smem>>, %arg5: memref<144xf32, #tpu.memory_space<smem>>, %arg6: memref<4xf32, #tpu.memory_space<smem>>, %arg7: memref<4xf32, #tpu.memory_space<smem>>, %arg8: memref<1x4x16x16xf32, #tpu.memory_space<vmem>>, %arg9: memref<4x18x18xf32, #tpu.memory_space<vmem>>) attributes {dimension_semantics = [#tpu.dimension_semantics<parallel>], iteration_bounds = array<i64: 2>, scalar_prefetch = 0 : i64, scratch_operands = 1 : i64, tpu.core_type = #tpu.core_type<tc>, window_params = [{transform_indices = @transform_0, window_bounds = array<i64: 1, 4, 20, 20>}, {transform_indices = @transform_1, window_bounds = array<i64: 144>}, {transform_indices = @transform_2, window_bounds = array<i64: 4>}, {transform_indices = @transform_3, window_bounds = array<i64: 4>}, {transform_indices = @transform_4, window_bounds = array<i64: 144>}, {transform_indices = @transform_5, window_bounds = array<i64: 4>}, {transform_indices = @transform_6, window_bounds = array<i64: 4>}, {transform_indices = @transform_7, window_bounds = array<i64: 1, 4, 16, 16>}]} {
    %cst = arith.constant 0.000000e+00 : f32
    %0 = vector.broadcast %cst : f32 to vector<18x18xf32>
    %cst_0 = arith.constant 0.000000e+00 : f32
    %1 = vector.broadcast %cst_0 : f32 to vector<18x18xf32>
    %cst_1 = arith.constant 0.000000e+00 : f32
    %2 = vector.broadcast %cst_1 : f32 to vector<18x18xf32>
    %cst_2 = arith.constant 0.000000e+00 : f32
    %3 = vector.broadcast %cst_2 : f32 to vector<18x18xf32>
    %c0 = arith.constant 0 : index
    %c0_3 = arith.constant 0 : index
    %c0_4 = arith.constant 0 : index
    %c0_5 = arith.constant 0 : index
    %4 = vector.load %arg1[%c0, %c0_3, %c0_4, %c0_5] : memref<1x4x20x20xf32, #tpu.memory_space<vmem>>, vector<1x1x18x18xf32>
    %5 = vector.shape_cast %4 : vector<1x1x18x18xf32> to vector<18x18xf32>
    %c0_6 = arith.constant 0 : index
    %6 = memref.load %arg2[%c0_6] : memref<144xf32, #tpu.memory_space<smem>>
    %7 = vector.broadcast %6 : f32 to vector<18x18xf32>
    %8 = arith.mulf %7, %5 : vector<18x18xf32>
    %9 = arith.addf %0, %8 : vector<18x18xf32>
    %c36 = arith.constant 36 : index
    %10 = memref.load %arg2[%c36] : memref<144xf32, #tpu.memory_space<smem>>
    %11 = vector.broadcast %10 : f32 to vector<18x18xf32>
    %12 = arith.mulf %11, %5 : vector<18x18xf32>
    %13 = arith.addf %1, %12 : vector<18x18xf32>
    %c72 = arith.constant 72 : index
    %14 = memref.load %arg2[%c72] : memref<144xf32, #tpu.memory_space<smem>>
    %15 = vector.broadcast %14 : f32 to vector<18x18xf32>
    %16 = arith.mulf %15, %5 : vector<18x18xf32>
    %17 = arith.addf %2, %16 : vector<18x18xf32>
    %c108 = arith.constant 108 : index
    %18 = memref.load %arg2[%c108] : memref<144xf32, #tpu.memory_space<smem>>
    %19 = vector.broadcast %18 : f32 to vector<18x18xf32>
    %20 = arith.mulf %19, %5 : vector<18x18xf32>
    %21 = arith.addf %3, %20 : vector<18x18xf32>
    %c0_7 = arith.constant 0 : index
    %c0_8 = arith.constant 0 : index
    %c0_9 = arith.constant 0 : index
    %c1 = arith.constant 1 : index
    %22 = vector.load %arg1[%c0_7, %c0_8, %c0_9, %c1] : memref<1x4x20x20xf32, #tpu.memory_space<vmem>>, vector<1x1x18x18xf32>
    %23 = vector.shape_cast %22 : vector<1x1x18x18xf32> to vector<18x18xf32>
    %c1_10 = arith.constant 1 : index
    %24 = memref.load %arg2[%c1_10] : memref<144xf32, #tpu.memory_space<smem>>
    %25 = vector.broadcast %24 : f32 to vector<18x18xf32>
    %26 = arith.mulf %25, %23 : vector<18x18xf32>
    %27 = arith.addf %9, %26 : vector<18x18xf32>
    %c37 = arith.constant 37 : index
    %28 = memref.load %arg2[%c37] : memref<144xf32, #tpu.memory_space<smem>>
    %29 = vector.broadcast %28 : f32 to vector<18x18xf32>
    %30 = arith.mulf %29, %23 : vector<18x18xf32>
    %31 = arith.addf %13, %30 : vector<18x18xf32>
    %c73 = arith.constant 73 : index
    %32 = memref.load %arg2[%c73] : memref<144xf32, #tpu.memory_space<smem>>
    %33 = vector.broadcast %32 : f32 to vector<18x18xf32>
    %34 = arith.mulf %33, %23 : vector<18x18xf32>
    %35 = arith.addf %17, %34 : vector<18x18xf32>
    %c109 = arith.constant 109 : index
    %36 = memref.load %arg2[%c109] : memref<144xf32, #tpu.memory_space<smem>>
    %37 = vector.broadcast %36 : f32 to vector<18x18xf32>
    %38 = arith.mulf %37, %23 : vector<18x18xf32>
    %39 = arith.addf %21, %38 : vector<18x18xf32>
    %c0_11 = arith.constant 0 : index
    %c0_12 = arith.constant 0 : index
    %c0_13 = arith.constant 0 : index
    %c2 = arith.constant 2 : index
    %40 = vector.load %arg1[%c0_11, %c0_12, %c0_13, %c2] : memref<1x4x20x20xf32, #tpu.memory_space<vmem>>, vector<1x1x18x18xf32>
    %41 = vector.shape_cast %40 : vector<1x1x18x18xf32> to vector<18x18xf32>
    %c2_14 = arith.constant 2 : index
    %42 = memref.load %arg2[%c2_14] : memref<144xf32, #tpu.memory_space<smem>>
    %43 = vector.broadcast %42 : f32 to vector<18x18xf32>
    %44 = arith.mulf %43, %41 : vector<18x18xf32>
    %45 = arith.addf %27, %44 : vector<18x18xf32>
    %c38 = arith.constant 38 : index
    %46 = memref.load %arg2[%c38] : memref<144xf32, #tpu.memory_space<smem>>
    %47 = vector.broadcast %46 : f32 to vector<18x18xf32>
    %48 = arith.mulf %47, %41 : vector<18x18xf32>
    %49 = arith.addf %31, %48 : vector<18x18xf32>
    %c74 = arith.constant 74 : index
    %50 = memref.load %arg2[%c74] : memref<144xf32, #tpu.memory_space<smem>>
    %51 = vector.broadcast %50 : f32 to vector<18x18xf32>
    %52 = arith.mulf %51, %41 : vector<18x18xf32>
    %53 = arith.addf %35, %52 : vector<18x18xf32>
    %c110 = arith.constant 110 : index
    %54 = memref.load %arg2[%c110] : memref<144xf32, #tpu.memory_space<smem>>
    %55 = vector.broadcast %54 : f32 to vector<18x18xf32>
    %56 = arith.mulf %55, %41 : vector<18x18xf32>
    %57 = arith.addf %39, %56 : vector<18x18xf32>
    %c0_15 = arith.constant 0 : index
    %c0_16 = arith.constant 0 : index
    %c1_17 = arith.constant 1 : index
    %c0_18 = arith.constant 0 : index
    %58 = vector.load %arg1[%c0_15, %c0_16, %c1_17, %c0_18] : memref<1x4x20x20xf32, #tpu.memory_space<vmem>>, vector<1x1x18x18xf32>
    %59 = vector.shape_cast %58 : vector<1x1x18x18xf32> to vector<18x18xf32>
    %c3 = arith.constant 3 : index
    %60 = memref.load %arg2[%c3] : memref<144xf32, #tpu.memory_space<smem>>
    %61 = vector.broadcast %60 : f32 to vector<18x18xf32>
    %62 = arith.mulf %61, %59 : vector<18x18xf32>
    %63 = arith.addf %45, %62 : vector<18x18xf32>
    %c39 = arith.constant 39 : index
    %64 = memref.load %arg2[%c39] : memref<144xf32, #tpu.memory_space<smem>>
    %65 = vector.broadcast %64 : f32 to vector<18x18xf32>
    %66 = arith.mulf %65, %59 : vector<18x18xf32>
    %67 = arith.addf %49, %66 : vector<18x18xf32>
    %c75 = arith.constant 75 : index
    %68 = memref.load %arg2[%c75] : memref<144xf32, #tpu.memory_space<smem>>
    %69 = vector.broadcast %68 : f32 to vector<18x18xf32>
    %70 = arith.mulf %69, %59 : vector<18x18xf32>
    %71 = arith.addf %53, %70 : vector<18x18xf32>
    %c111 = arith.constant 111 : index
    %72 = memref.load %arg2[%c111] : memref<144xf32, #tpu.memory_space<smem>>
    %73 = vector.broadcast %72 : f32 to vector<18x18xf32>
    %74 = arith.mulf %73, %59 : vector<18x18xf32>
    %75 = arith.addf %57, %74 : vector<18x18xf32>
    %c0_19 = arith.constant 0 : index
    %c0_20 = arith.constant 0 : index
    %c1_21 = arith.constant 1 : index
    %c1_22 = arith.constant 1 : index
    %76 = vector.load %arg1[%c0_19, %c0_20, %c1_21, %c1_22] : memref<1x4x20x20xf32, #tpu.memory_space<vmem>>, vector<1x1x18x18xf32>
    %77 = vector.shape_cast %76 : vector<1x1x18x18xf32> to vector<18x18xf32>
    %c4 = arith.constant 4 : index
    %78 = memref.load %arg2[%c4] : memref<144xf32, #tpu.memory_space<smem>>
    %79 = vector.broadcast %78 : f32 to vector<18x18xf32>
    %80 = arith.mulf %79, %77 : vector<18x18xf32>
    %81 = arith.addf %63, %80 : vector<18x18xf32>
    %c40 = arith.constant 40 : index
    %82 = memref.load %arg2[%c40] : memref<144xf32, #tpu.memory_space<smem>>
    %83 = vector.broadcast %82 : f32 to vector<18x18xf32>
    %84 = arith.mulf %83, %77 : vector<18x18xf32>
    %85 = arith.addf %67, %84 : vector<18x18xf32>
    %c76 = arith.constant 76 : index
    %86 = memref.load %arg2[%c76] : memref<144xf32, #tpu.memory_space<smem>>
    %87 = vector.broadcast %86 : f32 to vector<18x18xf32>
    %88 = arith.mulf %87, %77 : vector<18x18xf32>
    %89 = arith.addf %71, %88 : vector<18x18xf32>
    %c112 = arith.constant 112 : index
    %90 = memref.load %arg2[%c112] : memref<144xf32, #tpu.memory_space<smem>>
    %91 = vector.broadcast %90 : f32 to vector<18x18xf32>
    %92 = arith.mulf %91, %77 : vector<18x18xf32>
    %93 = arith.addf %75, %92 : vector<18x18xf32>
    %c0_23 = arith.constant 0 : index
    %c0_24 = arith.constant 0 : index
    %c1_25 = arith.constant 1 : index
    %c2_26 = arith.constant 2 : index
    %94 = vector.load %arg1[%c0_23, %c0_24, %c1_25, %c2_26] : memref<1x4x20x20xf32, #tpu.memory_space<vmem>>, vector<1x1x18x18xf32>
    %95 = vector.shape_cast %94 : vector<1x1x18x18xf32> to vector<18x18xf32>
    %c5 = arith.constant 5 : index
    %96 = memref.load %arg2[%c5] : memref<144xf32, #tpu.memory_space<smem>>
    %97 = vector.broadcast %96 : f32 to vector<18x18xf32>
    %98 = arith.mulf %97, %95 : vector<18x18xf32>
    %99 = arith.addf %81, %98 : vector<18x18xf32>
    %c41 = arith.constant 41 : index
    %100 = memref.load %arg2[%c41] : memref<144xf32, #tpu.memory_space<smem>>
    %101 = vector.broadcast %100 : f32 to vector<18x18xf32>
    %102 = arith.mulf %101, %95 : vector<18x18xf32>
    %103 = arith.addf %85, %102 : vector<18x18xf32>
    %c77 = arith.constant 77 : index
    %104 = memref.load %arg2[%c77] : memref<144xf32, #tpu.memory_space<smem>>
    %105 = vector.broadcast %104 : f32 to vector<18x18xf32>
    %106 = arith.mulf %105, %95 : vector<18x18xf32>
    %107 = arith.addf %89, %106 : vector<18x18xf32>
    %c113 = arith.constant 113 : index
    %108 = memref.load %arg2[%c113] : memref<144xf32, #tpu.memory_space<smem>>
    %109 = vector.broadcast %108 : f32 to vector<18x18xf32>
    %110 = arith.mulf %109, %95 : vector<18x18xf32>
    %111 = arith.addf %93, %110 : vector<18x18xf32>
    %c0_27 = arith.constant 0 : index
    %c0_28 = arith.constant 0 : index
    %c2_29 = arith.constant 2 : index
    %c0_30 = arith.constant 0 : index
    %112 = vector.load %arg1[%c0_27, %c0_28, %c2_29, %c0_30] : memref<1x4x20x20xf32, #tpu.memory_space<vmem>>, vector<1x1x18x18xf32>
    %113 = vector.shape_cast %112 : vector<1x1x18x18xf32> to vector<18x18xf32>
    %c6 = arith.constant 6 : index
    %114 = memref.load %arg2[%c6] : memref<144xf32, #tpu.memory_space<smem>>
    %115 = vector.broadcast %114 : f32 to vector<18x18xf32>
    %116 = arith.mulf %115, %113 : vector<18x18xf32>
    %117 = arith.addf %99, %116 : vector<18x18xf32>
    %c42 = arith.constant 42 : index
    %118 = memref.load %arg2[%c42] : memref<144xf32, #tpu.memory_space<smem>>
    %119 = vector.broadcast %118 : f32 to vector<18x18xf32>
    %120 = arith.mulf %119, %113 : vector<18x18xf32>
    %121 = arith.addf %103, %120 : vector<18x18xf32>
    %c78 = arith.constant 78 : index
    %122 = memref.load %arg2[%c78] : memref<144xf32, #tpu.memory_space<smem>>
    %123 = vector.broadcast %122 : f32 to vector<18x18xf32>
    %124 = arith.mulf %123, %113 : vector<18x18xf32>
    %125 = arith.addf %107, %124 : vector<18x18xf32>
    %c114 = arith.constant 114 : index
    %126 = memref.load %arg2[%c114] : memref<144xf32, #tpu.memory_space<smem>>
    %127 = vector.broadcast %126 : f32 to vector<18x18xf32>
    %128 = arith.mulf %127, %113 : vector<18x18xf32>
    %129 = arith.addf %111, %128 : vector<18x18xf32>
    %c0_31 = arith.constant 0 : index
    %c0_32 = arith.constant 0 : index
    %c2_33 = arith.constant 2 : index
    %c1_34 = arith.constant 1 : index
    %130 = vector.load %arg1[%c0_31, %c0_32, %c2_33, %c1_34] : memref<1x4x20x20xf32, #tpu.memory_space<vmem>>, vector<1x1x18x18xf32>
    %131 = vector.shape_cast %130 : vector<1x1x18x18xf32> to vector<18x18xf32>
    %c7 = arith.constant 7 : index
    %132 = memref.load %arg2[%c7] : memref<144xf32, #tpu.memory_space<smem>>
    %133 = vector.broadcast %132 : f32 to vector<18x18xf32>
    %134 = arith.mulf %133, %131 : vector<18x18xf32>
    %135 = arith.addf %117, %134 : vector<18x18xf32>
    %c43 = arith.constant 43 : index
    %136 = memref.load %arg2[%c43] : memref<144xf32, #tpu.memory_space<smem>>
    %137 = vector.broadcast %136 : f32 to vector<18x18xf32>
    %138 = arith.mulf %137, %131 : vector<18x18xf32>
    %139 = arith.addf %121, %138 : vector<18x18xf32>
    %c79 = arith.constant 79 : index
    %140 = memref.load %arg2[%c79] : memref<144xf32, #tpu.memory_space<smem>>
    %141 = vector.broadcast %140 : f32 to vector<18x18xf32>
    %142 = arith.mulf %141, %131 : vector<18x18xf32>
    %143 = arith.addf %125, %142 : vector<18x18xf32>
    %c115 = arith.constant 115 : index
    %144 = memref.load %arg2[%c115] : memref<144xf32, #tpu.memory_space<smem>>
    %145 = vector.broadcast %144 : f32 to vector<18x18xf32>
    %146 = arith.mulf %145, %131 : vector<18x18xf32>
    %147 = arith.addf %129, %146 : vector<18x18xf32>
    %c0_35 = arith.constant 0 : index
    %c0_36 = arith.constant 0 : index
    %c2_37 = arith.constant 2 : index
    %c2_38 = arith.constant 2 : index
    %148 = vector.load %arg1[%c0_35, %c0_36, %c2_37, %c2_38] : memref<1x4x20x20xf32, #tpu.memory_space<vmem>>, vector<1x1x18x18xf32>
    %149 = vector.shape_cast %148 : vector<1x1x18x18xf32> to vector<18x18xf32>
    %c8 = arith.constant 8 : index
    %150 = memref.load %arg2[%c8] : memref<144xf32, #tpu.memory_space<smem>>
    %151 = vector.broadcast %150 : f32 to vector<18x18xf32>
    %152 = arith.mulf %151, %149 : vector<18x18xf32>
    %153 = arith.addf %135, %152 : vector<18x18xf32>
    %c44 = arith.constant 44 : index
    %154 = memref.load %arg2[%c44] : memref<144xf32, #tpu.memory_space<smem>>
    %155 = vector.broadcast %154 : f32 to vector<18x18xf32>
    %156 = arith.mulf %155, %149 : vector<18x18xf32>
    %157 = arith.addf %139, %156 : vector<18x18xf32>
    %c80 = arith.constant 80 : index
    %158 = memref.load %arg2[%c80] : memref<144xf32, #tpu.memory_space<smem>>
    %159 = vector.broadcast %158 : f32 to vector<18x18xf32>
    %160 = arith.mulf %159, %149 : vector<18x18xf32>
    %161 = arith.addf %143, %160 : vector<18x18xf32>
    %c116 = arith.constant 116 : index
    %162 = memref.load %arg2[%c116] : memref<144xf32, #tpu.memory_space<smem>>
    %163 = vector.broadcast %162 : f32 to vector<18x18xf32>
    %164 = arith.mulf %163, %149 : vector<18x18xf32>
    %165 = arith.addf %147, %164 : vector<18x18xf32>
    %c0_39 = arith.constant 0 : index
    %c1_40 = arith.constant 1 : index
    %c0_41 = arith.constant 0 : index
    %c0_42 = arith.constant 0 : index
    %166 = vector.load %arg1[%c0_39, %c1_40, %c0_41, %c0_42] : memref<1x4x20x20xf32, #tpu.memory_space<vmem>>, vector<1x1x18x18xf32>
    %167 = vector.shape_cast %166 : vector<1x1x18x18xf32> to vector<18x18xf32>
    %c9 = arith.constant 9 : index
    %168 = memref.load %arg2[%c9] : memref<144xf32, #tpu.memory_space<smem>>
    %169 = vector.broadcast %168 : f32 to vector<18x18xf32>
    %170 = arith.mulf %169, %167 : vector<18x18xf32>
    %171 = arith.addf %153, %170 : vector<18x18xf32>
    %c45 = arith.constant 45 : index
    %172 = memref.load %arg2[%c45] : memref<144xf32, #tpu.memory_space<smem>>
    %173 = vector.broadcast %172 : f32 to vector<18x18xf32>
    %174 = arith.mulf %173, %167 : vector<18x18xf32>
    %175 = arith.addf %157, %174 : vector<18x18xf32>
    %c81 = arith.constant 81 : index
    %176 = memref.load %arg2[%c81] : memref<144xf32, #tpu.memory_space<smem>>
    %177 = vector.broadcast %176 : f32 to vector<18x18xf32>
    %178 = arith.mulf %177, %167 : vector<18x18xf32>
    %179 = arith.addf %161, %178 : vector<18x18xf32>
    %c117 = arith.constant 117 : index
    %180 = memref.load %arg2[%c117] : memref<144xf32, #tpu.memory_space<smem>>
    %181 = vector.broadcast %180 : f32 to vector<18x18xf32>
    %182 = arith.mulf %181, %167 : vector<18x18xf32>
    %183 = arith.addf %165, %182 : vector<18x18xf32>
    %c0_43 = arith.constant 0 : index
    %c1_44 = arith.constant 1 : index
    %c0_45 = arith.constant 0 : index
    %c1_46 = arith.constant 1 : index
    %184 = vector.load %arg1[%c0_43, %c1_44, %c0_45, %c1_46] : memref<1x4x20x20xf32, #tpu.memory_space<vmem>>, vector<1x1x18x18xf32>
    %185 = vector.shape_cast %184 : vector<1x1x18x18xf32> to vector<18x18xf32>
    %c10 = arith.constant 10 : index
    %186 = memref.load %arg2[%c10] : memref<144xf32, #tpu.memory_space<smem>>
    %187 = vector.broadcast %186 : f32 to vector<18x18xf32>
    %188 = arith.mulf %187, %185 : vector<18x18xf32>
    %189 = arith.addf %171, %188 : vector<18x18xf32>
    %c46 = arith.constant 46 : index
    %190 = memref.load %arg2[%c46] : memref<144xf32, #tpu.memory_space<smem>>
    %191 = vector.broadcast %190 : f32 to vector<18x18xf32>
    %192 = arith.mulf %191, %185 : vector<18x18xf32>
    %193 = arith.addf %175, %192 : vector<18x18xf32>
    %c82 = arith.constant 82 : index
    %194 = memref.load %arg2[%c82] : memref<144xf32, #tpu.memory_space<smem>>
    %195 = vector.broadcast %194 : f32 to vector<18x18xf32>
    %196 = arith.mulf %195, %185 : vector<18x18xf32>
    %197 = arith.addf %179, %196 : vector<18x18xf32>
    %c118 = arith.constant 118 : index
    %198 = memref.load %arg2[%c118] : memref<144xf32, #tpu.memory_space<smem>>
    %199 = vector.broadcast %198 : f32 to vector<18x18xf32>
    %200 = arith.mulf %199, %185 : vector<18x18xf32>
    %201 = arith.addf %183, %200 : vector<18x18xf32>
    %c0_47 = arith.constant 0 : index
    %c1_48 = arith.constant 1 : index
    %c0_49 = arith.constant 0 : index
    %c2_50 = arith.constant 2 : index
    %202 = vector.load %arg1[%c0_47, %c1_48, %c0_49, %c2_50] : memref<1x4x20x20xf32, #tpu.memory_space<vmem>>, vector<1x1x18x18xf32>
    %203 = vector.shape_cast %202 : vector<1x1x18x18xf32> to vector<18x18xf32>
    %c11 = arith.constant 11 : index
    %204 = memref.load %arg2[%c11] : memref<144xf32, #tpu.memory_space<smem>>
    %205 = vector.broadcast %204 : f32 to vector<18x18xf32>
    %206 = arith.mulf %205, %203 : vector<18x18xf32>
    %207 = arith.addf %189, %206 : vector<18x18xf32>
    %c47 = arith.constant 47 : index
    %208 = memref.load %arg2[%c47] : memref<144xf32, #tpu.memory_space<smem>>
    %209 = vector.broadcast %208 : f32 to vector<18x18xf32>
    %210 = arith.mulf %209, %203 : vector<18x18xf32>
    %211 = arith.addf %193, %210 : vector<18x18xf32>
    %c83 = arith.constant 83 : index
    %212 = memref.load %arg2[%c83] : memref<144xf32, #tpu.memory_space<smem>>
    %213 = vector.broadcast %212 : f32 to vector<18x18xf32>
    %214 = arith.mulf %213, %203 : vector<18x18xf32>
    %215 = arith.addf %197, %214 : vector<18x18xf32>
    %c119 = arith.constant 119 : index
    %216 = memref.load %arg2[%c119] : memref<144xf32, #tpu.memory_space<smem>>
    %217 = vector.broadcast %216 : f32 to vector<18x18xf32>
    %218 = arith.mulf %217, %203 : vector<18x18xf32>
    %219 = arith.addf %201, %218 : vector<18x18xf32>
    %c0_51 = arith.constant 0 : index
    %c1_52 = arith.constant 1 : index
    %c1_53 = arith.constant 1 : index
    %c0_54 = arith.constant 0 : index
    %220 = vector.load %arg1[%c0_51, %c1_52, %c1_53, %c0_54] : memref<1x4x20x20xf32, #tpu.memory_space<vmem>>, vector<1x1x18x18xf32>
    %221 = vector.shape_cast %220 : vector<1x1x18x18xf32> to vector<18x18xf32>
    %c12 = arith.constant 12 : index
    %222 = memref.load %arg2[%c12] : memref<144xf32, #tpu.memory_space<smem>>
    %223 = vector.broadcast %222 : f32 to vector<18x18xf32>
    %224 = arith.mulf %223, %221 : vector<18x18xf32>
    %225 = arith.addf %207, %224 : vector<18x18xf32>
    %c48 = arith.constant 48 : index
    %226 = memref.load %arg2[%c48] : memref<144xf32, #tpu.memory_space<smem>>
    %227 = vector.broadcast %226 : f32 to vector<18x18xf32>
    %228 = arith.mulf %227, %221 : vector<18x18xf32>
    %229 = arith.addf %211, %228 : vector<18x18xf32>
    %c84 = arith.constant 84 : index
    %230 = memref.load %arg2[%c84] : memref<144xf32, #tpu.memory_space<smem>>
    %231 = vector.broadcast %230 : f32 to vector<18x18xf32>
    %232 = arith.mulf %231, %221 : vector<18x18xf32>
    %233 = arith.addf %215, %232 : vector<18x18xf32>
    %c120 = arith.constant 120 : index
    %234 = memref.load %arg2[%c120] : memref<144xf32, #tpu.memory_space<smem>>
    %235 = vector.broadcast %234 : f32 to vector<18x18xf32>
    %236 = arith.mulf %235, %221 : vector<18x18xf32>
    %237 = arith.addf %219, %236 : vector<18x18xf32>
    %c0_55 = arith.constant 0 : index
    %c1_56 = arith.constant 1 : index
    %c1_57 = arith.constant 1 : index
    %c1_58 = arith.constant 1 : index
    %238 = vector.load %arg1[%c0_55, %c1_56, %c1_57, %c1_58] : memref<1x4x20x20xf32, #tpu.memory_space<vmem>>, vector<1x1x18x18xf32>
    %239 = vector.shape_cast %238 : vector<1x1x18x18xf32> to vector<18x18xf32>
    %c13 = arith.constant 13 : index
    %240 = memref.load %arg2[%c13] : memref<144xf32, #tpu.memory_space<smem>>
    %241 = vector.broadcast %240 : f32 to vector<18x18xf32>
    %242 = arith.mulf %241, %239 : vector<18x18xf32>
    %243 = arith.addf %225, %242 : vector<18x18xf32>
    %c49 = arith.constant 49 : index
    %244 = memref.load %arg2[%c49] : memref<144xf32, #tpu.memory_space<smem>>
    %245 = vector.broadcast %244 : f32 to vector<18x18xf32>
    %246 = arith.mulf %245, %239 : vector<18x18xf32>
    %247 = arith.addf %229, %246 : vector<18x18xf32>
    %c85 = arith.constant 85 : index
    %248 = memref.load %arg2[%c85] : memref<144xf32, #tpu.memory_space<smem>>
    %249 = vector.broadcast %248 : f32 to vector<18x18xf32>
    %250 = arith.mulf %249, %239 : vector<18x18xf32>
    %251 = arith.addf %233, %250 : vector<18x18xf32>
    %c121 = arith.constant 121 : index
    %252 = memref.load %arg2[%c121] : memref<144xf32, #tpu.memory_space<smem>>
    %253 = vector.broadcast %252 : f32 to vector<18x18xf32>
    %254 = arith.mulf %253, %239 : vector<18x18xf32>
    %255 = arith.addf %237, %254 : vector<18x18xf32>
    %c0_59 = arith.constant 0 : index
    %c1_60 = arith.constant 1 : index
    %c1_61 = arith.constant 1 : index
    %c2_62 = arith.constant 2 : index
    %256 = vector.load %arg1[%c0_59, %c1_60, %c1_61, %c2_62] : memref<1x4x20x20xf32, #tpu.memory_space<vmem>>, vector<1x1x18x18xf32>
    %257 = vector.shape_cast %256 : vector<1x1x18x18xf32> to vector<18x18xf32>
    %c14 = arith.constant 14 : index
    %258 = memref.load %arg2[%c14] : memref<144xf32, #tpu.memory_space<smem>>
    %259 = vector.broadcast %258 : f32 to vector<18x18xf32>
    %260 = arith.mulf %259, %257 : vector<18x18xf32>
    %261 = arith.addf %243, %260 : vector<18x18xf32>
    %c50 = arith.constant 50 : index
    %262 = memref.load %arg2[%c50] : memref<144xf32, #tpu.memory_space<smem>>
    %263 = vector.broadcast %262 : f32 to vector<18x18xf32>
    %264 = arith.mulf %263, %257 : vector<18x18xf32>
    %265 = arith.addf %247, %264 : vector<18x18xf32>
    %c86 = arith.constant 86 : index
    %266 = memref.load %arg2[%c86] : memref<144xf32, #tpu.memory_space<smem>>
    %267 = vector.broadcast %266 : f32 to vector<18x18xf32>
    %268 = arith.mulf %267, %257 : vector<18x18xf32>
    %269 = arith.addf %251, %268 : vector<18x18xf32>
    %c122 = arith.constant 122 : index
    %270 = memref.load %arg2[%c122] : memref<144xf32, #tpu.memory_space<smem>>
    %271 = vector.broadcast %270 : f32 to vector<18x18xf32>
    %272 = arith.mulf %271, %257 : vector<18x18xf32>
    %273 = arith.addf %255, %272 : vector<18x18xf32>
    %c0_63 = arith.constant 0 : index
    %c1_64 = arith.constant 1 : index
    %c2_65 = arith.constant 2 : index
    %c0_66 = arith.constant 0 : index
    %274 = vector.load %arg1[%c0_63, %c1_64, %c2_65, %c0_66] : memref<1x4x20x20xf32, #tpu.memory_space<vmem>>, vector<1x1x18x18xf32>
    %275 = vector.shape_cast %274 : vector<1x1x18x18xf32> to vector<18x18xf32>
    %c15 = arith.constant 15 : index
    %276 = memref.load %arg2[%c15] : memref<144xf32, #tpu.memory_space<smem>>
    %277 = vector.broadcast %276 : f32 to vector<18x18xf32>
    %278 = arith.mulf %277, %275 : vector<18x18xf32>
    %279 = arith.addf %261, %278 : vector<18x18xf32>
    %c51 = arith.constant 51 : index
    %280 = memref.load %arg2[%c51] : memref<144xf32, #tpu.memory_space<smem>>
    %281 = vector.broadcast %280 : f32 to vector<18x18xf32>
    %282 = arith.mulf %281, %275 : vector<18x18xf32>
    %283 = arith.addf %265, %282 : vector<18x18xf32>
    %c87 = arith.constant 87 : index
    %284 = memref.load %arg2[%c87] : memref<144xf32, #tpu.memory_space<smem>>
    %285 = vector.broadcast %284 : f32 to vector<18x18xf32>
    %286 = arith.mulf %285, %275 : vector<18x18xf32>
    %287 = arith.addf %269, %286 : vector<18x18xf32>
    %c123 = arith.constant 123 : index
    %288 = memref.load %arg2[%c123] : memref<144xf32, #tpu.memory_space<smem>>
    %289 = vector.broadcast %288 : f32 to vector<18x18xf32>
    %290 = arith.mulf %289, %275 : vector<18x18xf32>
    %291 = arith.addf %273, %290 : vector<18x18xf32>
    %c0_67 = arith.constant 0 : index
    %c1_68 = arith.constant 1 : index
    %c2_69 = arith.constant 2 : index
    %c1_70 = arith.constant 1 : index
    %292 = vector.load %arg1[%c0_67, %c1_68, %c2_69, %c1_70] : memref<1x4x20x20xf32, #tpu.memory_space<vmem>>, vector<1x1x18x18xf32>
    %293 = vector.shape_cast %292 : vector<1x1x18x18xf32> to vector<18x18xf32>
    %c16 = arith.constant 16 : index
    %294 = memref.load %arg2[%c16] : memref<144xf32, #tpu.memory_space<smem>>
    %295 = vector.broadcast %294 : f32 to vector<18x18xf32>
    %296 = arith.mulf %295, %293 : vector<18x18xf32>
    %297 = arith.addf %279, %296 : vector<18x18xf32>
    %c52 = arith.constant 52 : index
    %298 = memref.load %arg2[%c52] : memref<144xf32, #tpu.memory_space<smem>>
    %299 = vector.broadcast %298 : f32 to vector<18x18xf32>
    %300 = arith.mulf %299, %293 : vector<18x18xf32>
    %301 = arith.addf %283, %300 : vector<18x18xf32>
    %c88 = arith.constant 88 : index
    %302 = memref.load %arg2[%c88] : memref<144xf32, #tpu.memory_space<smem>>
    %303 = vector.broadcast %302 : f32 to vector<18x18xf32>
    %304 = arith.mulf %303, %293 : vector<18x18xf32>
    %305 = arith.addf %287, %304 : vector<18x18xf32>
    %c124 = arith.constant 124 : index
    %306 = memref.load %arg2[%c124] : memref<144xf32, #tpu.memory_space<smem>>
    %307 = vector.broadcast %306 : f32 to vector<18x18xf32>
    %308 = arith.mulf %307, %293 : vector<18x18xf32>
    %309 = arith.addf %291, %308 : vector<18x18xf32>
    %c0_71 = arith.constant 0 : index
    %c1_72 = arith.constant 1 : index
    %c2_73 = arith.constant 2 : index
    %c2_74 = arith.constant 2 : index
    %310 = vector.load %arg1[%c0_71, %c1_72, %c2_73, %c2_74] : memref<1x4x20x20xf32, #tpu.memory_space<vmem>>, vector<1x1x18x18xf32>
    %311 = vector.shape_cast %310 : vector<1x1x18x18xf32> to vector<18x18xf32>
    %c17 = arith.constant 17 : index
    %312 = memref.load %arg2[%c17] : memref<144xf32, #tpu.memory_space<smem>>
    %313 = vector.broadcast %312 : f32 to vector<18x18xf32>
    %314 = arith.mulf %313, %311 : vector<18x18xf32>
    %315 = arith.addf %297, %314 : vector<18x18xf32>
    %c53 = arith.constant 53 : index
    %316 = memref.load %arg2[%c53] : memref<144xf32, #tpu.memory_space<smem>>
    %317 = vector.broadcast %316 : f32 to vector<18x18xf32>
    %318 = arith.mulf %317, %311 : vector<18x18xf32>
    %319 = arith.addf %301, %318 : vector<18x18xf32>
    %c89 = arith.constant 89 : index
    %320 = memref.load %arg2[%c89] : memref<144xf32, #tpu.memory_space<smem>>
    %321 = vector.broadcast %320 : f32 to vector<18x18xf32>
    %322 = arith.mulf %321, %311 : vector<18x18xf32>
    %323 = arith.addf %305, %322 : vector<18x18xf32>
    %c125 = arith.constant 125 : index
    %324 = memref.load %arg2[%c125] : memref<144xf32, #tpu.memory_space<smem>>
    %325 = vector.broadcast %324 : f32 to vector<18x18xf32>
    %326 = arith.mulf %325, %311 : vector<18x18xf32>
    %327 = arith.addf %309, %326 : vector<18x18xf32>
    %c0_75 = arith.constant 0 : index
    %c2_76 = arith.constant 2 : index
    %c0_77 = arith.constant 0 : index
    %c0_78 = arith.constant 0 : index
    %328 = vector.load %arg1[%c0_75, %c2_76, %c0_77, %c0_78] : memref<1x4x20x20xf32, #tpu.memory_space<vmem>>, vector<1x1x18x18xf32>
    %329 = vector.shape_cast %328 : vector<1x1x18x18xf32> to vector<18x18xf32>
    %c18 = arith.constant 18 : index
    %330 = memref.load %arg2[%c18] : memref<144xf32, #tpu.memory_space<smem>>
    %331 = vector.broadcast %330 : f32 to vector<18x18xf32>
    %332 = arith.mulf %331, %329 : vector<18x18xf32>
    %333 = arith.addf %315, %332 : vector<18x18xf32>
    %c54 = arith.constant 54 : index
    %334 = memref.load %arg2[%c54] : memref<144xf32, #tpu.memory_space<smem>>
    %335 = vector.broadcast %334 : f32 to vector<18x18xf32>
    %336 = arith.mulf %335, %329 : vector<18x18xf32>
    %337 = arith.addf %319, %336 : vector<18x18xf32>
    %c90 = arith.constant 90 : index
    %338 = memref.load %arg2[%c90] : memref<144xf32, #tpu.memory_space<smem>>
    %339 = vector.broadcast %338 : f32 to vector<18x18xf32>
    %340 = arith.mulf %339, %329 : vector<18x18xf32>
    %341 = arith.addf %323, %340 : vector<18x18xf32>
    %c126 = arith.constant 126 : index
    %342 = memref.load %arg2[%c126] : memref<144xf32, #tpu.memory_space<smem>>
    %343 = vector.broadcast %342 : f32 to vector<18x18xf32>
    %344 = arith.mulf %343, %329 : vector<18x18xf32>
    %345 = arith.addf %327, %344 : vector<18x18xf32>
    %c0_79 = arith.constant 0 : index
    %c2_80 = arith.constant 2 : index
    %c0_81 = arith.constant 0 : index
    %c1_82 = arith.constant 1 : index
    %346 = vector.load %arg1[%c0_79, %c2_80, %c0_81, %c1_82] : memref<1x4x20x20xf32, #tpu.memory_space<vmem>>, vector<1x1x18x18xf32>
    %347 = vector.shape_cast %346 : vector<1x1x18x18xf32> to vector<18x18xf32>
    %c19 = arith.constant 19 : index
    %348 = memref.load %arg2[%c19] : memref<144xf32, #tpu.memory_space<smem>>
    %349 = vector.broadcast %348 : f32 to vector<18x18xf32>
    %350 = arith.mulf %349, %347 : vector<18x18xf32>
    %351 = arith.addf %333, %350 : vector<18x18xf32>
    %c55 = arith.constant 55 : index
    %352 = memref.load %arg2[%c55] : memref<144xf32, #tpu.memory_space<smem>>
    %353 = vector.broadcast %352 : f32 to vector<18x18xf32>
    %354 = arith.mulf %353, %347 : vector<18x18xf32>
    %355 = arith.addf %337, %354 : vector<18x18xf32>
    %c91 = arith.constant 91 : index
    %356 = memref.load %arg2[%c91] : memref<144xf32, #tpu.memory_space<smem>>
    %357 = vector.broadcast %356 : f32 to vector<18x18xf32>
    %358 = arith.mulf %357, %347 : vector<18x18xf32>
    %359 = arith.addf %341, %358 : vector<18x18xf32>
    %c127 = arith.constant 127 : index
    %360 = memref.load %arg2[%c127] : memref<144xf32, #tpu.memory_space<smem>>
    %361 = vector.broadcast %360 : f32 to vector<18x18xf32>
    %362 = arith.mulf %361, %347 : vector<18x18xf32>
    %363 = arith.addf %345, %362 : vector<18x18xf32>
    %c0_83 = arith.constant 0 : index
    %c2_84 = arith.constant 2 : index
    %c0_85 = arith.constant 0 : index
    %c2_86 = arith.constant 2 : index
    %364 = vector.load %arg1[%c0_83, %c2_84, %c0_85, %c2_86] : memref<1x4x20x20xf32, #tpu.memory_space<vmem>>, vector<1x1x18x18xf32>
    %365 = vector.shape_cast %364 : vector<1x1x18x18xf32> to vector<18x18xf32>
    %c20 = arith.constant 20 : index
    %366 = memref.load %arg2[%c20] : memref<144xf32, #tpu.memory_space<smem>>
    %367 = vector.broadcast %366 : f32 to vector<18x18xf32>
    %368 = arith.mulf %367, %365 : vector<18x18xf32>
    %369 = arith.addf %351, %368 : vector<18x18xf32>
    %c56 = arith.constant 56 : index
    %370 = memref.load %arg2[%c56] : memref<144xf32, #tpu.memory_space<smem>>
    %371 = vector.broadcast %370 : f32 to vector<18x18xf32>
    %372 = arith.mulf %371, %365 : vector<18x18xf32>
    %373 = arith.addf %355, %372 : vector<18x18xf32>
    %c92 = arith.constant 92 : index
    %374 = memref.load %arg2[%c92] : memref<144xf32, #tpu.memory_space<smem>>
    %375 = vector.broadcast %374 : f32 to vector<18x18xf32>
    %376 = arith.mulf %375, %365 : vector<18x18xf32>
    %377 = arith.addf %359, %376 : vector<18x18xf32>
    %c128 = arith.constant 128 : index
    %378 = memref.load %arg2[%c128] : memref<144xf32, #tpu.memory_space<smem>>
    %379 = vector.broadcast %378 : f32 to vector<18x18xf32>
    %380 = arith.mulf %379, %365 : vector<18x18xf32>
    %381 = arith.addf %363, %380 : vector<18x18xf32>
    %c0_87 = arith.constant 0 : index
    %c2_88 = arith.constant 2 : index
    %c1_89 = arith.constant 1 : index
    %c0_90 = arith.constant 0 : index
    %382 = vector.load %arg1[%c0_87, %c2_88, %c1_89, %c0_90] : memref<1x4x20x20xf32, #tpu.memory_space<vmem>>, vector<1x1x18x18xf32>
    %383 = vector.shape_cast %382 : vector<1x1x18x18xf32> to vector<18x18xf32>
    %c21 = arith.constant 21 : index
    %384 = memref.load %arg2[%c21] : memref<144xf32, #tpu.memory_space<smem>>
    %385 = vector.broadcast %384 : f32 to vector<18x18xf32>
    %386 = arith.mulf %385, %383 : vector<18x18xf32>
    %387 = arith.addf %369, %386 : vector<18x18xf32>
    %c57 = arith.constant 57 : index
    %388 = memref.load %arg2[%c57] : memref<144xf32, #tpu.memory_space<smem>>
    %389 = vector.broadcast %388 : f32 to vector<18x18xf32>
    %390 = arith.mulf %389, %383 : vector<18x18xf32>
    %391 = arith.addf %373, %390 : vector<18x18xf32>
    %c93 = arith.constant 93 : index
    %392 = memref.load %arg2[%c93] : memref<144xf32, #tpu.memory_space<smem>>
    %393 = vector.broadcast %392 : f32 to vector<18x18xf32>
    %394 = arith.mulf %393, %383 : vector<18x18xf32>
    %395 = arith.addf %377, %394 : vector<18x18xf32>
    %c129 = arith.constant 129 : index
    %396 = memref.load %arg2[%c129] : memref<144xf32, #tpu.memory_space<smem>>
    %397 = vector.broadcast %396 : f32 to vector<18x18xf32>
    %398 = arith.mulf %397, %383 : vector<18x18xf32>
    %399 = arith.addf %381, %398 : vector<18x18xf32>
    %c0_91 = arith.constant 0 : index
    %c2_92 = arith.constant 2 : index
    %c1_93 = arith.constant 1 : index
    %c1_94 = arith.constant 1 : index
    %400 = vector.load %arg1[%c0_91, %c2_92, %c1_93, %c1_94] : memref<1x4x20x20xf32, #tpu.memory_space<vmem>>, vector<1x1x18x18xf32>
    %401 = vector.shape_cast %400 : vector<1x1x18x18xf32> to vector<18x18xf32>
    %c22 = arith.constant 22 : index
    %402 = memref.load %arg2[%c22] : memref<144xf32, #tpu.memory_space<smem>>
    %403 = vector.broadcast %402 : f32 to vector<18x18xf32>
    %404 = arith.mulf %403, %401 : vector<18x18xf32>
    %405 = arith.addf %387, %404 : vector<18x18xf32>
    %c58 = arith.constant 58 : index
    %406 = memref.load %arg2[%c58] : memref<144xf32, #tpu.memory_space<smem>>
    %407 = vector.broadcast %406 : f32 to vector<18x18xf32>
    %408 = arith.mulf %407, %401 : vector<18x18xf32>
    %409 = arith.addf %391, %408 : vector<18x18xf32>
    %c94 = arith.constant 94 : index
    %410 = memref.load %arg2[%c94] : memref<144xf32, #tpu.memory_space<smem>>
    %411 = vector.broadcast %410 : f32 to vector<18x18xf32>
    %412 = arith.mulf %411, %401 : vector<18x18xf32>
    %413 = arith.addf %395, %412 : vector<18x18xf32>
    %c130 = arith.constant 130 : index
    %414 = memref.load %arg2[%c130] : memref<144xf32, #tpu.memory_space<smem>>
    %415 = vector.broadcast %414 : f32 to vector<18x18xf32>
    %416 = arith.mulf %415, %401 : vector<18x18xf32>
    %417 = arith.addf %399, %416 : vector<18x18xf32>
    %c0_95 = arith.constant 0 : index
    %c2_96 = arith.constant 2 : index
    %c1_97 = arith.constant 1 : index
    %c2_98 = arith.constant 2 : index
    %418 = vector.load %arg1[%c0_95, %c2_96, %c1_97, %c2_98] : memref<1x4x20x20xf32, #tpu.memory_space<vmem>>, vector<1x1x18x18xf32>
    %419 = vector.shape_cast %418 : vector<1x1x18x18xf32> to vector<18x18xf32>
    %c23 = arith.constant 23 : index
    %420 = memref.load %arg2[%c23] : memref<144xf32, #tpu.memory_space<smem>>
    %421 = vector.broadcast %420 : f32 to vector<18x18xf32>
    %422 = arith.mulf %421, %419 : vector<18x18xf32>
    %423 = arith.addf %405, %422 : vector<18x18xf32>
    %c59 = arith.constant 59 : index
    %424 = memref.load %arg2[%c59] : memref<144xf32, #tpu.memory_space<smem>>
    %425 = vector.broadcast %424 : f32 to vector<18x18xf32>
    %426 = arith.mulf %425, %419 : vector<18x18xf32>
    %427 = arith.addf %409, %426 : vector<18x18xf32>
    %c95 = arith.constant 95 : index
    %428 = memref.load %arg2[%c95] : memref<144xf32, #tpu.memory_space<smem>>
    %429 = vector.broadcast %428 : f32 to vector<18x18xf32>
    %430 = arith.mulf %429, %419 : vector<18x18xf32>
    %431 = arith.addf %413, %430 : vector<18x18xf32>
    %c131 = arith.constant 131 : index
    %432 = memref.load %arg2[%c131] : memref<144xf32, #tpu.memory_space<smem>>
    %433 = vector.broadcast %432 : f32 to vector<18x18xf32>
    %434 = arith.mulf %433, %419 : vector<18x18xf32>
    %435 = arith.addf %417, %434 : vector<18x18xf32>
    %c0_99 = arith.constant 0 : index
    %c2_100 = arith.constant 2 : index
    %c2_101 = arith.constant 2 : index
    %c0_102 = arith.constant 0 : index
    %436 = vector.load %arg1[%c0_99, %c2_100, %c2_101, %c0_102] : memref<1x4x20x20xf32, #tpu.memory_space<vmem>>, vector<1x1x18x18xf32>
    %437 = vector.shape_cast %436 : vector<1x1x18x18xf32> to vector<18x18xf32>
    %c24 = arith.constant 24 : index
    %438 = memref.load %arg2[%c24] : memref<144xf32, #tpu.memory_space<smem>>
    %439 = vector.broadcast %438 : f32 to vector<18x18xf32>
    %440 = arith.mulf %439, %437 : vector<18x18xf32>
    %441 = arith.addf %423, %440 : vector<18x18xf32>
    %c60 = arith.constant 60 : index
    %442 = memref.load %arg2[%c60] : memref<144xf32, #tpu.memory_space<smem>>
    %443 = vector.broadcast %442 : f32 to vector<18x18xf32>
    %444 = arith.mulf %443, %437 : vector<18x18xf32>
    %445 = arith.addf %427, %444 : vector<18x18xf32>
    %c96 = arith.constant 96 : index
    %446 = memref.load %arg2[%c96] : memref<144xf32, #tpu.memory_space<smem>>
    %447 = vector.broadcast %446 : f32 to vector<18x18xf32>
    %448 = arith.mulf %447, %437 : vector<18x18xf32>
    %449 = arith.addf %431, %448 : vector<18x18xf32>
    %c132 = arith.constant 132 : index
    %450 = memref.load %arg2[%c132] : memref<144xf32, #tpu.memory_space<smem>>
    %451 = vector.broadcast %450 : f32 to vector<18x18xf32>
    %452 = arith.mulf %451, %437 : vector<18x18xf32>
    %453 = arith.addf %435, %452 : vector<18x18xf32>
    %c0_103 = arith.constant 0 : index
    %c2_104 = arith.constant 2 : index
    %c2_105 = arith.constant 2 : index
    %c1_106 = arith.constant 1 : index
    %454 = vector.load %arg1[%c0_103, %c2_104, %c2_105, %c1_106] : memref<1x4x20x20xf32, #tpu.memory_space<vmem>>, vector<1x1x18x18xf32>
    %455 = vector.shape_cast %454 : vector<1x1x18x18xf32> to vector<18x18xf32>
    %c25 = arith.constant 25 : index
    %456 = memref.load %arg2[%c25] : memref<144xf32, #tpu.memory_space<smem>>
    %457 = vector.broadcast %456 : f32 to vector<18x18xf32>
    %458 = arith.mulf %457, %455 : vector<18x18xf32>
    %459 = arith.addf %441, %458 : vector<18x18xf32>
    %c61 = arith.constant 61 : index
    %460 = memref.load %arg2[%c61] : memref<144xf32, #tpu.memory_space<smem>>
    %461 = vector.broadcast %460 : f32 to vector<18x18xf32>
    %462 = arith.mulf %461, %455 : vector<18x18xf32>
    %463 = arith.addf %445, %462 : vector<18x18xf32>
    %c97 = arith.constant 97 : index
    %464 = memref.load %arg2[%c97] : memref<144xf32, #tpu.memory_space<smem>>
    %465 = vector.broadcast %464 : f32 to vector<18x18xf32>
    %466 = arith.mulf %465, %455 : vector<18x18xf32>
    %467 = arith.addf %449, %466 : vector<18x18xf32>
    %c133 = arith.constant 133 : index
    %468 = memref.load %arg2[%c133] : memref<144xf32, #tpu.memory_space<smem>>
    %469 = vector.broadcast %468 : f32 to vector<18x18xf32>
    %470 = arith.mulf %469, %455 : vector<18x18xf32>
    %471 = arith.addf %453, %470 : vector<18x18xf32>
    %c0_107 = arith.constant 0 : index
    %c2_108 = arith.constant 2 : index
    %c2_109 = arith.constant 2 : index
    %c2_110 = arith.constant 2 : index
    %472 = vector.load %arg1[%c0_107, %c2_108, %c2_109, %c2_110] : memref<1x4x20x20xf32, #tpu.memory_space<vmem>>, vector<1x1x18x18xf32>
    %473 = vector.shape_cast %472 : vector<1x1x18x18xf32> to vector<18x18xf32>
    %c26 = arith.constant 26 : index
    %474 = memref.load %arg2[%c26] : memref<144xf32, #tpu.memory_space<smem>>
    %475 = vector.broadcast %474 : f32 to vector<18x18xf32>
    %476 = arith.mulf %475, %473 : vector<18x18xf32>
    %477 = arith.addf %459, %476 : vector<18x18xf32>
    %c62 = arith.constant 62 : index
    %478 = memref.load %arg2[%c62] : memref<144xf32, #tpu.memory_space<smem>>
    %479 = vector.broadcast %478 : f32 to vector<18x18xf32>
    %480 = arith.mulf %479, %473 : vector<18x18xf32>
    %481 = arith.addf %463, %480 : vector<18x18xf32>
    %c98 = arith.constant 98 : index
    %482 = memref.load %arg2[%c98] : memref<144xf32, #tpu.memory_space<smem>>
    %483 = vector.broadcast %482 : f32 to vector<18x18xf32>
    %484 = arith.mulf %483, %473 : vector<18x18xf32>
    %485 = arith.addf %467, %484 : vector<18x18xf32>
    %c134 = arith.constant 134 : index
    %486 = memref.load %arg2[%c134] : memref<144xf32, #tpu.memory_space<smem>>
    %487 = vector.broadcast %486 : f32 to vector<18x18xf32>
    %488 = arith.mulf %487, %473 : vector<18x18xf32>
    %489 = arith.addf %471, %488 : vector<18x18xf32>
    %c0_111 = arith.constant 0 : index
    %c3_112 = arith.constant 3 : index
    %c0_113 = arith.constant 0 : index
    %c0_114 = arith.constant 0 : index
    %490 = vector.load %arg1[%c0_111, %c3_112, %c0_113, %c0_114] : memref<1x4x20x20xf32, #tpu.memory_space<vmem>>, vector<1x1x18x18xf32>
    %491 = vector.shape_cast %490 : vector<1x1x18x18xf32> to vector<18x18xf32>
    %c27 = arith.constant 27 : index
    %492 = memref.load %arg2[%c27] : memref<144xf32, #tpu.memory_space<smem>>
    %493 = vector.broadcast %492 : f32 to vector<18x18xf32>
    %494 = arith.mulf %493, %491 : vector<18x18xf32>
    %495 = arith.addf %477, %494 : vector<18x18xf32>
    %c63 = arith.constant 63 : index
    %496 = memref.load %arg2[%c63] : memref<144xf32, #tpu.memory_space<smem>>
    %497 = vector.broadcast %496 : f32 to vector<18x18xf32>
    %498 = arith.mulf %497, %491 : vector<18x18xf32>
    %499 = arith.addf %481, %498 : vector<18x18xf32>
    %c99 = arith.constant 99 : index
    %500 = memref.load %arg2[%c99] : memref<144xf32, #tpu.memory_space<smem>>
    %501 = vector.broadcast %500 : f32 to vector<18x18xf32>
    %502 = arith.mulf %501, %491 : vector<18x18xf32>
    %503 = arith.addf %485, %502 : vector<18x18xf32>
    %c135 = arith.constant 135 : index
    %504 = memref.load %arg2[%c135] : memref<144xf32, #tpu.memory_space<smem>>
    %505 = vector.broadcast %504 : f32 to vector<18x18xf32>
    %506 = arith.mulf %505, %491 : vector<18x18xf32>
    %507 = arith.addf %489, %506 : vector<18x18xf32>
    %c0_115 = arith.constant 0 : index
    %c3_116 = arith.constant 3 : index
    %c0_117 = arith.constant 0 : index
    %c1_118 = arith.constant 1 : index
    %508 = vector.load %arg1[%c0_115, %c3_116, %c0_117, %c1_118] : memref<1x4x20x20xf32, #tpu.memory_space<vmem>>, vector<1x1x18x18xf32>
    %509 = vector.shape_cast %508 : vector<1x1x18x18xf32> to vector<18x18xf32>
    %c28 = arith.constant 28 : index
    %510 = memref.load %arg2[%c28] : memref<144xf32, #tpu.memory_space<smem>>
    %511 = vector.broadcast %510 : f32 to vector<18x18xf32>
    %512 = arith.mulf %511, %509 : vector<18x18xf32>
    %513 = arith.addf %495, %512 : vector<18x18xf32>
    %c64 = arith.constant 64 : index
    %514 = memref.load %arg2[%c64] : memref<144xf32, #tpu.memory_space<smem>>
    %515 = vector.broadcast %514 : f32 to vector<18x18xf32>
    %516 = arith.mulf %515, %509 : vector<18x18xf32>
    %517 = arith.addf %499, %516 : vector<18x18xf32>
    %c100 = arith.constant 100 : index
    %518 = memref.load %arg2[%c100] : memref<144xf32, #tpu.memory_space<smem>>
    %519 = vector.broadcast %518 : f32 to vector<18x18xf32>
    %520 = arith.mulf %519, %509 : vector<18x18xf32>
    %521 = arith.addf %503, %520 : vector<18x18xf32>
    %c136 = arith.constant 136 : index
    %522 = memref.load %arg2[%c136] : memref<144xf32, #tpu.memory_space<smem>>
    %523 = vector.broadcast %522 : f32 to vector<18x18xf32>
    %524 = arith.mulf %523, %509 : vector<18x18xf32>
    %525 = arith.addf %507, %524 : vector<18x18xf32>
    %c0_119 = arith.constant 0 : index
    %c3_120 = arith.constant 3 : index
    %c0_121 = arith.constant 0 : index
    %c2_122 = arith.constant 2 : index
    %526 = vector.load %arg1[%c0_119, %c3_120, %c0_121, %c2_122] : memref<1x4x20x20xf32, #tpu.memory_space<vmem>>, vector<1x1x18x18xf32>
    %527 = vector.shape_cast %526 : vector<1x1x18x18xf32> to vector<18x18xf32>
    %c29 = arith.constant 29 : index
    %528 = memref.load %arg2[%c29] : memref<144xf32, #tpu.memory_space<smem>>
    %529 = vector.broadcast %528 : f32 to vector<18x18xf32>
    %530 = arith.mulf %529, %527 : vector<18x18xf32>
    %531 = arith.addf %513, %530 : vector<18x18xf32>
    %c65 = arith.constant 65 : index
    %532 = memref.load %arg2[%c65] : memref<144xf32, #tpu.memory_space<smem>>
    %533 = vector.broadcast %532 : f32 to vector<18x18xf32>
    %534 = arith.mulf %533, %527 : vector<18x18xf32>
    %535 = arith.addf %517, %534 : vector<18x18xf32>
    %c101 = arith.constant 101 : index
    %536 = memref.load %arg2[%c101] : memref<144xf32, #tpu.memory_space<smem>>
    %537 = vector.broadcast %536 : f32 to vector<18x18xf32>
    %538 = arith.mulf %537, %527 : vector<18x18xf32>
    %539 = arith.addf %521, %538 : vector<18x18xf32>
    %c137 = arith.constant 137 : index
    %540 = memref.load %arg2[%c137] : memref<144xf32, #tpu.memory_space<smem>>
    %541 = vector.broadcast %540 : f32 to vector<18x18xf32>
    %542 = arith.mulf %541, %527 : vector<18x18xf32>
    %543 = arith.addf %525, %542 : vector<18x18xf32>
    %c0_123 = arith.constant 0 : index
    %c3_124 = arith.constant 3 : index
    %c1_125 = arith.constant 1 : index
    %c0_126 = arith.constant 0 : index
    %544 = vector.load %arg1[%c0_123, %c3_124, %c1_125, %c0_126] : memref<1x4x20x20xf32, #tpu.memory_space<vmem>>, vector<1x1x18x18xf32>
    %545 = vector.shape_cast %544 : vector<1x1x18x18xf32> to vector<18x18xf32>
    %c30 = arith.constant 30 : index
    %546 = memref.load %arg2[%c30] : memref<144xf32, #tpu.memory_space<smem>>
    %547 = vector.broadcast %546 : f32 to vector<18x18xf32>
    %548 = arith.mulf %547, %545 : vector<18x18xf32>
    %549 = arith.addf %531, %548 : vector<18x18xf32>
    %c66 = arith.constant 66 : index
    %550 = memref.load %arg2[%c66] : memref<144xf32, #tpu.memory_space<smem>>
    %551 = vector.broadcast %550 : f32 to vector<18x18xf32>
    %552 = arith.mulf %551, %545 : vector<18x18xf32>
    %553 = arith.addf %535, %552 : vector<18x18xf32>
    %c102 = arith.constant 102 : index
    %554 = memref.load %arg2[%c102] : memref<144xf32, #tpu.memory_space<smem>>
    %555 = vector.broadcast %554 : f32 to vector<18x18xf32>
    %556 = arith.mulf %555, %545 : vector<18x18xf32>
    %557 = arith.addf %539, %556 : vector<18x18xf32>
    %c138 = arith.constant 138 : index
    %558 = memref.load %arg2[%c138] : memref<144xf32, #tpu.memory_space<smem>>
    %559 = vector.broadcast %558 : f32 to vector<18x18xf32>
    %560 = arith.mulf %559, %545 : vector<18x18xf32>
    %561 = arith.addf %543, %560 : vector<18x18xf32>
    %c0_127 = arith.constant 0 : index
    %c3_128 = arith.constant 3 : index
    %c1_129 = arith.constant 1 : index
    %c1_130 = arith.constant 1 : index
    %562 = vector.load %arg1[%c0_127, %c3_128, %c1_129, %c1_130] : memref<1x4x20x20xf32, #tpu.memory_space<vmem>>, vector<1x1x18x18xf32>
    %563 = vector.shape_cast %562 : vector<1x1x18x18xf32> to vector<18x18xf32>
    %c31 = arith.constant 31 : index
    %564 = memref.load %arg2[%c31] : memref<144xf32, #tpu.memory_space<smem>>
    %565 = vector.broadcast %564 : f32 to vector<18x18xf32>
    %566 = arith.mulf %565, %563 : vector<18x18xf32>
    %567 = arith.addf %549, %566 : vector<18x18xf32>
    %c67 = arith.constant 67 : index
    %568 = memref.load %arg2[%c67] : memref<144xf32, #tpu.memory_space<smem>>
    %569 = vector.broadcast %568 : f32 to vector<18x18xf32>
    %570 = arith.mulf %569, %563 : vector<18x18xf32>
    %571 = arith.addf %553, %570 : vector<18x18xf32>
    %c103 = arith.constant 103 : index
    %572 = memref.load %arg2[%c103] : memref<144xf32, #tpu.memory_space<smem>>
    %573 = vector.broadcast %572 : f32 to vector<18x18xf32>
    %574 = arith.mulf %573, %563 : vector<18x18xf32>
    %575 = arith.addf %557, %574 : vector<18x18xf32>
    %c139 = arith.constant 139 : index
    %576 = memref.load %arg2[%c139] : memref<144xf32, #tpu.memory_space<smem>>
    %577 = vector.broadcast %576 : f32 to vector<18x18xf32>
    %578 = arith.mulf %577, %563 : vector<18x18xf32>
    %579 = arith.addf %561, %578 : vector<18x18xf32>
    %c0_131 = arith.constant 0 : index
    %c3_132 = arith.constant 3 : index
    %c1_133 = arith.constant 1 : index
    %c2_134 = arith.constant 2 : index
    %580 = vector.load %arg1[%c0_131, %c3_132, %c1_133, %c2_134] : memref<1x4x20x20xf32, #tpu.memory_space<vmem>>, vector<1x1x18x18xf32>
    %581 = vector.shape_cast %580 : vector<1x1x18x18xf32> to vector<18x18xf32>
    %c32 = arith.constant 32 : index
    %582 = memref.load %arg2[%c32] : memref<144xf32, #tpu.memory_space<smem>>
    %583 = vector.broadcast %582 : f32 to vector<18x18xf32>
    %584 = arith.mulf %583, %581 : vector<18x18xf32>
    %585 = arith.addf %567, %584 : vector<18x18xf32>
    %c68 = arith.constant 68 : index
    %586 = memref.load %arg2[%c68] : memref<144xf32, #tpu.memory_space<smem>>
    %587 = vector.broadcast %586 : f32 to vector<18x18xf32>
    %588 = arith.mulf %587, %581 : vector<18x18xf32>
    %589 = arith.addf %571, %588 : vector<18x18xf32>
    %c104 = arith.constant 104 : index
    %590 = memref.load %arg2[%c104] : memref<144xf32, #tpu.memory_space<smem>>
    %591 = vector.broadcast %590 : f32 to vector<18x18xf32>
    %592 = arith.mulf %591, %581 : vector<18x18xf32>
    %593 = arith.addf %575, %592 : vector<18x18xf32>
    %c140 = arith.constant 140 : index
    %594 = memref.load %arg2[%c140] : memref<144xf32, #tpu.memory_space<smem>>
    %595 = vector.broadcast %594 : f32 to vector<18x18xf32>
    %596 = arith.mulf %595, %581 : vector<18x18xf32>
    %597 = arith.addf %579, %596 : vector<18x18xf32>
    %c0_135 = arith.constant 0 : index
    %c3_136 = arith.constant 3 : index
    %c2_137 = arith.constant 2 : index
    %c0_138 = arith.constant 0 : index
    %598 = vector.load %arg1[%c0_135, %c3_136, %c2_137, %c0_138] : memref<1x4x20x20xf32, #tpu.memory_space<vmem>>, vector<1x1x18x18xf32>
    %599 = vector.shape_cast %598 : vector<1x1x18x18xf32> to vector<18x18xf32>
    %c33 = arith.constant 33 : index
    %600 = memref.load %arg2[%c33] : memref<144xf32, #tpu.memory_space<smem>>
    %601 = vector.broadcast %600 : f32 to vector<18x18xf32>
    %602 = arith.mulf %601, %599 : vector<18x18xf32>
    %603 = arith.addf %585, %602 : vector<18x18xf32>
    %c69 = arith.constant 69 : index
    %604 = memref.load %arg2[%c69] : memref<144xf32, #tpu.memory_space<smem>>
    %605 = vector.broadcast %604 : f32 to vector<18x18xf32>
    %606 = arith.mulf %605, %599 : vector<18x18xf32>
    %607 = arith.addf %589, %606 : vector<18x18xf32>
    %c105 = arith.constant 105 : index
    %608 = memref.load %arg2[%c105] : memref<144xf32, #tpu.memory_space<smem>>
    %609 = vector.broadcast %608 : f32 to vector<18x18xf32>
    %610 = arith.mulf %609, %599 : vector<18x18xf32>
    %611 = arith.addf %593, %610 : vector<18x18xf32>
    %c141 = arith.constant 141 : index
    %612 = memref.load %arg2[%c141] : memref<144xf32, #tpu.memory_space<smem>>
    %613 = vector.broadcast %612 : f32 to vector<18x18xf32>
    %614 = arith.mulf %613, %599 : vector<18x18xf32>
    %615 = arith.addf %597, %614 : vector<18x18xf32>
    %c0_139 = arith.constant 0 : index
    %c3_140 = arith.constant 3 : index
    %c2_141 = arith.constant 2 : index
    %c1_142 = arith.constant 1 : index
    %616 = vector.load %arg1[%c0_139, %c3_140, %c2_141, %c1_142] : memref<1x4x20x20xf32, #tpu.memory_space<vmem>>, vector<1x1x18x18xf32>
    %617 = vector.shape_cast %616 : vector<1x1x18x18xf32> to vector<18x18xf32>
    %c34 = arith.constant 34 : index
    %618 = memref.load %arg2[%c34] : memref<144xf32, #tpu.memory_space<smem>>
    %619 = vector.broadcast %618 : f32 to vector<18x18xf32>
    %620 = arith.mulf %619, %617 : vector<18x18xf32>
    %621 = arith.addf %603, %620 : vector<18x18xf32>
    %c70 = arith.constant 70 : index
    %622 = memref.load %arg2[%c70] : memref<144xf32, #tpu.memory_space<smem>>
    %623 = vector.broadcast %622 : f32 to vector<18x18xf32>
    %624 = arith.mulf %623, %617 : vector<18x18xf32>
    %625 = arith.addf %607, %624 : vector<18x18xf32>
    %c106 = arith.constant 106 : index
    %626 = memref.load %arg2[%c106] : memref<144xf32, #tpu.memory_space<smem>>
    %627 = vector.broadcast %626 : f32 to vector<18x18xf32>
    %628 = arith.mulf %627, %617 : vector<18x18xf32>
    %629 = arith.addf %611, %628 : vector<18x18xf32>
    %c142 = arith.constant 142 : index
    %630 = memref.load %arg2[%c142] : memref<144xf32, #tpu.memory_space<smem>>
    %631 = vector.broadcast %630 : f32 to vector<18x18xf32>
    %632 = arith.mulf %631, %617 : vector<18x18xf32>
    %633 = arith.addf %615, %632 : vector<18x18xf32>
    %c0_143 = arith.constant 0 : index
    %c3_144 = arith.constant 3 : index
    %c2_145 = arith.constant 2 : index
    %c2_146 = arith.constant 2 : index
    %634 = vector.load %arg1[%c0_143, %c3_144, %c2_145, %c2_146] : memref<1x4x20x20xf32, #tpu.memory_space<vmem>>, vector<1x1x18x18xf32>
    %635 = vector.shape_cast %634 : vector<1x1x18x18xf32> to vector<18x18xf32>
    %c35 = arith.constant 35 : index
    %636 = memref.load %arg2[%c35] : memref<144xf32, #tpu.memory_space<smem>>
    %637 = vector.broadcast %636 : f32 to vector<18x18xf32>
    %638 = arith.mulf %637, %635 : vector<18x18xf32>
    %639 = arith.addf %621, %638 : vector<18x18xf32>
    %c71 = arith.constant 71 : index
    %640 = memref.load %arg2[%c71] : memref<144xf32, #tpu.memory_space<smem>>
    %641 = vector.broadcast %640 : f32 to vector<18x18xf32>
    %642 = arith.mulf %641, %635 : vector<18x18xf32>
    %643 = arith.addf %625, %642 : vector<18x18xf32>
    %c107 = arith.constant 107 : index
    %644 = memref.load %arg2[%c107] : memref<144xf32, #tpu.memory_space<smem>>
    %645 = vector.broadcast %644 : f32 to vector<18x18xf32>
    %646 = arith.mulf %645, %635 : vector<18x18xf32>
    %647 = arith.addf %629, %646 : vector<18x18xf32>
    %c143 = arith.constant 143 : index
    %648 = memref.load %arg2[%c143] : memref<144xf32, #tpu.memory_space<smem>>
    %649 = vector.broadcast %648 : f32 to vector<18x18xf32>
    %650 = arith.mulf %649, %635 : vector<18x18xf32>
    %651 = arith.addf %633, %650 : vector<18x18xf32>
    %652 = tpu.iota {dimensions = array<i32: 0>} : vector<18x18xi32>
    %653 = tpu.iota {dimensions = array<i32: 1>} : vector<18x18xi32>
    %c1_i32 = arith.constant 1 : i32
    %654 = vector.broadcast %c1_i32 : i32 to vector<18x18xi32>
    %655 = arith.cmpi sge, %652, %654 : vector<18x18xi32>
    %c16_i32 = arith.constant 16 : i32
    %656 = vector.broadcast %c16_i32 : i32 to vector<18x18xi32>
    %657 = arith.cmpi sle, %652, %656 : vector<18x18xi32>
    %658 = arith.andi %655, %657 : vector<18x18xi1>
    %c1_i32_147 = arith.constant 1 : i32
    %659 = vector.broadcast %c1_i32_147 : i32 to vector<18x18xi32>
    %660 = arith.cmpi sge, %653, %659 : vector<18x18xi32>
    %661 = arith.andi %658, %660 : vector<18x18xi1>
    %c16_i32_148 = arith.constant 16 : i32
    %662 = vector.broadcast %c16_i32_148 : i32 to vector<18x18xi32>
    %663 = arith.cmpi sle, %653, %662 : vector<18x18xi32>
    %664 = arith.andi %661, %663 : vector<18x18xi1>
    %c0_149 = arith.constant 0 : index
    %665 = memref.load %arg3[%c0_149] : memref<4xf32, #tpu.memory_space<smem>>
    %666 = vector.broadcast %665 : f32 to vector<18x18xf32>
    %667 = arith.mulf %639, %666 : vector<18x18xf32>
    %c0_150 = arith.constant 0 : index
    %668 = memref.load %arg4[%c0_150] : memref<4xf32, #tpu.memory_space<smem>>
    %669 = vector.broadcast %668 : f32 to vector<18x18xf32>
    %670 = arith.addf %667, %669 : vector<18x18xf32>
    %cst_151 = arith.constant 0.000000e+00 : f32
    %671 = vector.broadcast %cst_151 : f32 to vector<18x18xf32>
    %672 = arith.maximumf %670, %671 : vector<18x18xf32>
    %cst_152 = arith.constant 0.000000e+00 : f32
    %673 = vector.broadcast %cst_152 : f32 to vector<18x18xf32>
    %674 = arith.select %664, %672, %673 : vector<18x18xi1>, vector<18x18xf32>
    %c1_153 = arith.constant 1 : index
    %675 = memref.load %arg3[%c1_153] : memref<4xf32, #tpu.memory_space<smem>>
    %676 = vector.broadcast %675 : f32 to vector<18x18xf32>
    %677 = arith.mulf %643, %676 : vector<18x18xf32>
    %c1_154 = arith.constant 1 : index
    %678 = memref.load %arg4[%c1_154] : memref<4xf32, #tpu.memory_space<smem>>
    %679 = vector.broadcast %678 : f32 to vector<18x18xf32>
    %680 = arith.addf %677, %679 : vector<18x18xf32>
    %cst_155 = arith.constant 0.000000e+00 : f32
    %681 = vector.broadcast %cst_155 : f32 to vector<18x18xf32>
    %682 = arith.maximumf %680, %681 : vector<18x18xf32>
    %cst_156 = arith.constant 0.000000e+00 : f32
    %683 = vector.broadcast %cst_156 : f32 to vector<18x18xf32>
    %684 = arith.select %664, %682, %683 : vector<18x18xi1>, vector<18x18xf32>
    %c2_157 = arith.constant 2 : index
    %685 = memref.load %arg3[%c2_157] : memref<4xf32, #tpu.memory_space<smem>>
    %686 = vector.broadcast %685 : f32 to vector<18x18xf32>
    %687 = arith.mulf %647, %686 : vector<18x18xf32>
    %c2_158 = arith.constant 2 : index
    %688 = memref.load %arg4[%c2_158] : memref<4xf32, #tpu.memory_space<smem>>
    %689 = vector.broadcast %688 : f32 to vector<18x18xf32>
    %690 = arith.addf %687, %689 : vector<18x18xf32>
    %cst_159 = arith.constant 0.000000e+00 : f32
    %691 = vector.broadcast %cst_159 : f32 to vector<18x18xf32>
    %692 = arith.maximumf %690, %691 : vector<18x18xf32>
    %cst_160 = arith.constant 0.000000e+00 : f32
    %693 = vector.broadcast %cst_160 : f32 to vector<18x18xf32>
    %694 = arith.select %664, %692, %693 : vector<18x18xi1>, vector<18x18xf32>
    %c3_161 = arith.constant 3 : index
    %695 = memref.load %arg3[%c3_161] : memref<4xf32, #tpu.memory_space<smem>>
    %696 = vector.broadcast %695 : f32 to vector<18x18xf32>
    %697 = arith.mulf %651, %696 : vector<18x18xf32>
    %c3_162 = arith.constant 3 : index
    %698 = memref.load %arg4[%c3_162] : memref<4xf32, #tpu.memory_space<smem>>
    %699 = vector.broadcast %698 : f32 to vector<18x18xf32>
    %700 = arith.addf %697, %699 : vector<18x18xf32>
    %cst_163 = arith.constant 0.000000e+00 : f32
    %701 = vector.broadcast %cst_163 : f32 to vector<18x18xf32>
    %702 = arith.maximumf %700, %701 : vector<18x18xf32>
    %cst_164 = arith.constant 0.000000e+00 : f32
    %703 = vector.broadcast %cst_164 : f32 to vector<18x18xf32>
    %704 = arith.select %664, %702, %703 : vector<18x18xi1>, vector<18x18xf32>
    %705 = vector.shape_cast %674 : vector<18x18xf32> to vector<1x18x18xf32>
    %706 = vector.shape_cast %684 : vector<18x18xf32> to vector<1x18x18xf32>
    %707 = vector.shape_cast %694 : vector<18x18xf32> to vector<1x18x18xf32>
    %708 = vector.shape_cast %704 : vector<18x18xf32> to vector<1x18x18xf32>
    %709 = tpu.concatenate %705, %706, %707, %708 in 0 : vector<1x18x18xf32>, vector<1x18x18xf32>, vector<1x18x18xf32>, vector<1x18x18xf32> -> vector<4x18x18xf32>
    %c0_165 = arith.constant 0 : index
    %c0_166 = arith.constant 0 : index
    %c0_167 = arith.constant 0 : index
    %710 = vector.load %arg9[%c0_165, %c0_166, %c0_167] : memref<4x18x18xf32, #tpu.memory_space<vmem>>, vector<4x18x18xf32>
    tpu.vector_store %arg9[%c0_165, %c0_166, %c0_167], %709 {strides = array<i32>} : memref<4x18x18xf32, #tpu.memory_space<vmem>>, vector<4x18x18xf32>,
    %cst_168 = arith.constant 0.000000e+00 : f32
    %711 = vector.broadcast %cst_168 : f32 to vector<16x16xf32>
    %cst_169 = arith.constant 0.000000e+00 : f32
    %712 = vector.broadcast %cst_169 : f32 to vector<16x16xf32>
    %cst_170 = arith.constant 0.000000e+00 : f32
    %713 = vector.broadcast %cst_170 : f32 to vector<16x16xf32>
    %cst_171 = arith.constant 0.000000e+00 : f32
    %714 = vector.broadcast %cst_171 : f32 to vector<16x16xf32>
    %c0_172 = arith.constant 0 : index
    %c0_173 = arith.constant 0 : index
    %c0_174 = arith.constant 0 : index
    %715 = vector.load %arg9[%c0_172, %c0_173, %c0_174] : memref<4x18x18xf32, #tpu.memory_space<vmem>>, vector<1x16x16xf32>
    %716 = vector.shape_cast %715 : vector<1x16x16xf32> to vector<16x16xf32>
    %c0_175 = arith.constant 0 : index
    %717 = memref.load %arg5[%c0_175] : memref<144xf32, #tpu.memory_space<smem>>
    %718 = vector.broadcast %717 : f32 to vector<16x16xf32>
    %719 = arith.mulf %718, %716 : vector<16x16xf32>
    %720 = arith.addf %711, %719 : vector<16x16xf32>
    %c36_176 = arith.constant 36 : index
    %721 = memref.load %arg5[%c36_176] : memref<144xf32, #tpu.memory_space<smem>>
    %722 = vector.broadcast %721 : f32 to vector<16x16xf32>
    %723 = arith.mulf %722, %716 : vector<16x16xf32>
    %724 = arith.addf %712, %723 : vector<16x16xf32>
    %c72_177 = arith.constant 72 : index
    %725 = memref.load %arg5[%c72_177] : memref<144xf32, #tpu.memory_space<smem>>
    %726 = vector.broadcast %725 : f32 to vector<16x16xf32>
    %727 = arith.mulf %726, %716 : vector<16x16xf32>
    %728 = arith.addf %713, %727 : vector<16x16xf32>
    %c108_178 = arith.constant 108 : index
    %729 = memref.load %arg5[%c108_178] : memref<144xf32, #tpu.memory_space<smem>>
    %730 = vector.broadcast %729 : f32 to vector<16x16xf32>
    %731 = arith.mulf %730, %716 : vector<16x16xf32>
    %732 = arith.addf %714, %731 : vector<16x16xf32>
    %c0_179 = arith.constant 0 : index
    %c0_180 = arith.constant 0 : index
    %c1_181 = arith.constant 1 : index
    %733 = vector.load %arg9[%c0_179, %c0_180, %c1_181] : memref<4x18x18xf32, #tpu.memory_space<vmem>>, vector<1x16x16xf32>
    %734 = vector.shape_cast %733 : vector<1x16x16xf32> to vector<16x16xf32>
    %c1_182 = arith.constant 1 : index
    %735 = memref.load %arg5[%c1_182] : memref<144xf32, #tpu.memory_space<smem>>
    %736 = vector.broadcast %735 : f32 to vector<16x16xf32>
    %737 = arith.mulf %736, %734 : vector<16x16xf32>
    %738 = arith.addf %720, %737 : vector<16x16xf32>
    %c37_183 = arith.constant 37 : index
    %739 = memref.load %arg5[%c37_183] : memref<144xf32, #tpu.memory_space<smem>>
    %740 = vector.broadcast %739 : f32 to vector<16x16xf32>
    %741 = arith.mulf %740, %734 : vector<16x16xf32>
    %742 = arith.addf %724, %741 : vector<16x16xf32>
    %c73_184 = arith.constant 73 : index
    %743 = memref.load %arg5[%c73_184] : memref<144xf32, #tpu.memory_space<smem>>
    %744 = vector.broadcast %743 : f32 to vector<16x16xf32>
    %745 = arith.mulf %744, %734 : vector<16x16xf32>
    %746 = arith.addf %728, %745 : vector<16x16xf32>
    %c109_185 = arith.constant 109 : index
    %747 = memref.load %arg5[%c109_185] : memref<144xf32, #tpu.memory_space<smem>>
    %748 = vector.broadcast %747 : f32 to vector<16x16xf32>
    %749 = arith.mulf %748, %734 : vector<16x16xf32>
    %750 = arith.addf %732, %749 : vector<16x16xf32>
    %c0_186 = arith.constant 0 : index
    %c0_187 = arith.constant 0 : index
    %c2_188 = arith.constant 2 : index
    %751 = vector.load %arg9[%c0_186, %c0_187, %c2_188] : memref<4x18x18xf32, #tpu.memory_space<vmem>>, vector<1x16x16xf32>
    %752 = vector.shape_cast %751 : vector<1x16x16xf32> to vector<16x16xf32>
    %c2_189 = arith.constant 2 : index
    %753 = memref.load %arg5[%c2_189] : memref<144xf32, #tpu.memory_space<smem>>
    %754 = vector.broadcast %753 : f32 to vector<16x16xf32>
    %755 = arith.mulf %754, %752 : vector<16x16xf32>
    %756 = arith.addf %738, %755 : vector<16x16xf32>
    %c38_190 = arith.constant 38 : index
    %757 = memref.load %arg5[%c38_190] : memref<144xf32, #tpu.memory_space<smem>>
    %758 = vector.broadcast %757 : f32 to vector<16x16xf32>
    %759 = arith.mulf %758, %752 : vector<16x16xf32>
    %760 = arith.addf %742, %759 : vector<16x16xf32>
    %c74_191 = arith.constant 74 : index
    %761 = memref.load %arg5[%c74_191] : memref<144xf32, #tpu.memory_space<smem>>
    %762 = vector.broadcast %761 : f32 to vector<16x16xf32>
    %763 = arith.mulf %762, %752 : vector<16x16xf32>
    %764 = arith.addf %746, %763 : vector<16x16xf32>
    %c110_192 = arith.constant 110 : index
    %765 = memref.load %arg5[%c110_192] : memref<144xf32, #tpu.memory_space<smem>>
    %766 = vector.broadcast %765 : f32 to vector<16x16xf32>
    %767 = arith.mulf %766, %752 : vector<16x16xf32>
    %768 = arith.addf %750, %767 : vector<16x16xf32>
    %c0_193 = arith.constant 0 : index
    %c1_194 = arith.constant 1 : index
    %c0_195 = arith.constant 0 : index
    %769 = vector.load %arg9[%c0_193, %c1_194, %c0_195] : memref<4x18x18xf32, #tpu.memory_space<vmem>>, vector<1x16x16xf32>
    %770 = vector.shape_cast %769 : vector<1x16x16xf32> to vector<16x16xf32>
    %c3_196 = arith.constant 3 : index
    %771 = memref.load %arg5[%c3_196] : memref<144xf32, #tpu.memory_space<smem>>
    %772 = vector.broadcast %771 : f32 to vector<16x16xf32>
    %773 = arith.mulf %772, %770 : vector<16x16xf32>
    %774 = arith.addf %756, %773 : vector<16x16xf32>
    %c39_197 = arith.constant 39 : index
    %775 = memref.load %arg5[%c39_197] : memref<144xf32, #tpu.memory_space<smem>>
    %776 = vector.broadcast %775 : f32 to vector<16x16xf32>
    %777 = arith.mulf %776, %770 : vector<16x16xf32>
    %778 = arith.addf %760, %777 : vector<16x16xf32>
    %c75_198 = arith.constant 75 : index
    %779 = memref.load %arg5[%c75_198] : memref<144xf32, #tpu.memory_space<smem>>
    %780 = vector.broadcast %779 : f32 to vector<16x16xf32>
    %781 = arith.mulf %780, %770 : vector<16x16xf32>
    %782 = arith.addf %764, %781 : vector<16x16xf32>
    %c111_199 = arith.constant 111 : index
    %783 = memref.load %arg5[%c111_199] : memref<144xf32, #tpu.memory_space<smem>>
    %784 = vector.broadcast %783 : f32 to vector<16x16xf32>
    %785 = arith.mulf %784, %770 : vector<16x16xf32>
    %786 = arith.addf %768, %785 : vector<16x16xf32>
    %c0_200 = arith.constant 0 : index
    %c1_201 = arith.constant 1 : index
    %c1_202 = arith.constant 1 : index
    %787 = vector.load %arg9[%c0_200, %c1_201, %c1_202] : memref<4x18x18xf32, #tpu.memory_space<vmem>>, vector<1x16x16xf32>
    %788 = vector.shape_cast %787 : vector<1x16x16xf32> to vector<16x16xf32>
    %c4_203 = arith.constant 4 : index
    %789 = memref.load %arg5[%c4_203] : memref<144xf32, #tpu.memory_space<smem>>
    %790 = vector.broadcast %789 : f32 to vector<16x16xf32>
    %791 = arith.mulf %790, %788 : vector<16x16xf32>
    %792 = arith.addf %774, %791 : vector<16x16xf32>
    %c40_204 = arith.constant 40 : index
    %793 = memref.load %arg5[%c40_204] : memref<144xf32, #tpu.memory_space<smem>>
    %794 = vector.broadcast %793 : f32 to vector<16x16xf32>
    %795 = arith.mulf %794, %788 : vector<16x16xf32>
    %796 = arith.addf %778, %795 : vector<16x16xf32>
    %c76_205 = arith.constant 76 : index
    %797 = memref.load %arg5[%c76_205] : memref<144xf32, #tpu.memory_space<smem>>
    %798 = vector.broadcast %797 : f32 to vector<16x16xf32>
    %799 = arith.mulf %798, %788 : vector<16x16xf32>
    %800 = arith.addf %782, %799 : vector<16x16xf32>
    %c112_206 = arith.constant 112 : index
    %801 = memref.load %arg5[%c112_206] : memref<144xf32, #tpu.memory_space<smem>>
    %802 = vector.broadcast %801 : f32 to vector<16x16xf32>
    %803 = arith.mulf %802, %788 : vector<16x16xf32>
    %804 = arith.addf %786, %803 : vector<16x16xf32>
    %c0_207 = arith.constant 0 : index
    %c1_208 = arith.constant 1 : index
    %c2_209 = arith.constant 2 : index
    %805 = vector.load %arg9[%c0_207, %c1_208, %c2_209] : memref<4x18x18xf32, #tpu.memory_space<vmem>>, vector<1x16x16xf32>
    %806 = vector.shape_cast %805 : vector<1x16x16xf32> to vector<16x16xf32>
    %c5_210 = arith.constant 5 : index
    %807 = memref.load %arg5[%c5_210] : memref<144xf32, #tpu.memory_space<smem>>
    %808 = vector.broadcast %807 : f32 to vector<16x16xf32>
    %809 = arith.mulf %808, %806 : vector<16x16xf32>
    %810 = arith.addf %792, %809 : vector<16x16xf32>
    %c41_211 = arith.constant 41 : index
    %811 = memref.load %arg5[%c41_211] : memref<144xf32, #tpu.memory_space<smem>>
    %812 = vector.broadcast %811 : f32 to vector<16x16xf32>
    %813 = arith.mulf %812, %806 : vector<16x16xf32>
    %814 = arith.addf %796, %813 : vector<16x16xf32>
    %c77_212 = arith.constant 77 : index
    %815 = memref.load %arg5[%c77_212] : memref<144xf32, #tpu.memory_space<smem>>
    %816 = vector.broadcast %815 : f32 to vector<16x16xf32>
    %817 = arith.mulf %816, %806 : vector<16x16xf32>
    %818 = arith.addf %800, %817 : vector<16x16xf32>
    %c113_213 = arith.constant 113 : index
    %819 = memref.load %arg5[%c113_213] : memref<144xf32, #tpu.memory_space<smem>>
    %820 = vector.broadcast %819 : f32 to vector<16x16xf32>
    %821 = arith.mulf %820, %806 : vector<16x16xf32>
    %822 = arith.addf %804, %821 : vector<16x16xf32>
    %c0_214 = arith.constant 0 : index
    %c2_215 = arith.constant 2 : index
    %c0_216 = arith.constant 0 : index
    %823 = vector.load %arg9[%c0_214, %c2_215, %c0_216] : memref<4x18x18xf32, #tpu.memory_space<vmem>>, vector<1x16x16xf32>
    %824 = vector.shape_cast %823 : vector<1x16x16xf32> to vector<16x16xf32>
    %c6_217 = arith.constant 6 : index
    %825 = memref.load %arg5[%c6_217] : memref<144xf32, #tpu.memory_space<smem>>
    %826 = vector.broadcast %825 : f32 to vector<16x16xf32>
    %827 = arith.mulf %826, %824 : vector<16x16xf32>
    %828 = arith.addf %810, %827 : vector<16x16xf32>
    %c42_218 = arith.constant 42 : index
    %829 = memref.load %arg5[%c42_218] : memref<144xf32, #tpu.memory_space<smem>>
    %830 = vector.broadcast %829 : f32 to vector<16x16xf32>
    %831 = arith.mulf %830, %824 : vector<16x16xf32>
    %832 = arith.addf %814, %831 : vector<16x16xf32>
    %c78_219 = arith.constant 78 : index
    %833 = memref.load %arg5[%c78_219] : memref<144xf32, #tpu.memory_space<smem>>
    %834 = vector.broadcast %833 : f32 to vector<16x16xf32>
    %835 = arith.mulf %834, %824 : vector<16x16xf32>
    %836 = arith.addf %818, %835 : vector<16x16xf32>
    %c114_220 = arith.constant 114 : index
    %837 = memref.load %arg5[%c114_220] : memref<144xf32, #tpu.memory_space<smem>>
    %838 = vector.broadcast %837 : f32 to vector<16x16xf32>
    %839 = arith.mulf %838, %824 : vector<16x16xf32>
    %840 = arith.addf %822, %839 : vector<16x16xf32>
    %c0_221 = arith.constant 0 : index
    %c2_222 = arith.constant 2 : index
    %c1_223 = arith.constant 1 : index
    %841 = vector.load %arg9[%c0_221, %c2_222, %c1_223] : memref<4x18x18xf32, #tpu.memory_space<vmem>>, vector<1x16x16xf32>
    %842 = vector.shape_cast %841 : vector<1x16x16xf32> to vector<16x16xf32>
    %c7_224 = arith.constant 7 : index
    %843 = memref.load %arg5[%c7_224] : memref<144xf32, #tpu.memory_space<smem>>
    %844 = vector.broadcast %843 : f32 to vector<16x16xf32>
    %845 = arith.mulf %844, %842 : vector<16x16xf32>
    %846 = arith.addf %828, %845 : vector<16x16xf32>
    %c43_225 = arith.constant 43 : index
    %847 = memref.load %arg5[%c43_225] : memref<144xf32, #tpu.memory_space<smem>>
    %848 = vector.broadcast %847 : f32 to vector<16x16xf32>
    %849 = arith.mulf %848, %842 : vector<16x16xf32>
    %850 = arith.addf %832, %849 : vector<16x16xf32>
    %c79_226 = arith.constant 79 : index
    %851 = memref.load %arg5[%c79_226] : memref<144xf32, #tpu.memory_space<smem>>
    %852 = vector.broadcast %851 : f32 to vector<16x16xf32>
    %853 = arith.mulf %852, %842 : vector<16x16xf32>
    %854 = arith.addf %836, %853 : vector<16x16xf32>
    %c115_227 = arith.constant 115 : index
    %855 = memref.load %arg5[%c115_227] : memref<144xf32, #tpu.memory_space<smem>>
    %856 = vector.broadcast %855 : f32 to vector<16x16xf32>
    %857 = arith.mulf %856, %842 : vector<16x16xf32>
    %858 = arith.addf %840, %857 : vector<16x16xf32>
    %c0_228 = arith.constant 0 : index
    %c2_229 = arith.constant 2 : index
    %c2_230 = arith.constant 2 : index
    %859 = vector.load %arg9[%c0_228, %c2_229, %c2_230] : memref<4x18x18xf32, #tpu.memory_space<vmem>>, vector<1x16x16xf32>
    %860 = vector.shape_cast %859 : vector<1x16x16xf32> to vector<16x16xf32>
    %c8_231 = arith.constant 8 : index
    %861 = memref.load %arg5[%c8_231] : memref<144xf32, #tpu.memory_space<smem>>
    %862 = vector.broadcast %861 : f32 to vector<16x16xf32>
    %863 = arith.mulf %862, %860 : vector<16x16xf32>
    %864 = arith.addf %846, %863 : vector<16x16xf32>
    %c44_232 = arith.constant 44 : index
    %865 = memref.load %arg5[%c44_232] : memref<144xf32, #tpu.memory_space<smem>>
    %866 = vector.broadcast %865 : f32 to vector<16x16xf32>
    %867 = arith.mulf %866, %860 : vector<16x16xf32>
    %868 = arith.addf %850, %867 : vector<16x16xf32>
    %c80_233 = arith.constant 80 : index
    %869 = memref.load %arg5[%c80_233] : memref<144xf32, #tpu.memory_space<smem>>
    %870 = vector.broadcast %869 : f32 to vector<16x16xf32>
    %871 = arith.mulf %870, %860 : vector<16x16xf32>
    %872 = arith.addf %854, %871 : vector<16x16xf32>
    %c116_234 = arith.constant 116 : index
    %873 = memref.load %arg5[%c116_234] : memref<144xf32, #tpu.memory_space<smem>>
    %874 = vector.broadcast %873 : f32 to vector<16x16xf32>
    %875 = arith.mulf %874, %860 : vector<16x16xf32>
    %876 = arith.addf %858, %875 : vector<16x16xf32>
    %c1_235 = arith.constant 1 : index
    %c0_236 = arith.constant 0 : index
    %c0_237 = arith.constant 0 : index
    %877 = vector.load %arg9[%c1_235, %c0_236, %c0_237] : memref<4x18x18xf32, #tpu.memory_space<vmem>>, vector<1x16x16xf32>
    %878 = vector.shape_cast %877 : vector<1x16x16xf32> to vector<16x16xf32>
    %c9_238 = arith.constant 9 : index
    %879 = memref.load %arg5[%c9_238] : memref<144xf32, #tpu.memory_space<smem>>
    %880 = vector.broadcast %879 : f32 to vector<16x16xf32>
    %881 = arith.mulf %880, %878 : vector<16x16xf32>
    %882 = arith.addf %864, %881 : vector<16x16xf32>
    %c45_239 = arith.constant 45 : index
    %883 = memref.load %arg5[%c45_239] : memref<144xf32, #tpu.memory_space<smem>>
    %884 = vector.broadcast %883 : f32 to vector<16x16xf32>
    %885 = arith.mulf %884, %878 : vector<16x16xf32>
    %886 = arith.addf %868, %885 : vector<16x16xf32>
    %c81_240 = arith.constant 81 : index
    %887 = memref.load %arg5[%c81_240] : memref<144xf32, #tpu.memory_space<smem>>
    %888 = vector.broadcast %887 : f32 to vector<16x16xf32>
    %889 = arith.mulf %888, %878 : vector<16x16xf32>
    %890 = arith.addf %872, %889 : vector<16x16xf32>
    %c117_241 = arith.constant 117 : index
    %891 = memref.load %arg5[%c117_241] : memref<144xf32, #tpu.memory_space<smem>>
    %892 = vector.broadcast %891 : f32 to vector<16x16xf32>
    %893 = arith.mulf %892, %878 : vector<16x16xf32>
    %894 = arith.addf %876, %893 : vector<16x16xf32>
    %c1_242 = arith.constant 1 : index
    %c0_243 = arith.constant 0 : index
    %c1_244 = arith.constant 1 : index
    %895 = vector.load %arg9[%c1_242, %c0_243, %c1_244] : memref<4x18x18xf32, #tpu.memory_space<vmem>>, vector<1x16x16xf32>
    %896 = vector.shape_cast %895 : vector<1x16x16xf32> to vector<16x16xf32>
    %c10_245 = arith.constant 10 : index
    %897 = memref.load %arg5[%c10_245] : memref<144xf32, #tpu.memory_space<smem>>
    %898 = vector.broadcast %897 : f32 to vector<16x16xf32>
    %899 = arith.mulf %898, %896 : vector<16x16xf32>
    %900 = arith.addf %882, %899 : vector<16x16xf32>
    %c46_246 = arith.constant 46 : index
    %901 = memref.load %arg5[%c46_246] : memref<144xf32, #tpu.memory_space<smem>>
    %902 = vector.broadcast %901 : f32 to vector<16x16xf32>
    %903 = arith.mulf %902, %896 : vector<16x16xf32>
    %904 = arith.addf %886, %903 : vector<16x16xf32>
    %c82_247 = arith.constant 82 : index
    %905 = memref.load %arg5[%c82_247] : memref<144xf32, #tpu.memory_space<smem>>
    %906 = vector.broadcast %905 : f32 to vector<16x16xf32>
    %907 = arith.mulf %906, %896 : vector<16x16xf32>
    %908 = arith.addf %890, %907 : vector<16x16xf32>
    %c118_248 = arith.constant 118 : index
    %909 = memref.load %arg5[%c118_248] : memref<144xf32, #tpu.memory_space<smem>>
    %910 = vector.broadcast %909 : f32 to vector<16x16xf32>
    %911 = arith.mulf %910, %896 : vector<16x16xf32>
    %912 = arith.addf %894, %911 : vector<16x16xf32>
    %c1_249 = arith.constant 1 : index
    %c0_250 = arith.constant 0 : index
    %c2_251 = arith.constant 2 : index
    %913 = vector.load %arg9[%c1_249, %c0_250, %c2_251] : memref<4x18x18xf32, #tpu.memory_space<vmem>>, vector<1x16x16xf32>
    %914 = vector.shape_cast %913 : vector<1x16x16xf32> to vector<16x16xf32>
    %c11_252 = arith.constant 11 : index
    %915 = memref.load %arg5[%c11_252] : memref<144xf32, #tpu.memory_space<smem>>
    %916 = vector.broadcast %915 : f32 to vector<16x16xf32>
    %917 = arith.mulf %916, %914 : vector<16x16xf32>
    %918 = arith.addf %900, %917 : vector<16x16xf32>
    %c47_253 = arith.constant 47 : index
    %919 = memref.load %arg5[%c47_253] : memref<144xf32, #tpu.memory_space<smem>>
    %920 = vector.broadcast %919 : f32 to vector<16x16xf32>
    %921 = arith.mulf %920, %914 : vector<16x16xf32>
    %922 = arith.addf %904, %921 : vector<16x16xf32>
    %c83_254 = arith.constant 83 : index
    %923 = memref.load %arg5[%c83_254] : memref<144xf32, #tpu.memory_space<smem>>
    %924 = vector.broadcast %923 : f32 to vector<16x16xf32>
    %925 = arith.mulf %924, %914 : vector<16x16xf32>
    %926 = arith.addf %908, %925 : vector<16x16xf32>
    %c119_255 = arith.constant 119 : index
    %927 = memref.load %arg5[%c119_255] : memref<144xf32, #tpu.memory_space<smem>>
    %928 = vector.broadcast %927 : f32 to vector<16x16xf32>
    %929 = arith.mulf %928, %914 : vector<16x16xf32>
    %930 = arith.addf %912, %929 : vector<16x16xf32>
    %c1_256 = arith.constant 1 : index
    %c1_257 = arith.constant 1 : index
    %c0_258 = arith.constant 0 : index
    %931 = vector.load %arg9[%c1_256, %c1_257, %c0_258] : memref<4x18x18xf32, #tpu.memory_space<vmem>>, vector<1x16x16xf32>
    %932 = vector.shape_cast %931 : vector<1x16x16xf32> to vector<16x16xf32>
    %c12_259 = arith.constant 12 : index
    %933 = memref.load %arg5[%c12_259] : memref<144xf32, #tpu.memory_space<smem>>
    %934 = vector.broadcast %933 : f32 to vector<16x16xf32>
    %935 = arith.mulf %934, %932 : vector<16x16xf32>
    %936 = arith.addf %918, %935 : vector<16x16xf32>
    %c48_260 = arith.constant 48 : index
    %937 = memref.load %arg5[%c48_260] : memref<144xf32, #tpu.memory_space<smem>>
    %938 = vector.broadcast %937 : f32 to vector<16x16xf32>
    %939 = arith.mulf %938, %932 : vector<16x16xf32>
    %940 = arith.addf %922, %939 : vector<16x16xf32>
    %c84_261 = arith.constant 84 : index
    %941 = memref.load %arg5[%c84_261] : memref<144xf32, #tpu.memory_space<smem>>
    %942 = vector.broadcast %941 : f32 to vector<16x16xf32>
    %943 = arith.mulf %942, %932 : vector<16x16xf32>
    %944 = arith.addf %926, %943 : vector<16x16xf32>
    %c120_262 = arith.constant 120 : index
    %945 = memref.load %arg5[%c120_262] : memref<144xf32, #tpu.memory_space<smem>>
    %946 = vector.broadcast %945 : f32 to vector<16x16xf32>
    %947 = arith.mulf %946, %932 : vector<16x16xf32>
    %948 = arith.addf %930, %947 : vector<16x16xf32>
    %c1_263 = arith.constant 1 : index
    %c1_264 = arith.constant 1 : index
    %c1_265 = arith.constant 1 : index
    %949 = vector.load %arg9[%c1_263, %c1_264, %c1_265] : memref<4x18x18xf32, #tpu.memory_space<vmem>>, vector<1x16x16xf32>
    %950 = vector.shape_cast %949 : vector<1x16x16xf32> to vector<16x16xf32>
    %c13_266 = arith.constant 13 : index
    %951 = memref.load %arg5[%c13_266] : memref<144xf32, #tpu.memory_space<smem>>
    %952 = vector.broadcast %951 : f32 to vector<16x16xf32>
    %953 = arith.mulf %952, %950 : vector<16x16xf32>
    %954 = arith.addf %936, %953 : vector<16x16xf32>
    %c49_267 = arith.constant 49 : index
    %955 = memref.load %arg5[%c49_267] : memref<144xf32, #tpu.memory_space<smem>>
    %956 = vector.broadcast %955 : f32 to vector<16x16xf32>
    %957 = arith.mulf %956, %950 : vector<16x16xf32>
    %958 = arith.addf %940, %957 : vector<16x16xf32>
    %c85_268 = arith.constant 85 : index
    %959 = memref.load %arg5[%c85_268] : memref<144xf32, #tpu.memory_space<smem>>
    %960 = vector.broadcast %959 : f32 to vector<16x16xf32>
    %961 = arith.mulf %960, %950 : vector<16x16xf32>
    %962 = arith.addf %944, %961 : vector<16x16xf32>
    %c121_269 = arith.constant 121 : index
    %963 = memref.load %arg5[%c121_269] : memref<144xf32, #tpu.memory_space<smem>>
    %964 = vector.broadcast %963 : f32 to vector<16x16xf32>
    %965 = arith.mulf %964, %950 : vector<16x16xf32>
    %966 = arith.addf %948, %965 : vector<16x16xf32>
    %c1_270 = arith.constant 1 : index
    %c1_271 = arith.constant 1 : index
    %c2_272 = arith.constant 2 : index
    %967 = vector.load %arg9[%c1_270, %c1_271, %c2_272] : memref<4x18x18xf32, #tpu.memory_space<vmem>>, vector<1x16x16xf32>
    %968 = vector.shape_cast %967 : vector<1x16x16xf32> to vector<16x16xf32>
    %c14_273 = arith.constant 14 : index
    %969 = memref.load %arg5[%c14_273] : memref<144xf32, #tpu.memory_space<smem>>
    %970 = vector.broadcast %969 : f32 to vector<16x16xf32>
    %971 = arith.mulf %970, %968 : vector<16x16xf32>
    %972 = arith.addf %954, %971 : vector<16x16xf32>
    %c50_274 = arith.constant 50 : index
    %973 = memref.load %arg5[%c50_274] : memref<144xf32, #tpu.memory_space<smem>>
    %974 = vector.broadcast %973 : f32 to vector<16x16xf32>
    %975 = arith.mulf %974, %968 : vector<16x16xf32>
    %976 = arith.addf %958, %975 : vector<16x16xf32>
    %c86_275 = arith.constant 86 : index
    %977 = memref.load %arg5[%c86_275] : memref<144xf32, #tpu.memory_space<smem>>
    %978 = vector.broadcast %977 : f32 to vector<16x16xf32>
    %979 = arith.mulf %978, %968 : vector<16x16xf32>
    %980 = arith.addf %962, %979 : vector<16x16xf32>
    %c122_276 = arith.constant 122 : index
    %981 = memref.load %arg5[%c122_276] : memref<144xf32, #tpu.memory_space<smem>>
    %982 = vector.broadcast %981 : f32 to vector<16x16xf32>
    %983 = arith.mulf %982, %968 : vector<16x16xf32>
    %984 = arith.addf %966, %983 : vector<16x16xf32>
    %c1_277 = arith.constant 1 : index
    %c2_278 = arith.constant 2 : index
    %c0_279 = arith.constant 0 : index
    %985 = vector.load %arg9[%c1_277, %c2_278, %c0_279] : memref<4x18x18xf32, #tpu.memory_space<vmem>>, vector<1x16x16xf32>
    %986 = vector.shape_cast %985 : vector<1x16x16xf32> to vector<16x16xf32>
    %c15_280 = arith.constant 15 : index
    %987 = memref.load %arg5[%c15_280] : memref<144xf32, #tpu.memory_space<smem>>
    %988 = vector.broadcast %987 : f32 to vector<16x16xf32>
    %989 = arith.mulf %988, %986 : vector<16x16xf32>
    %990 = arith.addf %972, %989 : vector<16x16xf32>
    %c51_281 = arith.constant 51 : index
    %991 = memref.load %arg5[%c51_281] : memref<144xf32, #tpu.memory_space<smem>>
    %992 = vector.broadcast %991 : f32 to vector<16x16xf32>
    %993 = arith.mulf %992, %986 : vector<16x16xf32>
    %994 = arith.addf %976, %993 : vector<16x16xf32>
    %c87_282 = arith.constant 87 : index
    %995 = memref.load %arg5[%c87_282] : memref<144xf32, #tpu.memory_space<smem>>
    %996 = vector.broadcast %995 : f32 to vector<16x16xf32>
    %997 = arith.mulf %996, %986 : vector<16x16xf32>
    %998 = arith.addf %980, %997 : vector<16x16xf32>
    %c123_283 = arith.constant 123 : index
    %999 = memref.load %arg5[%c123_283] : memref<144xf32, #tpu.memory_space<smem>>
    %1000 = vector.broadcast %999 : f32 to vector<16x16xf32>
    %1001 = arith.mulf %1000, %986 : vector<16x16xf32>
    %1002 = arith.addf %984, %1001 : vector<16x16xf32>
    %c1_284 = arith.constant 1 : index
    %c2_285 = arith.constant 2 : index
    %c1_286 = arith.constant 1 : index
    %1003 = vector.load %arg9[%c1_284, %c2_285, %c1_286] : memref<4x18x18xf32, #tpu.memory_space<vmem>>, vector<1x16x16xf32>
    %1004 = vector.shape_cast %1003 : vector<1x16x16xf32> to vector<16x16xf32>
    %c16_287 = arith.constant 16 : index
    %1005 = memref.load %arg5[%c16_287] : memref<144xf32, #tpu.memory_space<smem>>
    %1006 = vector.broadcast %1005 : f32 to vector<16x16xf32>
    %1007 = arith.mulf %1006, %1004 : vector<16x16xf32>
    %1008 = arith.addf %990, %1007 : vector<16x16xf32>
    %c52_288 = arith.constant 52 : index
    %1009 = memref.load %arg5[%c52_288] : memref<144xf32, #tpu.memory_space<smem>>
    %1010 = vector.broadcast %1009 : f32 to vector<16x16xf32>
    %1011 = arith.mulf %1010, %1004 : vector<16x16xf32>
    %1012 = arith.addf %994, %1011 : vector<16x16xf32>
    %c88_289 = arith.constant 88 : index
    %1013 = memref.load %arg5[%c88_289] : memref<144xf32, #tpu.memory_space<smem>>
    %1014 = vector.broadcast %1013 : f32 to vector<16x16xf32>
    %1015 = arith.mulf %1014, %1004 : vector<16x16xf32>
    %1016 = arith.addf %998, %1015 : vector<16x16xf32>
    %c124_290 = arith.constant 124 : index
    %1017 = memref.load %arg5[%c124_290] : memref<144xf32, #tpu.memory_space<smem>>
    %1018 = vector.broadcast %1017 : f32 to vector<16x16xf32>
    %1019 = arith.mulf %1018, %1004 : vector<16x16xf32>
    %1020 = arith.addf %1002, %1019 : vector<16x16xf32>
    %c1_291 = arith.constant 1 : index
    %c2_292 = arith.constant 2 : index
    %c2_293 = arith.constant 2 : index
    %1021 = vector.load %arg9[%c1_291, %c2_292, %c2_293] : memref<4x18x18xf32, #tpu.memory_space<vmem>>, vector<1x16x16xf32>
    %1022 = vector.shape_cast %1021 : vector<1x16x16xf32> to vector<16x16xf32>
    %c17_294 = arith.constant 17 : index
    %1023 = memref.load %arg5[%c17_294] : memref<144xf32, #tpu.memory_space<smem>>
    %1024 = vector.broadcast %1023 : f32 to vector<16x16xf32>
    %1025 = arith.mulf %1024, %1022 : vector<16x16xf32>
    %1026 = arith.addf %1008, %1025 : vector<16x16xf32>
    %c53_295 = arith.constant 53 : index
    %1027 = memref.load %arg5[%c53_295] : memref<144xf32, #tpu.memory_space<smem>>
    %1028 = vector.broadcast %1027 : f32 to vector<16x16xf32>
    %1029 = arith.mulf %1028, %1022 : vector<16x16xf32>
    %1030 = arith.addf %1012, %1029 : vector<16x16xf32>
    %c89_296 = arith.constant 89 : index
    %1031 = memref.load %arg5[%c89_296] : memref<144xf32, #tpu.memory_space<smem>>
    %1032 = vector.broadcast %1031 : f32 to vector<16x16xf32>
    %1033 = arith.mulf %1032, %1022 : vector<16x16xf32>
    %1034 = arith.addf %1016, %1033 : vector<16x16xf32>
    %c125_297 = arith.constant 125 : index
    %1035 = memref.load %arg5[%c125_297] : memref<144xf32, #tpu.memory_space<smem>>
    %1036 = vector.broadcast %1035 : f32 to vector<16x16xf32>
    %1037 = arith.mulf %1036, %1022 : vector<16x16xf32>
    %1038 = arith.addf %1020, %1037 : vector<16x16xf32>
    %c2_298 = arith.constant 2 : index
    %c0_299 = arith.constant 0 : index
    %c0_300 = arith.constant 0 : index
    %1039 = vector.load %arg9[%c2_298, %c0_299, %c0_300] : memref<4x18x18xf32, #tpu.memory_space<vmem>>, vector<1x16x16xf32>
    %1040 = vector.shape_cast %1039 : vector<1x16x16xf32> to vector<16x16xf32>
    %c18_301 = arith.constant 18 : index
    %1041 = memref.load %arg5[%c18_301] : memref<144xf32, #tpu.memory_space<smem>>
    %1042 = vector.broadcast %1041 : f32 to vector<16x16xf32>
    %1043 = arith.mulf %1042, %1040 : vector<16x16xf32>
    %1044 = arith.addf %1026, %1043 : vector<16x16xf32>
    %c54_302 = arith.constant 54 : index
    %1045 = memref.load %arg5[%c54_302] : memref<144xf32, #tpu.memory_space<smem>>
    %1046 = vector.broadcast %1045 : f32 to vector<16x16xf32>
    %1047 = arith.mulf %1046, %1040 : vector<16x16xf32>
    %1048 = arith.addf %1030, %1047 : vector<16x16xf32>
    %c90_303 = arith.constant 90 : index
    %1049 = memref.load %arg5[%c90_303] : memref<144xf32, #tpu.memory_space<smem>>
    %1050 = vector.broadcast %1049 : f32 to vector<16x16xf32>
    %1051 = arith.mulf %1050, %1040 : vector<16x16xf32>
    %1052 = arith.addf %1034, %1051 : vector<16x16xf32>
    %c126_304 = arith.constant 126 : index
    %1053 = memref.load %arg5[%c126_304] : memref<144xf32, #tpu.memory_space<smem>>
    %1054 = vector.broadcast %1053 : f32 to vector<16x16xf32>
    %1055 = arith.mulf %1054, %1040 : vector<16x16xf32>
    %1056 = arith.addf %1038, %1055 : vector<16x16xf32>
    %c2_305 = arith.constant 2 : index
    %c0_306 = arith.constant 0 : index
    %c1_307 = arith.constant 1 : index
    %1057 = vector.load %arg9[%c2_305, %c0_306, %c1_307] : memref<4x18x18xf32, #tpu.memory_space<vmem>>, vector<1x16x16xf32>
    %1058 = vector.shape_cast %1057 : vector<1x16x16xf32> to vector<16x16xf32>
    %c19_308 = arith.constant 19 : index
    %1059 = memref.load %arg5[%c19_308] : memref<144xf32, #tpu.memory_space<smem>>
    %1060 = vector.broadcast %1059 : f32 to vector<16x16xf32>
    %1061 = arith.mulf %1060, %1058 : vector<16x16xf32>
    %1062 = arith.addf %1044, %1061 : vector<16x16xf32>
    %c55_309 = arith.constant 55 : index
    %1063 = memref.load %arg5[%c55_309] : memref<144xf32, #tpu.memory_space<smem>>
    %1064 = vector.broadcast %1063 : f32 to vector<16x16xf32>
    %1065 = arith.mulf %1064, %1058 : vector<16x16xf32>
    %1066 = arith.addf %1048, %1065 : vector<16x16xf32>
    %c91_310 = arith.constant 91 : index
    %1067 = memref.load %arg5[%c91_310] : memref<144xf32, #tpu.memory_space<smem>>
    %1068 = vector.broadcast %1067 : f32 to vector<16x16xf32>
    %1069 = arith.mulf %1068, %1058 : vector<16x16xf32>
    %1070 = arith.addf %1052, %1069 : vector<16x16xf32>
    %c127_311 = arith.constant 127 : index
    %1071 = memref.load %arg5[%c127_311] : memref<144xf32, #tpu.memory_space<smem>>
    %1072 = vector.broadcast %1071 : f32 to vector<16x16xf32>
    %1073 = arith.mulf %1072, %1058 : vector<16x16xf32>
    %1074 = arith.addf %1056, %1073 : vector<16x16xf32>
    %c2_312 = arith.constant 2 : index
    %c0_313 = arith.constant 0 : index
    %c2_314 = arith.constant 2 : index
    %1075 = vector.load %arg9[%c2_312, %c0_313, %c2_314] : memref<4x18x18xf32, #tpu.memory_space<vmem>>, vector<1x16x16xf32>
    %1076 = vector.shape_cast %1075 : vector<1x16x16xf32> to vector<16x16xf32>
    %c20_315 = arith.constant 20 : index
    %1077 = memref.load %arg5[%c20_315] : memref<144xf32, #tpu.memory_space<smem>>
    %1078 = vector.broadcast %1077 : f32 to vector<16x16xf32>
    %1079 = arith.mulf %1078, %1076 : vector<16x16xf32>
    %1080 = arith.addf %1062, %1079 : vector<16x16xf32>
    %c56_316 = arith.constant 56 : index
    %1081 = memref.load %arg5[%c56_316] : memref<144xf32, #tpu.memory_space<smem>>
    %1082 = vector.broadcast %1081 : f32 to vector<16x16xf32>
    %1083 = arith.mulf %1082, %1076 : vector<16x16xf32>
    %1084 = arith.addf %1066, %1083 : vector<16x16xf32>
    %c92_317 = arith.constant 92 : index
    %1085 = memref.load %arg5[%c92_317] : memref<144xf32, #tpu.memory_space<smem>>
    %1086 = vector.broadcast %1085 : f32 to vector<16x16xf32>
    %1087 = arith.mulf %1086, %1076 : vector<16x16xf32>
    %1088 = arith.addf %1070, %1087 : vector<16x16xf32>
    %c128_318 = arith.constant 128 : index
    %1089 = memref.load %arg5[%c128_318] : memref<144xf32, #tpu.memory_space<smem>>
    %1090 = vector.broadcast %1089 : f32 to vector<16x16xf32>
    %1091 = arith.mulf %1090, %1076 : vector<16x16xf32>
    %1092 = arith.addf %1074, %1091 : vector<16x16xf32>
    %c2_319 = arith.constant 2 : index
    %c1_320 = arith.constant 1 : index
    %c0_321 = arith.constant 0 : index
    %1093 = vector.load %arg9[%c2_319, %c1_320, %c0_321] : memref<4x18x18xf32, #tpu.memory_space<vmem>>, vector<1x16x16xf32>
    %1094 = vector.shape_cast %1093 : vector<1x16x16xf32> to vector<16x16xf32>
    %c21_322 = arith.constant 21 : index
    %1095 = memref.load %arg5[%c21_322] : memref<144xf32, #tpu.memory_space<smem>>
    %1096 = vector.broadcast %1095 : f32 to vector<16x16xf32>
    %1097 = arith.mulf %1096, %1094 : vector<16x16xf32>
    %1098 = arith.addf %1080, %1097 : vector<16x16xf32>
    %c57_323 = arith.constant 57 : index
    %1099 = memref.load %arg5[%c57_323] : memref<144xf32, #tpu.memory_space<smem>>
    %1100 = vector.broadcast %1099 : f32 to vector<16x16xf32>
    %1101 = arith.mulf %1100, %1094 : vector<16x16xf32>
    %1102 = arith.addf %1084, %1101 : vector<16x16xf32>
    %c93_324 = arith.constant 93 : index
    %1103 = memref.load %arg5[%c93_324] : memref<144xf32, #tpu.memory_space<smem>>
    %1104 = vector.broadcast %1103 : f32 to vector<16x16xf32>
    %1105 = arith.mulf %1104, %1094 : vector<16x16xf32>
    %1106 = arith.addf %1088, %1105 : vector<16x16xf32>
    %c129_325 = arith.constant 129 : index
    %1107 = memref.load %arg5[%c129_325] : memref<144xf32, #tpu.memory_space<smem>>
    %1108 = vector.broadcast %1107 : f32 to vector<16x16xf32>
    %1109 = arith.mulf %1108, %1094 : vector<16x16xf32>
    %1110 = arith.addf %1092, %1109 : vector<16x16xf32>
    %c2_326 = arith.constant 2 : index
    %c1_327 = arith.constant 1 : index
    %c1_328 = arith.constant 1 : index
    %1111 = vector.load %arg9[%c2_326, %c1_327, %c1_328] : memref<4x18x18xf32, #tpu.memory_space<vmem>>, vector<1x16x16xf32>
    %1112 = vector.shape_cast %1111 : vector<1x16x16xf32> to vector<16x16xf32>
    %c22_329 = arith.constant 22 : index
    %1113 = memref.load %arg5[%c22_329] : memref<144xf32, #tpu.memory_space<smem>>
    %1114 = vector.broadcast %1113 : f32 to vector<16x16xf32>
    %1115 = arith.mulf %1114, %1112 : vector<16x16xf32>
    %1116 = arith.addf %1098, %1115 : vector<16x16xf32>
    %c58_330 = arith.constant 58 : index
    %1117 = memref.load %arg5[%c58_330] : memref<144xf32, #tpu.memory_space<smem>>
    %1118 = vector.broadcast %1117 : f32 to vector<16x16xf32>
    %1119 = arith.mulf %1118, %1112 : vector<16x16xf32>
    %1120 = arith.addf %1102, %1119 : vector<16x16xf32>
    %c94_331 = arith.constant 94 : index
    %1121 = memref.load %arg5[%c94_331] : memref<144xf32, #tpu.memory_space<smem>>
    %1122 = vector.broadcast %1121 : f32 to vector<16x16xf32>
    %1123 = arith.mulf %1122, %1112 : vector<16x16xf32>
    %1124 = arith.addf %1106, %1123 : vector<16x16xf32>
    %c130_332 = arith.constant 130 : index
    %1125 = memref.load %arg5[%c130_332] : memref<144xf32, #tpu.memory_space<smem>>
    %1126 = vector.broadcast %1125 : f32 to vector<16x16xf32>
    %1127 = arith.mulf %1126, %1112 : vector<16x16xf32>
    %1128 = arith.addf %1110, %1127 : vector<16x16xf32>
    %c2_333 = arith.constant 2 : index
    %c1_334 = arith.constant 1 : index
    %c2_335 = arith.constant 2 : index
    %1129 = vector.load %arg9[%c2_333, %c1_334, %c2_335] : memref<4x18x18xf32, #tpu.memory_space<vmem>>, vector<1x16x16xf32>
    %1130 = vector.shape_cast %1129 : vector<1x16x16xf32> to vector<16x16xf32>
    %c23_336 = arith.constant 23 : index
    %1131 = memref.load %arg5[%c23_336] : memref<144xf32, #tpu.memory_space<smem>>
    %1132 = vector.broadcast %1131 : f32 to vector<16x16xf32>
    %1133 = arith.mulf %1132, %1130 : vector<16x16xf32>
    %1134 = arith.addf %1116, %1133 : vector<16x16xf32>
    %c59_337 = arith.constant 59 : index
    %1135 = memref.load %arg5[%c59_337] : memref<144xf32, #tpu.memory_space<smem>>
    %1136 = vector.broadcast %1135 : f32 to vector<16x16xf32>
    %1137 = arith.mulf %1136, %1130 : vector<16x16xf32>
    %1138 = arith.addf %1120, %1137 : vector<16x16xf32>
    %c95_338 = arith.constant 95 : index
    %1139 = memref.load %arg5[%c95_338] : memref<144xf32, #tpu.memory_space<smem>>
    %1140 = vector.broadcast %1139 : f32 to vector<16x16xf32>
    %1141 = arith.mulf %1140, %1130 : vector<16x16xf32>
    %1142 = arith.addf %1124, %1141 : vector<16x16xf32>
    %c131_339 = arith.constant 131 : index
    %1143 = memref.load %arg5[%c131_339] : memref<144xf32, #tpu.memory_space<smem>>
    %1144 = vector.broadcast %1143 : f32 to vector<16x16xf32>
    %1145 = arith.mulf %1144, %1130 : vector<16x16xf32>
    %1146 = arith.addf %1128, %1145 : vector<16x16xf32>
    %c2_340 = arith.constant 2 : index
    %c2_341 = arith.constant 2 : index
    %c0_342 = arith.constant 0 : index
    %1147 = vector.load %arg9[%c2_340, %c2_341, %c0_342] : memref<4x18x18xf32, #tpu.memory_space<vmem>>, vector<1x16x16xf32>
    %1148 = vector.shape_cast %1147 : vector<1x16x16xf32> to vector<16x16xf32>
    %c24_343 = arith.constant 24 : index
    %1149 = memref.load %arg5[%c24_343] : memref<144xf32, #tpu.memory_space<smem>>
    %1150 = vector.broadcast %1149 : f32 to vector<16x16xf32>
    %1151 = arith.mulf %1150, %1148 : vector<16x16xf32>
    %1152 = arith.addf %1134, %1151 : vector<16x16xf32>
    %c60_344 = arith.constant 60 : index
    %1153 = memref.load %arg5[%c60_344] : memref<144xf32, #tpu.memory_space<smem>>
    %1154 = vector.broadcast %1153 : f32 to vector<16x16xf32>
    %1155 = arith.mulf %1154, %1148 : vector<16x16xf32>
    %1156 = arith.addf %1138, %1155 : vector<16x16xf32>
    %c96_345 = arith.constant 96 : index
    %1157 = memref.load %arg5[%c96_345] : memref<144xf32, #tpu.memory_space<smem>>
    %1158 = vector.broadcast %1157 : f32 to vector<16x16xf32>
    %1159 = arith.mulf %1158, %1148 : vector<16x16xf32>
    %1160 = arith.addf %1142, %1159 : vector<16x16xf32>
    %c132_346 = arith.constant 132 : index
    %1161 = memref.load %arg5[%c132_346] : memref<144xf32, #tpu.memory_space<smem>>
    %1162 = vector.broadcast %1161 : f32 to vector<16x16xf32>
    %1163 = arith.mulf %1162, %1148 : vector<16x16xf32>
    %1164 = arith.addf %1146, %1163 : vector<16x16xf32>
    %c2_347 = arith.constant 2 : index
    %c2_348 = arith.constant 2 : index
    %c1_349 = arith.constant 1 : index
    %1165 = vector.load %arg9[%c2_347, %c2_348, %c1_349] : memref<4x18x18xf32, #tpu.memory_space<vmem>>, vector<1x16x16xf32>
    %1166 = vector.shape_cast %1165 : vector<1x16x16xf32> to vector<16x16xf32>
    %c25_350 = arith.constant 25 : index
    %1167 = memref.load %arg5[%c25_350] : memref<144xf32, #tpu.memory_space<smem>>
    %1168 = vector.broadcast %1167 : f32 to vector<16x16xf32>
    %1169 = arith.mulf %1168, %1166 : vector<16x16xf32>
    %1170 = arith.addf %1152, %1169 : vector<16x16xf32>
    %c61_351 = arith.constant 61 : index
    %1171 = memref.load %arg5[%c61_351] : memref<144xf32, #tpu.memory_space<smem>>
    %1172 = vector.broadcast %1171 : f32 to vector<16x16xf32>
    %1173 = arith.mulf %1172, %1166 : vector<16x16xf32>
    %1174 = arith.addf %1156, %1173 : vector<16x16xf32>
    %c97_352 = arith.constant 97 : index
    %1175 = memref.load %arg5[%c97_352] : memref<144xf32, #tpu.memory_space<smem>>
    %1176 = vector.broadcast %1175 : f32 to vector<16x16xf32>
    %1177 = arith.mulf %1176, %1166 : vector<16x16xf32>
    %1178 = arith.addf %1160, %1177 : vector<16x16xf32>
    %c133_353 = arith.constant 133 : index
    %1179 = memref.load %arg5[%c133_353] : memref<144xf32, #tpu.memory_space<smem>>
    %1180 = vector.broadcast %1179 : f32 to vector<16x16xf32>
    %1181 = arith.mulf %1180, %1166 : vector<16x16xf32>
    %1182 = arith.addf %1164, %1181 : vector<16x16xf32>
    %c2_354 = arith.constant 2 : index
    %c2_355 = arith.constant 2 : index
    %c2_356 = arith.constant 2 : index
    %1183 = vector.load %arg9[%c2_354, %c2_355, %c2_356] : memref<4x18x18xf32, #tpu.memory_space<vmem>>, vector<1x16x16xf32>
    %1184 = vector.shape_cast %1183 : vector<1x16x16xf32> to vector<16x16xf32>
    %c26_357 = arith.constant 26 : index
    %1185 = memref.load %arg5[%c26_357] : memref<144xf32, #tpu.memory_space<smem>>
    %1186 = vector.broadcast %1185 : f32 to vector<16x16xf32>
    %1187 = arith.mulf %1186, %1184 : vector<16x16xf32>
    %1188 = arith.addf %1170, %1187 : vector<16x16xf32>
    %c62_358 = arith.constant 62 : index
    %1189 = memref.load %arg5[%c62_358] : memref<144xf32, #tpu.memory_space<smem>>
    %1190 = vector.broadcast %1189 : f32 to vector<16x16xf32>
    %1191 = arith.mulf %1190, %1184 : vector<16x16xf32>
    %1192 = arith.addf %1174, %1191 : vector<16x16xf32>
    %c98_359 = arith.constant 98 : index
    %1193 = memref.load %arg5[%c98_359] : memref<144xf32, #tpu.memory_space<smem>>
    %1194 = vector.broadcast %1193 : f32 to vector<16x16xf32>
    %1195 = arith.mulf %1194, %1184 : vector<16x16xf32>
    %1196 = arith.addf %1178, %1195 : vector<16x16xf32>
    %c134_360 = arith.constant 134 : index
    %1197 = memref.load %arg5[%c134_360] : memref<144xf32, #tpu.memory_space<smem>>
    %1198 = vector.broadcast %1197 : f32 to vector<16x16xf32>
    %1199 = arith.mulf %1198, %1184 : vector<16x16xf32>
    %1200 = arith.addf %1182, %1199 : vector<16x16xf32>
    %c3_361 = arith.constant 3 : index
    %c0_362 = arith.constant 0 : index
    %c0_363 = arith.constant 0 : index
    %1201 = vector.load %arg9[%c3_361, %c0_362, %c0_363] : memref<4x18x18xf32, #tpu.memory_space<vmem>>, vector<1x16x16xf32>
    %1202 = vector.shape_cast %1201 : vector<1x16x16xf32> to vector<16x16xf32>
    %c27_364 = arith.constant 27 : index
    %1203 = memref.load %arg5[%c27_364] : memref<144xf32, #tpu.memory_space<smem>>
    %1204 = vector.broadcast %1203 : f32 to vector<16x16xf32>
    %1205 = arith.mulf %1204, %1202 : vector<16x16xf32>
    %1206 = arith.addf %1188, %1205 : vector<16x16xf32>
    %c63_365 = arith.constant 63 : index
    %1207 = memref.load %arg5[%c63_365] : memref<144xf32, #tpu.memory_space<smem>>
    %1208 = vector.broadcast %1207 : f32 to vector<16x16xf32>
    %1209 = arith.mulf %1208, %1202 : vector<16x16xf32>
    %1210 = arith.addf %1192, %1209 : vector<16x16xf32>
    %c99_366 = arith.constant 99 : index
    %1211 = memref.load %arg5[%c99_366] : memref<144xf32, #tpu.memory_space<smem>>
    %1212 = vector.broadcast %1211 : f32 to vector<16x16xf32>
    %1213 = arith.mulf %1212, %1202 : vector<16x16xf32>
    %1214 = arith.addf %1196, %1213 : vector<16x16xf32>
    %c135_367 = arith.constant 135 : index
    %1215 = memref.load %arg5[%c135_367] : memref<144xf32, #tpu.memory_space<smem>>
    %1216 = vector.broadcast %1215 : f32 to vector<16x16xf32>
    %1217 = arith.mulf %1216, %1202 : vector<16x16xf32>
    %1218 = arith.addf %1200, %1217 : vector<16x16xf32>
    %c3_368 = arith.constant 3 : index
    %c0_369 = arith.constant 0 : index
    %c1_370 = arith.constant 1 : index
    %1219 = vector.load %arg9[%c3_368, %c0_369, %c1_370] : memref<4x18x18xf32, #tpu.memory_space<vmem>>, vector<1x16x16xf32>
    %1220 = vector.shape_cast %1219 : vector<1x16x16xf32> to vector<16x16xf32>
    %c28_371 = arith.constant 28 : index
    %1221 = memref.load %arg5[%c28_371] : memref<144xf32, #tpu.memory_space<smem>>
    %1222 = vector.broadcast %1221 : f32 to vector<16x16xf32>
    %1223 = arith.mulf %1222, %1220 : vector<16x16xf32>
    %1224 = arith.addf %1206, %1223 : vector<16x16xf32>
    %c64_372 = arith.constant 64 : index
    %1225 = memref.load %arg5[%c64_372] : memref<144xf32, #tpu.memory_space<smem>>
    %1226 = vector.broadcast %1225 : f32 to vector<16x16xf32>
    %1227 = arith.mulf %1226, %1220 : vector<16x16xf32>
    %1228 = arith.addf %1210, %1227 : vector<16x16xf32>
    %c100_373 = arith.constant 100 : index
    %1229 = memref.load %arg5[%c100_373] : memref<144xf32, #tpu.memory_space<smem>>
    %1230 = vector.broadcast %1229 : f32 to vector<16x16xf32>
    %1231 = arith.mulf %1230, %1220 : vector<16x16xf32>
    %1232 = arith.addf %1214, %1231 : vector<16x16xf32>
    %c136_374 = arith.constant 136 : index
    %1233 = memref.load %arg5[%c136_374] : memref<144xf32, #tpu.memory_space<smem>>
    %1234 = vector.broadcast %1233 : f32 to vector<16x16xf32>
    %1235 = arith.mulf %1234, %1220 : vector<16x16xf32>
    %1236 = arith.addf %1218, %1235 : vector<16x16xf32>
    %c3_375 = arith.constant 3 : index
    %c0_376 = arith.constant 0 : index
    %c2_377 = arith.constant 2 : index
    %1237 = vector.load %arg9[%c3_375, %c0_376, %c2_377] : memref<4x18x18xf32, #tpu.memory_space<vmem>>, vector<1x16x16xf32>
    %1238 = vector.shape_cast %1237 : vector<1x16x16xf32> to vector<16x16xf32>
    %c29_378 = arith.constant 29 : index
    %1239 = memref.load %arg5[%c29_378] : memref<144xf32, #tpu.memory_space<smem>>
    %1240 = vector.broadcast %1239 : f32 to vector<16x16xf32>
    %1241 = arith.mulf %1240, %1238 : vector<16x16xf32>
    %1242 = arith.addf %1224, %1241 : vector<16x16xf32>
    %c65_379 = arith.constant 65 : index
    %1243 = memref.load %arg5[%c65_379] : memref<144xf32, #tpu.memory_space<smem>>
    %1244 = vector.broadcast %1243 : f32 to vector<16x16xf32>
    %1245 = arith.mulf %1244, %1238 : vector<16x16xf32>
    %1246 = arith.addf %1228, %1245 : vector<16x16xf32>
    %c101_380 = arith.constant 101 : index
    %1247 = memref.load %arg5[%c101_380] : memref<144xf32, #tpu.memory_space<smem>>
    %1248 = vector.broadcast %1247 : f32 to vector<16x16xf32>
    %1249 = arith.mulf %1248, %1238 : vector<16x16xf32>
    %1250 = arith.addf %1232, %1249 : vector<16x16xf32>
    %c137_381 = arith.constant 137 : index
    %1251 = memref.load %arg5[%c137_381] : memref<144xf32, #tpu.memory_space<smem>>
    %1252 = vector.broadcast %1251 : f32 to vector<16x16xf32>
    %1253 = arith.mulf %1252, %1238 : vector<16x16xf32>
    %1254 = arith.addf %1236, %1253 : vector<16x16xf32>
    %c3_382 = arith.constant 3 : index
    %c1_383 = arith.constant 1 : index
    %c0_384 = arith.constant 0 : index
    %1255 = vector.load %arg9[%c3_382, %c1_383, %c0_384] : memref<4x18x18xf32, #tpu.memory_space<vmem>>, vector<1x16x16xf32>
    %1256 = vector.shape_cast %1255 : vector<1x16x16xf32> to vector<16x16xf32>
    %c30_385 = arith.constant 30 : index
    %1257 = memref.load %arg5[%c30_385] : memref<144xf32, #tpu.memory_space<smem>>
    %1258 = vector.broadcast %1257 : f32 to vector<16x16xf32>
    %1259 = arith.mulf %1258, %1256 : vector<16x16xf32>
    %1260 = arith.addf %1242, %1259 : vector<16x16xf32>
    %c66_386 = arith.constant 66 : index
    %1261 = memref.load %arg5[%c66_386] : memref<144xf32, #tpu.memory_space<smem>>
    %1262 = vector.broadcast %1261 : f32 to vector<16x16xf32>
    %1263 = arith.mulf %1262, %1256 : vector<16x16xf32>
    %1264 = arith.addf %1246, %1263 : vector<16x16xf32>
    %c102_387 = arith.constant 102 : index
    %1265 = memref.load %arg5[%c102_387] : memref<144xf32, #tpu.memory_space<smem>>
    %1266 = vector.broadcast %1265 : f32 to vector<16x16xf32>
    %1267 = arith.mulf %1266, %1256 : vector<16x16xf32>
    %1268 = arith.addf %1250, %1267 : vector<16x16xf32>
    %c138_388 = arith.constant 138 : index
    %1269 = memref.load %arg5[%c138_388] : memref<144xf32, #tpu.memory_space<smem>>
    %1270 = vector.broadcast %1269 : f32 to vector<16x16xf32>
    %1271 = arith.mulf %1270, %1256 : vector<16x16xf32>
    %1272 = arith.addf %1254, %1271 : vector<16x16xf32>
    %c3_389 = arith.constant 3 : index
    %c1_390 = arith.constant 1 : index
    %c1_391 = arith.constant 1 : index
    %1273 = vector.load %arg9[%c3_389, %c1_390, %c1_391] : memref<4x18x18xf32, #tpu.memory_space<vmem>>, vector<1x16x16xf32>
    %1274 = vector.shape_cast %1273 : vector<1x16x16xf32> to vector<16x16xf32>
    %c31_392 = arith.constant 31 : index
    %1275 = memref.load %arg5[%c31_392] : memref<144xf32, #tpu.memory_space<smem>>
    %1276 = vector.broadcast %1275 : f32 to vector<16x16xf32>
    %1277 = arith.mulf %1276, %1274 : vector<16x16xf32>
    %1278 = arith.addf %1260, %1277 : vector<16x16xf32>
    %c67_393 = arith.constant 67 : index
    %1279 = memref.load %arg5[%c67_393] : memref<144xf32, #tpu.memory_space<smem>>
    %1280 = vector.broadcast %1279 : f32 to vector<16x16xf32>
    %1281 = arith.mulf %1280, %1274 : vector<16x16xf32>
    %1282 = arith.addf %1264, %1281 : vector<16x16xf32>
    %c103_394 = arith.constant 103 : index
    %1283 = memref.load %arg5[%c103_394] : memref<144xf32, #tpu.memory_space<smem>>
    %1284 = vector.broadcast %1283 : f32 to vector<16x16xf32>
    %1285 = arith.mulf %1284, %1274 : vector<16x16xf32>
    %1286 = arith.addf %1268, %1285 : vector<16x16xf32>
    %c139_395 = arith.constant 139 : index
    %1287 = memref.load %arg5[%c139_395] : memref<144xf32, #tpu.memory_space<smem>>
    %1288 = vector.broadcast %1287 : f32 to vector<16x16xf32>
    %1289 = arith.mulf %1288, %1274 : vector<16x16xf32>
    %1290 = arith.addf %1272, %1289 : vector<16x16xf32>
    %c3_396 = arith.constant 3 : index
    %c1_397 = arith.constant 1 : index
    %c2_398 = arith.constant 2 : index
    %1291 = vector.load %arg9[%c3_396, %c1_397, %c2_398] : memref<4x18x18xf32, #tpu.memory_space<vmem>>, vector<1x16x16xf32>
    %1292 = vector.shape_cast %1291 : vector<1x16x16xf32> to vector<16x16xf32>
    %c32_399 = arith.constant 32 : index
    %1293 = memref.load %arg5[%c32_399] : memref<144xf32, #tpu.memory_space<smem>>
    %1294 = vector.broadcast %1293 : f32 to vector<16x16xf32>
    %1295 = arith.mulf %1294, %1292 : vector<16x16xf32>
    %1296 = arith.addf %1278, %1295 : vector<16x16xf32>
    %c68_400 = arith.constant 68 : index
    %1297 = memref.load %arg5[%c68_400] : memref<144xf32, #tpu.memory_space<smem>>
    %1298 = vector.broadcast %1297 : f32 to vector<16x16xf32>
    %1299 = arith.mulf %1298, %1292 : vector<16x16xf32>
    %1300 = arith.addf %1282, %1299 : vector<16x16xf32>
    %c104_401 = arith.constant 104 : index
    %1301 = memref.load %arg5[%c104_401] : memref<144xf32, #tpu.memory_space<smem>>
    %1302 = vector.broadcast %1301 : f32 to vector<16x16xf32>
    %1303 = arith.mulf %1302, %1292 : vector<16x16xf32>
    %1304 = arith.addf %1286, %1303 : vector<16x16xf32>
    %c140_402 = arith.constant 140 : index
    %1305 = memref.load %arg5[%c140_402] : memref<144xf32, #tpu.memory_space<smem>>
    %1306 = vector.broadcast %1305 : f32 to vector<16x16xf32>
    %1307 = arith.mulf %1306, %1292 : vector<16x16xf32>
    %1308 = arith.addf %1290, %1307 : vector<16x16xf32>
    %c3_403 = arith.constant 3 : index
    %c2_404 = arith.constant 2 : index
    %c0_405 = arith.constant 0 : index
    %1309 = vector.load %arg9[%c3_403, %c2_404, %c0_405] : memref<4x18x18xf32, #tpu.memory_space<vmem>>, vector<1x16x16xf32>
    %1310 = vector.shape_cast %1309 : vector<1x16x16xf32> to vector<16x16xf32>
    %c33_406 = arith.constant 33 : index
    %1311 = memref.load %arg5[%c33_406] : memref<144xf32, #tpu.memory_space<smem>>
    %1312 = vector.broadcast %1311 : f32 to vector<16x16xf32>
    %1313 = arith.mulf %1312, %1310 : vector<16x16xf32>
    %1314 = arith.addf %1296, %1313 : vector<16x16xf32>
    %c69_407 = arith.constant 69 : index
    %1315 = memref.load %arg5[%c69_407] : memref<144xf32, #tpu.memory_space<smem>>
    %1316 = vector.broadcast %1315 : f32 to vector<16x16xf32>
    %1317 = arith.mulf %1316, %1310 : vector<16x16xf32>
    %1318 = arith.addf %1300, %1317 : vector<16x16xf32>
    %c105_408 = arith.constant 105 : index
    %1319 = memref.load %arg5[%c105_408] : memref<144xf32, #tpu.memory_space<smem>>
    %1320 = vector.broadcast %1319 : f32 to vector<16x16xf32>
    %1321 = arith.mulf %1320, %1310 : vector<16x16xf32>
    %1322 = arith.addf %1304, %1321 : vector<16x16xf32>
    %c141_409 = arith.constant 141 : index
    %1323 = memref.load %arg5[%c141_409] : memref<144xf32, #tpu.memory_space<smem>>
    %1324 = vector.broadcast %1323 : f32 to vector<16x16xf32>
    %1325 = arith.mulf %1324, %1310 : vector<16x16xf32>
    %1326 = arith.addf %1308, %1325 : vector<16x16xf32>
    %c3_410 = arith.constant 3 : index
    %c2_411 = arith.constant 2 : index
    %c1_412 = arith.constant 1 : index
    %1327 = vector.load %arg9[%c3_410, %c2_411, %c1_412] : memref<4x18x18xf32, #tpu.memory_space<vmem>>, vector<1x16x16xf32>
    %1328 = vector.shape_cast %1327 : vector<1x16x16xf32> to vector<16x16xf32>
    %c34_413 = arith.constant 34 : index
    %1329 = memref.load %arg5[%c34_413] : memref<144xf32, #tpu.memory_space<smem>>
    %1330 = vector.broadcast %1329 : f32 to vector<16x16xf32>
    %1331 = arith.mulf %1330, %1328 : vector<16x16xf32>
    %1332 = arith.addf %1314, %1331 : vector<16x16xf32>
    %c70_414 = arith.constant 70 : index
    %1333 = memref.load %arg5[%c70_414] : memref<144xf32, #tpu.memory_space<smem>>
    %1334 = vector.broadcast %1333 : f32 to vector<16x16xf32>
    %1335 = arith.mulf %1334, %1328 : vector<16x16xf32>
    %1336 = arith.addf %1318, %1335 : vector<16x16xf32>
    %c106_415 = arith.constant 106 : index
    %1337 = memref.load %arg5[%c106_415] : memref<144xf32, #tpu.memory_space<smem>>
    %1338 = vector.broadcast %1337 : f32 to vector<16x16xf32>
    %1339 = arith.mulf %1338, %1328 : vector<16x16xf32>
    %1340 = arith.addf %1322, %1339 : vector<16x16xf32>
    %c142_416 = arith.constant 142 : index
    %1341 = memref.load %arg5[%c142_416] : memref<144xf32, #tpu.memory_space<smem>>
    %1342 = vector.broadcast %1341 : f32 to vector<16x16xf32>
    %1343 = arith.mulf %1342, %1328 : vector<16x16xf32>
    %1344 = arith.addf %1326, %1343 : vector<16x16xf32>
    %c3_417 = arith.constant 3 : index
    %c2_418 = arith.constant 2 : index
    %c2_419 = arith.constant 2 : index
    %1345 = vector.load %arg9[%c3_417, %c2_418, %c2_419] : memref<4x18x18xf32, #tpu.memory_space<vmem>>, vector<1x16x16xf32>
    %1346 = vector.shape_cast %1345 : vector<1x16x16xf32> to vector<16x16xf32>
    %c35_420 = arith.constant 35 : index
    %1347 = memref.load %arg5[%c35_420] : memref<144xf32, #tpu.memory_space<smem>>
    %1348 = vector.broadcast %1347 : f32 to vector<16x16xf32>
    %1349 = arith.mulf %1348, %1346 : vector<16x16xf32>
    %1350 = arith.addf %1332, %1349 : vector<16x16xf32>
    %c71_421 = arith.constant 71 : index
    %1351 = memref.load %arg5[%c71_421] : memref<144xf32, #tpu.memory_space<smem>>
    %1352 = vector.broadcast %1351 : f32 to vector<16x16xf32>
    %1353 = arith.mulf %1352, %1346 : vector<16x16xf32>
    %1354 = arith.addf %1336, %1353 : vector<16x16xf32>
    %c107_422 = arith.constant 107 : index
    %1355 = memref.load %arg5[%c107_422] : memref<144xf32, #tpu.memory_space<smem>>
    %1356 = vector.broadcast %1355 : f32 to vector<16x16xf32>
    %1357 = arith.mulf %1356, %1346 : vector<16x16xf32>
    %1358 = arith.addf %1340, %1357 : vector<16x16xf32>
    %c143_423 = arith.constant 143 : index
    %1359 = memref.load %arg5[%c143_423] : memref<144xf32, #tpu.memory_space<smem>>
    %1360 = vector.broadcast %1359 : f32 to vector<16x16xf32>
    %1361 = arith.mulf %1360, %1346 : vector<16x16xf32>
    %1362 = arith.addf %1344, %1361 : vector<16x16xf32>
    %c0_424 = arith.constant 0 : index
    %1363 = memref.load %arg6[%c0_424] : memref<4xf32, #tpu.memory_space<smem>>
    %1364 = vector.broadcast %1363 : f32 to vector<16x16xf32>
    %1365 = arith.mulf %1350, %1364 : vector<16x16xf32>
    %c0_425 = arith.constant 0 : index
    %1366 = memref.load %arg7[%c0_425] : memref<4xf32, #tpu.memory_space<smem>>
    %1367 = vector.broadcast %1366 : f32 to vector<16x16xf32>
    %1368 = arith.addf %1365, %1367 : vector<16x16xf32>
    %cst_426 = arith.constant 0.000000e+00 : f32
    %1369 = vector.broadcast %cst_426 : f32 to vector<16x16xf32>
    %1370 = arith.maximumf %1368, %1369 : vector<16x16xf32>
    %c1_427 = arith.constant 1 : index
    %1371 = memref.load %arg6[%c1_427] : memref<4xf32, #tpu.memory_space<smem>>
    %1372 = vector.broadcast %1371 : f32 to vector<16x16xf32>
    %1373 = arith.mulf %1354, %1372 : vector<16x16xf32>
    %c1_428 = arith.constant 1 : index
    %1374 = memref.load %arg7[%c1_428] : memref<4xf32, #tpu.memory_space<smem>>
    %1375 = vector.broadcast %1374 : f32 to vector<16x16xf32>
    %1376 = arith.addf %1373, %1375 : vector<16x16xf32>
    %cst_429 = arith.constant 0.000000e+00 : f32
    %1377 = vector.broadcast %cst_429 : f32 to vector<16x16xf32>
    %1378 = arith.maximumf %1376, %1377 : vector<16x16xf32>
    %c2_430 = arith.constant 2 : index
    %1379 = memref.load %arg6[%c2_430] : memref<4xf32, #tpu.memory_space<smem>>
    %1380 = vector.broadcast %1379 : f32 to vector<16x16xf32>
    %1381 = arith.mulf %1358, %1380 : vector<16x16xf32>
    %c2_431 = arith.constant 2 : index
    %1382 = memref.load %arg7[%c2_431] : memref<4xf32, #tpu.memory_space<smem>>
    %1383 = vector.broadcast %1382 : f32 to vector<16x16xf32>
    %1384 = arith.addf %1381, %1383 : vector<16x16xf32>
    %cst_432 = arith.constant 0.000000e+00 : f32
    %1385 = vector.broadcast %cst_432 : f32 to vector<16x16xf32>
    %1386 = arith.maximumf %1384, %1385 : vector<16x16xf32>
    %c3_433 = arith.constant 3 : index
    %1387 = memref.load %arg6[%c3_433] : memref<4xf32, #tpu.memory_space<smem>>
    %1388 = vector.broadcast %1387 : f32 to vector<16x16xf32>
    %1389 = arith.mulf %1362, %1388 : vector<16x16xf32>
    %c3_434 = arith.constant 3 : index
    %1390 = memref.load %arg7[%c3_434] : memref<4xf32, #tpu.memory_space<smem>>
    %1391 = vector.broadcast %1390 : f32 to vector<16x16xf32>
    %1392 = arith.addf %1389, %1391 : vector<16x16xf32>
    %cst_435 = arith.constant 0.000000e+00 : f32
    %1393 = vector.broadcast %cst_435 : f32 to vector<16x16xf32>
    %1394 = arith.maximumf %1392, %1393 : vector<16x16xf32>
    %1395 = vector.shape_cast %1370 : vector<16x16xf32> to vector<1x16x16xf32>
    %1396 = vector.shape_cast %1378 : vector<16x16xf32> to vector<1x16x16xf32>
    %1397 = vector.shape_cast %1386 : vector<16x16xf32> to vector<1x16x16xf32>
    %1398 = vector.shape_cast %1394 : vector<16x16xf32> to vector<1x16x16xf32>
    %1399 = tpu.concatenate %1395, %1396, %1397, %1398 in 0 : vector<1x16x16xf32>, vector<1x16x16xf32>, vector<1x16x16xf32>, vector<1x16x16xf32> -> vector<4x16x16xf32>
    %1400 = vector.shape_cast %1399 : vector<4x16x16xf32> to vector<1x4x16x16xf32>
    %c0_436 = arith.constant 0 : index
    %c0_437 = arith.constant 0 : index
    %c0_438 = arith.constant 0 : index
    %c0_439 = arith.constant 0 : index
    %1401 = vector.load %arg8[%c0_436, %c0_437, %c0_438, %c0_439] : memref<1x4x16x16xf32, #tpu.memory_space<vmem>>, vector<1x4x16x16xf32>
    tpu.vector_store %arg8[%c0_436, %c0_437, %c0_438, %c0_439], %1400 {strides = array<i32>} : memref<1x4x16x16xf32, #tpu.memory_space<vmem>>, vector<1x4x16x16xf32>,
    return
  }
  func.func @transform_0(%arg0: i32) -> (i32, i32, i32, i32) {
    %c0_i32 = arith.constant 0 : i32
    %c0_i32_0 = arith.constant 0 : i32
    %c0_i32_1 = arith.constant 0 : i32
    %c0_i32_2 = arith.constant 0 : i32
    return %arg0, %c0_i32, %c0_i32_0, %c0_i32_1 : i32, i32, i32, i32
  }
  func.func @transform_1(%arg0: i32) -> i32 {
    %c0_i32 = arith.constant 0 : i32
    %c0_i32_0 = arith.constant 0 : i32
    return %c0_i32 : i32
  }
  func.func @transform_2(%arg0: i32) -> i32 {
    %c0_i32 = arith.constant 0 : i32
    %c0_i32_0 = arith.constant 0 : i32
    return %c0_i32 : i32
  }
  func.func @transform_3(%arg0: i32) -> i32 {
    %c0_i32 = arith.constant 0 : i32
    %c0_i32_0 = arith.constant 0 : i32
    return %c0_i32 : i32
  }
  func.func @transform_4(%arg0: i32) -> i32 {
    %c0_i32 = arith.constant 0 : i32
    %c0_i32_0 = arith.constant 0 : i32
    return %c0_i32 : i32
  }
  func.func @transform_5(%arg0: i32) -> i32 {
    %c0_i32 = arith.constant 0 : i32
    %c0_i32_0 = arith.constant 0 : i32
    return %c0_i32 : i32
  }
  func.func @transform_6(%arg0: i32) -> i32 {
    %c0_i32 = arith.constant 0 : i32
    %c0_i32_0 = arith.constant 0 : i32
    return %c0_i32 : i32
  }
  func.func @transform_7(%arg0: i32) -> (i32, i32, i32, i32) {
    %c0_i32 = arith.constant 0 : i32
    %c0_i32_0 = arith.constant 0 : i32
    %c0_i32_1 = arith.constant 0 : i32
    %c0_i32_2 = arith.constant 0 : i32
    return %arg0, %c0_i32, %c0_i32_0, %c0_i32_1 : i32, i32, i32, i32
  }
}

</mosaic_0001>

<bundles_post_ra>
// kernel: tpu_custom_call.1
= control target key start
LH: loop header
LB: loop body
LE: loop exit
PB: predicated region body
PF: predicated region fallthrough
CT: control target
= control target key end

     0   :  { %12 = vsyncpa [#allocation5], 0  ;;  %s8716_s0 = inlined_call_operand.vmem [shape: f32[2,4,20,20], index: 0, kind: input, shape index: {}]   ;;  %s8717_s1 = inlined_call_operand.vmem [shape: f32[144], index: 1, kind: input, shape index: {}]   ;;  %s8718_s2 = inlined_call_operand.vmem [shape: f32[4], index: 2, kind: input, shape index: {}]   ;;  %s8719_s3 = inlined_call_operand.vmem [shape: f32[4], index: 3, kind: input, shape index: {}]   ;;  %s8720_s4 = inlined_call_operand.vmem [shape: f32[144], index: 4, kind: input, shape index: {}]   ;;  %s8721_s5 = inlined_call_operand.vmem [shape: f32[4], index: 5, kind: input, shape index: {}]   ;;  %s8722_s6 = inlined_call_operand.vmem [shape: f32[4], index: 6, kind: input, shape index: {}]   ;;  %s8723_s7 = inlined_call_operand.hbm [shape: f32[2,4,16,16], index: 7, kind: output, shape index: {}]  }
   0x1   :  { %13 = vsyncpa [#allocation7], 0 }
   0x2   :  { %14 = vsyncpa [#allocation10], 0 }
   0x3   :  { %15 = vsyncpa [#allocation13], 0 }
   0x4   :  { %16 = vsyncpa [#allocation4], 0 }
   0x5   :  { %18 = vsyncpa [#allocation4 + $0x1], 0  ;;  %s5344_s24 = smov 0   ;;  %s5346_s25 = smov 0  }
   0x6   :  { %s5348_s26 = smov 0   ;;  %s5350_s27 = smov 0  }
   0x7 LB: > { %s5365_s28 = sadd.s32 4294967295, %s5291_s27   ;;  %s4642_s29 = sadd.s32 4294967294, %s5291_s27   ;;  %s5291_s27 = sphi %s5350_s27, %s9227_s27   ;;  %s5287_s26 = sphi %s5348_s26, %s9226_s26   ;;  %s5283_s25 = sphi %s5346_s25, %s9225_s25   ;;  %s5279_s24 = sphi %s5344_s24, %s9224_s24  }
   0x8   : > { %s5369_s30 = sadd.s32 1, %s5291_s27   ;;  %s183_s8 = sadd.s32 1, %s5287_s26 }
   0x9   : > { %s180_s9 = ssub.s32 %s5291_s27, %s5369_s30  ;;  %p193_p0 = scmp.ne.s32.totalorder %s5287_s26, %s5283_s25 }
   0xa   : > { %p181_p1 = scmp.eq.s32.totalorder %s180_s9, 0  ;;  %p194_p2 = scmp.eq.s32.totalorder %s5365_s28, 1 }
   0xb   : > { %p199_p3 = scmp.ne.s32.totalorder %s5283_s25, %s5279_s24  ;;  %p200_p4 = scmp.eq.s32.totalorder %s4642_s29, 1 }
   0xc   : > { %s5380_s10 = scalar_select %p181_p1, %s5287_s26, %s183_s8  }
   0xd   : > { %p5382_p5 = por %p194_p2, %p193_p0  ;;  %p5386_p6 = por %p200_p4, %p199_p3 }
   0xe   : > { %p4643_p7 = scmp.ge.s32.totalorder %s5291_s27, 1  ;;  %p207_p8 = scmp.lt.s32.totalorder %s5291_s27, 3 }
   0xf   : > { %s8728_s11 = scalar_select %p5382_p5, 1, 0 }
  0x10   : > { %s8729_s12 = scalar_select %p5386_p6, 1, 0 }
  0x11   : > { %p8724_p9 = scmp.eq.s32.totalorder %s5365_s28, 0  ;;  %p5393_p10 = pnand %p4643_p7, %p207_p8 }
  0x12   : > { %s231_s16 = sshll.u32 %s8718_s2, 4  ;;  %s253_s19 = sshll.u32 %s8720_s4, 4  ;;  %s232_s16 = int_to_ptr.vmem [resolvable:$true] %s231_s16  ;;  %s254_s19 = int_to_ptr.vmem [resolvable:$true] %s253_s19 }
  0x13   : > { %s8730_s13 = scalar_select %p5393_p10, 1, 0 }
  0x14   : > { %p5018_p11 = pneg %p5393_p10  ;;  %s220_s23 = sshll.u32 %s8717_s1, 4  ;;  %s5414_s23 = int_to_ptr.vmem [resolvable:$true] %s220_s23 }
  0x15   : > { %s242_s9 = sshll.u32 %s8719_s3, 4  ;;  %s5125_s14 = scalar_lea.vmem %s232_s16, 16  ;;  %s243_s9 = int_to_ptr.vmem [resolvable:$true] %s242_s9 }
  0x16   : > { %p5407_p12 = pnand %p8724_p9, %p5018_p11  ;;  %p5126_p13 = scmp.ne.s32.totalorder %s232_s16, %s5125_s14 }
  0x17   : > { %p5133_p3 = scmp.lt.s32.totalorder %s232_s16, %s232_s16  ;;  %p5134_p4 = scmp.lt.s32.totalorder %s5125_s14, %s5125_s14 }
  0x18   : > { %p5421_p0 = pneg %p5407_p12 }
  0x19   : > { %p5135_p7 = por %p5134_p4, %p5133_p3 }
  0x1a   : > { %p5128_p1 = pnand %p5421_p0, %p5126_p13 }
  0x1c   : > { %p5129_p2 = pneg %p5128_p1 }
  0x1e   : > { %p5136_p8 = pnand %p5135_p7, %p5129_p2 }
  0x20   : > { %5139 = shalt.err (!%p5136_p8)
}
  0x21   : > { %s5293_s17 = smov [#allocation6]   ;;  %s5140_s18 = scalar_lea.vmem %s254_s19, 32 }
  0x22   : > { %5024 = dma.vmem_to_smem (!%p5407_p12), %s232_s16, 16, %s5293_s17, [#allocation7]  }
  0x23   : > { %p5141_p11 = scmp.ne.s32.totalorder %s254_s19, %s5140_s18  ;;  %p5148_p5 = scmp.lt.s32.totalorder %s254_s19, %s254_s19 }
  0x24   : > { %p5149_p10 = scmp.lt.s32.totalorder %s5140_s18, %s5140_s18 }
  0x25   : > { %p5143_p9 = pnand %p5141_p11, %p5421_p0 }
  0x26   : > { %p5150_p13 = por %p5149_p10, %p5148_p5 }
  0x27   : > { %p5144_p6 = pneg %p5143_p9 }
  0x29   : > { %p5151_p1 = pnand %p5150_p13, %p5144_p6 }
  0x2b   : > { %5154 = shalt.err (!%p5151_p1)
}
  0x2c   : > { %s5294_s21 = smov [#allocation9]   ;;  %s5155_s22 = scalar_lea.vmem %s5414_s23, 32 }
  0x2d   : > { %5030 = dma.vmem_to_smem (!%p5407_p12), %s254_s19, 32, %s5294_s21, [#allocation10]  }
  0x2e   : > { %p5156_p2 = scmp.ne.s32.totalorder %s5414_s23, %s5155_s22  ;;  %p5163_p9 = scmp.lt.s32.totalorder %s5414_s23, %s5414_s23 }
  0x2f   : > { %p5164_p7 = scmp.lt.s32.totalorder %s5155_s22, %s5155_s22 }
  0x30   : > { %p5158_p3 = pnand %p5156_p2, %p5421_p0 }
  0x31   : > { %p5165_p8 = por %p5164_p7, %p5163_p9 }
  0x32   : > { %p5159_p4 = pneg %p5158_p3 }
  0x34   : > { %p5166_p5 = pnand %p5165_p8, %p5159_p4 }
  0x36   : > { %5169 = shalt.err (!%p5166_p5)
}
  0x37   : > { %s5295_s16 = smov [#allocation3]   ;;  %s5170_s19 = scalar_lea.vmem %s243_s9, 16 }
  0x38   : > { %5021 = dma.vmem_to_smem (!%p5407_p12), %s5414_s23, 32, %s5295_s16, [#allocation5]  }
  0x39   : > { %p5171_p6 = scmp.ne.s32.totalorder %s243_s9, %s5170_s19  ;;  %p5178_p13 = scmp.lt.s32.totalorder %s243_s9, %s243_s9 }
  0x3a   : > { %p5179_p1 = scmp.lt.s32.totalorder %s5170_s19, %s5170_s19 }
  0x3b   : > { %p5173_p10 = pnand %p5171_p6, %p5421_p0 }
  0x3c   : > { %p5180_p2 = por %p5179_p1, %p5178_p13 }
  0x3d   : > { %p5174_p11 = pneg %p5173_p10 }
  0x3f   : > { %p5181_p3 = pnand %p5180_p2, %p5174_p11 }
  0x41   : > { %5184 = shalt.err (!%p5181_p3)
}
  0x42   : > { %s5296_s14 = smov [#allocation8]   ;;  %s264_s18 = sshll.u32 %s8721_s5, 4  ;;  %s265_s18 = int_to_ptr.vmem [resolvable:$true] %s264_s18 }
  0x43   : > { %5027 = dma.vmem_to_smem (!%p5407_p12), %s243_s9, 16, %s5296_s14, [#allocation7]  }
  0x44   : > { %s275_s16 = sshll.u32 %s8722_s6, 4  ;;  %s5185_s29 = scalar_lea.vmem %s265_s18, 16  ;;  %s276_s16 = int_to_ptr.vmem [resolvable:$true] %s275_s16 }
  0x45   : > { %p5186_p4 = scmp.ne.s32.totalorder %s265_s18, %s5185_s29  ;;  %p5193_p8 = scmp.lt.s32.totalorder %s265_s18, %s265_s18 }
  0x46   : > { %p5194_p5 = scmp.lt.s32.totalorder %s5185_s29, %s5185_s29 }
  0x47   : > { %p5188_p9 = pnand %p5186_p4, %p5421_p0 }
  0x48   : > { %p5195_p6 = por %p5194_p5, %p5193_p8 }
  0x49   : > { %p5189_p7 = pneg %p5188_p9 }
  0x4b   : > { %p5196_p10 = pnand %p5195_p6, %p5189_p7 }
  0x4d   : > { %5199 = shalt.err (!%p5196_p10)
}
  0x4e   : > { %s5297_s9 = smov [#allocation11]   ;;  %s5200_s8 = scalar_lea.vmem %s276_s16, 16 }
  0x4f   : > { %5033 = dma.vmem_to_smem (!%p5407_p12), %s265_s18, 16, %s5297_s9, [#allocation10]  }
  0x50   : > { %p5201_p11 = scmp.ne.s32.totalorder %s276_s16, %s5200_s8  ;;  %p5208_p2 = scmp.lt.s32.totalorder %s276_s16, %s276_s16 }
  0x51   : > { %p5209_p3 = scmp.lt.s32.totalorder %s5200_s8, %s5200_s8 }
  0x52   : > { %p5203_p13 = pnand %p5201_p11, %p5421_p0 }
  0x53   : > { %p5210_p4 = por %p5209_p3, %p5208_p2 }
  0x54   : > { %p5204_p1 = pneg %p5203_p13 }
  0x56   : > { %p5211_p9 = pnand %p5210_p4, %p5204_p1 }
  0x58   : > { %5214 = shalt.err (!%p5211_p9)
}
  0x59   : > { %s5298_s19 = smov [#allocation12]   ;;  %p8733_p7 = scmp.ne.s32.totalorder %s8730_s13, 0 }
  0x5a   : > { %5036 = dma.vmem_to_smem (!%p5407_p12), %s276_s16, 16, %s5298_s19, [#allocation13]  }
  0x5b   : > { %296 = sbr.rel (%p8733_p7) target bundleno = 1327 (0x52f), region = 48 }
  0x60   : > { %p8734_p8 = scmp.eq.s32.totalorder %s5365_s28, 0 }
  0x62   : > { %5258 = dma.done.wait (%p8734_p8), [#allocation5], 32   ;;  %p8735_p5 = pmov %p8734_p8 }
  0x64   : > { %5260 = vsyncadd (%p8735_p5), [#allocation5], 4294967264  ;;  %p8736_p0 = pmov %p8735_p5 }
  0x66   : > { %5262 = dma.done.wait (%p8736_p0), [#allocation7], 32   ;;  %p8737_p6 = pmov %p8736_p0 }
  0x67   : > { %p8738_p10 = pmov %p8736_p0 }
  0x68   : > { %5264 = vsyncadd (%p8737_p6), [#allocation7], 4294967264 }
  0x69   : > { %5266 = dma.done.wait (%p8738_p10), [#allocation10], 48   ;;  %p8739_p12 = pmov %p8736_p0 }
  0x6a   : > { %p8740_p11 = pmov %p8736_p0 }
  0x6b   : > { %5268 = vsyncadd (%p8739_p12), [#allocation10], 4294967248 }
  0x6c   : > { %5270 = dma.done.wait (%p8740_p11), [#allocation13], 16   ;;  %p8741_p13 = pmov %p8736_p0 }
  0x6e   : > { %5272 = vsyncadd (%p8741_p13), [#allocation13], 4294967280 }
  0x6f   : > { %322 = sfence }
  0x70   : > { %p349_p1 = scmp.lt.s32.totalorder %s5365_s28, 1  ;;  %s4663_s13 = sld [smem:[#allocation3 + $0x1]]  ;;  %vm2784_vm4 = vcmask 146432   ;;  %vm2787_vm6 = vcmask 140288   ;;  %vm4497_vm11 = vcmask 130048  }
  0x71   : > { %s4664_s20 = sld [smem:[#allocation3 + $0x25]]  ;;  %s5299_s22 = smov 127  }
  0x72   : > { %s350_s15 = scalar_select %p349_p1, %s5365_s28, 1 }
  0x73   : > { %s4665_s21 = sld [smem:[#allocation3 + $0x49]]  ;;  %s5300_s19 = smov 126  }
  0x74   : > { %s4991_s14 = smul.u32 96, %s350_s15  ;;  %s4666_s16 = sld [smem:[#allocation3 + $0x6d]] }
  0x75   : > { %s4667_s29 = sld [smem:[#allocation3 + $0x2]]  ;;  %p9222_p3 = scmp.ne.s32.totalorder %s8728_s11, 0 }
  0x76   : > { %s5487_s18 = scalar_lea.vmem %s8716_s0, %s4991_s14  ;;  %v390_v0 = vstv %s4663_s13  ;;  %s4668_s9 = sld [smem:[#allocation3 + $0x26]] }
  0x77   : > { %v5490_v1 = vld [vmem:[%s5487_s18 + $0x10] sm:$0x3]  ;;  %v5493_v2 = vld [vmem:[%s5487_s18] sm:$0xff]  ;;  %v410_v3 = vstv %s4664_s20  ;;  %v5496_v4 = vld [vmem:[%s5487_s18 + $0x8] sm:$0xff]  ;;  %s4669_s8 = sld [smem:[#allocation3 + $0x4a]] }
  0x78   : > { %v393_v5 = vmul.f32 %v390_v0, %v5490_v1  ;;  %v391_v6 = vmul.f32 %v390_v0, %v5493_v2  ;;  %v411_v7 = vmul.f32 %v410_v3, %v5493_v2  ;;  %v392_v8 = vmul.f32 %v390_v0, %v5496_v4  ;;  %s4670_s13 = sld [smem:[#allocation3 + $0x6e]]  ;;  %v5545_v35 = vld [vmem:[%s5487_s18 + $0x9] sm:$0xff]  ;;  %v5548_v37 = vld [vmem:[%s5487_s18 + $0x1] sm:$0xff]  ;;  %v5555_v41 = vld [vmem:[%s5487_s18 + $0x11] sm:$0x3] }
  0x79   : > { %v413_v9 = vmul.f32 %v410_v3, %v5490_v1  ;;  %v412_v10 = vmul.f32 %v410_v3, %v5496_v4  ;;  %v430_v11 = vstv %s4665_s21  ;;  %s4675_s20 = sld [smem:[#allocation3 + $0x4]] }
  0x7a   : > { %401 = vrot.lane.b32.xlu1 %v393_v5, %s5299_s22  ;;  %397 = vrot.lane.b32.xlu0 %v391_v6, %s5299_s22  ;;  %v432_v12 = vmul.f32 %v430_v11, %v5496_v4  ;;  %v431_v13 = vmul.f32 %v430_v11, %v5493_v2  ;;  %v450_v14 = vstv %s4666_s16  ;;  %v433_v16 = vmul.f32 %v430_v11, %v5490_v1  ;;  %s4676_s15 = sld [smem:[#allocation3 + $0x28]]  ;;  %v5605_v11 = vld [vmem:[%s5487_s18 + $0x2] sm:$0xff] }
  0x7b   : > { %v451_v15 = vmul.f32 %v450_v14, %v5493_v2  ;;  %v453_v17 = vmul.f32 %v450_v14, %v5490_v1  ;;  %v452_v18 = vmul.f32 %v450_v14, %v5496_v4  ;;  %v470_v19 = vstv %s4667_s29  ;;  %s4677_s14 = sld [smem:[#allocation3 + $0x4c]] }
  0x7c   : > { %v472_v20 = vmul.f32 %v470_v19, %v5496_v4  ;;  %v471_v21 = vmul.f32 %v470_v19, %v5493_v2  ;;  %v490_v22 = vstv %s4668_s9  ;;  %v473_v24 = vmul.f32 %v470_v19, %v5490_v1  ;;  %s4678_s23 = sld [smem:[#allocation3 + $0x70]] }
  0x7d   : > { %v491_v23 = vmul.f32 %v490_v22, %v5493_v2  ;;  %v493_v25 = vmul.f32 %v490_v22, %v5490_v1  ;;  %v492_v26 = vmul.f32 %v490_v22, %v5496_v4  ;;  %v510_v27 = vstv %s4669_s8  ;;  %s4679_s17 = sld [smem:[#allocation3 + $0x5]] }
  0x7e   : > { %417 = vrot.lane.b32.xlu1 %v411_v7, %s5299_s22  ;;  %399 = vrot.lane.b32.xlu0 %v392_v8, %s5299_s22  ;;  %v512_v28 = vmul.f32 %v510_v27, %v5496_v4  ;;  %v511_v29 = vmul.f32 %v510_v27, %v5493_v2  ;;  %v530_v30 = vstv %s4670_s13  ;;  %v513_v32 = vmul.f32 %v510_v27, %v5490_v1  ;;  %s4680_s21 = sld [smem:[#allocation3 + $0x29]] }
  0x7f   : > { %v531_v31 = vmul.f32 %v530_v30, %v5493_v2  ;;  %v533_v33 = vmul.f32 %v530_v30, %v5490_v1  ;;  %v532_v34 = vmul.f32 %v530_v30, %v5496_v4  ;;  %v585_v36 = vstv %s4675_s20  ;;  %s4681_s16 = sld [smem:[#allocation3 + $0x4d]] }
  0x80   : > { %v587_v38 = vmul.f32 %v585_v36, %v5545_v35  ;;  %v586_v39 = vmul.f32 %v585_v36, %v5548_v37  ;;  %v605_v40 = vstv %s4676_s15  ;;  %v588_v43 = vmul.f32 %v585_v36, %v5555_v41  ;;  %s4682_s29 = sld [smem:[#allocation3 + $0x71]] }
  0x81   : > { %v606_v42 = vmul.f32 %v605_v40, %v5548_v37  ;;  %v608_v44 = vmul.f32 %v605_v40, %v5555_v41  ;;  %v607_v45 = vmul.f32 %v605_v40, %v5545_v35  ;;  %v625_v46 = vstv %s4677_s14  ;;  %s4687_s9 = sld [smem:[#allocation3 + $0x7]] }
  0x82   : > { %421 = vrot.lane.b32.xlu1 %v413_v9, %s5299_s22  ;;  %419 = vrot.lane.b32.xlu0 %v412_v10, %s5299_s22  ;;  %v627_v47 = vmul.f32 %v625_v46, %v5545_v35  ;;  %v626_v48 = vmul.f32 %v625_v46, %v5548_v37  ;;  %v645_v49 = vstv %s4678_s23  ;;  %v628_v51 = vmul.f32 %v625_v46, %v5555_v41  ;;  %s4688_s8 = sld [smem:[#allocation3 + $0x2b]]  ;;  %v5602_v9 = vld [vmem:[%s5487_s18 + $0xa] sm:$0xff] }
  0x83   : > { %v646_v50 = vmul.f32 %v645_v49, %v5548_v37  ;;  %v648_v52 = vmul.f32 %v645_v49, %v5555_v41  ;;  %v647_v53 = vmul.f32 %v645_v49, %v5545_v35  ;;  %v665_v54 = vstv %s4679_s17  ;;  %s4689_s13 = sld [smem:[#allocation3 + $0x4f]] }
  0x84   : > { %v667_v55 = vmul.f32 %v665_v54, %v5545_v35  ;;  %v666_v56 = vmul.f32 %v665_v54, %v5548_v37  ;;  %v685_v57 = vstv %s4680_s21  ;;  %v668_v59 = vmul.f32 %v665_v54, %v5555_v41  ;;  %s4690_s20 = sld [smem:[#allocation3 + $0x73]] }
  0x85   : > { %v686_v58 = vmul.f32 %v685_v57, %v5548_v37  ;;  %v688_v60 = vmul.f32 %v685_v57, %v5555_v41  ;;  %v687_v61 = vmul.f32 %v685_v57, %v5545_v35  ;;  %v705_v62 = vstv %s4681_s16  ;;  %s4691_s15 = sld [smem:[#allocation3 + $0x8]] }
  0x86   : > { %439 = vrot.lane.b32.xlu1 %v432_v12, %s5299_s22  ;;  %437 = vrot.lane.b32.xlu0 %v431_v13, %s5299_s22  ;;  %v707_v63 = vmul.f32 %v705_v62, %v5545_v35  ;;  %v706_v0 = vmul.f32 %v705_v62, %v5548_v37  ;;  %v725_v3 = vstv %s4682_s29  ;;  %v708_v6 = vmul.f32 %v705_v62, %v5555_v41  ;;  %s4692_s14 = sld [smem:[#allocation3 + $0x2c]] }
  0x87   : > { %v726_v5 = vmul.f32 %v725_v3, %v5548_v37  ;;  %v728_v7 = vmul.f32 %v725_v3, %v5555_v41  ;;  %v727_v8 = vmul.f32 %v725_v3, %v5545_v35  ;;  %v780_v10 = vstv %s4687_s9  ;;  %s4693_s23 = sld [smem:[#allocation3 + $0x50]] }
  0x88   : > { %v782_v12 = vmul.f32 %v780_v10, %v5602_v9  ;;  %v781_v13 = vmul.f32 %v780_v10, %v5605_v11  ;;  %v800_v14 = vstv %s4688_s8  ;;  %s4694_s17 = sld [smem:[#allocation3 + $0x74]] }
  0x89   : > { %v802_v19 = vmul.f32 %v800_v14, %v5602_v9  ;;  %s357_s21 = sld [smem:[#allocation3]] }
  0x8a   : > { %457 = vrot.lane.b32.xlu1 %v451_v15, %s5299_s22  ;;  %441 = vrot.lane.b32.xlu0 %v433_v16, %s5299_s22  ;;  %v5612_v15 = vld [vmem:[%s5487_s18 + $0x12] sm:$0x3]  ;;  %v801_v16 = vmul.f32 %v800_v14, %v5605_v11  ;;  %s4660_s16 = sld [smem:[#allocation3 + $0x24]] }
  0x8b   : > { %s4671_s29 = sld [smem:[#allocation3 + $0x3]] }
  0x8c   : > { %s4702_s9 = sld [smem:[#allocation3 + $0xa]] }
  0x8d   : > { %s5662_s8 = sld [smem:[#allocation3 + $0x27]] }
  0x8e   : > { %461 = vrot.lane.b32.xlu1 %v453_v17, %s5299_s22  ;;  %459 = vrot.lane.b32.xlu0 %v452_v18, %s5299_s22  ;;  %v783_v17 = vmul.f32 %v780_v10, %v5612_v15  ;;  %v803_v18 = vmul.f32 %v800_v14, %v5612_v15 }
  0x90   : > { %v366_v54 = vstv %s4660_s16  ;;  %s4706_s16 = sld [smem:[#allocation3 + $0xb]] }
  0x92   : > { %479 = vrot.lane.b32.xlu1 %v472_v20, %s5300_s19  ;;  %477 = vrot.lane.b32.xlu0 %v471_v21, %s5300_s19  ;;  %v820_v20 = vstv %s4689_s13  ;;  %s5668_s13 = sld [smem:[#allocation3 + $0x48]] }
  0x93   : > { %v822_v21 = vmul.f32 %v820_v20, %v5602_v9  ;;  %v821_v22 = vmul.f32 %v820_v20, %v5605_v11  ;;  %v561_v14 = vstv %s5662_s8  ;;  %s4709_s8 = sld [smem:[#allocation3 + $0x77]] }
  0x96   : > { %497 = vrot.lane.b32.xlu1 %v491_v23, %s5300_s19  ;;  %481 = vrot.lane.b32.xlu0 %v473_v24, %s5300_s19  ;;  %v840_v23 = vstv %s4690_s20  ;;  %s5674_s20 = sld [smem:[#allocation3 + $0x2e]] }
  0x97   : > { %v841_v24 = vmul.f32 %v840_v23, %v5605_v11  ;;  %v842_v27 = vmul.f32 %v840_v23, %v5602_v9 }
  0x9a   : > { %501 = vrot.lane.b32.xlu1 %v493_v25, %s5300_s19  ;;  %499 = vrot.lane.b32.xlu0 %v492_v26, %s5300_s19  ;;  %v823_v25 = vmul.f32 %v820_v20, %v5612_v15  ;;  %v843_v26 = vmul.f32 %v840_v23, %v5612_v15 }
  0x9c   : > { %v996_v23 = vstv %s5674_s20  ;;  %s4717_s20 = sld [smem:[#allocation3 + $0xd]] }
  0x9e   : > { %519 = vrot.lane.b32.xlu1 %v512_v28, %s5300_s19  ;;  %517 = vrot.lane.b32.xlu0 %v511_v29, %s5300_s19  ;;  %v860_v28 = vstv %s4691_s15  ;;  %s5684_s15 = sld [smem:[#allocation3 + $0x6c]] }
  0xa2   : > { %537 = vrot.lane.b32.xlu1 %v531_v31, %s5300_s19  ;;  %521 = vrot.lane.b32.xlu0 %v513_v32, %s5300_s19  ;;  %v862_v31 = vmul.f32 %v860_v28, %v5602_v9  ;;  %v861_v32 = vmul.f32 %v860_v28, %v5605_v11 }
  0xa6   : > { %541 = vrot.lane.b32.xlu1 %v533_v33, %s5300_s19  ;;  %539 = vrot.lane.b32.xlu0 %v532_v34, %s5300_s19  ;;  %v880_v33 = vstv %s4692_s14  ;;  %s5694_s14 = sld [smem:[#allocation3 + $0x4b]] }
  0xaa   : > { %594 = vrot.lane.b32.xlu1 %v587_v38, %s5299_s22  ;;  %592 = vrot.lane.b32.xlu0 %v586_v39, %s5299_s22  ;;  %v881_v38 = vmul.f32 %v880_v33, %v5605_v11  ;;  %v863_v39 = vmul.f32 %v860_v28, %v5612_v15 }
  0xae   : > { %612 = vrot.lane.b32.xlu1 %v606_v42, %s5299_s22  ;;  %596 = vrot.lane.b32.xlu0 %v588_v43, %s5299_s22  ;;  %v883_v43 = vmul.f32 %v880_v33, %v5612_v15 }
  0xb2   : > { %616 = vrot.lane.b32.xlu1 %v608_v44, %s5299_s22  ;;  %614 = vrot.lane.b32.xlu0 %v607_v45, %s5299_s22  ;;  %v882_v44 = vmul.f32 %v880_v33, %v5602_v9  ;;  %v900_v45 = vstv %s4693_s23  ;;  %s5705_s23 = sld [smem:[#allocation3 + $0x52]] }
  0xb3   : > { %v901_v49 = vmul.f32 %v900_v45, %v5605_v11 }
  0xb6   : > { %634 = vrot.lane.b32.xlu1 %v627_v47, %s5299_s22  ;;  %632 = vrot.lane.b32.xlu0 %v626_v48, %s5299_s22  ;;  %v902_v48 = vmul.f32 %v900_v45, %v5602_v9 }
  0xba   : > { %652 = vrot.lane.b32.xlu1 %v646_v50, %s5299_s22  ;;  %636 = vrot.lane.b32.xlu0 %v628_v51, %s5299_s22  ;;  %v920_v50 = vstv %s4694_s17  ;;  %v358_v51 = vstv %s357_s21  ;;  %s5716_s17 = sld [smem:[#allocation3 + $0x6f]] }
  0xbb   : > { %v359_v57 = vmul.f32 %v358_v51, %v5493_v2  ;;  %v361_v62 = vmul.f32 %v358_v51, %v5490_v1  ;;  %v922_v3 = vmul.f32 %v920_v50, %v5602_v9  ;;  %v368_v9 = vmul.f32 %v366_v54, %v5496_v4  ;;  %s5731_s21 = sld [smem:[#allocation3 + $0x76]] }
  0xbe   : > { %656 = vrot.lane.b32.xlu1 %v648_v52, %s5299_s22  ;;  %654 = vrot.lane.b32.xlu0 %v647_v53, %s5299_s22 }
  0xc2   : > { %674 = vrot.lane.b32.xlu1 %v667_v55, %s5300_s19  ;;  %672 = vrot.lane.b32.xlu0 %v666_v56, %s5300_s19  ;;  %v921_v55 = vmul.f32 %v920_v50, %v5605_v11  ;;  %v903_v56 = vmul.f32 %v900_v45, %v5612_v15 }
  0xc6   : > { %692 = vrot.lane.b32.xlu1 %v686_v58, %s5300_s19  ;;  %676 = vrot.lane.b32.xlu0 %v668_v59, %s5300_s19  ;;  %v360_v58 = vmul.f32 %v358_v51, %v5496_v4  ;;  %v553_v59 = vstv %s4671_s29  ;;  %s4707_s29 = sld [smem:[#allocation3 + $0x2f]] }
  0xca   : > { %696 = vrot.lane.b32.xlu1 %v688_v60, %s5300_s19  ;;  %694 = vrot.lane.b32.xlu0 %v687_v61, %s5300_s19 }
  0xce   : > { %714 = vrot.lane.b32.xlu1 %v707_v63, %s5300_s19  ;;  %712 = vrot.lane.b32.xlu0 %v706_v0, %s5300_s19  ;;  %v367_v63 = vmul.f32 %v366_v54, %v5493_v2  ;;  %v923_v0 = vmul.f32 %v920_v50, %v5612_v15  ;;  %v369_v15 = vmul.f32 %v366_v54, %v5490_v1 }
  0xd2   : > { %732 = vrot.lane.b32.xlu1 %v726_v5, %s5300_s19  ;;  %716 = vrot.lane.b32.xlu0 %v708_v6, %s5300_s19  ;;  %v5691_v5 = vld [vmem:[%s5487_s18 + $0x20] sm:$0xff]  ;;  %v976_v6 = vstv %s4702_s9  ;;  %s4708_s9 = sld [smem:[#allocation3 + $0x53]] }
  0xd6   : > { %736 = vrot.lane.b32.xlu1 %v728_v7, %s5300_s19  ;;  %734 = vrot.lane.b32.xlu0 %v727_v8, %s5300_s19  ;;  %v555_v7 = vmul.f32 %v553_v59, %v5545_v35 }
  0xda   : > { %789 = vrot.lane.b32.xlu1 %v782_v12, %s5299_s22  ;;  %787 = vrot.lane.b32.xlu0 %v781_v13, %s5299_s22  ;;  %v5697_v12 = vld [vmem:[%s5487_s18 + $0x18] sm:$0xff]  ;;  %v554_v13 = vmul.f32 %v553_v59, %v5548_v37 }
  0xde   : > { %807 = vrot.lane.b32.xlu1 %v801_v16, %s5299_s22  ;;  %791 = vrot.lane.b32.xlu0 %v783_v17, %s5299_s22 }
  0xe2   : > { %811 = vrot.lane.b32.xlu1 %v803_v18, %s5299_s22  ;;  %809 = vrot.lane.b32.xlu0 %v802_v19, %s5299_s22  ;;  %v374_v18 = vstv %s5668_s13  ;;  %s4683_s13 = sld [smem:[#allocation3 + $0x6]] }
  0xe3   : > { %v375_v33 = vmul.f32 %v374_v18, %v5493_v2 }
  0xe6   : > { %829 = vrot.lane.b32.xlu1 %v822_v21, %s5299_s22  ;;  %827 = vrot.lane.b32.xlu0 %v821_v22, %s5299_s22  ;;  %v978_v21 = vmul.f32 %v5691_v5, %v976_v6  ;;  %v977_v22 = vmul.f32 %v5697_v12, %v976_v6 }
  0xea   : > { %847 = vrot.lane.b32.xlu1 %v841_v24, %s5299_s22  ;;  %831 = vrot.lane.b32.xlu0 %v823_v25, %s5299_s22  ;;  %v5712_v24 = vld [vmem:[%s5487_s18 + $0x28] sm:$0x3]  ;;  %v562_v25 = vmul.f32 %v561_v14, %v5548_v37 }
  0xeb   : > { %v979_v45 = vmul.f32 %v5712_v24, %v976_v6 }
  0xec   : > { %v5634_v29 = vpop.permute.xlu1 %401  ;;  %v398_v30 = vpop.permute.xlu0 %397 }
  0xed   : > { %v406_v8 = vadd.f32 %v398_v30, %v359_v57  ;;  %v377_v57 = vmul.f32 %v374_v18, %v5490_v1 }
  0xee   : > { %851 = vrot.lane.b32.xlu1 %v843_v26, %s5299_s22  ;;  %849 = vrot.lane.b32.xlu0 %v842_v27, %s5299_s22  ;;  %v556_v26 = vmul.f32 %v553_v59, %v5555_v41  ;;  %v408_v27 = vadd.f32 %v5634_v29, %v361_v62  ;;  %v997_v29 = vmul.f32 %v5697_v12, %v996_v23 }
  0xf0   : > { %v5640_v34 = vpop.permute.xlu1 %417  ;;  %v400_v36 = vpop.permute.xlu0 %399 }
  0xf1   : > { %v407_v10 = vadd.f32 %v400_v36, %v360_v58  ;;  %v426_v28 = vadd.f32 %v5640_v34, %v367_v63  ;;  %v564_v34 = vmul.f32 %v561_v14, %v5555_v41 }
  0xf2   : > { %869 = vrot.lane.b32.xlu1 %v862_v31, %s5300_s19  ;;  %867 = vrot.lane.b32.xlu0 %v861_v32, %s5300_s19  ;;  %v376_v32 = vmul.f32 %v374_v18, %v5496_v4 }
  0xf4   : > { %v5646_v40 = vpop.permute.xlu1 %421  ;;  %v5648_v42 = vpop.permute.xlu0 %419 }
  0xf5   : > { %v428_v50 = vadd.f32 %v5646_v40, %v369_v15  ;;  %v427_v51 = vadd.f32 %v5648_v42, %v368_v9  ;;  %v1016_v40 = vstv %s5705_s23  ;;  %s4685_s23 = sld [smem:[#allocation3 + $0x4e]] }
  0xf6   : > { %887 = vrot.lane.b32.xlu1 %v881_v38, %s5300_s19  ;;  %871 = vrot.lane.b32.xlu0 %v863_v39, %s5300_s19  ;;  %v382_v39 = vstv %s5684_s15  ;;  %s4684_s15 = sld [smem:[#allocation3 + $0x2a]] }
  0xf8   : > { %v5654_v46 = vpop.permute.xlu1 %439  ;;  %v5656_v47 = vpop.permute.xlu0 %437 }
  0xfa   : > { %891 = vrot.lane.b32.xlu1 %v883_v43, %s5300_s19  ;;  %889 = vrot.lane.b32.xlu0 %v882_v44, %s5300_s19 }
  0xfc   : > { %v5664_v52 = vpop.permute.xlu1 %457  ;;  %v5666_v53 = vpop.permute.xlu0 %441 }
  0xfe   : > { %909 = vrot.lane.b32.xlu1 %v902_v48, %s5300_s19  ;;  %907 = vrot.lane.b32.xlu0 %v901_v49, %s5300_s19  ;;  %v563_v48 = vmul.f32 %v561_v14, %v5545_v35  ;;  %v569_v49 = vstv %s5694_s14  ;;  %v385_v14 = vmul.f32 %v382_v39, %v5490_v1  ;;  %s4718_s14 = sld [smem:[#allocation3 + $0x31]] }
  0xff   : > { %v571_v42 = vmul.f32 %v569_v49, %v5545_v35  ;;  %v570_v6 = vmul.f32 %v569_v49, %v5548_v37 }
 0x100   : > { %v5678_v60 = vpop.permute.xlu1 %461  ;;  %v5680_v61 = vpop.permute.xlu0 %459 }
 0x102   : > { %927 = vrot.lane.b32.xlu1 %v921_v55, %s5300_s19  ;;  %911 = vrot.lane.b32.xlu0 %v903_v56, %s5300_s19  ;;  %v383_v56 = vmul.f32 %v382_v39, %v5493_v2  ;;  %v577_v2 = vstv %s5716_s17  ;;  %s4719_s17 = sld [smem:[#allocation3 + $0x55]] }
 0x104   : > { %v480_v16 = vpop.permute.xlu1 %479  ;;  %v478_v17 = vpop.permute.xlu0 %477  ;;  %v466_v1 = vadd.f32 %v5664_v52, %v383_v56  ;;  %v580_v52 = vmul.f32 %v577_v2, %v5555_v41  ;;  %v1076_v56 = vstv %s4707_s29  ;;  %s4721_s29 = sld [smem:[#allocation3 + $0xe]] }
 0x105   : > { %v487_v19 = vadd.f32 %v480_v16, %v407_v10  ;;  %v486_v20 = vadd.f32 %v478_v17, %v406_v8  ;;  %v446_v8 = vadd.f32 %v5656_v47, %v375_v33  ;;  %v384_v16 = vmul.f32 %v382_v39, %v5496_v4 }
 0x106   : > { %931 = vrot.lane.b32.xlu1 %v923_v0, %s5300_s19  ;;  %929 = vrot.lane.b32.xlu0 %v922_v3, %s5300_s19  ;;  %v999_v0 = vmul.f32 %v5712_v24, %v996_v23  ;;  %v998_v3 = vmul.f32 %v5691_v5, %v996_v23  ;;  %v1036_v47 = vstv %s5731_s21  ;;  %v468_v33 = vadd.f32 %v5678_v60, %v385_v14  ;;  %s4686_s21 = sld [smem:[#allocation3 + $0x72]] }
 0x107   : > { %v5720_v30 = vadd.f32 %v555_v7, %v487_v19  ;;  %v5722_v31 = vadd.f32 %v554_v13, %v486_v20  ;;  %v447_v7 = vadd.f32 %v5654_v46, %v376_v32  ;;  %v1018_v19 = vmul.f32 %v5691_v5, %v1016_v40 }
 0x108   : > { %v498_v36 = vpop.permute.xlu1 %497  ;;  %v482_v38 = vpop.permute.xlu0 %481  ;;  %v1017_v46 = vmul.f32 %v5697_v12, %v1016_v40  ;;  %v578_v20 = vmul.f32 %v577_v2, %v5548_v37  ;;  %v1037_v32 = vmul.f32 %v5697_v12, %v1036_v47  ;;  %v1019_v37 = vmul.f32 %v5712_v24, %v1016_v40 }
 0x109   : > { %v506_v43 = vadd.f32 %v498_v36, %v426_v28  ;;  %v488_v44 = vadd.f32 %v482_v38, %v408_v27  ;;  %v467_v36 = vadd.f32 %v5680_v61, %v384_v16  ;;  %v1056_v60 = vstv %s4706_s16  ;;  %s4720_s16 = sld [smem:[#allocation3 + $0x79]] }
 0x10a   : > { %985 = vrot.lane.b32.xlu1 %v978_v21, %s5299_s22  ;;  %983 = vrot.lane.b32.xlu0 %v977_v22, %s5299_s22  ;;  %v572_v21 = vmul.f32 %v569_v49, %v5555_v41  ;;  %v448_v22 = vadd.f32 %v5666_v53, %v377_v57  ;;  %v579_v53 = vmul.f32 %v577_v2, %v5545_v35  ;;  %v1116_v14 = vstv %s4709_s8  ;;  %s4723_s8 = sld [smem:[#allocation3 + $0x56]] }
 0x10b   : > { %v5738_v54 = vadd.f32 %v562_v25, %v506_v43  ;;  %v5740_v55 = vadd.f32 %v556_v26, %v488_v44  ;;  %v1039_v41 = vmul.f32 %v5712_v24, %v1036_v47  ;;  %v1038_v35 = vmul.f32 %v5691_v5, %v1036_v47 }
 0x10c   : > { %v502_v58 = vpop.permute.xlu1 %501  ;;  %v500_v59 = vpop.permute.xlu0 %499  ;;  %v1078_v40 = vmul.f32 %v5691_v5, %v1076_v56  ;;  %v1117_v16 = vmul.f32 %v5697_v12, %v1116_v14  ;;  %v1119_v47 = vmul.f32 %v5712_v24, %v1116_v14 }
 0x10d   : > { %v508_v62 = vadd.f32 %v502_v58, %v428_v50  ;;  %v507_v63 = vadd.f32 %v500_v59, %v427_v51  ;;  %v1058_v50 = vmul.f32 %v5691_v5, %v1056_v60  ;;  %v1057_v51 = vmul.f32 %v5697_v12, %v1056_v60 }
 0x10e   : > { %1003 = vrot.lane.b32.xlu1 %v997_v29, %s5299_s22  ;;  %987 = vrot.lane.b32.xlu0 %v979_v45, %s5299_s22  ;;  %v1077_v59 = vmul.f32 %v5697_v12, %v1076_v56 }
 0x10f   : > { %v5754_v10 = vadd.f32 %v564_v34, %v508_v62  ;;  %v5756_v13 = vadd.f32 %v563_v48, %v507_v63  ;;  %v1059_v62 = vmul.f32 %v5712_v24, %v1056_v60  ;;  %v5874_v60 = vstv %s4685_s23  ;;  %s4735_s23 = sld [smem:[#allocation3 + $0x7c]] }
 0x110   : > { %v520_v15 = vpop.permute.xlu1 %519  ;;  %v518_v9 = vpop.permute.xlu0 %517 }
 0x111   : > { %v527_v17 = vadd.f32 %v520_v15, %v447_v7  ;;  %v526_v18 = vadd.f32 %v518_v9, %v446_v8 }
 0x112   : > { %1007 = vrot.lane.b32.xlu1 %v999_v0, %s5299_s22  ;;  %1005 = vrot.lane.b32.xlu0 %v998_v3, %s5299_s22  ;;  %v1079_v3 = vmul.f32 %v5712_v24, %v1076_v56  ;;  %v1211_v56 = vstv %s4719_s17  ;;  %s4736_s17 = sld [smem:[#allocation3 + $0x11]] }
 0x113   : > { %v5769_v4 = vadd.f32 %v571_v42, %v527_v17  ;;  %v5771_v23 = vadd.f32 %v570_v6, %v526_v18  ;;  %v1096_v42 = vstv %s4708_s9  ;;  %s4722_s9 = sld [smem:[#allocation3 + $0x32]] }
 0x114   : > { %v538_v25 = vpop.permute.xlu1 %537  ;;  %v522_v26 = vpop.permute.xlu0 %521  ;;  %v1098_v7 = vmul.f32 %v5691_v5, %v1096_v42  ;;  %v1097_v8 = vmul.f32 %v5697_v12, %v1096_v42  ;;  %v1099_v17 = vmul.f32 %v5712_v24, %v1096_v42  ;;  %v5839_v12 = vld [vmem:[%s5487_s18 + $0x21] sm:$0xff] }
 0x115   : > { %v546_v27 = vadd.f32 %v538_v25, %v466_v1  ;;  %v528_v28 = vadd.f32 %v522_v26, %v448_v22  ;;  %v1171_v1 = vstv %s4717_s20  ;;  %v5842_v22 = vld [vmem:[%s5487_s18 + $0x19] sm:$0xff]  ;;  %v1213_v42 = vmul.f32 %v5839_v12, %v1211_v56  ;;  %s4732_s20 = sld [smem:[#allocation3 + $0x10]] }
 0x116   : > { %1025 = vrot.lane.b32.xlu1 %v1018_v19, %s5299_s22  ;;  %1023 = vrot.lane.b32.xlu0 %v1017_v46, %s5299_s22  ;;  %v5831_v46 = vstv %s4683_s13  ;;  %s4724_s13 = sld [smem:[#allocation3 + $0x7a]] }
 0x117   : > { %v5781_v38 = vadd.f32 %v578_v20, %v546_v27  ;;  %v5783_v39 = vadd.f32 %v572_v21, %v528_v28  ;;  %v1118_v20 = vmul.f32 %v5691_v5, %v1116_v14  ;;  %v749_v25 = vmul.f32 %v5831_v46, %v5605_v11 }
 0x118   : > { %v542_v43 = vpop.permute.xlu1 %541  ;;  %v540_v44 = vpop.permute.xlu0 %539  ;;  %v5848_v28 = vstv %s4684_s15  ;;  %v1173_v5 = vmul.f32 %v5839_v12, %v1171_v1  ;;  %s4733_s15 = sld [smem:[#allocation3 + $0x34]] }
 0x119   : > { %v548_v45 = vadd.f32 %v542_v43, %v468_v33  ;;  %v547_v29 = vadd.f32 %v540_v44, %v467_v36  ;;  %v757_v33 = vmul.f32 %v5848_v28, %v5605_v11 }
 0x11a   : > { %1043 = vrot.lane.b32.xlu1 %v1037_v32, %s5299_s22  ;;  %1027 = vrot.lane.b32.xlu0 %v1019_v37, %s5299_s22  ;;  %v1191_v37 = vstv %s4718_s14  ;;  %s4734_s14 = sld [smem:[#allocation3 + $0x58]] }
 0x11b   : > { %v5789_v34 = vadd.f32 %v580_v52, %v548_v45  ;;  %v5791_v61 = vadd.f32 %v579_v53, %v547_v29  ;;  %v5856_v52 = vld [vmem:[%s5487_s18 + $0x29] sm:$0x3] }
 0x11c   : > { %v5793_v48 = vpop.permute.xlu1 %594  ;;  %v593_v49 = vpop.permute.xlu0 %592  ;;  %v1174_v45 = vmul.f32 %v5856_v52, %v1171_v1 }
 0x11d   : > { %v601_v21 = vadd.f32 %v593_v49, %v5722_v31  ;;  %v1172_v31 = vmul.f32 %v5842_v22, %v1171_v1  ;;  %v1194_v49 = vmul.f32 %v5856_v52, %v1191_v37 }
 0x11e   : > { %1047 = vrot.lane.b32.xlu1 %v1039_v41, %s5299_s22  ;;  %1045 = vrot.lane.b32.xlu0 %v1038_v35, %s5299_s22 }
 0x120   : > { %v613_v57 = vpop.permute.xlu1 %612  ;;  %v5799_v58 = vpop.permute.xlu0 %596 }
 0x121   : > { %v621_v32 = vadd.f32 %v613_v57, %v5738_v54  ;;  %v1192_v54 = vmul.f32 %v5842_v22, %v1191_v37  ;;  %v765_v57 = vmul.f32 %v5874_v60, %v5605_v11 }
 0x122   : > { %1065 = vrot.lane.b32.xlu1 %v1058_v50, %s5300_s19  ;;  %1063 = vrot.lane.b32.xlu0 %v1057_v51, %s5300_s19  ;;  %v1193_v50 = vmul.f32 %v5839_v12, %v1191_v37  ;;  %v1271_v37 = vstv %s4722_s9  ;;  %s4747_s9 = sld [smem:[#allocation3 + $0x13]] }
 0x124   : > { %v5805_v63 = vpop.permute.xlu1 %616  ;;  %v5807_v0 = vpop.permute.xlu0 %614 }
 0x126   : > { %1083 = vrot.lane.b32.xlu1 %v1077_v59, %s5300_s19  ;;  %1067 = vrot.lane.b32.xlu0 %v1059_v62, %s5300_s19 }
 0x128   : > { %v5813_v6 = vpop.permute.xlu1 %634  ;;  %v633_v2 = vpop.permute.xlu0 %632 }
 0x129   : > { %v641_v51 = vadd.f32 %v633_v2, %v5771_v23  ;;  %v1231_v2 = vstv %s4720_s16  ;;  %s4738_s16 = sld [smem:[#allocation3 + $0x59]] }
 0x12a   : > { %1087 = vrot.lane.b32.xlu1 %v1079_v3, %s5300_s19  ;;  %1085 = vrot.lane.b32.xlu0 %v1078_v40, %s5300_s19  ;;  %v5885_v3 = vstv %s4686_s21  ;;  %s4737_s21 = sld [smem:[#allocation3 + $0x35]] }
 0x12b   : > { %v773_v14 = vmul.f32 %v5885_v3, %v5605_v11  ;;  %v1234_v11 = vmul.f32 %v5856_v52, %v1231_v2 }
 0x12c   : > { %v5819_v15 = vpop.permute.xlu1 %652  ;;  %v5821_v9 = vpop.permute.xlu0 %636 }
 0x12d   : > { %v661_v23 = vadd.f32 %v5819_v15, %v5781_v38 }
 0x12e   : > { %1105 = vrot.lane.b32.xlu1 %v1098_v7, %s5300_s19  ;;  %1103 = vrot.lane.b32.xlu0 %v1097_v8, %s5300_s19  ;;  %v1212_v7 = vmul.f32 %v5842_v22, %v1211_v56 }
 0x130   : > { %v5827_v18 = vpop.permute.xlu1 %656  ;;  %v5829_v19 = vpop.permute.xlu0 %654 }
 0x132   : > { %1123 = vrot.lane.b32.xlu1 %v1117_v16, %s5300_s19  ;;  %1107 = vrot.lane.b32.xlu0 %v1099_v17, %s5300_s19 }
 0x134   : > { %v5846_v26 = vpop.permute.xlu1 %674  ;;  %v673_v27 = vpop.permute.xlu0 %672 }
 0x135   : > { %v681_v24 = vadd.f32 %v673_v27, %v601_v21  ;;  %v1214_v21 = vmul.f32 %v5856_v52, %v1211_v56  ;;  %v1251_v27 = vstv %s4721_s29  ;;  %v1291_v56 = vstv %s4723_s8  ;;  %s4739_s29 = sld [smem:[#allocation3 + $0x7d]] }
 0x136   : > { %1127 = vrot.lane.b32.xlu1 %v1119_v47, %s5300_s19  ;;  %1125 = vrot.lane.b32.xlu0 %v1118_v20, %s5300_s19  ;;  %v1232_v20 = vmul.f32 %v5842_v22, %v1231_v2  ;;  %s4748_s8 = sld [smem:[#allocation3 + $0x37]] }
 0x137   : > { %v5858_v53 = vadd.f32 %v749_v25, %v681_v24  ;;  %v1233_v25 = vmul.f32 %v5839_v12, %v1231_v2 }
 0x138   : > { %v693_v36 = vpop.permute.xlu1 %692  ;;  %v5862_v43 = vpop.permute.xlu0 %676 }
 0x139   : > { %v701_v44 = vadd.f32 %v693_v36, %v621_v32  ;;  %v1252_v32 = vmul.f32 %v5842_v22, %v1251_v27 }
 0x13a   : > { %1180 = vrot.lane.b32.xlu1 %v1173_v5, %s5299_s22  ;;  %1178 = vrot.lane.b32.xlu0 %v1172_v31, %s5299_s22  ;;  %v1253_v31 = vmul.f32 %v5839_v12, %v1251_v27 }
 0x13b   : > { %v5868_v29 = vadd.f32 %v757_v33, %v701_v44  ;;  %v1272_v44 = vmul.f32 %v5842_v22, %v1271_v37 }
 0x13c   : > { %v5870_v41 = vpop.permute.xlu1 %696  ;;  %v5872_v35 = vpop.permute.xlu0 %694 }
 0x13e   : > { %1198 = vrot.lane.b32.xlu1 %v1192_v54, %s5299_s22  ;;  %1182 = vrot.lane.b32.xlu0 %v1174_v45, %s5299_s22  ;;  %v1254_v54 = vmul.f32 %v5856_v52, %v1251_v27  ;;  %v1366_v27 = vstv %s4732_s20  ;;  %s4750_s20 = sld [smem:[#allocation3 + $0x7f]] }
 0x140   : > { %v5883_v59 = vpop.permute.xlu1 %714  ;;  %v713_v62 = vpop.permute.xlu0 %712 }
 0x141   : > { %v721_v40 = vadd.f32 %v713_v62, %v641_v51  ;;  %v1273_v51 = vmul.f32 %v5839_v12, %v1271_v37 }
 0x142   : > { %1202 = vrot.lane.b32.xlu1 %v1194_v49, %s5299_s22  ;;  %1200 = vrot.lane.b32.xlu0 %v1193_v50, %s5299_s22  ;;  %v1274_v50 = vmul.f32 %v5856_v52, %v1271_v37 }
 0x143   : > { %v5893_v8 = vadd.f32 %v765_v57, %v721_v40  ;;  %v1293_v40 = vmul.f32 %v5839_v12, %v1291_v56 }
 0x144   : > { %v733_v16 = vpop.permute.xlu1 %732  ;;  %v5897_v17 = vpop.permute.xlu0 %716 }
 0x145   : > { %8742 = vst [vmem:[#allocation20_spill] sm:$0xff] %v5893_v8  ;;  %v741_v47 = vadd.f32 %v733_v16, %v661_v23  ;;  %v1294_v16 = vmul.f32 %v5856_v52, %v1291_v56 }
 0x146   : > { %1220 = vrot.lane.b32.xlu1 %v1213_v42, %s5299_s22  ;;  %1218 = vrot.lane.b32.xlu0 %v1212_v7, %s5299_s22  ;;  %v1292_v42 = vmul.f32 %v5842_v22, %v1291_v56  ;;  %v1311_v7 = vstv %s4724_s13  ;;  %s4749_s13 = sld [smem:[#allocation3 + $0x5b]] }
 0x147   : > { %v5903_v38 = vadd.f32 %v773_v14, %v741_v47  ;;  %v1312_v14 = vmul.f32 %v5842_v22, %v1311_v7  ;;  %v5965_v22 = vld [vmem:[%s5487_s18 + $0x1a] sm:$0xff] }
 0x148   : > { %v5905_v15 = vpop.permute.xlu1 %736  ;;  %v5907_v1 = vpop.permute.xlu0 %734 }
 0x149   : > { %8743 = vst [vmem:[#allocation21_spill] sm:$0xff] %v5903_v38 }
 0x14a   : > { %1238 = vrot.lane.b32.xlu1 %v1232_v20, %s5299_s22  ;;  %1222 = vrot.lane.b32.xlu0 %v1214_v21, %s5299_s22  ;;  %v1314_v21 = vmul.f32 %v5856_v52, %v1311_v7  ;;  %v1386_v52 = vstv %s4733_s15  ;;  %s4751_s15 = sld [smem:[#allocation3 + $0x14]] }
 0x14c   : > { %v5913_v24 = vpop.permute.xlu1 %789  ;;  %v5915_v5 = vpop.permute.xlu0 %787 }
 0x14e   : > { %1242 = vrot.lane.b32.xlu1 %v1234_v11, %s5299_s22  ;;  %1240 = vrot.lane.b32.xlu0 %v1233_v25, %s5299_s22  ;;  %v1313_v11 = vmul.f32 %v5839_v12, %v1311_v7  ;;  %v5962_v25 = vld [vmem:[%s5487_s18 + $0x22] sm:$0xff] }
 0x14f   : > { %v1368_v37 = vmul.f32 %v5962_v25, %v1366_v27 }
 0x150   : > { %v5921_v33 = vpop.permute.xlu1 %807  ;;  %v5923_v36 = vpop.permute.xlu0 %791 }
 0x152   : > { %1260 = vrot.lane.b32.xlu1 %v1253_v31, %s5300_s19  ;;  %1258 = vrot.lane.b32.xlu0 %v1252_v32, %s5300_s19 }
 0x154   : > { %v5929_v45 = vpop.permute.xlu1 %811  ;;  %v5931_v49 = vpop.permute.xlu0 %809 }
 0x156   : > { %1278 = vrot.lane.b32.xlu1 %v1272_v44, %s5300_s19  ;;  %1262 = vrot.lane.b32.xlu0 %v1254_v54, %s5300_s19  ;;  %v1367_v44 = vmul.f32 %v5965_v22, %v1366_v27  ;;  %v5976_v54 = vld [vmem:[%s5487_s18 + $0x2a] sm:$0x3] }
 0x157   : > { %v1369_v56 = vmul.f32 %v5976_v54, %v1366_v27  ;;  %v1389_v7 = vmul.f32 %v5976_v54, %v1386_v52 }
 0x158   : > { %v5937_v57 = vpop.permute.xlu1 %829  ;;  %v5939_v62 = vpop.permute.xlu0 %827 }
 0x159   : > { %8744 = vst [vmem:[#allocation22_spill] sm:$0xff] %v5939_v62 }
 0x15a   : > { %1282 = vrot.lane.b32.xlu1 %v1274_v50, %s5300_s19  ;;  %1280 = vrot.lane.b32.xlu0 %v1273_v51, %s5300_s19  ;;  %v1387_v51 = vmul.f32 %v5965_v22, %v1386_v52 }
 0x15c   : > { %v5945_v23 = vpop.permute.xlu1 %847  ;;  %v5947_v2 = vpop.permute.xlu0 %831 }
 0x15d   : > { %8745 = vst [vmem:[#allocation23_spill] sm:$0xff] %v5945_v23  ;;  %8746 = vst [vmem:[#allocation24_spill] sm:$0xff] %v5947_v2  ;;  %v5098_v2 = vld [vmem:[%s5487_s18 + $0x20] sm:$0xff] }
 0x15e   : > { %1300 = vrot.lane.b32.xlu1 %v1293_v40, %s5300_s19  ;;  %1298 = vrot.lane.b32.xlu0 %v1292_v42, %s5300_s19 }
 0x160   : > { %v5953_v47 = vpop.permute.xlu1 %851  ;;  %v5955_v20 = vpop.permute.xlu0 %849 }
 0x161   : > { %8747 = vst [vmem:[#allocation25_spill] sm:$0xff] %v5953_v47  ;;  %8748 = vst [vmem:[#allocation26_spill] sm:$0xff] %v5955_v20 }
 0x162   : > { %1318 = vrot.lane.b32.xlu1 %v1312_v14, %s5300_s19  ;;  %1302 = vrot.lane.b32.xlu0 %v1294_v16, %s5300_s19  ;;  %v1388_v14 = vmul.f32 %v5962_v25, %v1386_v52  ;;  %v1406_v16 = vstv %s4734_s14  ;;  %s4752_s14 = sld [smem:[#allocation3 + $0x38]] }
 0x163   : > { %v1408_v27 = vmul.f32 %v5962_v25, %v1406_v16 }
 0x164   : > { %v5967_v31 = vpop.permute.xlu1 %869  ;;  %v5969_v32 = vpop.permute.xlu0 %867 }
 0x165   : > { %8749 = vst [vmem:[#allocation27_spill] sm:$0xff] %v5969_v32 }
 0x166   : > { %1322 = vrot.lane.b32.xlu1 %v1314_v21, %s5300_s19  ;;  %1320 = vrot.lane.b32.xlu0 %v1313_v11, %s5300_s19 }
 0x168   : > { %v5978_v12 = vpop.permute.xlu1 %887  ;;  %v5980_v50 = vpop.permute.xlu0 %871 }
 0x169   : > { %8750 = vst [vmem:[#allocation28_spill] sm:$0xff] %v5978_v12  ;;  %8751 = vst [vmem:[#allocation29_spill] sm:$0xff] %v5980_v50 }
 0x16a   : > { %1375 = vrot.lane.b32.xlu1 %v1368_v37, %s5299_s22  ;;  %1373 = vrot.lane.b32.xlu0 %v1367_v44, %s5299_s22  ;;  %v1407_v37 = vmul.f32 %v5965_v22, %v1406_v16  ;;  %v1426_v44 = vstv %s4735_s23  ;;  %s4753_s23 = sld [smem:[#allocation3 + $0x5c]] }
 0x16b   : > { %v1427_v52 = vmul.f32 %v5965_v22, %v1426_v44 }
 0x16c   : > { %v5986_v40 = vpop.permute.xlu1 %891  ;;  %v5988_v42 = vpop.permute.xlu0 %889 }
 0x16d   : > { %8752 = vst [vmem:[#allocation30_spill] sm:$0xff] %v5986_v40  ;;  %8753 = vst [vmem:[#allocation31_spill] sm:$0xff] %v5988_v42 }
 0x16e   : > { %1393 = vrot.lane.b32.xlu1 %v1387_v51, %s5299_s22  ;;  %1377 = vrot.lane.b32.xlu0 %v1369_v56, %s5299_s22 }
 0x170   : > { %v5994_v21 = vpop.permute.xlu1 %909  ;;  %v5996_v11 = vpop.permute.xlu0 %907 }
 0x171   : > { %8754 = vst [vmem:[#allocation32_spill] sm:$0xff] %v5994_v21  ;;  %8755 = vst [vmem:[#allocation33_spill] sm:$0xff] %v5996_v11 }
 0x172   : > { %1397 = vrot.lane.b32.xlu1 %v1389_v7, %s5299_s22  ;;  %1395 = vrot.lane.b32.xlu0 %v1388_v14, %s5299_s22  ;;  %v1409_v7 = vmul.f32 %v5976_v54, %v1406_v16 }
 0x174   : > { %v6002_v51 = vpop.permute.xlu1 %927  ;;  %v6004_v56 = vpop.permute.xlu0 %911 }
 0x175   : > { %8756 = vst [vmem:[#allocation34_spill] sm:$0xff] %v6002_v51  ;;  %8757 = vst [vmem:[#allocation35_spill] sm:$0xff] %v6004_v56  ;;  %v1429_v51 = vmul.f32 %v5976_v54, %v1426_v44  ;;  %v1428_v56 = vmul.f32 %v5962_v25, %v1426_v44 }
 0x176   : > { %1415 = vrot.lane.b32.xlu1 %v1408_v27, %s5299_s22  ;;  %1413 = vrot.lane.b32.xlu0 %v1407_v37, %s5299_s22  ;;  %v1446_v27 = vstv %s4736_s17  ;;  %s4754_s17 = sld [smem:[#allocation3 + $0x80]] }
 0x177   : > { %v1448_v16 = vmul.f32 %v5962_v25, %v1446_v27 }
 0x178   : > { %v6010_v14 = vpop.permute.xlu1 %931  ;;  %v6012_v11 = vpop.permute.xlu0 %929 }
 0x179   : > { %8758 = vst [vmem:[#allocation36_spill] sm:$0xff] %v6010_v14  ;;  %8759 = vst [vmem:[#allocation37_spill] sm:$0xff] %v6012_v11  ;;  %v1447_v11 = vmul.f32 %v5965_v22, %v1446_v27 }
 0x17a   : > { %1433 = vrot.lane.b32.xlu1 %v1427_v52, %s5299_s22  ;;  %1417 = vrot.lane.b32.xlu0 %v1409_v7, %s5299_s22  ;;  %v1466_v52 = vstv %s4737_s21  ;;  %s4762_s21 = sld [smem:[#allocation3 + $0x16]] }
 0x17b   : > { %v1467_v44 = vmul.f32 %v5965_v22, %v1466_v52 }
 0x17c   : > { %v6018_v21 = vpop.permute.xlu1 %985  ;;  %v6020_v37 = vpop.permute.xlu0 %983 }
 0x17d   : > { %8760 = vst [vmem:[#allocation38_spill] sm:$0xff] %v6018_v21  ;;  %8761 = vst [vmem:[#allocation39_spill] sm:$0xff] %v6020_v37 }
 0x17e   : > { %1437 = vrot.lane.b32.xlu1 %v1429_v51, %s5299_s22  ;;  %1435 = vrot.lane.b32.xlu0 %v1428_v56, %s5299_s22  ;;  %v1449_v51 = vmul.f32 %v5976_v54, %v1446_v27 }
 0x180   : > { %v6026_v7 = vpop.permute.xlu1 %1003  ;;  %v6028_v14 = vpop.permute.xlu0 %987 }
 0x181   : > { %8762 = vst [vmem:[#allocation40_spill] sm:$0xff] %v6026_v7  ;;  %8763 = vst [vmem:[#allocation41_spill] sm:$0xff] %v6028_v14  ;;  %v1469_v7 = vmul.f32 %v5976_v54, %v1466_v52  ;;  %v1468_v14 = vmul.f32 %v5962_v25, %v1466_v52 }
 0x182   : > { %1455 = vrot.lane.b32.xlu1 %v1448_v16, %s5300_s19  ;;  %1453 = vrot.lane.b32.xlu0 %v1447_v11, %s5300_s19  ;;  %v1486_v16 = vstv %s4738_s16  ;;  %s4763_s16 = sld [smem:[#allocation3 + $0x3a]] }
 0x183   : > { %v1488_v27 = vmul.f32 %v5962_v25, %v1486_v16 }
 0x184   : > { %v6034_v56 = vpop.permute.xlu1 %1007  ;;  %v6036_v37 = vpop.permute.xlu0 %1005 }
 0x185   : > { %8764 = vst [vmem:[#allocation42_spill] sm:$0xff] %v6034_v56  ;;  %8765 = vst [vmem:[#allocation43_spill] sm:$0xff] %v6036_v37  ;;  %v1487_v37 = vmul.f32 %v5965_v22, %v1486_v16 }
 0x186   : > { %1473 = vrot.lane.b32.xlu1 %v1467_v44, %s5300_s19  ;;  %1457 = vrot.lane.b32.xlu0 %v1449_v51, %s5300_s19  ;;  %v1506_v44 = vstv %s4739_s29  ;;  %s4764_s29 = sld [smem:[#allocation3 + $0x5e]] }
 0x188   : > { %v6042_v21 = vpop.permute.xlu1 %1025  ;;  %v6044_v11 = vpop.permute.xlu0 %1023 }
 0x189   : > { %8766 = vst [vmem:[#allocation44_spill] sm:$0xff] %v6042_v21  ;;  %8767 = vst [vmem:[#allocation45_spill] sm:$0xff] %v6044_v11 }
 0x18a   : > { %1477 = vrot.lane.b32.xlu1 %v1469_v7, %s5300_s19  ;;  %1475 = vrot.lane.b32.xlu0 %v1468_v14, %s5300_s19  ;;  %v1507_v7 = vmul.f32 %v5965_v22, %v1506_v44  ;;  %v1489_v14 = vmul.f32 %v5976_v54, %v1486_v16  ;;  %v6070_v22 = vld [vmem:[%s5487_s18 + $0x30] sm:$0xff] }
 0x18c   : > { %v6050_v51 = vpop.permute.xlu1 %1043  ;;  %v6052_v52 = vpop.permute.xlu0 %1027 }
 0x18d   : > { %8768 = vst [vmem:[#allocation46_spill] sm:$0xff] %v6050_v51  ;;  %8769 = vst [vmem:[#allocation47_spill] sm:$0xff] %v6052_v52  ;;  %v1509_v52 = vmul.f32 %v5976_v54, %v1506_v44  ;;  %v6067_v51 = vld [vmem:[%s5487_s18 + $0x38] sm:$0xff]  ;;  %v1582_v54 = vstv %s4748_s8  ;;  %s4766_s8 = sld [smem:[#allocation3 + $0x17]] }
 0x18e   : > { %1495 = vrot.lane.b32.xlu1 %v1488_v27, %s5300_s19  ;;  %1493 = vrot.lane.b32.xlu0 %v1487_v37, %s5300_s19  ;;  %v1508_v27 = vmul.f32 %v5962_v25, %v1506_v44  ;;  %v1562_v37 = vstv %s4747_s9  ;;  %s4765_s9 = sld [smem:[#allocation3 + $0x82]] }
 0x190   : > { %v6058_v11 = vpop.permute.xlu1 %1047  ;;  %v6060_v21 = vpop.permute.xlu0 %1045 }
 0x191   : > { %8770 = vst [vmem:[#allocation48_spill] sm:$0xff] %v6058_v11  ;;  %8771 = vst [vmem:[#allocation49_spill] sm:$0xff] %v6060_v21  ;;  %v6081_v21 = vld [vmem:[%s5487_s18 + $0x40] sm:$0x3] }
 0x192   : > { %1513 = vrot.lane.b32.xlu1 %v1507_v7, %s5300_s19  ;;  %1497 = vrot.lane.b32.xlu0 %v1489_v14, %s5300_s19  ;;  %v1564_v7 = vmul.f32 %v6067_v51, %v1562_v37  ;;  %v1563_v14 = vmul.f32 %v6070_v22, %v1562_v37 }
 0x194   : > { %v6072_v16 = vpop.permute.xlu1 %1065  ;;  %v6074_v56 = vpop.permute.xlu0 %1063 }
 0x195   : > { %8772 = vst [vmem:[#allocation50_spill] sm:$0xff] %v6072_v16  ;;  %8773 = vst [vmem:[#allocation51_spill] sm:$0xff] %v6074_v56 }
 0x196   : > { %1517 = vrot.lane.b32.xlu1 %v1509_v52, %s5300_s19  ;;  %1515 = vrot.lane.b32.xlu0 %v1508_v27, %s5300_s19  ;;  %v1583_v52 = vmul.f32 %v6070_v22, %v1582_v54  ;;  %v1565_v27 = vmul.f32 %v6081_v21, %v1562_v37 }
 0x198   : > { %v6083_v25 = vpop.permute.xlu1 %1083  ;;  %v6085_v44 = vpop.permute.xlu0 %1067 }
 0x199   : > { %8774 = vst [vmem:[#allocation52_spill] sm:$0xff] %v6083_v25  ;;  %8775 = vst [vmem:[#allocation53_spill] sm:$0xff] %v6085_v44  ;;  %v1585_v25 = vmul.f32 %v6081_v21, %v1582_v54  ;;  %v1584_v44 = vmul.f32 %v6067_v51, %v1582_v54 }
 0x19a   : > { %1571 = vrot.lane.b32.xlu1 %v1564_v7, %s5299_s22  ;;  %1569 = vrot.lane.b32.xlu0 %v1563_v14, %s5299_s22  ;;  %v1602_v7 = vstv %s4749_s13  ;;  %s4767_s13 = sld [smem:[#allocation3 + $0x3b]] }
 0x19b   : > { %v1604_v37 = vmul.f32 %v6067_v51, %v1602_v7 }
 0x19c   : > { %v6091_v11 = vpop.permute.xlu1 %1087  ;;  %v6093_v56 = vpop.permute.xlu0 %1085 }
 0x19d   : > { %8776 = vst [vmem:[#allocation54_spill] sm:$0xff] %v6091_v11  ;;  %8777 = vst [vmem:[#allocation55_spill] sm:$0xff] %v6093_v56  ;;  %v1603_v56 = vmul.f32 %v6070_v22, %v1602_v7 }
 0x19e   : > { %1589 = vrot.lane.b32.xlu1 %v1583_v52, %s5299_s22  ;;  %1573 = vrot.lane.b32.xlu0 %v1565_v27, %s5299_s22  ;;  %v1622_v52 = vstv %s4750_s20  ;;  %s4768_s20 = sld [smem:[#allocation3 + $0x5f]] }
 0x19f   : > { %v1623_v54 = vmul.f32 %v6070_v22, %v1622_v52 }
 0x1a0   : > { %v6099_v16 = vpop.permute.xlu1 %1105  ;;  %v6101_v14 = vpop.permute.xlu0 %1103 }
 0x1a1   : > { %8778 = vst [vmem:[#allocation56_spill] sm:$0xff] %v6099_v16  ;;  %8779 = vst [vmem:[#allocation57_spill] sm:$0xff] %v6101_v14 }
 0x1a2   : > { %1593 = vrot.lane.b32.xlu1 %v1585_v25, %s5299_s22  ;;  %1591 = vrot.lane.b32.xlu0 %v1584_v44, %s5299_s22  ;;  %v1605_v25 = vmul.f32 %v6081_v21, %v1602_v7 }
 0x1a4   : > { %v6107_v27 = vpop.permute.xlu1 %1123  ;;  %v6109_v11 = vpop.permute.xlu0 %1107 }
 0x1a5   : > { %8780 = vst [vmem:[#allocation58_spill] sm:$0xff] %v6107_v27  ;;  %8781 = vst [vmem:[#allocation59_spill] sm:$0xff] %v6109_v11  ;;  %v1625_v27 = vmul.f32 %v6081_v21, %v1622_v52  ;;  %v1624_v11 = vmul.f32 %v6067_v51, %v1622_v52 }
 0x1a6   : > { %1611 = vrot.lane.b32.xlu1 %v1604_v37, %s5299_s22  ;;  %1609 = vrot.lane.b32.xlu0 %v1603_v56, %s5299_s22  ;;  %v1642_v37 = vstv %s4751_s15  ;;  %s4769_s15 = sld [smem:[#allocation3 + $0x83]] }
 0x1a7   : > { %v1644_v7 = vmul.f32 %v6067_v51, %v1642_v37 }
 0x1a8   : > { %v6115_v44 = vpop.permute.xlu1 %1127  ;;  %v6117_v14 = vpop.permute.xlu0 %1125 }
 0x1a9   : > { %8782 = vst [vmem:[#allocation60_spill] sm:$0xff] %v6115_v44  ;;  %8783 = vst [vmem:[#allocation61_spill] sm:$0xff] %v6117_v14  ;;  %v1643_v14 = vmul.f32 %v6070_v22, %v1642_v37 }
 0x1aa   : > { %1629 = vrot.lane.b32.xlu1 %v1623_v54, %s5299_s22  ;;  %1613 = vrot.lane.b32.xlu0 %v1605_v25, %s5299_s22  ;;  %v1662_v54 = vstv %s4752_s14  ;;  %s4777_s14 = sld [smem:[#allocation3 + $0x19]] }
 0x1ab   : > { %v1663_v52 = vmul.f32 %v6070_v22, %v1662_v54 }
 0x1ac   : > { %v6123_v16 = vpop.permute.xlu1 %1180  ;;  %v6125_v56 = vpop.permute.xlu0 %1178 }
 0x1ad   : > { %8784 = vst [vmem:[#allocation62_spill] sm:$0xff] %v6123_v16  ;;  %8785 = vst [vmem:[#allocation63_spill] sm:$0xff] %v6125_v56 }
 0x1ae   : > { %1633 = vrot.lane.b32.xlu1 %v1625_v27, %s5299_s22  ;;  %1631 = vrot.lane.b32.xlu0 %v1624_v11, %s5299_s22  ;;  %v1645_v27 = vmul.f32 %v6081_v21, %v1642_v37 }
 0x1b0   : > { %v6131_v25 = vpop.permute.xlu1 %1198  ;;  %v6133_v44 = vpop.permute.xlu0 %1182 }
 0x1b1   : > { %8786 = vst [vmem:[#allocation64_spill] sm:$0xff] %v6131_v25  ;;  %8787 = vst [vmem:[#allocation65_spill] sm:$0xff] %v6133_v44  ;;  %v1665_v25 = vmul.f32 %v6081_v21, %v1662_v54  ;;  %v1664_v44 = vmul.f32 %v6067_v51, %v1662_v54 }
 0x1b2   : > { %1651 = vrot.lane.b32.xlu1 %v1644_v7, %s5300_s19  ;;  %1649 = vrot.lane.b32.xlu0 %v1643_v14, %s5300_s19  ;;  %v1682_v7 = vstv %s4753_s23  ;;  %s4778_s23 = sld [smem:[#allocation3 + $0x3d]] }
 0x1b3   : > { %v1684_v37 = vmul.f32 %v6067_v51, %v1682_v7 }
 0x1b4   : > { %v6139_v11 = vpop.permute.xlu1 %1202  ;;  %v6141_v56 = vpop.permute.xlu0 %1200 }
 0x1b5   : > { %8788 = vst [vmem:[#allocation66_spill] sm:$0xff] %v6139_v11  ;;  %8789 = vst [vmem:[#allocation67_spill] sm:$0xff] %v6141_v56  ;;  %v1683_v56 = vmul.f32 %v6070_v22, %v1682_v7 }
 0x1b6   : > { %1669 = vrot.lane.b32.xlu1 %v1663_v52, %s5300_s19  ;;  %1653 = vrot.lane.b32.xlu0 %v1645_v27, %s5300_s19  ;;  %v1702_v52 = vstv %s4754_s17  ;;  %s4779_s17 = sld [smem:[#allocation3 + $0x61]] }
 0x1b8   : > { %v6147_v16 = vpop.permute.xlu1 %1220  ;;  %v6149_v14 = vpop.permute.xlu0 %1218 }
 0x1b9   : > { %8790 = vst [vmem:[#allocation68_spill] sm:$0xff] %v6147_v16  ;;  %8791 = vst [vmem:[#allocation69_spill] sm:$0xff] %v6149_v14 }
 0x1ba   : > { %1673 = vrot.lane.b32.xlu1 %v1665_v25, %s5300_s19  ;;  %1671 = vrot.lane.b32.xlu0 %v1664_v44, %s5300_s19  ;;  %v1703_v25 = vmul.f32 %v6070_v22, %v1702_v52  ;;  %v1685_v44 = vmul.f32 %v6081_v21, %v1682_v7  ;;  %v6175_v22 = vld [vmem:[%s5487_s18 + $0x31] sm:$0xff] }
 0x1bc   : > { %v6155_v27 = vpop.permute.xlu1 %1238  ;;  %v6157_v54 = vpop.permute.xlu0 %1222 }
 0x1bd   : > { %8792 = vst [vmem:[#allocation70_spill] sm:$0xff] %v6155_v27  ;;  %8793 = vst [vmem:[#allocation71_spill] sm:$0xff] %v6157_v54  ;;  %v1705_v54 = vmul.f32 %v6081_v21, %v1702_v52  ;;  %v6172_v27 = vld [vmem:[%s5487_s18 + $0x39] sm:$0xff]  ;;  %v1777_v21 = vstv %s4763_s16  ;;  %s4781_s16 = sld [smem:[#allocation3 + $0x1a]] }
 0x1be   : > { %1691 = vrot.lane.b32.xlu1 %v1684_v37, %s5300_s19  ;;  %1689 = vrot.lane.b32.xlu0 %v1683_v56, %s5300_s19  ;;  %v1704_v37 = vmul.f32 %v6067_v51, %v1702_v52  ;;  %v1757_v56 = vstv %s4762_s21  ;;  %s4780_s21 = sld [smem:[#allocation3 + $0x85]] }
 0x1c0   : > { %v6163_v14 = vpop.permute.xlu1 %1242  ;;  %v6165_v16 = vpop.permute.xlu0 %1240 }
 0x1c1   : > { %8794 = vst [vmem:[#allocation72_spill] sm:$0xff] %v6163_v14  ;;  %8795 = vst [vmem:[#allocation73_spill] sm:$0xff] %v6165_v16  ;;  %v6186_v16 = vld [vmem:[%s5487_s18 + $0x41] sm:$0x3] }
 0x1c2   : > { %1709 = vrot.lane.b32.xlu1 %v1703_v25, %s5300_s19  ;;  %1693 = vrot.lane.b32.xlu0 %v1685_v44, %s5300_s19  ;;  %v1759_v25 = vmul.f32 %v6172_v27, %v1757_v56  ;;  %v1758_v44 = vmul.f32 %v6175_v22, %v1757_v56 }
 0x1c4   : > { %v6177_v7 = vpop.permute.xlu1 %1260  ;;  %v6179_v11 = vpop.permute.xlu0 %1258 }
 0x1c5   : > { %8796 = vst [vmem:[#allocation74_spill] sm:$0xff] %v6177_v7  ;;  %8797 = vst [vmem:[#allocation75_spill] sm:$0xff] %v6179_v11 }
 0x1c6   : > { %1713 = vrot.lane.b32.xlu1 %v1705_v54, %s5300_s19  ;;  %1711 = vrot.lane.b32.xlu0 %v1704_v37, %s5300_s19  ;;  %v1778_v54 = vmul.f32 %v6175_v22, %v1777_v21  ;;  %v1760_v37 = vmul.f32 %v6186_v16, %v1757_v56 }
 0x1c8   : > { %v6188_v51 = vpop.permute.xlu1 %1278  ;;  %v6190_v52 = vpop.permute.xlu0 %1262 }
 0x1c9   : > { %8798 = vst [vmem:[#allocation76_spill] sm:$0xff] %v6188_v51  ;;  %8799 = vst [vmem:[#allocation77_spill] sm:$0xff] %v6190_v52  ;;  %v1780_v51 = vmul.f32 %v6186_v16, %v1777_v21  ;;  %v1779_v52 = vmul.f32 %v6172_v27, %v1777_v21 }
 0x1ca   : > { %1766 = vrot.lane.b32.xlu1 %v1759_v25, %s5299_s22  ;;  %1764 = vrot.lane.b32.xlu0 %v1758_v44, %s5299_s22  ;;  %v1797_v25 = vstv %s4764_s29  ;;  %s4782_s29 = sld [smem:[#allocation3 + $0x3e]] }
 0x1cb   : > { %v1799_v56 = vmul.f32 %v6172_v27, %v1797_v25 }
 0x1cc   : > { %v6196_v14 = vpop.permute.xlu1 %1282  ;;  %v6198_v11 = vpop.permute.xlu0 %1280 }
 0x1cd   : > { %8800 = vst [vmem:[#allocation78_spill] sm:$0xff] %v6196_v14  ;;  %8801 = vst [vmem:[#allocation79_spill] sm:$0xff] %v6198_v11  ;;  %v1798_v11 = vmul.f32 %v6175_v22, %v1797_v25 }
 0x1ce   : > { %1784 = vrot.lane.b32.xlu1 %v1778_v54, %s5299_s22  ;;  %1768 = vrot.lane.b32.xlu0 %v1760_v37, %s5299_s22  ;;  %v1817_v54 = vstv %s4765_s9  ;;  %s4783_s9 = sld [smem:[#allocation3 + $0x62]] }
 0x1cf   : > { %v1818_v21 = vmul.f32 %v6175_v22, %v1817_v54 }
 0x1d0   : > { %v6204_v7 = vpop.permute.xlu1 %1300  ;;  %v6206_v44 = vpop.permute.xlu0 %1298 }
 0x1d1   : > { %8802 = vst [vmem:[#allocation80_spill] sm:$0xff] %v6204_v7  ;;  %8803 = vst [vmem:[#allocation81_spill] sm:$0xff] %v6206_v44 }
 0x1d2   : > { %1788 = vrot.lane.b32.xlu1 %v1780_v51, %s5299_s22  ;;  %1786 = vrot.lane.b32.xlu0 %v1779_v52, %s5299_s22  ;;  %v1800_v51 = vmul.f32 %v6186_v16, %v1797_v25 }
 0x1d4   : > { %v6212_v37 = vpop.permute.xlu1 %1318  ;;  %v6214_v14 = vpop.permute.xlu0 %1302 }
 0x1d5   : > { %8804 = vst [vmem:[#allocation82_spill] sm:$0xff] %v6212_v37  ;;  %8805 = vst [vmem:[#allocation83_spill] sm:$0xff] %v6214_v14  ;;  %v1820_v37 = vmul.f32 %v6186_v16, %v1817_v54  ;;  %v1819_v14 = vmul.f32 %v6172_v27, %v1817_v54 }
 0x1d6   : > { %1806 = vrot.lane.b32.xlu1 %v1799_v56, %s5299_s22  ;;  %1804 = vrot.lane.b32.xlu0 %v1798_v11, %s5299_s22  ;;  %v1837_v56 = vstv %s4766_s8  ;;  %s4784_s8 = sld [smem:[#allocation3 + $0x86]] }
 0x1d7   : > { %v1839_v25 = vmul.f32 %v6172_v27, %v1837_v56 }
 0x1d8   : > { %v6220_v52 = vpop.permute.xlu1 %1322  ;;  %v6222_v44 = vpop.permute.xlu0 %1320 }
 0x1d9   : > { %8806 = vst [vmem:[#allocation84_spill] sm:$0xff] %v6220_v52  ;;  %8807 = vst [vmem:[#allocation85_spill] sm:$0xff] %v6222_v44  ;;  %v1838_v44 = vmul.f32 %v6175_v22, %v1837_v56 }
 0x1da   : > { %1824 = vrot.lane.b32.xlu1 %v1818_v21, %s5299_s22  ;;  %1808 = vrot.lane.b32.xlu0 %v1800_v51, %s5299_s22  ;;  %v1857_v21 = vstv %s4767_s13  ;;  %s4792_s13 = sld [smem:[#allocation3 + $0x1c]] }
 0x1db   : > { %v1858_v54 = vmul.f32 %v6175_v22, %v1857_v21 }
 0x1dc   : > { %v6228_v7 = vpop.permute.xlu1 %1375  ;;  %v6230_v11 = vpop.permute.xlu0 %1373 }
 0x1dd   : > { %8808 = vst [vmem:[#allocation86_spill] sm:$0xff] %v6228_v7  ;;  %8809 = vst [vmem:[#allocation87_spill] sm:$0xff] %v6230_v11 }
 0x1de   : > { %1828 = vrot.lane.b32.xlu1 %v1820_v37, %s5299_s22  ;;  %1826 = vrot.lane.b32.xlu0 %v1819_v14, %s5299_s22  ;;  %v1840_v37 = vmul.f32 %v6186_v16, %v1837_v56 }
 0x1e0   : > { %v6236_v51 = vpop.permute.xlu1 %1393  ;;  %v6238_v52 = vpop.permute.xlu0 %1377 }
 0x1e1   : > { %8810 = vst [vmem:[#allocation88_spill] sm:$0xff] %v6236_v51  ;;  %8811 = vst [vmem:[#allocation89_spill] sm:$0xff] %v6238_v52  ;;  %v1860_v51 = vmul.f32 %v6186_v16, %v1857_v21  ;;  %v1859_v52 = vmul.f32 %v6172_v27, %v1857_v21 }
 0x1e2   : > { %1846 = vrot.lane.b32.xlu1 %v1839_v25, %s5300_s19  ;;  %1844 = vrot.lane.b32.xlu0 %v1838_v44, %s5300_s19  ;;  %v1877_v25 = vstv %s4768_s20  ;;  %s4793_s20 = sld [smem:[#allocation3 + $0x40]] }
 0x1e3   : > { %v1879_v56 = vmul.f32 %v6172_v27, %v1877_v25 }
 0x1e4   : > { %v6244_v14 = vpop.permute.xlu1 %1397  ;;  %v6246_v11 = vpop.permute.xlu0 %1395 }
 0x1e5   : > { %8812 = vst [vmem:[#allocation90_spill] sm:$0xff] %v6244_v14  ;;  %8813 = vst [vmem:[#allocation91_spill] sm:$0xff] %v6246_v11  ;;  %v1878_v11 = vmul.f32 %v6175_v22, %v1877_v25 }
 0x1e6   : > { %1864 = vrot.lane.b32.xlu1 %v1858_v54, %s5300_s19  ;;  %1848 = vrot.lane.b32.xlu0 %v1840_v37, %s5300_s19  ;;  %v1897_v54 = vstv %s4769_s15  ;;  %s4794_s15 = sld [smem:[#allocation3 + $0x64]] }
 0x1e8   : > { %v6252_v7 = vpop.permute.xlu1 %1415  ;;  %v6254_v44 = vpop.permute.xlu0 %1413 }
 0x1e9   : > { %8814 = vst [vmem:[#allocation92_spill] sm:$0xff] %v6252_v7  ;;  %8815 = vst [vmem:[#allocation93_spill] sm:$0xff] %v6254_v44 }
 0x1ea   : > { %1868 = vrot.lane.b32.xlu1 %v1860_v51, %s5300_s19  ;;  %1866 = vrot.lane.b32.xlu0 %v1859_v52, %s5300_s19  ;;  %v1898_v51 = vmul.f32 %v6175_v22, %v1897_v54  ;;  %v1880_v52 = vmul.f32 %v6186_v16, %v1877_v25  ;;  %v6280_v22 = vld [vmem:[%s5487_s18 + $0x32] sm:$0xff] }
 0x1ec   : > { %v6260_v37 = vpop.permute.xlu1 %1433  ;;  %v6262_v21 = vpop.permute.xlu0 %1417 }
 0x1ed   : > { %8816 = vst [vmem:[#allocation94_spill] sm:$0xff] %v6260_v37  ;;  %8817 = vst [vmem:[#allocation95_spill] sm:$0xff] %v6262_v21  ;;  %v1900_v21 = vmul.f32 %v6186_v16, %v1897_v54  ;;  %v6277_v37 = vld [vmem:[%s5487_s18 + $0x3a] sm:$0xff]  ;;  %v1972_v16 = vstv %s4778_s23  ;;  %s4796_s23 = sld [smem:[#allocation3 + $0x1d]] }
 0x1ee   : > { %1886 = vrot.lane.b32.xlu1 %v1879_v56, %s5300_s19  ;;  %1884 = vrot.lane.b32.xlu0 %v1878_v11, %s5300_s19  ;;  %v1899_v56 = vmul.f32 %v6172_v27, %v1897_v54  ;;  %v1952_v11 = vstv %s4777_s14  ;;  %s4795_s14 = sld [smem:[#allocation3 + $0x88]] }
 0x1f0   : > { %v6268_v44 = vpop.permute.xlu1 %1437  ;;  %v6270_v7 = vpop.permute.xlu0 %1435 }
 0x1f1   : > { %8818 = vst [vmem:[#allocation96_spill] sm:$0xff] %v6268_v44  ;;  %8819 = vst [vmem:[#allocation97_spill] sm:$0xff] %v6270_v7  ;;  %v6291_v7 = vld [vmem:[%s5487_s18 + $0x42] sm:$0x3] }
 0x1f2   : > { %1904 = vrot.lane.b32.xlu1 %v1898_v51, %s5300_s19  ;;  %1888 = vrot.lane.b32.xlu0 %v1880_v52, %s5300_s19  ;;  %v1954_v51 = vmul.f32 %v6277_v37, %v1952_v11  ;;  %v1953_v52 = vmul.f32 %v6280_v22, %v1952_v11 }
 0x1f4   : > { %v6282_v25 = vpop.permute.xlu1 %1455  ;;  %v6284_v14 = vpop.permute.xlu0 %1453 }
 0x1f5   : > { %8820 = vst [vmem:[#allocation98_spill] sm:$0xff] %v6282_v25  ;;  %8821 = vst [vmem:[#allocation99_spill] sm:$0xff] %v6284_v14 }
 0x1f6   : > { %1908 = vrot.lane.b32.xlu1 %v1900_v21, %s5300_s19  ;;  %1906 = vrot.lane.b32.xlu0 %v1899_v56, %s5300_s19  ;;  %v1973_v21 = vmul.f32 %v6280_v22, %v1972_v16  ;;  %v1955_v56 = vmul.f32 %v6291_v7, %v1952_v11 }
 0x1f8   : > { %v6293_v27 = vpop.permute.xlu1 %1473  ;;  %v6295_v54 = vpop.permute.xlu0 %1457 }
 0x1f9   : > { %8822 = vst [vmem:[#allocation100_spill] sm:$0xff] %v6293_v27  ;;  %8823 = vst [vmem:[#allocation101_spill] sm:$0xff] %v6295_v54  ;;  %v1975_v27 = vmul.f32 %v6291_v7, %v1972_v16  ;;  %v1974_v54 = vmul.f32 %v6277_v37, %v1972_v16 }
 0x1fa   : > { %1961 = vrot.lane.b32.xlu1 %v1954_v51, %s5299_s22  ;;  %1959 = vrot.lane.b32.xlu0 %v1953_v52, %s5299_s22  ;;  %v1992_v51 = vstv %s4779_s17  ;;  %s4797_s17 = sld [smem:[#allocation3 + $0x41]] }
 0x1fb   : > { %v1994_v11 = vmul.f32 %v6277_v37, %v1992_v51 }
 0x1fc   : > { %v6301_v44 = vpop.permute.xlu1 %1477  ;;  %v6303_v14 = vpop.permute.xlu0 %1475 }
 0x1fd   : > { %8824 = vst [vmem:[#allocation102_spill] sm:$0xff] %v6301_v44  ;;  %8825 = vst [vmem:[#allocation103_spill] sm:$0xff] %v6303_v14  ;;  %v1993_v14 = vmul.f32 %v6280_v22, %v1992_v51 }
 0x1fe   : > { %1979 = vrot.lane.b32.xlu1 %v1973_v21, %s5299_s22  ;;  %1963 = vrot.lane.b32.xlu0 %v1955_v56, %s5299_s22  ;;  %v2012_v21 = vstv %s4780_s21  ;;  %s4798_s21 = sld [smem:[#allocation3 + $0x65]] }
 0x1ff   : > { %v2013_v16 = vmul.f32 %v6280_v22, %v2012_v21 }
 0x200   : > { %v6309_v25 = vpop.permute.xlu1 %1495  ;;  %v6311_v52 = vpop.permute.xlu0 %1493 }
 0x201   : > { %8826 = vst [vmem:[#allocation104_spill] sm:$0xff] %v6309_v25  ;;  %8827 = vst [vmem:[#allocation105_spill] sm:$0xff] %v6311_v52 }
 0x202   : > { %1983 = vrot.lane.b32.xlu1 %v1975_v27, %s5299_s22  ;;  %1981 = vrot.lane.b32.xlu0 %v1974_v54, %s5299_s22  ;;  %v1995_v27 = vmul.f32 %v6291_v7, %v1992_v51 }
 0x204   : > { %v6317_v56 = vpop.permute.xlu1 %1513  ;;  %v6319_v44 = vpop.permute.xlu0 %1497 }
 0x205   : > { %8828 = vst [vmem:[#allocation106_spill] sm:$0xff] %v6317_v56  ;;  %8829 = vst [vmem:[#allocation107_spill] sm:$0xff] %v6319_v44  ;;  %v2015_v56 = vmul.f32 %v6291_v7, %v2012_v21  ;;  %v2014_v44 = vmul.f32 %v6277_v37, %v2012_v21 }
 0x206   : > { %2001 = vrot.lane.b32.xlu1 %v1994_v11, %s5299_s22  ;;  %1999 = vrot.lane.b32.xlu0 %v1993_v14, %s5299_s22  ;;  %v2032_v11 = vstv %s4781_s16  ;;  %s4799_s16 = sld [smem:[#allocation3 + $0x89]] }
 0x207   : > { %v2034_v51 = vmul.f32 %v6277_v37, %v2032_v11 }
 0x208   : > { %v6325_v54 = vpop.permute.xlu1 %1517  ;;  %v6327_v52 = vpop.permute.xlu0 %1515 }
 0x209   : > { %8830 = vst [vmem:[#allocation108_spill] sm:$0xff] %v6325_v54  ;;  %8831 = vst [vmem:[#allocation109_spill] sm:$0xff] %v6327_v52  ;;  %v2033_v52 = vmul.f32 %v6280_v22, %v2032_v11 }
 0x20a   : > { %2019 = vrot.lane.b32.xlu1 %v2013_v16, %s5299_s22  ;;  %2003 = vrot.lane.b32.xlu0 %v1995_v27, %s5299_s22  ;;  %v2052_v16 = vstv %s4782_s29  ;;  %s4807_s29 = sld [smem:[#allocation3 + $0x1f]] }
 0x20b   : > { %v2053_v21 = vmul.f32 %v6280_v22, %v2052_v16 }
 0x20c   : > { %v6333_v25 = vpop.permute.xlu1 %1571  ;;  %v6335_v14 = vpop.permute.xlu0 %1569 }
 0x20d   : > { %8832 = vst [vmem:[#allocation110_spill] sm:$0xff] %v6333_v25  ;;  %8833 = vst [vmem:[#allocation111_spill] sm:$0xff] %v6335_v14 }
 0x20e   : > { %2023 = vrot.lane.b32.xlu1 %v2015_v56, %s5299_s22  ;;  %2021 = vrot.lane.b32.xlu0 %v2014_v44, %s5299_s22  ;;  %v2035_v56 = vmul.f32 %v6291_v7, %v2032_v11 }
 0x210   : > { %v6341_v27 = vpop.permute.xlu1 %1589  ;;  %v6343_v54 = vpop.permute.xlu0 %1573 }
 0x211   : > { %8834 = vst [vmem:[#allocation112_spill] sm:$0xff] %v6341_v27  ;;  %8835 = vst [vmem:[#allocation113_spill] sm:$0xff] %v6343_v54  ;;  %v2055_v27 = vmul.f32 %v6291_v7, %v2052_v16  ;;  %v2054_v54 = vmul.f32 %v6277_v37, %v2052_v16 }
 0x212   : > { %2041 = vrot.lane.b32.xlu1 %v2034_v51, %s5300_s19  ;;  %2039 = vrot.lane.b32.xlu0 %v2033_v52, %s5300_s19  ;;  %v2072_v51 = vstv %s4783_s9  ;;  %s4808_s9 = sld [smem:[#allocation3 + $0x43]] }
 0x213   : > { %v2074_v11 = vmul.f32 %v6277_v37, %v2072_v51 }
 0x214   : > { %v6349_v44 = vpop.permute.xlu1 %1593  ;;  %v6351_v14 = vpop.permute.xlu0 %1591 }
 0x215   : > { %8836 = vst [vmem:[#allocation114_spill] sm:$0xff] %v6349_v44  ;;  %8837 = vst [vmem:[#allocation115_spill] sm:$0xff] %v6351_v14  ;;  %v2073_v14 = vmul.f32 %v6280_v22, %v2072_v51 }
 0x216   : > { %2059 = vrot.lane.b32.xlu1 %v2053_v21, %s5300_s19  ;;  %2043 = vrot.lane.b32.xlu0 %v2035_v56, %s5300_s19  ;;  %v2092_v21 = vstv %s4784_s8  ;;  %s4809_s8 = sld [smem:[#allocation3 + $0x67]] }
 0x218   : > { %v6357_v25 = vpop.permute.xlu1 %1611  ;;  %v6359_v52 = vpop.permute.xlu0 %1609 }
 0x219   : > { %8838 = vst [vmem:[#allocation116_spill] sm:$0xff] %v6357_v25  ;;  %8839 = vst [vmem:[#allocation117_spill] sm:$0xff] %v6359_v52 }
 0x21a   : > { %2063 = vrot.lane.b32.xlu1 %v2055_v27, %s5300_s19  ;;  %2061 = vrot.lane.b32.xlu0 %v2054_v54, %s5300_s19  ;;  %v2093_v27 = vmul.f32 %v6280_v22, %v2092_v21  ;;  %v2075_v54 = vmul.f32 %v6291_v7, %v2072_v51  ;;  %v6385_v22 = vld [vmem:[%s5487_s18 + $0x48] sm:$0xff] }
 0x21c   : > { %v6365_v56 = vpop.permute.xlu1 %1629  ;;  %v6367_v16 = vpop.permute.xlu0 %1613 }
 0x21d   : > { %8840 = vst [vmem:[#allocation118_spill] sm:$0xff] %v6365_v56  ;;  %8841 = vst [vmem:[#allocation119_spill] sm:$0xff] %v6367_v16  ;;  %v2095_v16 = vmul.f32 %v6291_v7, %v2092_v21  ;;  %v6382_v56 = vld [vmem:[%s5487_s18 + $0x50] sm:$0xff]  ;;  %v2168_v7 = vstv %s4793_s20  ;;  %s4811_s20 = sld [smem:[#allocation3 + $0x20]] }
 0x21e   : > { %2081 = vrot.lane.b32.xlu1 %v2074_v11, %s5300_s19  ;;  %2079 = vrot.lane.b32.xlu0 %v2073_v14, %s5300_s19  ;;  %v2094_v11 = vmul.f32 %v6277_v37, %v2092_v21  ;;  %v2148_v14 = vstv %s4792_s13  ;;  %s4810_s13 = sld [smem:[#allocation3 + $0x8b]] }
 0x220   : > { %v6373_v52 = vpop.permute.xlu1 %1633  ;;  %v6375_v25 = vpop.permute.xlu0 %1631 }
 0x221   : > { %8842 = vst [vmem:[#allocation120_spill] sm:$0xff] %v6373_v52  ;;  %8843 = vst [vmem:[#allocation121_spill] sm:$0xff] %v6375_v25  ;;  %v6396_v25 = vld [vmem:[%s5487_s18 + $0x58] sm:$0x3] }
 0x222   : > { %2099 = vrot.lane.b32.xlu1 %v2093_v27, %s5300_s19  ;;  %2083 = vrot.lane.b32.xlu0 %v2075_v54, %s5300_s19  ;;  %v2150_v27 = vmul.f32 %v6382_v56, %v2148_v14  ;;  %v2149_v54 = vmul.f32 %v6385_v22, %v2148_v14 }
 0x224   : > { %v6387_v51 = vpop.permute.xlu1 %1651  ;;  %v6389_v44 = vpop.permute.xlu0 %1649 }
 0x225   : > { %8844 = vst [vmem:[#allocation122_spill] sm:$0xff] %v6387_v51  ;;  %8845 = vst [vmem:[#allocation123_spill] sm:$0xff] %v6389_v44 }
 0x226   : > { %2103 = vrot.lane.b32.xlu1 %v2095_v16, %s5300_s19  ;;  %2101 = vrot.lane.b32.xlu0 %v2094_v11, %s5300_s19  ;;  %v2169_v16 = vmul.f32 %v6385_v22, %v2168_v7  ;;  %v2151_v11 = vmul.f32 %v6396_v25, %v2148_v14 }
 0x228   : > { %v6398_v37 = vpop.permute.xlu1 %1669  ;;  %v6400_v21 = vpop.permute.xlu0 %1653 }
 0x229   : > { %8846 = vst [vmem:[#allocation124_spill] sm:$0xff] %v6398_v37  ;;  %8847 = vst [vmem:[#allocation125_spill] sm:$0xff] %v6400_v21  ;;  %v2171_v37 = vmul.f32 %v6396_v25, %v2168_v7  ;;  %v2170_v21 = vmul.f32 %v6382_v56, %v2168_v7 }
 0x22a   : > { %2157 = vrot.lane.b32.xlu1 %v2150_v27, %s5299_s22  ;;  %2155 = vrot.lane.b32.xlu0 %v2149_v54, %s5299_s22  ;;  %v2188_v27 = vstv %s4794_s15  ;;  %s4812_s15 = sld [smem:[#allocation3 + $0x44]] }
 0x22b   : > { %v2190_v14 = vmul.f32 %v6382_v56, %v2188_v27 }
 0x22c   : > { %v6406_v52 = vpop.permute.xlu1 %1673  ;;  %v6408_v44 = vpop.permute.xlu0 %1671 }
 0x22d   : > { %8848 = vst [vmem:[#allocation126_spill] sm:$0xff] %v6406_v52  ;;  %8849 = vst [vmem:[#allocation127_spill] sm:$0xff] %v6408_v44  ;;  %v2189_v44 = vmul.f32 %v6385_v22, %v2188_v27 }
 0x22e   : > { %2175 = vrot.lane.b32.xlu1 %v2169_v16, %s5299_s22  ;;  %2159 = vrot.lane.b32.xlu0 %v2151_v11, %s5299_s22  ;;  %v2208_v16 = vstv %s4795_s14  ;;  %s4813_s14 = sld [smem:[#allocation3 + $0x68]] }
 0x22f   : > { %v2209_v7 = vmul.f32 %v6385_v22, %v2208_v16 }
 0x230   : > { %v6414_v51 = vpop.permute.xlu1 %1691  ;;  %v6416_v54 = vpop.permute.xlu0 %1689 }
 0x231   : > { %8850 = vst [vmem:[#allocation128_spill] sm:$0xff] %v6414_v51  ;;  %8851 = vst [vmem:[#allocation129_spill] sm:$0xff] %v6416_v54 }
 0x232   : > { %2179 = vrot.lane.b32.xlu1 %v2171_v37, %s5299_s22  ;;  %2177 = vrot.lane.b32.xlu0 %v2170_v21, %s5299_s22  ;;  %v2191_v37 = vmul.f32 %v6396_v25, %v2188_v27 }
 0x234   : > { %v6422_v11 = vpop.permute.xlu1 %1709  ;;  %v6424_v52 = vpop.permute.xlu0 %1693 }
 0x235   : > { %8852 = vst [vmem:[#allocation130_spill] sm:$0xff] %v6422_v11  ;;  %8853 = vst [vmem:[#allocation131_spill] sm:$0xff] %v6424_v52  ;;  %v2211_v11 = vmul.f32 %v6396_v25, %v2208_v16  ;;  %v2210_v52 = vmul.f32 %v6382_v56, %v2208_v16 }
 0x236   : > { %2197 = vrot.lane.b32.xlu1 %v2190_v14, %s5299_s22  ;;  %2195 = vrot.lane.b32.xlu0 %v2189_v44, %s5299_s22  ;;  %v2228_v14 = vstv %s4796_s23  ;;  %s4814_s23 = sld [smem:[#allocation3 + $0x8c]] }
 0x237   : > { %v2230_v27 = vmul.f32 %v6382_v56, %v2228_v14 }
 0x238   : > { %v6430_v21 = vpop.permute.xlu1 %1713  ;;  %v6432_v54 = vpop.permute.xlu0 %1711 }
 0x239   : > { %8854 = vst [vmem:[#allocation132_spill] sm:$0xff] %v6430_v21  ;;  %8855 = vst [vmem:[#allocation133_spill] sm:$0xff] %v6432_v54  ;;  %v2229_v54 = vmul.f32 %v6385_v22, %v2228_v14 }
 0x23a   : > { %2215 = vrot.lane.b32.xlu1 %v2209_v7, %s5299_s22  ;;  %2199 = vrot.lane.b32.xlu0 %v2191_v37, %s5299_s22  ;;  %v2248_v7 = vstv %s4797_s17  ;;  %s4822_s17 = sld [smem:[#allocation3 + $0x22]] }
 0x23b   : > { %v2249_v16 = vmul.f32 %v6385_v22, %v2248_v7 }
 0x23c   : > { %v6438_v51 = vpop.permute.xlu1 %1766  ;;  %v6440_v44 = vpop.permute.xlu0 %1764 }
 0x23d   : > { %8856 = vst [vmem:[#allocation134_spill] sm:$0xff] %v6438_v51  ;;  %8857 = vst [vmem:[#allocation135_spill] sm:$0xff] %v6440_v44 }
 0x23e   : > { %2219 = vrot.lane.b32.xlu1 %v2211_v11, %s5299_s22  ;;  %2217 = vrot.lane.b32.xlu0 %v2210_v52, %s5299_s22  ;;  %v2231_v11 = vmul.f32 %v6396_v25, %v2228_v14 }
 0x240   : > { %v6446_v37 = vpop.permute.xlu1 %1784  ;;  %v6448_v21 = vpop.permute.xlu0 %1768 }
 0x241   : > { %8858 = vst [vmem:[#allocation136_spill] sm:$0xff] %v6446_v37  ;;  %8859 = vst [vmem:[#allocation137_spill] sm:$0xff] %v6448_v21  ;;  %v2251_v37 = vmul.f32 %v6396_v25, %v2248_v7  ;;  %v2250_v21 = vmul.f32 %v6382_v56, %v2248_v7 }
 0x242   : > { %2237 = vrot.lane.b32.xlu1 %v2230_v27, %s5300_s19  ;;  %2235 = vrot.lane.b32.xlu0 %v2229_v54, %s5300_s19  ;;  %v2268_v27 = vstv %s4798_s21  ;;  %s4823_s21 = sld [smem:[#allocation3 + $0x46]] }
 0x243   : > { %v2270_v14 = vmul.f32 %v6382_v56, %v2268_v27 }
 0x244   : > { %v6454_v52 = vpop.permute.xlu1 %1788  ;;  %v6456_v44 = vpop.permute.xlu0 %1786 }
 0x245   : > { %8860 = vst [vmem:[#allocation138_spill] sm:$0xff] %v6454_v52  ;;  %8861 = vst [vmem:[#allocation139_spill] sm:$0xff] %v6456_v44  ;;  %v2269_v44 = vmul.f32 %v6385_v22, %v2268_v27 }
 0x246   : > { %2255 = vrot.lane.b32.xlu1 %v2249_v16, %s5300_s19  ;;  %2239 = vrot.lane.b32.xlu0 %v2231_v11, %s5300_s19  ;;  %v2288_v16 = vstv %s4799_s16  ;;  %s4824_s16 = sld [smem:[#allocation3 + $0x6a]] }
 0x248   : > { %v6462_v51 = vpop.permute.xlu1 %1806  ;;  %v6464_v54 = vpop.permute.xlu0 %1804 }
 0x249   : > { %8862 = vst [vmem:[#allocation140_spill] sm:$0xff] %v6462_v51  ;;  %8863 = vst [vmem:[#allocation141_spill] sm:$0xff] %v6464_v54 }
 0x24a   : > { %2259 = vrot.lane.b32.xlu1 %v2251_v37, %s5300_s19  ;;  %2257 = vrot.lane.b32.xlu0 %v2250_v21, %s5300_s19  ;;  %v2289_v37 = vmul.f32 %v6385_v22, %v2288_v16  ;;  %v2271_v21 = vmul.f32 %v6396_v25, %v2268_v27  ;;  %v6490_v22 = vld [vmem:[%s5487_s18 + $0x49] sm:$0xff] }
 0x24c   : > { %v6470_v11 = vpop.permute.xlu1 %1824  ;;  %v6472_v7 = vpop.permute.xlu0 %1808 }
 0x24d   : > { %8864 = vst [vmem:[#allocation142_spill] sm:$0xff] %v6470_v11  ;;  %8865 = vst [vmem:[#allocation143_spill] sm:$0xff] %v6472_v7  ;;  %v2291_v7 = vmul.f32 %v6396_v25, %v2288_v16  ;;  %v6487_v11 = vld [vmem:[%s5487_s18 + $0x51] sm:$0xff]  ;;  %v2363_v25 = vstv %s4808_s9  ;;  %s4825_s9 = sld [smem:[#allocation3 + $0x8e]] }
 0x24e   : > { %2277 = vrot.lane.b32.xlu1 %v2270_v14, %s5300_s19  ;;  %2275 = vrot.lane.b32.xlu0 %v2269_v44, %s5300_s19  ;;  %v2290_v14 = vmul.f32 %v6382_v56, %v2288_v16  ;;  %v2343_v44 = vstv %s4807_s29  ;;  %s6612_s29 = sld [smem:[#allocation3 + $0x9]] }
 0x250   : > { %v6478_v54 = vpop.permute.xlu1 %1828  ;;  %v6480_v51 = vpop.permute.xlu0 %1826 }
 0x251   : > { %8866 = vst [vmem:[#allocation144_spill] sm:$0xff] %v6478_v54  ;;  %8867 = vst [vmem:[#allocation145_spill] sm:$0xff] %v6480_v51  ;;  %v6501_v51 = vld [vmem:[%s5487_s18 + $0x59] sm:$0x3] }
 0x252   : > { %2295 = vrot.lane.b32.xlu1 %v2289_v37, %s5300_s19  ;;  %2279 = vrot.lane.b32.xlu0 %v2271_v21, %s5300_s19  ;;  %v2345_v37 = vmul.f32 %v6487_v11, %v2343_v44  ;;  %v2344_v21 = vmul.f32 %v6490_v22, %v2343_v44 }
 0x254   : > { %v6492_v27 = vpop.permute.xlu1 %1846  ;;  %v6494_v52 = vpop.permute.xlu0 %1844 }
 0x255   : > { %8868 = vst [vmem:[#allocation146_spill] sm:$0xff] %v6492_v27  ;;  %8869 = vst [vmem:[#allocation147_spill] sm:$0xff] %v6494_v52 }
 0x256   : > { %2299 = vrot.lane.b32.xlu1 %v2291_v7, %s5300_s19  ;;  %2297 = vrot.lane.b32.xlu0 %v2290_v14, %s5300_s19  ;;  %v2364_v7 = vmul.f32 %v6490_v22, %v2363_v25  ;;  %v2346_v14 = vmul.f32 %v6501_v51, %v2343_v44 }
 0x258   : > { %v6503_v56 = vpop.permute.xlu1 %1864  ;;  %v6505_v16 = vpop.permute.xlu0 %1848 }
 0x259   : > { %8870 = vst [vmem:[#allocation148_spill] sm:$0xff] %v6503_v56  ;;  %8871 = vst [vmem:[#allocation149_spill] sm:$0xff] %v6505_v16  ;;  %v2366_v56 = vmul.f32 %v6501_v51, %v2363_v25  ;;  %v2365_v16 = vmul.f32 %v6487_v11, %v2363_v25 }
 0x25a   : > { %2352 = vrot.lane.b32.xlu1 %v2345_v37, %s5299_s22  ;;  %2350 = vrot.lane.b32.xlu0 %v2344_v21, %s5299_s22  ;;  %v2383_v37 = vstv %s4809_s8  ;;  %s4699_s8 = sld [smem:[#allocation3 + $0x2d]] }
 0x25b   : > { %v2385_v44 = vmul.f32 %v6487_v11, %v2383_v37 }
 0x25c   : > { %v6511_v54 = vpop.permute.xlu1 %1868  ;;  %v6513_v52 = vpop.permute.xlu0 %1866 }
 0x25d   : > { %8872 = vst [vmem:[#allocation150_spill] sm:$0xff] %v6511_v54  ;;  %8873 = vst [vmem:[#allocation151_spill] sm:$0xff] %v6513_v52  ;;  %v2384_v52 = vmul.f32 %v6490_v22, %v2383_v37 }
 0x25e   : > { %2370 = vrot.lane.b32.xlu1 %v2364_v7, %s5299_s22  ;;  %2354 = vrot.lane.b32.xlu0 %v2346_v14, %s5299_s22  ;;  %v2403_v7 = vstv %s4810_s13  ;;  %s6622_s13 = sld [smem:[#allocation3 + $0x51]] }
 0x25f   : > { %v2404_v25 = vmul.f32 %v6490_v22, %v2403_v7 }
 0x260   : > { %v6519_v27 = vpop.permute.xlu1 %1886  ;;  %v6521_v21 = vpop.permute.xlu0 %1884  ;;  %v952_v42 = vstv %s4699_s8  ;;  %s6769_s8 = sld [smem:[#allocation3 + $0x6b]] }
 0x261   : > { %8874 = vst [vmem:[#allocation152_spill] sm:$0xff] %v6519_v27  ;;  %8875 = vst [vmem:[#allocation153_spill] sm:$0xff] %v6521_v21 }
 0x262   : > { %2374 = vrot.lane.b32.xlu1 %v2366_v56, %s5299_s22  ;;  %2372 = vrot.lane.b32.xlu0 %v2365_v16, %s5299_s22  ;;  %v2386_v56 = vmul.f32 %v6501_v51, %v2383_v37 }
 0x264   : > { %v6527_v14 = vpop.permute.xlu1 %1904  ;;  %v6529_v54 = vpop.permute.xlu0 %1888  ;;  %v960_v20 = vstv %s6622_s13  ;;  %s6777_s13 = sld [smem:[#allocation3 + $0x57]] }
 0x265   : > { %8876 = vst [vmem:[#allocation154_spill] sm:$0xff] %v6527_v14  ;;  %8877 = vst [vmem:[#allocation155_spill] sm:$0xff] %v6529_v54  ;;  %v2406_v14 = vmul.f32 %v6501_v51, %v2403_v7  ;;  %v2405_v54 = vmul.f32 %v6487_v11, %v2403_v7 }
 0x266   : > { %2392 = vrot.lane.b32.xlu1 %v2385_v44, %s5299_s22  ;;  %2390 = vrot.lane.b32.xlu0 %v2384_v52, %s5299_s22  ;;  %v2423_v44 = vstv %s4811_s20  ;;  %s6624_s20 = sld [smem:[#allocation3 + $0x75]] }
 0x267   : > { %v2425_v37 = vmul.f32 %v6487_v11, %v2423_v44 }
 0x268   : > { %v6535_v16 = vpop.permute.xlu1 %1908  ;;  %v6537_v21 = vpop.permute.xlu0 %1906 }
 0x269   : > { %8878 = vst [vmem:[#allocation156_spill] sm:$0xff] %v6535_v16  ;;  %8879 = vst [vmem:[#allocation157_spill] sm:$0xff] %v6537_v21  ;;  %v2424_v21 = vmul.f32 %v6490_v22, %v2423_v44 }
 0x26a   : > { %2410 = vrot.lane.b32.xlu1 %v2404_v25, %s5299_s22  ;;  %2394 = vrot.lane.b32.xlu0 %v2386_v56, %s5299_s22  ;;  %v2443_v25 = vstv %s4812_s15  ;;  %s6630_s15 = sld [smem:[#allocation3 + $0xc]] }
 0x26b   : > { %v2444_v7 = vmul.f32 %v6490_v22, %v2443_v25 }
 0x26c   : > { %v6543_v27 = vpop.permute.xlu1 %1961  ;;  %v6545_v52 = vpop.permute.xlu0 %1959  ;;  %v968_v32 = vstv %s6624_s20  ;;  %s6790_s20 = sld [smem:[#allocation3 + $0x7b]] }
 0x26d   : > { %8880 = vst [vmem:[#allocation158_spill] sm:$0xff] %v6543_v27  ;;  %8881 = vst [vmem:[#allocation159_spill] sm:$0xff] %v6545_v52 }
 0x26e   : > { %2414 = vrot.lane.b32.xlu1 %v2406_v14, %s5299_s22  ;;  %2412 = vrot.lane.b32.xlu0 %v2405_v54, %s5299_s22  ;;  %v2426_v14 = vmul.f32 %v6501_v51, %v2423_v44 }
 0x270   : > { %v6551_v56 = vpop.permute.xlu1 %1979  ;;  %v6553_v16 = vpop.permute.xlu0 %1963 }
 0x271   : > { %8882 = vst [vmem:[#allocation160_spill] sm:$0xff] %v6551_v56  ;;  %8883 = vst [vmem:[#allocation161_spill] sm:$0xff] %v6553_v16  ;;  %v2446_v56 = vmul.f32 %v6501_v51, %v2443_v25  ;;  %v2445_v16 = vmul.f32 %v6487_v11, %v2443_v25 }
 0x272   : > { %2432 = vrot.lane.b32.xlu1 %v2425_v37, %s5300_s19  ;;  %2430 = vrot.lane.b32.xlu0 %v2424_v21, %s5300_s19  ;;  %v2463_v37 = vstv %s4813_s14  ;;  %s6636_s14 = sld [smem:[#allocation3 + $0x30]] }
 0x273   : > { %v2465_v44 = vmul.f32 %v6487_v11, %v2463_v37 }
 0x274   : > { %v6559_v54 = vpop.permute.xlu1 %1983  ;;  %v6561_v52 = vpop.permute.xlu0 %1981 }
 0x275   : > { %8884 = vst [vmem:[#allocation162_spill] sm:$0xff] %v6559_v54  ;;  %8885 = vst [vmem:[#allocation163_spill] sm:$0xff] %v6561_v52  ;;  %v2464_v52 = vmul.f32 %v6490_v22, %v2463_v37 }
 0x276   : > { %2450 = vrot.lane.b32.xlu1 %v2444_v7, %s5300_s19  ;;  %2434 = vrot.lane.b32.xlu0 %v2426_v14, %s5300_s19  ;;  %v2483_v7 = vstv %s4814_s23  ;;  %s6638_s23 = sld [smem:[#allocation3 + $0x54]] }
 0x278   : > { %v6567_v27 = vpop.permute.xlu1 %2001  ;;  %v6569_v21 = vpop.permute.xlu0 %1999 }
 0x279   : > { %8886 = vst [vmem:[#allocation164_spill] sm:$0xff] %v6567_v27  ;;  %8887 = vst [vmem:[#allocation165_spill] sm:$0xff] %v6569_v21 }
 0x27a   : > { %2454 = vrot.lane.b32.xlu1 %v2446_v56, %s5300_s19  ;;  %2452 = vrot.lane.b32.xlu0 %v2445_v16, %s5300_s19  ;;  %v2484_v56 = vmul.f32 %v6490_v22, %v2483_v7  ;;  %v2466_v16 = vmul.f32 %v6501_v51, %v2463_v37  ;;  %v6595_v22 = vld [vmem:[%s5487_s18 + $0x4a] sm:$0xff] }
 0x27c   : > { %v6575_v14 = vpop.permute.xlu1 %2019  ;;  %v6577_v25 = vpop.permute.xlu0 %2003 }
 0x27d   : > { %8888 = vst [vmem:[#allocation166_spill] sm:$0xff] %v6575_v14  ;;  %8889 = vst [vmem:[#allocation167_spill] sm:$0xff] %v6577_v25  ;;  %v2486_v25 = vmul.f32 %v6501_v51, %v2483_v7  ;;  %v6592_v14 = vld [vmem:[%s5487_s18 + $0x52] sm:$0xff]  ;;  %v2558_v51 = vstv %s4823_s21  ;;  %s6661_s21 = sld [smem:[#allocation3 + $0x78]] }
 0x27e   : > { %2472 = vrot.lane.b32.xlu1 %v2465_v44, %s5300_s19  ;;  %2470 = vrot.lane.b32.xlu0 %v2464_v52, %s5300_s19  ;;  %v2485_v44 = vmul.f32 %v6487_v11, %v2483_v7  ;;  %v2538_v52 = vstv %s4822_s17  ;;  %s6652_s17 = sld [smem:[#allocation3 + $0x23]] }
 0x280   : > { %v6583_v21 = vpop.permute.xlu1 %2023  ;;  %v6585_v27 = vpop.permute.xlu0 %2021 }
 0x281   : > { %8890 = vst [vmem:[#allocation168_spill] sm:$0xff] %v6583_v21  ;;  %8891 = vst [vmem:[#allocation169_spill] sm:$0xff] %v6585_v27  ;;  %v6606_v27 = vld [vmem:[%s5487_s18 + $0x5a] sm:$0x3] }
 0x282   : > { %2490 = vrot.lane.b32.xlu1 %v2484_v56, %s5300_s19  ;;  %2474 = vrot.lane.b32.xlu0 %v2466_v16, %s5300_s19  ;;  %v2540_v56 = vmul.f32 %v6592_v14, %v2538_v52  ;;  %v2539_v16 = vmul.f32 %v6595_v22, %v2538_v52 }
 0x283   : > { %v1163_v8 = vstv %s6661_s21  ;;  %s6898_s21 = sld [smem:[#allocation3 + $0x7e]] }
 0x284   : > { %v6597_v37 = vpop.permute.xlu1 %2041  ;;  %v6599_v54 = vpop.permute.xlu0 %2039 }
 0x285   : > { %8892 = vst [vmem:[#allocation170_spill] sm:$0xff] %v6597_v37  ;;  %8893 = vst [vmem:[#allocation171_spill] sm:$0xff] %v6599_v54  ;;  %v944_v37 = vstv %s6612_s29  ;;  %s6740_s29 = sld [smem:[#allocation3 + $0xf]] }
 0x286   : > { %2494 = vrot.lane.b32.xlu1 %v2486_v25, %s5300_s19  ;;  %2492 = vrot.lane.b32.xlu0 %v2485_v44, %s5300_s19  ;;  %v2559_v25 = vmul.f32 %v6595_v22, %v2558_v51  ;;  %v2541_v44 = vmul.f32 %v6606_v27, %v2538_v52  ;;  %v2560_v52 = vmul.f32 %v6592_v14, %v2558_v51 }
 0x288   : > { %v6608_v11 = vpop.permute.xlu1 %2059  ;;  %v6610_v7 = vpop.permute.xlu0 %2043 }
 0x289   : > { %8894 = vst [vmem:[#allocation172_spill] sm:$0xff] %v6608_v11  ;;  %8895 = vst [vmem:[#allocation173_spill] sm:$0xff] %v6610_v7  ;;  %v2598_v11 = vstv %s4825_s9  ;;  %s6754_s9 = sld [smem:[#allocation3 + $0x33]] }
 0x28a   : > { %2547 = vrot.lane.b32.xlu1 %v2540_v56, %s5299_s22  ;;  %2545 = vrot.lane.b32.xlu0 %v2539_v16, %s5299_s22  ;;  %v2561_v56 = vmul.f32 %v6606_v27, %v2558_v51  ;;  %v2578_v16 = vstv %s4824_s16  ;;  %s6696_s16 = sld [smem:[#allocation3 + $0x47]] }
 0x28b   : > { %v2579_v51 = vmul.f32 %v6595_v22, %v2578_v16 }
 0x28c   : > { %v6618_v21 = vpop.permute.xlu1 %2063  ;;  %v6620_v54 = vpop.permute.xlu0 %2061 }
 0x28d   : > { %8896 = vst [vmem:[#allocation174_spill] sm:$0xff] %v6618_v21  ;;  %8897 = vst [vmem:[#allocation175_spill] sm:$0xff] %v6620_v54 }
 0x28e   : > { %2565 = vrot.lane.b32.xlu1 %v2559_v25, %s5299_s22  ;;  %2549 = vrot.lane.b32.xlu0 %v2541_v44, %s5299_s22  ;;  %v2580_v25 = vmul.f32 %v6592_v14, %v2578_v16  ;;  %v5096_v44 = vld [vmem:[%s5487_s18 + $0xa] sm:$0xff] }
 0x28f   : > { %v6646_v7 = vmul.f32 %v5096_v44, %v5831_v46  ;;  %v6678_v47 = vmul.f32 %v5096_v44, %v5885_v3 }
 0x290   : > { %v6632_v21 = vpop.permute.xlu1 %2081  ;;  %v6634_v54 = vpop.permute.xlu0 %2079 }
 0x291   : > { %8898 = vst [vmem:[#allocation176_spill] sm:$0xff] %v6632_v21  ;;  %8899 = vst [vmem:[#allocation177_spill] sm:$0xff] %v6634_v54  ;;  %v5097_v21 = vld [vmem:[%s5487_s18 + $0x12] sm:$0x3] }
 0x292   : > { %2569 = vrot.lane.b32.xlu1 %v2561_v56, %s5299_s22  ;;  %2567 = vrot.lane.b32.xlu0 %v2560_v52, %s5299_s22  ;;  %v6650_v54 = vmul.f32 %v5097_v21, %v5831_v46  ;;  %v6655_v56 = vmul.f32 %v5097_v21, %v5848_v28  ;;  %v6658_v52 = vmul.f32 %v5096_v44, %v5848_v28 }
 0x293   : > { %v6668_v46 = vmul.f32 %v5096_v44, %v5874_v60  ;;  %v6671_v12 = vmul.f32 %v5097_v21, %v5874_v60  ;;  %v6674_v28 = vmul.f32 %v5097_v21, %v5885_v3  ;;  %v6686_v60 = vmul.f32 %v5098_v2, %v944_v37  ;;  %v5099_v21 = vld [vmem:[%s5487_s18 + $0x18] sm:$0xff]  ;;  %v5100_v44 = vld [vmem:[%s5487_s18 + $0x28] sm:$0x3] }
 0x294   : > { %v6663_v40 = vpop.permute.xlu1 %2099  ;;  %v6665_v50 = vpop.permute.xlu0 %2083  ;;  %v6689_v23 = vmul.f32 %v5099_v21, %v944_v37  ;;  %v6691_v3 = vmul.f32 %v5099_v21, %v952_v42  ;;  %v6694_v38 = vmul.f32 %v5100_v44, %v944_v37  ;;  %v6711_v37 = vmul.f32 %v5099_v21, %v968_v32 }
 0x295   : > { %8900 = vst [vmem:[#allocation178_spill] sm:$0xff] %v6663_v40  ;;  %8901 = vst [vmem:[#allocation179_spill] sm:$0xff] %v6665_v50  ;;  %v2599_v50 = vmul.f32 %v6595_v22, %v2598_v11  ;;  %v2581_v40 = vmul.f32 %v6606_v27, %v2578_v16  ;;  %v6702_v16 = vmul.f32 %v5098_v2, %v960_v20 }
 0x296   : > { %2587 = vrot.lane.b32.xlu1 %v2580_v25, %s5299_s22  ;;  %2585 = vrot.lane.b32.xlu0 %v2579_v51, %s5299_s22  ;;  %8902 = vst [vmem:[#allocation180_spill] sm:$0xff] %v6686_v60  ;;  %8903 = vst [vmem:[#allocation181_spill] sm:$0xff] %v6689_v23  ;;  %v6698_v25 = vmul.f32 %v5100_v44, %v952_v42  ;;  %v6700_v51 = vmul.f32 %v5098_v2, %v952_v42  ;;  %v1139_v60 = vstv %s6630_s15  ;;  %s6803_s15 = sld [smem:[#allocation3 + $0x8f]] }
 0x297   : > { %8904 = vst [vmem:[#allocation182_spill] sm:$0xff] %v6691_v3  ;;  %8905 = vst [vmem:[#allocation183_spill] sm:$0xff] %v6694_v38  ;;  %v6709_v3 = vmul.f32 %v5099_v21, %v960_v20  ;;  %v6713_v38 = vmul.f32 %v5100_v44, %v960_v20  ;;  %v6716_v42 = vmul.f32 %v5100_v44, %v968_v32  ;;  %v5101_v21 = vld [vmem:[%s5487_s18 + $0x21] sm:$0xff]  ;;  %v5102_v20 = vld [vmem:[%s5487_s18 + $0x19] sm:$0xff]  ;;  %v2618_v44 = vstv %s6652_s17  ;;  %s6892_s17 = sld [smem:[#allocation3 + $0x5a]] }
 0x298   : > { %8906 = vst [vmem:[#allocation184_spill] sm:$0xff] %v6698_v25  ;;  %8907 = vst [vmem:[#allocation185_spill] sm:$0xff] %v6700_v51  ;;  %v6705_v62 = vpop.permute.xlu1 %2103  ;;  %v6707_v23 = vpop.permute.xlu0 %2101  ;;  %v1147_v25 = vstv %s6636_s14  ;;  %v1155_v51 = vstv %s6638_s23  ;;  %s6859_s14 = sld [smem:[#allocation3 + $0x12]] }
 0x299   : > { %8908 = vst [vmem:[#allocation186_spill] sm:$0xff] %v6702_v16  ;;  %8909 = vst [vmem:[#allocation187_spill] sm:$0xff] %v6705_v62  ;;  %v2601_v62 = vmul.f32 %v6606_v27, %v2598_v11  ;;  %v6723_v16 = vmul.f32 %v5098_v2, %v968_v32  ;;  %s6867_s23 = sld [smem:[#allocation3 + $0x36]] }
 0x29a   : > { %8910 = vst [vmem:[#allocation188_spill] sm:$0xff] %v6707_v23  ;;  %8911 = vst [vmem:[#allocation189_spill] sm:$0xff] %v6709_v3  ;;  %2605 = vrot.lane.b32.xlu1 %v2599_v50, %s5299_s22  ;;  %2589 = vrot.lane.b32.xlu0 %v2581_v40, %s5299_s22  ;;  %v2600_v23 = vmul.f32 %v6592_v14, %v2598_v11  ;;  %v6734_v3 = vmul.f32 %v5102_v20, %v1147_v25  ;;  %v5103_v50 = vld [vmem:[%s5487_s18 + $0x29] sm:$0x3] }
 0x29b   : > { %8912 = vst [vmem:[#allocation190_spill] sm:$0xff] %v6711_v37  ;;  %8913 = vst [vmem:[#allocation191_spill] sm:$0xff] %v6713_v38  ;;  %v6726_v37 = vmul.f32 %v5101_v21, %v1139_v60  ;;  %v6729_v38 = vmul.f32 %v5102_v20, %v1139_v60  ;;  %v6737_v40 = vmul.f32 %v5103_v50, %v1139_v60 }
 0x29c   : > { %8914 = vst [vmem:[#allocation192_spill] sm:$0xff] %v6716_v42  ;;  %v602_v42 = vadd.f32 %v5793_v48, %v5720_v30  ;;  %v6742_v2 = vpop.permute.xlu1 %2157  ;;  %v6744_v32 = vpop.permute.xlu0 %2155  ;;  %v603_v11 = vadd.f32 %v5799_v58, %v5740_v55  ;;  %v6752_v30 = vmul.f32 %v5101_v21, %v1155_v51  ;;  %v6756_v48 = vmul.f32 %v5102_v20, %v1155_v51 }
 0x29d   : > { %8915 = vst [vmem:[#allocation193_spill] sm:$0xff] %v6726_v37  ;;  %8916 = vst [vmem:[#allocation194_spill] sm:$0xff] %v6729_v38  ;;  %v6748_v38 = vmul.f32 %v5103_v50, %v1147_v25  ;;  %v6750_v37 = vmul.f32 %v5101_v21, %v1147_v25  ;;  %v2620_v60 = vmul.f32 %v6592_v14, %v2618_v44 }
 0x29e   : > { %8917 = vst [vmem:[#allocation195_spill] sm:$0xff] %v6742_v2  ;;  %8918 = vst [vmem:[#allocation196_spill] sm:$0xff] %v6744_v32  ;;  %2609 = vrot.lane.b32.xlu1 %v2601_v62, %s5299_s22  ;;  %2607 = vrot.lane.b32.xlu0 %v2600_v23, %s5299_s22  ;;  %v2619_v32 = vmul.f32 %v6595_v22, %v2618_v44  ;;  %v623_v55 = vadd.f32 %v5805_v63, %v5754_v10  ;;  %v2638_v2 = vstv %s6696_s16  ;;  %s6949_s16 = sld [smem:[#allocation3 + $0x15]] }
 0x29f   : > { %8919 = vst [vmem:[#allocation197_spill] sm:$0xff] %v6752_v30  ;;  %8920 = vst [vmem:[#allocation198_spill] sm:$0xff] %v6756_v48  ;;  %v622_v58 = vadd.f32 %v5807_v0, %v5756_v13  ;;  %v6766_v25 = vmul.f32 %v5102_v20, %v1163_v8  ;;  %v642_v62 = vadd.f32 %v5813_v6, %v5769_v4 }
 0x2a0   : > { %v682_v23 = vadd.f32 %v5846_v26, %v602_v42  ;;  %v683_v48 = vadd.f32 %v5862_v43, %v603_v11  ;;  %v6775_v30 = vmul.f32 %v5103_v50, %v1155_v51  ;;  %v6779_v10 = vpop.permute.xlu1 %2175  ;;  %v6781_v63 = vpop.permute.xlu0 %2159  ;;  %v643_v13 = vadd.f32 %v5821_v9, %v5783_v39 }
 0x2a1   : > { %8921 = vst [vmem:[#allocation199_spill] sm:$0xff] %v6779_v10  ;;  %8922 = vst [vmem:[#allocation200_spill] sm:$0xff] %v6781_v63  ;;  %v663_v0 = vadd.f32 %v5827_v18, %v5789_v34  ;;  %v703_v4 = vadd.f32 %v5870_v41, %v623_v55  ;;  %v702_v6 = vadd.f32 %v5872_v35, %v622_v58  ;;  %v1334_v42 = vstv %s6740_s29  ;;  %s6961_s29 = sld [smem:[#allocation3 + $0x39]]  ;;  %v8982_v63 = vld [vmem:[#allocation48_spill] sm:$0xff] }
 0x2a2   : > { %v722_v26 = vadd.f32 %v5883_v59, %v642_v62  ;;  %2627 = vrot.lane.b32.xlu1 %v2620_v60, %s5300_s19  ;;  %2625 = vrot.lane.b32.xlu0 %v2619_v32, %s5300_s19  ;;  %v2639_v43 = vmul.f32 %v6595_v22, %v2638_v2  ;;  %v2621_v39 = vmul.f32 %v6606_v27, %v2618_v44  ;;  %v2658_v32 = vstv %s6769_s8  ;;  %s6991_s8 = sld [smem:[#allocation3 + $0x81]] }
 0x2a3   : > { %v662_v34 = vadd.f32 %v5829_v19, %v5791_v61  ;;  %v723_v9 = vadd.f32 %v5897_v17, %v643_v13  ;;  %v6799_v18 = vmul.f32 %v5103_v50, %v1163_v8  ;;  %v6801_v41 = vmul.f32 %v5101_v21, %v1163_v8 }
 0x2a4   : > { %v743_v35 = vadd.f32 %v5905_v15, %v663_v0  ;;  %v753_v59 = vadd.f32 %v6646_v7, %v682_v23  ;;  %v754_v51 = vadd.f32 %v6650_v54, %v683_v48  ;;  %v6809_v20 = vpop.permute.xlu1 %2179  ;;  %v6811_v61 = vpop.permute.xlu0 %2177  ;;  %v762_v8 = vadd.f32 %v6655_v56, %v703_v4  ;;  %v5105_v56 = vld [vmem:[%s5487_s18 + $0x1a] sm:$0xff]  ;;  %v5106_v48 = vld [vmem:[%s5487_s18 + $0x2a] sm:$0x3] }
 0x2a5   : > { %8923 = vst [vmem:[#allocation201_spill] sm:$0xff] %v6809_v20  ;;  %8924 = vst [vmem:[#allocation202_spill] sm:$0xff] %v6811_v61  ;;  %v742_v19 = vadd.f32 %v5907_v1, %v662_v34  ;;  %v761_v17 = vadd.f32 %v6658_v52, %v702_v6  ;;  %v1342_v15 = vstv %s6754_s9  ;;  %v769_v7 = vadd.f32 %v6668_v46, %v722_v26  ;;  %v5104_v1 = vld [vmem:[%s5487_s18 + $0x22] sm:$0xff]  ;;  %v8969_v61 = vld [vmem:[#allocation43_spill] sm:$0xff]  ;;  %s6980_s9 = sld [smem:[#allocation3 + $0x5d]] }
 0x2a6   : > { %2645 = vrot.lane.b32.xlu1 %v2639_v43, %s5300_s19  ;;  %2629 = vrot.lane.b32.xlu0 %v2621_v39, %s5300_s19  ;;  %v2641_v54 = vmul.f32 %v6606_v27, %v2638_v2  ;;  %v2640_v21 = vmul.f32 %v6592_v14, %v2638_v2  ;;  %v770_v44 = vadd.f32 %v6671_v12, %v723_v9  ;;  %v1350_v55 = vstv %s6777_s13  ;;  %v8972_v20 = vld [vmem:[#allocation50_spill] sm:$0xff]  ;;  %s7040_s13 = sld [smem:[#allocation3 + $0x18]] }
 0x2a7   : > { %v6824_v50 = vmul.f32 %v5104_v1, %v1334_v42  ;;  %v6827_v52 = vmul.f32 %v5105_v56, %v1334_v42  ;;  %v778_v46 = vadd.f32 %v6674_v28, %v743_v35  ;;  %v6831_v11 = vmul.f32 %v5105_v56, %v1342_v15  ;;  %v8930_v35 = vld [vmem:[#allocation22_spill] sm:$0xff] }
 0x2a8   : > { %v6834_v60 = vmul.f32 %v5106_v48, %v1334_v42  ;;  %v6837_v58 = vpop.permute.xlu1 %2197  ;;  %v6839_v12 = vpop.permute.xlu0 %2195  ;;  %v797_v2 = vadd.f32 %v5913_v24, %v753_v59  ;;  %v796_v62 = vadd.f32 %v5915_v5, %v5858_v53  ;;  %v777_v23 = vadd.f32 %v6678_v47, %v742_v19  ;;  %v8931_v19 = vld [vmem:[#allocation21_spill] sm:$0xff] }
 0x2a9   : > { %8925 = vst [vmem:[#allocation203_spill] sm:$0xff] %v6837_v58  ;;  %8926 = vst [vmem:[#allocation204_spill] sm:$0xff] %v6839_v12  ;;  %v6845_v13 = vmul.f32 %v5106_v48, %v1342_v15  ;;  %v6847_v28 = vmul.f32 %v5104_v1, %v1342_v15  ;;  %v1358_v0 = vstv %s6790_s20  ;;  %v2660_v4 = vmul.f32 %v6592_v14, %v2658_v32  ;;  %v8968_v12 = vld [vmem:[#allocation42_spill] sm:$0xff]  ;;  %s7048_s20 = sld [smem:[#allocation3 + $0x3c]] }
 0x2aa   : > { %2649 = vrot.lane.b32.xlu1 %v2641_v54, %s5300_s19  ;;  %2647 = vrot.lane.b32.xlu0 %v2640_v21, %s5300_s19  ;;  %v2659_v6 = vmul.f32 %v6595_v22, %v2658_v32  ;;  %v816_v24 = vadd.f32 %v5921_v33, %v5868_v29  ;;  %v798_v53 = vadd.f32 %v5923_v36, %v754_v51  ;;  %v2678_v47 = vstv %s6803_s15  ;;  %v8929_v36 = vld [vmem:[#allocation20_spill] sm:$0xff]  ;;  %s7071_s15 = sld [smem:[#allocation3 + $0x60]] }
 0x2ab   : > { %v6857_v5 = vmul.f32 %v5104_v1, %v1350_v55  ;;  %v818_v26 = vadd.f32 %v5929_v45, %v762_v8  ;;  %v817_v43 = vadd.f32 %v5931_v49, %v761_v17  ;;  %v877_v39 = vadd.f32 %v5967_v31, %v797_v2  ;;  %v8932_v8 = vld [vmem:[#allocation23_spill] sm:$0xff]  ;;  %v8933_v17 = vld [vmem:[#allocation24_spill] sm:$0xff] }
 0x2ac   : > { %v6865_v34 = vmul.f32 %v5105_v56, %v1350_v55  ;;  %v6869_v9 = vpop.permute.xlu1 %2215  ;;  %v6871_v29 = vpop.permute.xlu0 %2199  ;;  %v837_v33 = vadd.f32 %v5937_v57, %v769_v7  ;;  %v836_v59 = vadd.f32 %v8930_v35, %v8929_v36  ;;  %v6876_v51 = vmul.f32 %v5105_v56, %v1358_v0  ;;  %v8934_v7 = vld [vmem:[#allocation27_spill] sm:$0xff]  ;;  %v8935_v56 = vld [vmem:[#allocation25_spill] sm:$0xff] }
 0x2ad   : > { %8927 = vst [vmem:[#allocation205_spill] sm:$0xff] %v6869_v9  ;;  %8928 = vst [vmem:[#allocation206_spill] sm:$0xff] %v6871_v29  ;;  %v6878_v45 = vmul.f32 %v5106_v48, %v1350_v55  ;;  %v6880_v49 = vmul.f32 %v5106_v48, %v1358_v0  ;;  %v2679_v31 = vmul.f32 %v6595_v22, %v2678_v47  ;;  %v8936_v55 = vld [vmem:[#allocation26_spill] sm:$0xff]  ;;  %v8938_v22 = vld [vmem:[#allocation180_spill] sm:$0xff] }
 0x2ae   : > { %2667 = vrot.lane.b32.xlu1 %v2660_v4, %s5300_s19  ;;  %2665 = vrot.lane.b32.xlu0 %v2659_v6, %s5300_s19  ;;  %v2661_v42 = vmul.f32 %v6606_v27, %v2658_v32  ;;  %v856_v57 = vadd.f32 %v8932_v8, %v8931_v19  ;;  %v838_v15 = vadd.f32 %v8933_v17, %v770_v44  ;;  %v8937_v4 = vld [vmem:[#allocation28_spill] sm:$0xff]  ;;  %v8943_v19 = vld [vmem:[#allocation31_spill] sm:$0xff]  ;;  %v8945_v17 = vld [vmem:[#allocation33_spill] sm:$0xff] }
 0x2af   : > { %v876_v54 = vadd.f32 %v8934_v7, %v796_v62  ;;  %v6890_v21 = vmul.f32 %v5104_v1, %v1358_v0  ;;  %v858_v48 = vadd.f32 %v8935_v56, %v778_v46  ;;  %v857_v2 = vadd.f32 %v8936_v55, %v777_v23  ;;  %v8941_v62 = vld [vmem:[#allocation29_spill] sm:$0xff]  ;;  %v8942_v0 = vld [vmem:[#allocation30_spill] sm:$0xff]  ;;  %v8944_v8 = vld [vmem:[#allocation32_spill] sm:$0xff] }
 0x2b0   : > { %v896_v6 = vadd.f32 %v8937_v4, %v816_v24  ;;  %v949_v36 = vadd.f32 %v8938_v22, %v877_v39  ;;  %v6900_v32 = vpop.permute.xlu1 %2219  ;;  %v6902_v44 = vpop.permute.xlu0 %2217  ;;  %v878_v1 = vadd.f32 %v8941_v62, %v798_v53  ;;  %v898_v35 = vadd.f32 %v8942_v0, %v818_v26  ;;  %v8946_v56 = vld [vmem:[#allocation34_spill] sm:$0xff]  ;;  %v8947_v55 = vld [vmem:[#allocation35_spill] sm:$0xff]  ;;  %v8948_v26 = vld [vmem:[#allocation181_spill] sm:$0xff] }
 0x2b1   : > { %8939 = vst [vmem:[#allocation20_spill] sm:$0xff] %v6900_v32  ;;  %8940 = vst [vmem:[#allocation22_spill] sm:$0xff] %v6902_v44  ;;  %v897_v46 = vadd.f32 %v8943_v19, %v817_v43  ;;  %v917_v23 = vadd.f32 %v8944_v8, %v837_v33  ;;  %v916_v24 = vadd.f32 %v8945_v17, %v836_v59  ;;  %v1530_v22 = vstv %s6859_s14  ;;  %v8949_v33 = vld [vmem:[#allocation36_spill] sm:$0xff]  ;;  %v8950_v59 = vld [vmem:[#allocation37_spill] sm:$0xff]  ;;  %s7078_s14 = sld [smem:[#allocation3 + $0x84]] }
 0x2b2   : > { %2685 = vrot.lane.b32.xlu1 %v2679_v31, %s5300_s19  ;;  %2669 = vrot.lane.b32.xlu0 %v2661_v42, %s5300_s19  ;;  %v2681_v39 = vmul.f32 %v6606_v27, %v2678_v47  ;;  %v2680_v7 = vmul.f32 %v6592_v14, %v2678_v47  ;;  %v936_v53 = vadd.f32 %v8946_v56, %v856_v57  ;;  %v8951_v31 = vld [vmem:[#allocation182_spill] sm:$0xff]  ;;  %v1538_v42 = vstv %s6867_s23  ;;  %v8954_v14 = vld [vmem:[#allocation183_spill] sm:$0xff]  ;;  %v8955_v57 = vld [vmem:[#allocation184_spill] sm:$0xff]  ;;  %s7127_s23 = sld [smem:[#allocation3 + $0x1b]] }
 0x2b3   : > { %v918_v4 = vadd.f32 %v8947_v55, %v838_v15  ;;  %v948_v43 = vadd.f32 %v8948_v26, %v876_v54  ;;  %v938_v62 = vadd.f32 %v8949_v33, %v858_v48  ;;  %v937_v0 = vadd.f32 %v8950_v59, %v857_v2  ;;  %v8956_v17 = vld [vmem:[#allocation185_spill] sm:$0xff]  ;;  %v8957_v56 = vld [vmem:[#allocation186_spill] sm:$0xff]  ;;  %v5107_v26 = vld [vmem:[%s5487_s18 + $0x38] sm:$0xff] }
 0x2b4   : > { %v956_v19 = vadd.f32 %v8951_v31, %v896_v6  ;;  %v6921_v8 = vpop.permute.xlu1 %2237  ;;  %v6923_v27 = vpop.permute.xlu0 %2235  ;;  %v950_v47 = vadd.f32 %v8954_v14, %v878_v1  ;;  %v958_v15 = vadd.f32 %v8955_v57, %v898_v35  ;;  %v957_v54 = vadd.f32 %v8956_v17, %v897_v46  ;;  %v8958_v48 = vld [vmem:[#allocation189_spill] sm:$0xff]  ;;  %v5108_v33 = vld [vmem:[%s5487_s18 + $0x30] sm:$0xff]  ;;  %v8960_v31 = vld [vmem:[#allocation191_spill] sm:$0xff] }
 0x2b5   : > { %8952 = vst [vmem:[#allocation21_spill] sm:$0xff] %v6921_v8  ;;  %8953 = vst [vmem:[#allocation23_spill] sm:$0xff] %v6923_v27  ;;  %v965_v55 = vadd.f32 %v8957_v56, %v917_v23  ;;  %v964_v2 = vadd.f32 %v8958_v48, %v916_v24  ;;  %v6931_v6 = vmul.f32 %v5107_v26, %v1530_v22  ;;  %v8959_v1 = vld [vmem:[#allocation190_spill] sm:$0xff]  ;;  %v1546_v23 = vstv %s6892_s17  ;;  %v8961_v57 = vld [vmem:[#allocation192_spill] sm:$0xff]  ;;  %s7135_s17 = sld [smem:[#allocation3 + $0x3f]] }
 0x2b6   : > { %v6934_v59 = vmul.f32 %v5108_v33, %v1530_v22  ;;  %2689 = vrot.lane.b32.xlu1 %v2681_v39, %s5300_s19  ;;  %2687 = vrot.lane.b32.xlu0 %v2680_v7, %s5300_s19  ;;  %v972_v35 = vadd.f32 %v8959_v1, %v936_v53  ;;  %v966_v14 = vadd.f32 %v8960_v31, %v918_v4  ;;  %v5109_v56 = vld [vmem:[%s5487_s18 + $0x40] sm:$0x3]  ;;  %v1554_v44 = vstv %s6898_s21  ;;  %v8964_v53 = vld [vmem:[#allocation38_spill] sm:$0xff]  ;;  %v8965_v4 = vld [vmem:[#allocation39_spill] sm:$0xff]  ;;  %s7158_s21 = sld [smem:[#allocation3 + $0x63]] }
 0x2b7   : > { %v6940_v46 = vmul.f32 %v5108_v33, %v1538_v42  ;;  %v974_v17 = vadd.f32 %v8961_v57, %v938_v62  ;;  %v973_v24 = vadd.f32 %v6723_v16, %v937_v0  ;;  %v6946_v48 = vmul.f32 %v5109_v56, %v1530_v22  ;;  %v8966_v16 = vld [vmem:[#allocation40_spill] sm:$0xff]  ;;  %v8967_v62 = vld [vmem:[#allocation41_spill] sm:$0xff]  ;;  %v8987_v27 = vld [vmem:[#allocation59_spill] sm:$0xff] }
 0x2b8   : > { %v6951_v39 = vpop.permute.xlu1 %2255  ;;  %v6953_v7 = vpop.permute.xlu0 %2239  ;;  %v993_v1 = vadd.f32 %v8964_v53, %v949_v36  ;;  %v992_v31 = vadd.f32 %v8965_v4, %v948_v43  ;;  %v6957_v32 = vmul.f32 %v5109_v56, %v1538_v42  ;;  %v6959_v29 = vmul.f32 %v5107_v26, %v1538_v42  ;;  %v8970_v42 = vld [vmem:[#allocation44_spill] sm:$0xff] }
 0x2b9   : > { %8962 = vst [vmem:[#allocation24_spill] sm:$0xff] %v6951_v39  ;;  %8963 = vst [vmem:[#allocation27_spill] sm:$0xff] %v6953_v7  ;;  %v1012_v22 = vadd.f32 %v8966_v16, %v956_v19  ;;  %v994_v0 = vadd.f32 %v8967_v62, %v950_v47  ;;  %v6965_v57 = vmul.f32 %v5107_v26, %v1546_v23  ;;  %v8971_v7 = vld [vmem:[#allocation45_spill] sm:$0xff] }
 0x2ba   : > { %v6967_v9 = vmul.f32 %v5108_v33, %v1546_v23  ;;  %v1014_v58 = vadd.f32 %v8968_v12, %v958_v15  ;;  %v1013_v36 = vadd.f32 %v8969_v61, %v957_v54  ;;  %v6971_v53 = vmul.f32 %v5108_v33, %v1554_v44  ;;  %v8975_v12 = vld [vmem:[#allocation46_spill] sm:$0xff]  ;;  %v8976_v15 = vld [vmem:[#allocation47_spill] sm:$0xff] }
 0x2bb   : > { %v6973_v43 = vmul.f32 %v5109_v56, %v1546_v23  ;;  %v1033_v4 = vadd.f32 %v8970_v42, %v965_v55  ;;  %v1032_v39 = vadd.f32 %v8971_v7, %v964_v2  ;;  %v1073_v19 = vadd.f32 %v8972_v20, %v993_v1  ;;  %v8977_v33 = vld [vmem:[#allocation51_spill] sm:$0xff]  ;;  %v8978_v20 = vld [vmem:[#allocation52_spill] sm:$0xff]  ;;  %v8980_v1 = vld [vmem:[#allocation54_spill] sm:$0xff] }
 0x2bc   : > { %v6978_v16 = vmul.f32 %v5109_v56, %v1554_v44  ;;  %v6982_v47 = vpop.permute.xlu1 %2259  ;;  %v6984_v62 = vpop.permute.xlu0 %2257  ;;  %v1052_v61 = vadd.f32 %v8975_v12, %v972_v35  ;;  %v1034_v54 = vadd.f32 %v8976_v15, %v966_v14  ;;  %v1072_v23 = vadd.f32 %v8977_v33, %v992_v31  ;;  %v8979_v56 = vld [vmem:[#allocation53_spill] sm:$0xff]  ;;  %v8984_v14 = vld [vmem:[#allocation56_spill] sm:$0xff] }
 0x2bd   : > { %8973 = vst [vmem:[#allocation25_spill] sm:$0xff] %v6982_v47  ;;  %8974 = vst [vmem:[#allocation26_spill] sm:$0xff] %v6984_v62  ;;  %v6989_v55 = vmul.f32 %v5107_v26, %v1554_v44  ;;  %v1092_v2 = vadd.f32 %v8978_v20, %v1012_v22  ;;  %v1074_v7 = vadd.f32 %v8979_v56, %v994_v0  ;;  %v8981_v47 = vld [vmem:[#allocation55_spill] sm:$0xff]  ;;  %v8983_v12 = vld [vmem:[#allocation49_spill] sm:$0xff]  ;;  %v1725_v56 = vstv %s6949_s16  ;;  %s7165_s16 = sld [smem:[#allocation3 + $0x87]] }
 0x2be   : > { %v1094_v42 = vadd.f32 %v8980_v1, %v1014_v58  ;;  %v1093_v62 = vadd.f32 %v8981_v47, %v1013_v36  ;;  %v1054_v35 = vadd.f32 %v8982_v63, %v974_v17  ;;  %v1053_v10 = vadd.f32 %v8983_v12, %v973_v24  ;;  %v8985_v31 = vld [vmem:[#allocation57_spill] sm:$0xff]  ;;  %v8986_v26 = vld [vmem:[#allocation58_spill] sm:$0xff]  ;;  %v8991_v63 = vld [vmem:[#allocation60_spill] sm:$0xff] }
 0x2bf   : > { %v1113_v15 = vadd.f32 %v8984_v14, %v1033_v4  ;;  %v1112_v44 = vadd.f32 %v8985_v31, %v1032_v39  ;;  %v1132_v33 = vadd.f32 %v8986_v26, %v1052_v61  ;;  %v1114_v22 = vadd.f32 %v8987_v27, %v1034_v54  ;;  %v8988_v20 = vld [vmem:[#allocation193_spill] sm:$0xff]  ;;  %v8993_v4 = vld [vmem:[#allocation194_spill] sm:$0xff]  ;;  %v5110_v26 = vld [vmem:[%s5487_s18 + $0x39] sm:$0xff] }
 0x2c0   : > { %v1144_v0 = vadd.f32 %v8988_v20, %v1073_v19  ;;  %v7005_v58 = vpop.permute.xlu1 %2277  ;;  %v7007_v36 = vpop.permute.xlu0 %2275  ;;  %v1134_v17 = vadd.f32 %v8991_v63, %v1054_v35  ;;  %v8992_v24 = vld [vmem:[#allocation61_spill] sm:$0xff]  ;;  %v1143_v39 = vadd.f32 %v8993_v4, %v1072_v23  ;;  %v1733_v1 = vstv %s6961_s29  ;;  %v8995_v31 = vld [vmem:[#allocation198_spill] sm:$0xff]  ;;  %s7214_s29 = sld [smem:[#allocation3 + $0x1e]] }
 0x2c1   : > { %8989 = vst [vmem:[#allocation28_spill] sm:$0xff] %v7005_v58  ;;  %8990 = vst [vmem:[#allocation180_spill] sm:$0xff] %v7007_v36  ;;  %v1133_v47 = vadd.f32 %v8992_v24, %v1053_v10  ;;  %v1151_v61 = vadd.f32 %v6734_v3, %v1092_v2  ;;  %v1145_v27 = vadd.f32 %v6737_v40, %v1074_v7  ;;  %v8994_v12 = vld [vmem:[#allocation197_spill] sm:$0xff]  ;;  %v5111_v20 = vld [vmem:[%s5487_s18 + $0x31] sm:$0xff]  ;;  %v1749_v63 = vstv %s6991_s8  ;;  %s7245_s8 = sld [smem:[#allocation3 + $0x66]] }
 0x2c2   : > { %v1153_v19 = vadd.f32 %v6748_v38, %v1094_v42  ;;  %v1152_v54 = vadd.f32 %v6750_v37, %v1093_v62  ;;  %v1160_v14 = vadd.f32 %v8994_v12, %v1113_v15  ;;  %v1159_v35 = vadd.f32 %v8995_v31, %v1112_v44  ;;  %v5112_v15 = vld [vmem:[%s5487_s18 + $0x41] sm:$0x3]  ;;  %v9002_v31 = vld [vmem:[#allocation66_spill] sm:$0xff] }
 0x2c3   : > { %v7020_v10 = vmul.f32 %v5110_v26, %v1725_v56  ;;  %v7023_v23 = vmul.f32 %v5111_v20, %v1725_v56  ;;  %v1167_v3 = vadd.f32 %v6766_v25, %v1132_v33  ;;  %v1161_v40 = vadd.f32 %v6775_v30, %v1114_v22  ;;  %v8998_v25 = vld [vmem:[#allocation62_spill] sm:$0xff]  ;;  %v8999_v30 = vld [vmem:[#allocation63_spill] sm:$0xff]  ;;  %v9000_v12 = vld [vmem:[#allocation64_spill] sm:$0xff] }
 0x2c4   : > { %v7027_v2 = vmul.f32 %v5111_v20, %v1733_v1  ;;  %v1741_v38 = vstv %s6980_s9  ;;  %v7030_v7 = vpop.permute.xlu1 %2295  ;;  %v7032_v37 = vpop.permute.xlu0 %2279  ;;  %v1169_v62 = vadd.f32 %v6799_v18, %v1134_v17  ;;  %v1168_v42 = vadd.f32 %v6801_v41, %v1133_v47  ;;  %v9001_v17 = vld [vmem:[#allocation65_spill] sm:$0xff]  ;;  %v9006_v36 = vld [vmem:[#allocation68_spill] sm:$0xff]  ;;  %s7222_s9 = sld [smem:[#allocation3 + $0x42]] }
 0x2c5   : > { %8996 = vst [vmem:[#allocation29_spill] sm:$0xff] %v7030_v7  ;;  %8997 = vst [vmem:[#allocation30_spill] sm:$0xff] %v7032_v37  ;;  %v7037_v44 = vmul.f32 %v5112_v15, %v1725_v56  ;;  %v1188_v33 = vadd.f32 %v8998_v25, %v1144_v0  ;;  %v1187_v22 = vadd.f32 %v8999_v30, %v1143_v39  ;;  %v9003_v7 = vld [vmem:[#allocation67_spill] sm:$0xff] }
 0x2c6   : > { %v7044_v24 = vmul.f32 %v5112_v15, %v1733_v1  ;;  %v7046_v4 = vmul.f32 %v5110_v26, %v1733_v1  ;;  %v1207_v18 = vadd.f32 %v9000_v12, %v1151_v61  ;;  %v1189_v41 = vadd.f32 %v9001_v17, %v1145_v27  ;;  %v9007_v12 = vld [vmem:[#allocation69_spill] sm:$0xff]  ;;  %v9008_v17 = vld [vmem:[#allocation74_spill] sm:$0xff] }
 0x2c7   : > { %v7052_v47 = vmul.f32 %v5110_v26, %v1741_v38  ;;  %v7054_v56 = vmul.f32 %v5111_v20, %v1741_v38  ;;  %v1209_v37 = vadd.f32 %v9002_v31, %v1153_v19  ;;  %v1208_v0 = vadd.f32 %v9003_v7, %v1152_v54  ;;  %v9010_v19 = vld [vmem:[#allocation70_spill] sm:$0xff] }
 0x2c8   : > { %v7058_v25 = vmul.f32 %v5111_v20, %v1749_v63  ;;  %v7060_v39 = vmul.f32 %v5112_v15, %v1741_v38  ;;  %v7062_v1 = vpop.permute.xlu1 %2299  ;;  %v7064_v30 = vpop.permute.xlu0 %2297  ;;  %v1228_v61 = vadd.f32 %v9006_v36, %v1160_v14  ;;  %v1227_v27 = vadd.f32 %v9007_v12, %v1159_v35  ;;  %v9011_v20 = vld [vmem:[#allocation71_spill] sm:$0xff]  ;;  %v9014_v36 = vld [vmem:[#allocation76_spill] sm:$0xff]  ;;  %v9015_v35 = vld [vmem:[#allocation77_spill] sm:$0xff] }
 0x2c9   : > { %9004 = vst [vmem:[#allocation31_spill] sm:$0xff] %v7062_v1  ;;  %9005 = vst [vmem:[#allocation32_spill] sm:$0xff] %v7064_v30  ;;  %v1268_v58 = vadd.f32 %v9008_v17, %v1188_v33  ;;  %v7069_v8 = vmul.f32 %v5112_v15, %v1749_v63  ;;  %v1247_v54 = vadd.f32 %v9010_v19, %v1167_v3  ;;  %v9012_v38 = vld [vmem:[#allocation75_spill] sm:$0xff]  ;;  %v9016_v33 = vld [vmem:[#allocation78_spill] sm:$0xff] }
 0x2ca   : > { %v1229_v7 = vadd.f32 %v9011_v20, %v1161_v40  ;;  %v1267_v31 = vadd.f32 %v9012_v38, %v1187_v22  ;;  %v7076_v1 = vmul.f32 %v5110_v26, %v1749_v63  ;;  %v1287_v14 = vadd.f32 %v9014_v36, %v1207_v18  ;;  %v9017_v17 = vld [vmem:[#allocation79_spill] sm:$0xff]  ;;  %v9019_v19 = vld [vmem:[#allocation73_spill] sm:$0xff]  ;;  %v9020_v20 = vld [vmem:[#allocation80_spill] sm:$0xff] }
 0x2cb   : > { %9009 = vst [vmem:[#allocation33_spill] sm:$0xff] %v7069_v8  ;;  %v1269_v12 = vadd.f32 %v9015_v35, %v1189_v41  ;;  %v1289_v15 = vadd.f32 %v9016_v33, %v1209_v37  ;;  %v1288_v30 = vadd.f32 %v9017_v17, %v1208_v0  ;;  %v9018_v8 = vld [vmem:[#allocation72_spill] sm:$0xff]  ;;  %v1248_v40 = vadd.f32 %v9019_v19, %v1168_v42  ;;  %v9021_v38 = vld [vmem:[#allocation81_spill] sm:$0xff]  ;;  %v9024_v18 = vld [vmem:[#allocation82_spill] sm:$0xff] }
 0x2cc   : > { %9013 = vst [vmem:[#allocation34_spill] sm:$0xff] %v7076_v1  ;;  %v1249_v3 = vadd.f32 %v9018_v8, %v1169_v62  ;;  %v1308_v22 = vadd.f32 %v9020_v20, %v1228_v61  ;;  %v1307_v26 = vadd.f32 %v9021_v38, %v1227_v27  ;;  %v7088_v63 = vpop.permute.xlu1 %2352  ;;  %v7090_v1 = vpop.permute.xlu0 %2350  ;;  %v1327_v41 = vadd.f32 %v9024_v18, %v1247_v54  ;;  %v9025_v36 = vld [vmem:[#allocation83_spill] sm:$0xff]  ;;  %v9026_v8 = vld [vmem:[#allocation84_spill] sm:$0xff]  ;;  %v9027_v42 = vld [vmem:[#allocation85_spill] sm:$0xff] }
 0x2cd   : > { %9022 = vst [vmem:[#allocation35_spill] sm:$0xff] %v7088_v63  ;;  %9023 = vst [vmem:[#allocation181_spill] sm:$0xff] %v7090_v1  ;;  %v1309_v37 = vadd.f32 %v9025_v36, %v1229_v7  ;;  %v1339_v0 = vadd.f32 %v6824_v50, %v1268_v58  ;;  %v1920_v35 = vstv %s7040_s13  ;;  %v1328_v33 = vadd.f32 %v9027_v42, %v1248_v40  ;;  %v9033_v36 = vld [vmem:[#allocation89_spill] sm:$0xff]  ;;  %v9042_v1 = vld [vmem:[#allocation95_spill] sm:$0xff]  ;;  %s7252_s13 = sld [smem:[#allocation3 + $0x8a]] }
 0x2ce   : > { %v1329_v62 = vadd.f32 %v9026_v8, %v1249_v3  ;;  %v1338_v61 = vadd.f32 %v6827_v52, %v1267_v31  ;;  %v1928_v27 = vstv %s7048_s20  ;;  %v1346_v17 = vadd.f32 %v6831_v11, %v1287_v14  ;;  %v5113_v3 = vld [vmem:[%s5487_s18 + $0x3a] sm:$0xff]  ;;  %v5114_v52 = vld [vmem:[%s5487_s18 + $0x32] sm:$0xff]  ;;  %v5115_v14 = vld [vmem:[%s5487_s18 + $0x42] sm:$0x3]  ;;  %s7305_s20 = sld [smem:[#allocation3 + $0x21]] }
 0x2cf   : > { %v1340_v19 = vadd.f32 %v6834_v60, %v1269_v12  ;;  %v1348_v54 = vadd.f32 %v6845_v13, %v1289_v15  ;;  %v1347_v7 = vadd.f32 %v6847_v28, %v1288_v30  ;;  %v1355_v50 = vadd.f32 %v6857_v5, %v1308_v22  ;;  %v9030_v22 = vld [vmem:[#allocation86_spill] sm:$0xff] }
 0x2d0   : > { %v1354_v58 = vadd.f32 %v6865_v34, %v1307_v26  ;;  %v7107_v40 = vmul.f32 %v5113_v3, %v1920_v35  ;;  %v7110_v31 = vmul.f32 %v5114_v52, %v1920_v35  ;;  %v7112_v20 = vpop.permute.xlu1 %2370  ;;  %v7114_v11 = vpop.permute.xlu0 %2354  ;;  %v1362_v60 = vadd.f32 %v6876_v51, %v1327_v41  ;;  %v9031_v26 = vld [vmem:[#allocation87_spill] sm:$0xff]  ;;  %v9032_v41 = vld [vmem:[#allocation88_spill] sm:$0xff] }
 0x2d1   : > { %9028 = vst [vmem:[#allocation36_spill] sm:$0xff] %v7112_v20  ;;  %9029 = vst [vmem:[#allocation37_spill] sm:$0xff] %v7114_v11  ;;  %v1356_v13 = vadd.f32 %v6878_v45, %v1309_v37  ;;  %v7118_v28 = vmul.f32 %v5114_v52, %v1928_v27  ;;  %v1936_v5 = vstv %s7071_s15  ;;  %v1364_v30 = vadd.f32 %v6880_v49, %v1329_v62  ;;  %s7313_s15 = sld [smem:[#allocation3 + $0x45]] }
 0x2d2   : > { %v1363_v34 = vadd.f32 %v6890_v21, %v1328_v33  ;;  %v7124_v12 = vmul.f32 %v5115_v14, %v1920_v35  ;;  %v1944_v15 = vstv %s7078_s14  ;;  %v1383_v38 = vadd.f32 %v9030_v22, %v1339_v0  ;;  %v9036_v0 = vld [vmem:[#allocation90_spill] sm:$0xff]  ;;  %v9037_v33 = vld [vmem:[#allocation91_spill] sm:$0xff]  ;;  %s7336_s14 = sld [smem:[#allocation3 + $0x69]] }
 0x2d3   : > { %v1382_v18 = vadd.f32 %v9031_v26, %v1338_v61  ;;  %v7131_v51 = vmul.f32 %v5115_v14, %v1928_v27  ;;  %v7133_v45 = vmul.f32 %v5113_v3, %v1928_v27  ;;  %v1402_v49 = vadd.f32 %v9032_v41, %v1346_v17  ;;  %v9038_v26 = vld [vmem:[#allocation92_spill] sm:$0xff]  ;;  %v9039_v41 = vld [vmem:[#allocation93_spill] sm:$0xff] }
 0x2d4   : > { %v1384_v21 = vadd.f32 %v9033_v36, %v1340_v19  ;;  %v7139_v37 = vmul.f32 %v5113_v3, %v1936_v5  ;;  %v7141_v35 = vmul.f32 %v5114_v52, %v1936_v5  ;;  %v7143_v8 = vpop.permute.xlu1 %2374  ;;  %v7145_v62 = vpop.permute.xlu0 %2372  ;;  %v1404_v42 = vadd.f32 %v9036_v0, %v1348_v54  ;;  %v9040_v36 = vld [vmem:[#allocation98_spill] sm:$0xff]  ;;  %v9043_v0 = vld [vmem:[#allocation99_spill] sm:$0xff] }
 0x2d5   : > { %9034 = vst [vmem:[#allocation182_spill] sm:$0xff] %v7143_v8  ;;  %9035 = vst [vmem:[#allocation183_spill] sm:$0xff] %v7145_v62  ;;  %v1403_v61 = vadd.f32 %v9037_v33, %v1347_v7  ;;  %v7149_v27 = vmul.f32 %v5114_v52, %v1944_v15  ;;  %v7151_v22 = vmul.f32 %v5115_v14, %v1936_v5  ;;  %v9041_v8 = vld [vmem:[#allocation94_spill] sm:$0xff] }
 0x2d6   : > { %v1423_v17 = vadd.f32 %v9038_v26, %v1355_v50  ;;  %v1422_v19 = vadd.f32 %v9039_v41, %v1354_v58  ;;  %v1463_v11 = vadd.f32 %v9040_v36, %v1383_v38  ;;  %v7156_v20 = vmul.f32 %v5115_v14, %v1944_v15  ;;  %v9044_v50 = vld [vmem:[#allocation100_spill] sm:$0xff]  ;;  %v9045_v58 = vld [vmem:[#allocation101_spill] sm:$0xff]  ;;  %v9046_v38 = vld [vmem:[#allocation102_spill] sm:$0xff] }
 0x2d7   : > { %v1442_v62 = vadd.f32 %v9041_v8, %v1362_v60  ;;  %v1424_v54 = vadd.f32 %v9042_v1, %v1356_v13  ;;  %v1462_v7 = vadd.f32 %v9043_v0, %v1382_v18  ;;  %v7163_v52 = vmul.f32 %v5113_v3, %v1944_v15  ;;  %v9047_v26 = vld [vmem:[#allocation103_spill] sm:$0xff]  ;;  %v9050_v1 = vld [vmem:[#allocation96_spill] sm:$0xff]  ;;  %v9051_v18 = vld [vmem:[#allocation97_spill] sm:$0xff] }
 0x2d8   : > { %v1482_v5 = vadd.f32 %v9044_v50, %v1402_v49  ;;  %v1464_v33 = vadd.f32 %v9045_v58, %v1384_v21  ;;  %v1484_v14 = vadd.f32 %v9046_v38, %v1404_v42  ;;  %v1483_v41 = vadd.f32 %v9047_v26, %v1403_v61  ;;  %v7171_v36 = vpop.permute.xlu1 %2392  ;;  %v7173_v60 = vpop.permute.xlu0 %2390  ;;  %v9052_v15 = vld [vmem:[#allocation104_spill] sm:$0xff]  ;;  %v9053_v0 = vld [vmem:[#allocation105_spill] sm:$0xff]  ;;  %v9054_v49 = vld [vmem:[#allocation106_spill] sm:$0xff] }
 0x2d9   : > { %9048 = vst [vmem:[#allocation184_spill] sm:$0xff] %v7171_v36  ;;  %9049 = vst [vmem:[#allocation185_spill] sm:$0xff] %v7173_v60  ;;  %v1444_v13 = vadd.f32 %v9050_v1, %v1364_v30  ;;  %v1443_v3 = vadd.f32 %v9051_v18, %v1363_v34  ;;  %v1503_v8 = vadd.f32 %v9052_v15, %v1423_v17  ;;  %v9055_v21 = vld [vmem:[#allocation107_spill] sm:$0xff]  ;;  %v2116_v61 = vstv %s7127_s23  ;;  %v9056_v38 = vld [vmem:[#allocation108_spill] sm:$0xff]  ;;  %s7343_s23 = sld [smem:[#allocation3 + $0x8d]] }
 0x2da   : > { %v1502_v63 = vadd.f32 %v9053_v0, %v1422_v19  ;;  %v1522_v50 = vadd.f32 %v9054_v49, %v1442_v62  ;;  %v1504_v58 = vadd.f32 %v9055_v21, %v1424_v54  ;;  %v1535_v42 = vadd.f32 %v6931_v6, %v1463_v11  ;;  %v9057_v60 = vld [vmem:[#allocation109_spill] sm:$0xff] }
 0x2db   : > { %v1524_v26 = vadd.f32 %v9056_v38, %v1444_v13  ;;  %v1523_v36 = vadd.f32 %v9057_v60, %v1443_v3  ;;  %v1534_v30 = vadd.f32 %v6934_v59, %v1462_v7  ;;  %v2124_v34 = vstv %s7135_s17  ;;  %v5116_v7 = vld [vmem:[%s5487_s18 + $0x50] sm:$0xff]  ;;  %v9061_v3 = vld [vmem:[#allocation111_spill] sm:$0xff]  ;;  %v9065_v0 = vld [vmem:[#allocation113_spill] sm:$0xff]  ;;  %s7420_s17 = sld [smem:[#allocation8]] }
 0x2dc   : > { %v1542_v17 = vadd.f32 %v6940_v46, %v1482_v5  ;;  %v1536_v19 = vadd.f32 %v6946_v48, %v1464_v33  ;;  %v1544_v62 = vadd.f32 %v6957_v32, %v1484_v14  ;;  %v1543_v54 = vadd.f32 %v6959_v29, %v1483_v41  ;;  %v7191_v6 = vpop.permute.xlu1 %2410  ;;  %v7193_v11 = vpop.permute.xlu0 %2394  ;;  %v5117_v46 = vld [vmem:[%s5487_s18 + $0x48] sm:$0xff] }
 0x2dd   : > { %9058 = vst [vmem:[#allocation186_spill] sm:$0xff] %v7191_v6  ;;  %9059 = vst [vmem:[#allocation189_spill] sm:$0xff] %v7193_v11  ;;  %v1551_v60 = vadd.f32 %v6965_v57, %v1503_v8  ;;  %v1550_v59 = vadd.f32 %v6967_v9, %v1502_v63  ;;  %v7198_v1 = vmul.f32 %v5116_v7, %v2116_v61  ;;  %v2132_v33 = vstv %s7158_s21  ;;  %v5118_v57 = vld [vmem:[%s5487_s18 + $0x58] sm:$0x3]  ;;  %v9060_v63 = vld [vmem:[#allocation110_spill] sm:$0xff]  ;;  %s7428_s21 = sld [smem:[#allocation6 + $0x1]] }
 0x2de   : > { %v7201_v5 = vmul.f32 %v5117_v46, %v2116_v61  ;;  %v1558_v32 = vadd.f32 %v6971_v53, %v1522_v50  ;;  %v1552_v48 = vadd.f32 %v6973_v43, %v1504_v58  ;;  %v7205_v29 = vmul.f32 %v5117_v46, %v2124_v34  ;;  %v9066_v58 = vld [vmem:[#allocation114_spill] sm:$0xff]  ;;  %v9073_v11 = vld [vmem:[#allocation119_spill] sm:$0xff] }
 0x2df   : > { %v1560_v14 = vadd.f32 %v6978_v16, %v1524_v26  ;;  %v1559_v41 = vadd.f32 %v6989_v55, %v1523_v36  ;;  %v7211_v13 = vmul.f32 %v5118_v57, %v2116_v61  ;;  %v2140_v9 = vstv %s7165_s16  ;;  %v9064_v55 = vld [vmem:[#allocation112_spill] sm:$0xff]  ;;  %v9067_v61 = vld [vmem:[#allocation115_spill] sm:$0xff]  ;;  %s7434_s16 = sld [smem:[#allocation8 + $0x1]] }
 0x2e0   : > { %v1579_v18 = vadd.f32 %v9060_v63, %v1535_v42  ;;  %v1578_v15 = vadd.f32 %v9061_v3, %v1534_v30  ;;  %v7218_v53 = vmul.f32 %v5118_v57, %v2124_v34  ;;  %v7220_v43 = vmul.f32 %v5116_v7, %v2124_v34  ;;  %v7224_v8 = vpop.permute.xlu1 %2414  ;;  %v7226_v16 = vpop.permute.xlu0 %2412  ;;  %v9068_v34 = vld [vmem:[#allocation116_spill] sm:$0xff]  ;;  %v9069_v3 = vld [vmem:[#allocation117_spill] sm:$0xff] }
 0x2e1   : > { %9062 = vst [vmem:[#allocation190_spill] sm:$0xff] %v7224_v8  ;;  %9063 = vst [vmem:[#allocation191_spill] sm:$0xff] %v7226_v16  ;;  %v1598_v36 = vadd.f32 %v9064_v55, %v1542_v17  ;;  %v1580_v49 = vadd.f32 %v9065_v0, %v1536_v19  ;;  %v7230_v50 = vmul.f32 %v5116_v7, %v2132_v33  ;;  %v9070_v8 = vld [vmem:[#allocation122_spill] sm:$0xff] }
 0x2e2   : > { %v7232_v21 = vmul.f32 %v5117_v46, %v2132_v33  ;;  %v1600_v42 = vadd.f32 %v9066_v58, %v1544_v62  ;;  %v1599_v38 = vadd.f32 %v9067_v61, %v1543_v54  ;;  %v7236_v26 = vmul.f32 %v5117_v46, %v2140_v9  ;;  %v9072_v19 = vld [vmem:[#allocation118_spill] sm:$0xff]  ;;  %v9074_v58 = vld [vmem:[#allocation123_spill] sm:$0xff] }
 0x2e3   : > { %v7238_v30 = vmul.f32 %v5118_v57, %v2132_v33  ;;  %v1619_v63 = vadd.f32 %v9068_v34, %v1551_v60  ;;  %v1618_v16 = vadd.f32 %v9069_v3, %v1550_v59  ;;  %v1659_v17 = vadd.f32 %v9070_v8, %v1579_v18  ;;  %v9078_v33 = vld [vmem:[#allocation124_spill] sm:$0xff]  ;;  %v9079_v18 = vld [vmem:[#allocation125_spill] sm:$0xff]  ;;  %v9080_v61 = vld [vmem:[#allocation126_spill] sm:$0xff] }
 0x2e4   : > { %v7243_v55 = vmul.f32 %v5118_v57, %v2140_v9  ;;  %v1638_v0 = vadd.f32 %v9072_v19, %v1558_v32  ;;  %v1620_v62 = vadd.f32 %v9073_v11, %v1552_v48  ;;  %v1658_v54 = vadd.f32 %v9074_v58, %v1578_v15  ;;  %v7254_v60 = vpop.permute.xlu1 %2432  ;;  %v7256_v59 = vpop.permute.xlu0 %2430  ;;  %v9081_v34 = vld [vmem:[#allocation127_spill] sm:$0xff]  ;;  %v9082_v48 = vld [vmem:[#allocation120_spill] sm:$0xff]  ;;  %v9083_v3 = vld [vmem:[#allocation121_spill] sm:$0xff] }
 0x2e5   : > { %v7250_v46 = vmul.f32 %v5116_v7, %v2140_v9  ;;  %9076 = vst [vmem:[#allocation39_spill] sm:$0xff] %v7254_v60  ;;  %9077 = vst [vmem:[#allocation40_spill] sm:$0xff] %v7256_v59  ;;  %v1678_v57 = vadd.f32 %v9078_v33, %v1598_v36  ;;  %v1660_v8 = vadd.f32 %v9079_v18, %v1580_v49  ;;  %v9084_v9 = vld [vmem:[#allocation128_spill] sm:$0xff]  ;;  %v9085_v58 = vld [vmem:[#allocation129_spill] sm:$0xff]  ;;  %v2311_v49 = vstv %s7214_s29  ;;  %s7443_s29 = sld [smem:[#allocation6 + $0x2]] }
 0x2e6   : > { %9071 = vst [vmem:[#allocation192_spill] sm:$0xff] %v7243_v55  ;;  %v1680_v32 = vadd.f32 %v9080_v61, %v1600_v42  ;;  %v1679_v11 = vadd.f32 %v9081_v34, %v1599_v38  ;;  %v1640_v15 = vadd.f32 %v9082_v48, %v1560_v14  ;;  %v1639_v7 = vadd.f32 %v9083_v3, %v1559_v41  ;;  %v9086_v60 = vld [vmem:[#allocation130_spill] sm:$0xff]  ;;  %v9087_v59 = vld [vmem:[#allocation131_spill] sm:$0xff]  ;;  %v9088_v42 = vld [vmem:[#allocation132_spill] sm:$0xff] }
 0x2e7   : > { %9075 = vst [vmem:[#allocation38_spill] sm:$0xff] %v7250_v46  ;;  %v1699_v19 = vadd.f32 %v9084_v9, %v1619_v63  ;;  %v1698_v6 = vadd.f32 %v9085_v58, %v1618_v16  ;;  %v1718_v46 = vadd.f32 %v9086_v60, %v1638_v0  ;;  %v1700_v55 = vadd.f32 %v9087_v59, %v1620_v62  ;;  %v9089_v38 = vld [vmem:[#allocation133_spill] sm:$0xff]  ;;  %v9096_v9 = vld [vmem:[#allocation136_spill] sm:$0xff] }
 0x2e8   : > { %v1730_v36 = vadd.f32 %v7020_v10, %v1659_v17  ;;  %v1720_v33 = vadd.f32 %v9088_v42, %v1640_v15  ;;  %v1719_v18 = vadd.f32 %v9089_v38, %v1639_v7  ;;  %v1729_v14 = vadd.f32 %v7023_v23, %v1658_v54  ;;  %v7274_v63 = vpop.permute.xlu1 %2450  ;;  %v7276_v16 = vpop.permute.xlu0 %2434  ;;  %v5119_v54 = vld [vmem:[%s5487_s18 + $0x51] sm:$0xff]  ;;  %v5120_v61 = vld [vmem:[%s5487_s18 + $0x49] sm:$0xff] }
 0x2e9   : > { %v2319_v41 = vstv %s7222_s9  ;;  %v1737_v0 = vadd.f32 %v7027_v2, %v1678_v57  ;;  %v1731_v62 = vadd.f32 %v7037_v44, %v1660_v8  ;;  %v1739_v10 = vadd.f32 %v7044_v24, %v1680_v32  ;;  %v9090_v8 = vld [vmem:[#allocation33_spill] sm:$0xff]  ;;  %v9098_v38 = vld [vmem:[#allocation138_spill] sm:$0xff]  ;;  %s7453_s9 = sld [smem:[#allocation8 + $0x2]] }
 0x2ea   : > { %v1738_v17 = vadd.f32 %v7046_v4, %v1679_v11  ;;  %v1746_v60 = vadd.f32 %v7052_v47, %v1699_v19  ;;  %v1745_v23 = vadd.f32 %v7054_v56, %v1698_v6  ;;  %v7285_v59 = vmul.f32 %v5119_v54, %v2311_v49  ;;  %v9091_v4 = vld [vmem:[#allocation34_spill] sm:$0xff]  ;;  %v5121_v47 = vld [vmem:[%s5487_s18 + $0x59] sm:$0x3]  ;;  %v9097_v58 = vld [vmem:[#allocation137_spill] sm:$0xff] }
 0x2eb   : > { %v7288_v34 = vmul.f32 %v5120_v61, %v2311_v49  ;;  %v1753_v2 = vadd.f32 %v7058_v25, %v1718_v46  ;;  %v1747_v57 = vadd.f32 %v7060_v39, %v1700_v55  ;;  %v7292_v44 = vmul.f32 %v5120_v61, %v2319_v41  ;;  %v9094_v25 = vld [vmem:[#allocation134_spill] sm:$0xff]  ;;  %v9095_v39 = vld [vmem:[#allocation135_spill] sm:$0xff] }
 0x2ec   : > { %v2327_v24 = vstv %s7245_s8  ;;  %v1755_v32 = vadd.f32 %v9090_v8, %v1720_v33  ;;  %v1754_v11 = vadd.f32 %v9091_v4, %v1719_v18  ;;  %v7298_v48 = vmul.f32 %v5121_v47, %v2311_v49  ;;  %v7301_v6 = vpop.permute.xlu1 %2454  ;;  %v7303_v15 = vpop.permute.xlu0 %2452  ;;  %v9099_v8 = vld [vmem:[#allocation139_spill] sm:$0xff]  ;;  %s7487_s8 = sld [smem:[#allocation9 + $0x1]] }
 0x2ed   : > { %v2335_v56 = vstv %s7252_s13  ;;  %9092 = vst [vmem:[#allocation41_spill] sm:$0xff] %v7301_v6  ;;  %9093 = vst [vmem:[#allocation42_spill] sm:$0xff] %v7303_v15  ;;  %v1774_v46 = vadd.f32 %v9094_v25, %v1730_v36  ;;  %v1773_v55 = vadd.f32 %v9095_v39, %v1729_v14  ;;  %v7309_v3 = vmul.f32 %v5121_v47, %v2319_v41  ;;  %v9102_v39 = vld [vmem:[#allocation141_spill] sm:$0xff]  ;;  %v9103_v6 = vld [vmem:[#allocation146_spill] sm:$0xff]  ;;  %s7503_s13 = sld [smem:[#allocation6 + $0x3]] }
 0x2ee   : > { %v7311_v7 = vmul.f32 %v5119_v54, %v2319_v41  ;;  %v1793_v19 = vadd.f32 %v9096_v9, %v1737_v0  ;;  %v1775_v49 = vadd.f32 %v9097_v58, %v1731_v62  ;;  %v7317_v42 = vmul.f32 %v5119_v54, %v2327_v24  ;;  %v9101_v41 = vld [vmem:[#allocation140_spill] sm:$0xff] }
 0x2ef   : > { %v7319_v33 = vmul.f32 %v5120_v61, %v2327_v24  ;;  %v1795_v18 = vadd.f32 %v9098_v38, %v1739_v10  ;;  %v1794_v36 = vadd.f32 %v9099_v8, %v1738_v17  ;;  %v7323_v4 = vmul.f32 %v5120_v61, %v2335_v56  ;;  %v9107_v10 = vld [vmem:[#allocation142_spill] sm:$0xff]  ;;  %v9108_v61 = vld [vmem:[#allocation143_spill] sm:$0xff] }
 0x2f0   : > { %v7325_v14 = vmul.f32 %v5121_v47, %v2327_v24  ;;  %v1814_v25 = vadd.f32 %v9101_v41, %v1746_v60  ;;  %v1813_v15 = vadd.f32 %v9102_v39, %v1745_v23  ;;  %v1854_v0 = vadd.f32 %v9103_v6, %v1774_v46  ;;  %v7332_v62 = vpop.permute.xlu1 %2472  ;;  %v7334_v58 = vpop.permute.xlu0 %2470  ;;  %v9109_v24 = vld [vmem:[#allocation147_spill] sm:$0xff]  ;;  %v9111_v23 = vld [vmem:[#allocation148_spill] sm:$0xff]  ;;  %v9112_v6 = vld [vmem:[#allocation149_spill] sm:$0xff] }
 0x2f1   : > { %v7330_v9 = vmul.f32 %v5121_v47, %v2335_v56  ;;  %9105 = vst [vmem:[#allocation45_spill] sm:$0xff] %v7332_v62  ;;  %9106 = vst [vmem:[#allocation50_spill] sm:$0xff] %v7334_v58  ;;  %v1833_v17 = vadd.f32 %v9107_v10, %v1753_v2  ;;  %v1815_v38 = vadd.f32 %v9108_v61, %v1747_v57  ;;  %v9113_v41 = vld [vmem:[#allocation150_spill] sm:$0xff]  ;;  %v9114_v58 = vld [vmem:[#allocation151_spill] sm:$0xff] }
 0x2f2   : > { %9100 = vst [vmem:[#allocation43_spill] sm:$0xff] %v7325_v14  ;;  %v1853_v8 = vadd.f32 %v9109_v24, %v1773_v55  ;;  %v7341_v60 = vmul.f32 %v5119_v54, %v2335_v56  ;;  %v1873_v47 = vadd.f32 %v9111_v23, %v1793_v19  ;;  %v1855_v46 = vadd.f32 %v9112_v6, %v1775_v49  ;;  %v9116_v10 = vld [vmem:[#allocation145_spill] sm:$0xff]  ;;  %v9117_v61 = vld [vmem:[#allocation152_spill] sm:$0xff]  ;;  %v9119_v56 = vld [vmem:[#allocation154_spill] sm:$0xff] }
 0x2f3   : > { %9104 = vst [vmem:[#allocation44_spill] sm:$0xff] %v7330_v9  ;;  %v1875_v39 = vadd.f32 %v9113_v41, %v1795_v18  ;;  %v1874_v62 = vadd.f32 %v9114_v58, %v1794_v36  ;;  %v9115_v9 = vld [vmem:[#allocation144_spill] sm:$0xff]  ;;  %v1834_v57 = vadd.f32 %v9116_v10, %v1754_v11  ;;  %v1894_v55 = vadd.f32 %v9117_v61, %v1814_v25  ;;  %v9118_v24 = vld [vmem:[#allocation153_spill] sm:$0xff]  ;;  %v9120_v14 = vld [vmem:[#allocation155_spill] sm:$0xff] }
 0x2f4   : > { %9110 = vst [vmem:[#allocation46_spill] sm:$0xff] %v7341_v60  ;;  %v1835_v2 = vadd.f32 %v9115_v9, %v1755_v32  ;;  %v1893_v54 = vadd.f32 %v9118_v24, %v1813_v15  ;;  %v1913_v60 = vadd.f32 %v9119_v56, %v1833_v17  ;;  %v1895_v19 = vadd.f32 %v9120_v14, %v1815_v38  ;;  %v7356_v23 = vpop.permute.xlu1 %2490  ;;  %v7358_v18 = vpop.permute.xlu0 %2474  ;;  %v9121_v32 = vld [vmem:[#allocation156_spill] sm:$0xff]  ;;  %v9122_v11 = vld [vmem:[#allocation157_spill] sm:$0xff]  ;;  %v5122_v41 = vld [vmem:[%s5487_s18 + $0x52] sm:$0xff] }
 0x2f5   : > { %v1925_v49 = vadd.f32 %v7107_v40, %v1854_v0  ;;  %v2506_v36 = vstv %s7305_s20  ;;  %v1914_v58 = vadd.f32 %v9122_v11, %v1834_v57  ;;  %v1924_v25 = vadd.f32 %v7110_v31, %v1853_v8  ;;  %v5123_v31 = vld [vmem:[%s5487_s18 + $0x4a] sm:$0xff]  ;;  %v9127_v24 = vld [vmem:[#allocation160_spill] sm:$0xff]  ;;  %s7601_s20 = sld [smem:[#allocation9 + $0x25]] }
 0x2f6   : > { %v1915_v9 = vadd.f32 %v9121_v32, %v1835_v2  ;;  %v2514_v15 = vstv %s7313_s15  ;;  %v1932_v17 = vadd.f32 %v7118_v28, %v1873_v47  ;;  %v1926_v14 = vadd.f32 %v7124_v12, %v1855_v46  ;;  %v5124_v46 = vld [vmem:[%s5487_s18 + $0x5a] sm:$0x3]  ;;  %v9125_v57 = vld [vmem:[#allocation158_spill] sm:$0xff]  ;;  %v9128_v56 = vld [vmem:[#allocation161_spill] sm:$0xff]  ;;  %s7414_s18 = sld [smem:[#allocation6]] }
 0x2f7   : > { %v1934_v40 = vadd.f32 %v7131_v51, %v1875_v39  ;;  %v1933_v0 = vadd.f32 %v7133_v45, %v1874_v62  ;;  %v1941_v38 = vadd.f32 %v7139_v37, %v1894_v55  ;;  %v1940_v6 = vadd.f32 %v7141_v35, %v1893_v54  ;;  %s7615_s15 = sld [smem:[#allocation8 + $0x3]] }
 0x2f8   : > { %v7372_v2 = vmul.f32 %v5122_v41, %v2506_v36  ;;  %v7375_v8 = vmul.f32 %v5123_v31, %v2506_v36  ;;  %v1948_v28 = vadd.f32 %v7149_v27, %v1913_v60  ;;  %v1942_v12 = vadd.f32 %v7151_v22, %v1895_v19  ;;  %v7379_v47 = vpop.permute.xlu1 %2494  ;;  %v7381_v51 = vpop.permute.xlu0 %2492  ;;  %v9126_v27 = vld [vmem:[#allocation159_spill] sm:$0xff] }
 0x2f9   : > { %9123 = vst [vmem:[#allocation47_spill] sm:$0xff] %v7379_v47  ;;  %9124 = vst [vmem:[#allocation51_spill] sm:$0xff] %v7381_v51  ;;  %v7383_v45 = vmul.f32 %v5123_v31, %v2514_v15  ;;  %v2522_v37 = vstv %s7336_s14  ;;  %v1950_v62 = vadd.f32 %v7156_v20, %v1915_v9  ;;  %v1949_v35 = vadd.f32 %v7163_v52, %v1914_v58  ;;  %v9129_v52 = vld [vmem:[#allocation162_spill] sm:$0xff]  ;;  %v9130_v9 = vld [vmem:[#allocation163_spill] sm:$0xff]  ;;  %s7669_s14 = sld [smem:[#allocation9 + $0x49]] }
 0x2fa   : > { %v7389_v39 = vmul.f32 %v5124_v46, %v2506_v36  ;;  %v2530_v10 = vstv %s7343_s23  ;;  %v1969_v61 = vadd.f32 %v9125_v57, %v1925_v49  ;;  %v1968_v60 = vadd.f32 %v9126_v27, %v1924_v25  ;;  %v9134_v57 = vld [vmem:[#allocation165_spill] sm:$0xff]  ;;  %v9136_v51 = vld [vmem:[#allocation171_spill] sm:$0xff]  ;;  %s7693_s23 = sld [smem:[#allocation9 + $0x6d]] }
 0x2fb   : > { %v7394_v22 = vmul.f32 %v5124_v46, %v2514_v15  ;;  %v7396_v55 = vmul.f32 %v5122_v41, %v2514_v15  ;;  %v1988_v54 = vadd.f32 %v9127_v24, %v1932_v17  ;;  %v1970_v19 = vadd.f32 %v9128_v56, %v1926_v14  ;;  %v9133_v17 = vld [vmem:[#allocation164_spill] sm:$0xff]  ;;  %v9135_v24 = vld [vmem:[#allocation170_spill] sm:$0xff] }
 0x2fc   : > { %v7400_v32 = vmul.f32 %v5122_v41, %v2522_v37  ;;  %v7402_v20 = vmul.f32 %v5123_v31, %v2522_v37  ;;  %v1990_v36 = vadd.f32 %v9129_v52, %v1934_v40  ;;  %v1989_v11 = vadd.f32 %v9130_v9, %v1933_v0  ;;  %v7406_v58 = vpop.permute.xlu1 %2547  ;;  %v7408_v49 = vpop.permute.xlu0 %2545  ;;  %v9137_v0 = vld [vmem:[#allocation172_spill] sm:$0xff]  ;;  %v9138_v9 = vld [vmem:[#allocation173_spill] sm:$0xff] }
 0x2fd   : > { %v7410_v25 = vmul.f32 %v5123_v31, %v2530_v10  ;;  %v7412_v15 = vmul.f32 %v5124_v46, %v2522_v37  ;;  %v2009_v14 = vadd.f32 %v9133_v17, %v1941_v38  ;;  %v2008_v27 = vadd.f32 %v9134_v57, %v1940_v6  ;;  %v9142_v17 = vld [vmem:[#allocation167_spill] sm:$0xff]  ;;  %v9143_v57 = vld [vmem:[#allocation168_spill] sm:$0xff] }
 0x2fe   : > { %v2049_v56 = vadd.f32 %v9135_v24, %v1969_v61  ;;  %v2048_v40 = vadd.f32 %v9136_v51, %v1968_v60  ;;  %v2068_v52 = vadd.f32 %v9137_v0, %v1988_v54  ;;  %v2050_v47 = vadd.f32 %v9138_v9, %v1970_v19  ;;  %v9144_v24 = vld [vmem:[#allocation174_spill] sm:$0xff]  ;;  %v9145_v60 = vld [vmem:[#allocation175_spill] sm:$0xff]  ;;  %v9146_v0 = vld [vmem:[#allocation176_spill] sm:$0xff] }
 0x2ff   : > { %9131 = vst [vmem:[#allocation52_spill] sm:$0xff] %v7410_v25  ;;  %9132 = vst [vmem:[#allocation53_spill] sm:$0xff] %v7412_v15  ;;  %v7424_v31 = vmul.f32 %v5124_v46, %v2530_v10  ;;  %v7426_v37 = vmul.f32 %v5122_v41, %v2530_v10  ;;  %v9141_v15 = vld [vmem:[#allocation166_spill] sm:$0xff]  ;;  %v2010_v6 = vadd.f32 %v9142_v17, %v1942_v12  ;;  %v9147_v46 = vld [vmem:[#allocation177_spill] sm:$0xff] }
 0x300   : > { %v2028_v38 = vadd.f32 %v9141_v15, %v1948_v28  ;;  %v2030_v61 = vadd.f32 %v9143_v57, %v1950_v62  ;;  %v2070_v51 = vadd.f32 %v9144_v24, %v1990_v36  ;;  %v2069_v54 = vadd.f32 %v9145_v60, %v1989_v11  ;;  %v7439_v41 = vpop.permute.xlu1 %2565  ;;  %v7441_v10 = vpop.permute.xlu0 %2549  ;;  %v9148_v28 = vld [vmem:[#allocation169_spill] sm:$0xff]  ;;  %v9149_v62 = vld [vmem:[#allocation178_spill] sm:$0xff]  ;;  %v9150_v11 = vld [vmem:[#allocation179_spill] sm:$0xff] }
 0x301   : > { %9139 = vst [vmem:[#allocation54_spill] sm:$0xff] %v7424_v31  ;;  %9140 = vst [vmem:[#allocation55_spill] sm:$0xff] %v7426_v37  ;;  %v2089_v19 = vadd.f32 %v9146_v0, %v2009_v14  ;;  %v2088_v9 = vadd.f32 %v9147_v46, %v2008_v27  ;;  %v2697_v37 = vlaneseq  ;;  %v2029_v12 = vadd.f32 %v9148_v28, %v1949_v35  ;;  %v9151_v14 = vld [vmem:[#allocation187_spill] sm:$0xff]  ;;  %v9152_v0 = vld [vmem:[#allocation188_spill] sm:$0xff] }
 0x302   : > { %v2108_v15 = vadd.f32 %v9149_v62, %v2028_v38  ;;  %v2121_v36 = vadd.f32 %v7198_v1, %v2049_v56  ;;  %v2120_v17 = vadd.f32 %v7201_v5, %v2048_v40  ;;  %v2090_v57 = vadd.f32 %v9150_v11, %v2010_v6  ;;  %v9153_v35 = vld [vmem:[#allocation195_spill] sm:$0xff]  ;;  %v9154_v28 = vld [vmem:[#allocation196_spill] sm:$0xff]  ;;  %v9170_v31 = vld [vmem:[#allocation205_spill] sm:$0xff] }
 0x303   : > { %v2110_v24 = vadd.f32 %v9151_v14, %v2030_v61  ;;  %v2128_v27 = vadd.f32 %v7205_v29, %v2068_v52  ;;  %v2122_v60 = vadd.f32 %v7211_v13, %v2050_v47  ;;  %v2109_v46 = vadd.f32 %v9152_v0, %v2029_v12  ;;  %v9155_v61 = vld [vmem:[#allocation21_spill] sm:$0xff]  ;;  %v9156_v62 = vld [vmem:[#allocation23_spill] sm:$0xff] }
 0x304   : > { %v2165_v38 = vadd.f32 %v9153_v35, %v2121_v36  ;;  %v2164_v1 = vadd.f32 %v9154_v28, %v2120_v17  ;;  %v2130_v5 = vadd.f32 %v7218_v53, %v2070_v51  ;;  %v2129_v56 = vadd.f32 %v7220_v43, %v2069_v54  ;;  %v7462_v52 = vpop.permute.xlu1 %2569  ;;  %v7464_v13 = vpop.permute.xlu0 %2567  ;;  %v9157_v51 = vld [vmem:[#allocation192_spill] sm:$0xff]  ;;  %v9161_v0 = vld [vmem:[#allocation201_spill] sm:$0xff]  ;;  %v9172_v25 = vld [vmem:[#allocation35_spill] sm:$0xff] }
 0x305   : > { %v2137_v40 = vadd.f32 %v7230_v50, %v2089_v19  ;;  %v2136_v29 = vadd.f32 %v7232_v21, %v2088_v9  ;;  %v7466_v47 = vand.u32 127, %v2697_v37  ;;  %v2144_v6 = vadd.f32 %v7236_v26, %v2108_v15  ;;  %v9158_v9 = vld [vmem:[#allocation199_spill] sm:$0xff]  ;;  %v9159_v17 = vld [vmem:[#allocation200_spill] sm:$0xff]  ;;  %v9160_v15 = vld [vmem:[#allocation38_spill] sm:$0xff] }
 0x306   : > { %v2245_v12 = vadd.f32 %v9155_v61, %v2165_v38  ;;  %v2244_v53 = vadd.f32 %v9156_v62, %v2164_v1  ;;  %v7472_v43 = vstv %s7414_s18  ;;  %v2138_v50 = vadd.f32 %v7238_v30, %v2090_v57  ;;  %v9166_v38 = vld [vmem:[#allocation27_spill] sm:$0xff]  ;;  %v9167_v61 = vld [vmem:[#allocation202_spill] sm:$0xff]  ;;  %s4843_s18 = sld [smem:[#allocation9 + $0x2]] }
 0x307   : > { %v2146_v21 = vadd.f32 %v9157_v51, %v2110_v24  ;;  %v7477_v54 = vstv %s7420_s17  ;;  %v7479_v19 = vshrl.u32 %v2697_v37, 7  ;;  %v2184_v36 = vadd.f32 %v9158_v9, %v2128_v27  ;;  %v9168_v51 = vld [vmem:[#allocation203_spill] sm:$0xff]  ;;  %s4844_s17 = sld [smem:[#allocation9 + $0x26]] }
 0x308   : > { %v2166_v26 = vadd.f32 %v9159_v17, %v2122_v60  ;;  %v2145_v11 = vadd.f32 %v9160_v15, %v2109_v46  ;;  %v7485_v14 = vstv %s7428_s21  ;;  %v2186_v35 = vadd.f32 %v9161_v0, %v2130_v5  ;;  %v7490_v30 = vpop.permute.xlu1 %2587  ;;  %v7492_v57 = vpop.permute.xlu0 %2585  ;;  %v9165_v60 = vld [vmem:[#allocation24_spill] sm:$0xff]  ;;  %s4845_s21 = sld [smem:[#allocation9 + $0x4a]] }
 0x309   : > { %9162 = vst [vmem:[#allocation48_spill] sm:$0xff] %v7490_v30  ;;  %9163 = vst [vmem:[#allocation49_spill] sm:$0xff] %v7492_v57  ;;  %v7495_v24 = vstv %s7434_s16  ;;  %v7498_v37 = vadd.s32 16, %v7479_v19  ;;  %v7501_v27 = vstv %s7443_s29  ;;  %v2264_v46 = vadd.f32 %v9165_v60, %v2184_v36  ;;  %v9169_v17 = vld [vmem:[#allocation204_spill] sm:$0xff]  ;;  %v9171_v57 = vld [vmem:[#allocation206_spill] sm:$0xff]  ;;  %s4846_s16 = sld [smem:[#allocation9 + $0x6e]] }
 0x30a   : > { %9164 = vst [vmem:[#allocation56_spill] sm:$0xff] %v7501_v27  ;;  %v2246_v28 = vadd.f32 %v9166_v38, %v2166_v26  ;;  %v2316_v1 = vadd.f32 %v7285_v59, %v2245_v12  ;;  %v2315_v5 = vadd.f32 %v7288_v34, %v2244_v53  ;;  %v2185_v62 = vadd.f32 %v9167_v61, %v2129_v56  ;;  %v9173_v60 = vld [vmem:[#allocation181_spill] sm:$0xff]  ;;  %v9174_v38 = vld [vmem:[#allocation20_spill] sm:$0xff]  ;;  %v9175_v12 = vld [vmem:[#allocation22_spill] sm:$0xff]  ;;  %s4851_s29 = sld [smem:[#allocation9 + $0x4]] }
 0x30b   : > { %v2205_v9 = vadd.f32 %v9168_v51, %v2137_v40  ;;  %v2204_v15 = vadd.f32 %v9169_v17, %v2136_v29  ;;  %v7513_v0 = vstv %s7453_s9  ;;  %v2224_v27 = vadd.f32 %v9170_v31, %v2144_v6  ;;  %v9176_v53 = vld [vmem:[#allocation25_spill] sm:$0xff]  ;;  %v9177_v61 = vld [vmem:[#allocation26_spill] sm:$0xff]  ;;  %v9178_v6 = vld [vmem:[#allocation39_spill] sm:$0xff]  ;;  %s4852_s9 = sld [smem:[#allocation9 + $0x28]] }
 0x30c   : > { %v2206_v30 = vadd.f32 %v9171_v57, %v2138_v50  ;;  %v2360_v36 = vadd.f32 %v9172_v25, %v2316_v1  ;;  %v2359_v26 = vadd.f32 %v9173_v60, %v2315_v5  ;;  %v2226_v59 = vadd.f32 %v9174_v38, %v2146_v21  ;;  %v7523_v51 = vpop.permute.xlu1 %2605  ;;  %v7525_v29 = vpop.permute.xlu0 %2589  ;;  %v9179_v21 = vld [vmem:[#allocation40_spill] sm:$0xff]  ;;  %v9183_v60 = vld [vmem:[#allocation30_spill] sm:$0xff] }
 0x30d   : > { %v2225_v34 = vadd.f32 %v9175_v12, %v2145_v11  ;;  %v2266_v56 = vadd.f32 %v9176_v53, %v2186_v35  ;;  %v2265_v40 = vadd.f32 %v9177_v61, %v2185_v62  ;;  %vm2712_vm0 = vcmp.ge.s32.totalorder %v7466_v47, 1  ;;  %v9180_v35 = vld [vmem:[#allocation28_spill] sm:$0xff]  ;;  %v9182_v62 = vld [vmem:[#allocation29_spill] sm:$0xff]  ;;  %v9184_v12 = vld [vmem:[#allocation31_spill] sm:$0xff] }
 0x30e   : > { %vm2703_vm1 = vcmp.ge.s32.totalorder %v7479_v19, 1  ;;  %v2323_v25 = vadd.f32 %v7292_v44, %v2264_v46  ;;  %v2317_v31 = vadd.f32 %v7298_v48, %v2246_v28  ;;  %v2440_v50 = vadd.f32 %v9178_v6, %v2360_v36  ;;  %v9181_v1 = vld [vmem:[#allocation180_spill] sm:$0xff]  ;;  %v9187_v53 = vld [vmem:[#allocation37_spill] sm:$0xff] }
 0x30f   : > { %v2439_v11 = vadd.f32 %v9179_v21, %v2359_v26  ;;  %v2285_v57 = vadd.f32 %v9180_v35, %v2205_v9  ;;  %v2284_v5 = vadd.f32 %v9181_v1, %v2204_v15  ;;  %v2304_v17 = vadd.f32 %v9182_v62, %v2224_v27  ;;  %v9185_v46 = vld [vmem:[#allocation32_spill] sm:$0xff]  ;;  %v9190_v62 = vld [vmem:[#allocation46_spill] sm:$0xff]  ;;  %vm7582_vm5 = vmand %vm2703_vm1, %vm2712_vm0 }
 0x310   : > { %v2286_v38 = vadd.f32 %v9183_v60, %v2206_v30  ;;  %vm2716_vm2 = vcmp.le.s32.totalorder %v7466_v47, 16  ;;  %v2306_v44 = vadd.f32 %v9184_v12, %v2226_v59  ;;  %v2305_v48 = vadd.f32 %v9185_v46, %v2225_v34  ;;  %v9186_v28 = vld [vmem:[#allocation36_spill] sm:$0xff]  ;;  %v7544_v6 = vpop.permute.xlu1 %2609  ;;  %v7546_v15 = vpop.permute.xlu0 %2607 }
 0x311   : > { %v2379_v36 = vadd.f32 %v9186_v28, %v2323_v25  ;;  %v2361_v61 = vadd.f32 %v9187_v53, %v2317_v31  ;;  %v2325_v26 = vadd.f32 %v7309_v3, %v2266_v56  ;;  %v2324_v9 = vadd.f32 %v7311_v7, %v2265_v40  ;;  %v9188_v40 = vld [vmem:[#allocation43_spill] sm:$0xff]  ;;  %v9189_v35 = vld [vmem:[#allocation44_spill] sm:$0xff]  ;;  %vm7595_vm7 = vmand %vm2712_vm0, %vm2716_vm2 }
 0x312   : > { %vm2708_vm3 = vcmp.le.s32.totalorder %v7498_v37, 16  ;;  %v7550_v30 = vstv %s7503_s13  ;;  %v2825_v27 = vstv %s7487_s8  ;;  %v2511_v25 = vadd.f32 %v7372_v2, %v2440_v50  ;;  %v9191_v2 = vld [vmem:[#allocation182_spill] sm:$0xff]  ;;  %vm7611_vm8 = vmand %vm7582_vm5, %vm2716_vm2  ;;  %s4853_s8 = sld [smem:[#allocation9 + $0x4c]] }
 0x313   : > { %v2459_v59 = vadd.f32 %v7274_v63, %v2379_v36  ;;  %v2441_v34 = vadd.f32 %v7276_v16, %v2361_v61  ;;  %v2510_v31 = vadd.f32 %v7375_v8, %v2439_v11  ;;  %v2332_v3 = vadd.f32 %v7317_v42, %v2285_v57  ;;  %v9192_v8 = vld [vmem:[#allocation183_spill] sm:$0xff]  ;;  %v9193_v42 = vld [vmem:[#allocation184_spill] sm:$0xff]  ;;  %v9197_v36 = vld [vmem:[#allocation41_spill] sm:$0xff]  ;;  %s4854_s13 = sld [smem:[#allocation9 + $0x70]] }
 0x314   : > { %v2331_v7 = vadd.f32 %v7319_v33, %v2284_v5  ;;  %v2339_v56 = vadd.f32 %v7323_v4, %v2304_v17  ;;  %v2333_v21 = vadd.f32 %v9188_v40, %v2286_v38  ;;  %v2341_v1 = vadd.f32 %v9189_v35, %v2306_v44  ;;  %v9194_v33 = vld [vmem:[#allocation185_spill] sm:$0xff]  ;;  %v2628_v4 = vpop.permute.xlu1 %2627  ;;  %v2626_v17 = vpop.permute.xlu0 %2625  ;;  %v9198_v61 = vld [vmem:[#allocation42_spill] sm:$0xff]  ;;  %vm7622_vm9 = vmand %vm2708_vm3, %vm2712_vm0 }
 0x315   : > { %v2340_v60 = vadd.f32 %v9190_v62, %v2305_v48  ;;  %v2555_v63 = vadd.f32 %v7406_v58, %v2511_v25  ;;  %v2554_v16 = vadd.f32 %v7408_v49, %v2510_v31  ;;  %v2381_v50 = vadd.f32 %v9191_v2, %v2325_v26  ;;  %v9195_v58 = vld [vmem:[#allocation186_spill] sm:$0xff]  ;;  %v9196_v49 = vld [vmem:[#allocation189_spill] sm:$0xff]  ;;  %vm7645_vm10 = vmand %vm7622_vm9, %vm2716_vm2 }
 0x316   : > { %v2380_v11 = vadd.f32 %v9192_v8, %v2324_v9  ;;  %v2400_v57 = vadd.f32 %v9193_v42, %v2332_v3  ;;  %v2399_v5 = vadd.f32 %v9194_v33, %v2331_v7  ;;  %v2518_v38 = vadd.f32 %v7383_v45, %v2459_v59  ;;  %v9201_v59 = vld [vmem:[#allocation190_spill] sm:$0xff]  ;;  %v9202_v3 = vld [vmem:[#allocation191_spill] sm:$0xff] }
 0x317   : > { %v2512_v12 = vadd.f32 %v7389_v39, %v2441_v34  ;;  %v2635_v44 = vadd.f32 %v2628_v4, %v2555_v63  ;;  %v2634_v46 = vadd.f32 %v2626_v17, %v2554_v16  ;;  %v2419_v48 = vadd.f32 %v9195_v58, %v2339_v56  ;;  %v9212_v58 = vld [vmem:[#allocation53_spill] sm:$0xff] }
 0x318   : > { %v2401_v28 = vadd.f32 %v9196_v49, %v2333_v21  ;;  %v2461_v53 = vadd.f32 %v9197_v36, %v2381_v50  ;;  %v2460_v26 = vadd.f32 %v9198_v61, %v2380_v11  ;;  %v2574_v9 = vadd.f32 %v7439_v41, %v2518_v38  ;;  %v9203_v41 = vld [vmem:[#allocation45_spill] sm:$0xff]  ;;  %v2646_v21 = vpop.permute.xlu1 %2645  ;;  %v2630_v35 = vpop.permute.xlu0 %2629  ;;  %v9215_v49 = vld [vmem:[#allocation48_spill] sm:$0xff] }
 0x319   : > { %v2556_v25 = vadd.f32 %v7441_v10, %v2512_v12  ;;  %v2723_v31 = vmul.f32 %v7472_v43, %v2635_v44  ;;  %v2722_v39 = vmul.f32 %v7472_v43, %v2634_v46  ;;  %v2421_v34 = vadd.f32 %v9201_v59, %v2341_v1  ;;  %v9204_v10 = vld [vmem:[#allocation50_spill] sm:$0xff]  ;;  %v9211_v46 = vld [vmem:[#allocation52_spill] sm:$0xff] }
 0x31a   : > { %v2420_v7 = vadd.f32 %v9202_v3, %v2340_v60  ;;  %v2480_v56 = vadd.f32 %v9203_v41, %v2400_v57  ;;  %v2479_v40 = vadd.f32 %v9204_v10, %v2399_v5  ;;  %v2654_v63 = vadd.f32 %v2646_v21, %v2574_v9 }
 0x31b   : > { %v2728_v62 = vadd.f32 %v7477_v54, %v2723_v31  ;;  %v2727_v1 = vadd.f32 %v7477_v54, %v2722_v39  ;;  %v2636_v60 = vadd.f32 %v2630_v35, %v2556_v25  ;;  %v2499_v16 = vadd.f32 %v7356_v23, %v2419_v48  ;;  %v9218_v25 = vld [vmem:[#allocation51_spill] sm:$0xff] }
 0x31c   : > { %v2481_v2 = vadd.f32 %v7358_v18, %v2401_v28  ;;  %v2520_v50 = vadd.f32 %v7394_v22, %v2461_v53  ;;  %v2519_v8 = vadd.f32 %v7396_v55, %v2460_v26  ;;  %v2738_v23 = vmul.f32 %v7485_v14, %v2654_v63  ;;  %v2650_v17 = vpop.permute.xlu1 %2649  ;;  %v2648_v38 = vpop.permute.xlu0 %2647  ;;  %v9216_v28 = vld [vmem:[#allocation49_spill] sm:$0xff]  ;;  %v9217_v26 = vld [vmem:[#allocation47_spill] sm:$0xff] }
 0x31d   : > { %v2731_v42 = vmax.f32 %v2728_v62, 0.0  ;;  %v2730_v57 = vmax.f32 %v2727_v1, 0.0  ;;  %v2724_v22 = vmul.f32 %v7472_v43, %v2636_v60  ;;  %v2527_v5 = vadd.f32 %v7400_v32, %v2480_v56  ;;  %v9219_v62 = vld [vmem:[#allocation56_spill] sm:$0xff]  ;;  %v9220_v60 = vld [vmem:[#allocation54_spill] sm:$0xff] }
 0x31e   : > { %v2576_v55 = vadd.f32 %v7462_v52, %v2520_v50  ;;  %v2575_v33 = vadd.f32 %v7464_v13, %v2519_v8  ;;  %v2526_v4 = vadd.f32 %v7402_v20, %v2479_v40  ;;  %v2743_v44 = vadd.f32 %v7495_v24, %v2738_v23 }
 0x31f   : > { %v2734_v12 = vsel %vm7595_vm7, %v2731_v42, 0.0  ;;  %v2733_v37 = vsel %vm7611_vm8, %v2730_v57, 0.0  ;;  %v2729_v43 = vadd.f32 %v7477_v54, %v2724_v22  ;;  %v2534_v52 = vadd.f32 %v9211_v46, %v2499_v16 }
 0x320   : > { %v2528_v13 = vadd.f32 %v9212_v58, %v2481_v2  ;;  %2786 = vst.msk [vmem:[#allocation2 + $0x8] sm:$0xff] %vm2784_vm4, %v2734_v12  ;;  %2785 = vst.msk [vmem:[#allocation2] sm:$0xff] %vm2784_vm4, %v2733_v37  ;;  %v2656_v20 = vadd.f32 %v2650_v17, %v2576_v55  ;;  %v2655_v48 = vadd.f32 %v2648_v38, %v2575_v33  ;;  %v2746_v53 = vmax.f32 %v2743_v44, 0.0  ;;  %v2668_v39 = vpop.permute.xlu1 %2667  ;;  %v2666_v59 = vpop.permute.xlu0 %2665  ;;  %v9221_v2 = vld [vmem:[#allocation55_spill] sm:$0xff] }
 0x321   : > { %v2595_v54 = vadd.f32 %v9215_v49, %v2527_v5  ;;  %v2594_v36 = vadd.f32 %v9216_v28, %v2526_v4  ;;  %v2732_v61 = vmax.f32 %v2729_v43, 0.0  ;;  %v2501_v9 = vadd.f32 %v9217_v26, %v2421_v34 }
 0x322   : > { %v2500_v47 = vadd.f32 %v9218_v25, %v2420_v7  ;;  %v2740_v31 = vmul.f32 %v7485_v14, %v2656_v20  ;;  %v2739_v45 = vmul.f32 %v7485_v14, %v2655_v48  ;;  %v2749_v3 = vsel %vm7611_vm8, %v2746_v53, 0.0 }
 0x323   : > { %v2735_v41 = vsel %vm7645_vm10, %v2732_v61, 0.0  ;;  %v2675_v56 = vadd.f32 %v2668_v39, %v2595_v54  ;;  %v2674_v10 = vadd.f32 %v2666_v59, %v2594_v36  ;;  %2789 = vst.msk [vmem:[#allocation2 + $0x18] sm:$0xff] %vm2784_vm4, %v2749_v3  ;;  %v2774_v40 = vstv %s7615_s15  ;;  %s4856_s15 = sld [smem:[#allocation9 + $0x29]] }
 0x324   : > { %2788 = vst.msk [vmem:[#allocation2 + $0x10] sm:$0x3] %vm2787_vm6, %v2735_v41  ;;  %v2745_v34 = vadd.f32 %v7495_v24, %v2740_v31  ;;  %v2744_v7 = vadd.f32 %v7495_v24, %v2739_v45  ;;  %v2839_v14 = vstv %s7601_s20  ;;  %v2614_v21 = vadd.f32 %v7523_v51, %v2534_v52  ;;  %v2686_v42 = vpop.permute.xlu1 %2685  ;;  %v2670_v57 = vpop.permute.xlu0 %2669  ;;  %s4855_s20 = sld [smem:[#allocation9 + $0x5]] }
 0x325   : > { %v2596_v35 = vadd.f32 %v7525_v29, %v2528_v13  ;;  %v2755_v1 = vmul.f32 %v9219_v62, %v2675_v56  ;;  %v2754_v63 = vmul.f32 %v9219_v62, %v2674_v10  ;;  %v2536_v16 = vadd.f32 %v9220_v60, %v2501_v9 }
 0x326   : > { %v2535_v50 = vadd.f32 %v9221_v2, %v2500_v47  ;;  %v2748_v8 = vmax.f32 %v2745_v34, 0.0  ;;  %v2747_v24 = vmax.f32 %v2744_v7, 0.0  ;;  %v2694_v22 = vadd.f32 %v2686_v42, %v2614_v21 }
 0x327   : > { %v7673_v23 = vld [vmem:[#allocation2 + $0x8] sm:$0xff]  ;;  %v7675_v51 = vld [vmem:[#allocation2] sm:$0xff]  ;;  %v2760_v29 = vadd.f32 %v7513_v0, %v2755_v1  ;;  %v2759_v18 = vadd.f32 %v7513_v0, %v2754_v63  ;;  %v2676_v55 = vadd.f32 %v2670_v57, %v2596_v35  ;;  %v2616_v43 = vadd.f32 %v7544_v6, %v2536_v16 }
 0x328   : > { %v2751_v33 = vsel %vm7645_vm10, %v2748_v8, 0.0  ;;  %v2750_v5 = vsel %vm7595_vm7, %v2747_v24, 0.0  ;;  %v2827_v4 = vmul.f32 %v2825_v27, %v7673_v23  ;;  %v2826_v17 = vmul.f32 %v2825_v27, %v7675_v51  ;;  %v2690_v52 = vpop.permute.xlu1 %2689  ;;  %v2688_v27 = vpop.permute.xlu0 %2687  ;;  %v7748_v60 = vld [vmem:[#allocation2 + $0x1] sm:$0xff] }
 0x329   : > { %2791 = vst.msk [vmem:[#allocation2 + $0x28] sm:$0x3] %vm2787_vm6, %v2751_v33  ;;  %v2763_v38 = vmax.f32 %v2760_v29, 0.0  ;;  %v2762_v12 = vmax.f32 %v2759_v18, 0.0  ;;  %v2770_v37 = vmul.f32 %v7550_v30, %v2694_v22  ;;  %v2756_v44 = vmul.f32 %v9219_v62, %v2676_v55 }
 0x32a   : > { %2790 = vst.msk [vmem:[#allocation2 + $0x20] sm:$0xff] %vm2784_vm4, %v2750_v5  ;;  %v2615_v46 = vadd.f32 %v7546_v15, %v2535_v50  ;;  %2832 = vrot.lane.b32.xlu1 %v2827_v4, %s5299_s22  ;;  %2830 = vrot.lane.b32.xlu0 %v2826_v17, %s5299_s22  ;;  %v2696_v6 = vadd.f32 %v2690_v52, %v2616_v43  ;;  %v2853_v53 = vstv %s7669_s14  ;;  %v2867_v45 = vstv %s7693_s23  ;;  %s4857_s14 = sld [smem:[#allocation9 + $0x4d]] }
 0x32b   : > { %v2766_v58 = vsel %vm7595_vm7, %v2763_v38, 0.0  ;;  %v2765_v13 = vsel %vm7611_vm8, %v2762_v12, 0.0  ;;  %v2775_v20 = vadd.f32 %v2774_v40, %v2770_v37  ;;  %v2761_v48 = vadd.f32 %v7513_v0, %v2756_v44  ;;  %v7750_v16 = vld [vmem:[#allocation2 + $0x9] sm:$0xff]  ;;  %s4858_s23 = sld [smem:[#allocation9 + $0x71]] }
 0x32c   : > { %2793 = vst.msk [vmem:[#allocation2 + $0x38] sm:$0xff] %vm2784_vm4, %v2766_v58  ;;  %2792 = vst.msk [vmem:[#allocation2 + $0x30] sm:$0xff] %vm2784_vm4, %v2765_v13  ;;  %v2695_v15 = vadd.f32 %v2688_v27, %v2615_v46  ;;  %v2841_v49 = vmul.f32 %v2839_v14, %v7673_v23  ;;  %v2840_v54 = vmul.f32 %v2839_v14, %v7675_v51  ;;  %v2881_v10 = vstv %s4843_s18  ;;  %s4863_s18 = sld [smem:[#allocation9 + $0x7]] }
 0x32d   : > { %v2778_v28 = vmax.f32 %v2775_v20, 0.0  ;;  %v2764_v36 = vmax.f32 %v2761_v48, 0.0  ;;  %v2772_v61 = vmul.f32 %v7550_v30, %v2696_v6  ;;  %v2855_v31 = vmul.f32 %v2853_v53, %v7673_v23  ;;  %v7784_v20 = vld [vmem:[#allocation2 + $0x2] sm:$0xff]  ;;  %v7786_v48 = vld [vmem:[#allocation2 + $0xa] sm:$0xff] }
 0x32e   : > { %v2771_v26 = vmul.f32 %v7550_v30, %v2695_v15  ;;  %2846 = vrot.lane.b32.xlu1 %v2841_v49, %s5299_s22  ;;  %2844 = vrot.lane.b32.xlu0 %v2840_v54, %s5299_s22  ;;  %v2854_v30 = vmul.f32 %v2853_v53, %v7675_v51  ;;  %v2869_v41 = vmul.f32 %v2867_v45, %v7673_v23  ;;  %v2895_v19 = vstv %s4844_s17  ;;  %s4864_s17 = sld [smem:[#allocation9 + $0x2b]] }
 0x32f   : > { %v2781_v0 = vsel %vm7611_vm8, %v2778_v28, 0.0  ;;  %v2767_v9 = vsel %vm7645_vm10, %v2764_v36, 0.0  ;;  %v2777_v25 = vadd.f32 %v2774_v40, %v2772_v61  ;;  %v2868_v56 = vmul.f32 %v2867_v45, %v7675_v51 }
 0x330   : > { %2795 = vst.msk [vmem:[#allocation2 + $0x48] sm:$0xff] %vm2784_vm4, %v2781_v0  ;;  %v2776_v47 = vadd.f32 %v2774_v40, %v2771_v26  ;;  %v2883_v32 = vmul.f32 %v2881_v10, %v7673_v23  ;;  %v2882_v34 = vmul.f32 %v2881_v10, %v7675_v51  ;;  %v2897_v7 = vmul.f32 %v2895_v19, %v7673_v23 }
 0x331   : > { %2794 = vst.msk [vmem:[#allocation2 + $0x40] sm:$0x3] %vm2787_vm6, %v2767_v9  ;;  %v2780_v39 = vmax.f32 %v2777_v25, 0.0  ;;  %v2896_v40 = vmul.f32 %v2895_v19, %v7675_v51  ;;  %v2909_v14 = vstv %s4845_s21  ;;  %v2923_v62 = vstv %s4846_s16  ;;  %s4865_s21 = sld [smem:[#allocation9 + $0x4f]]  ;;  %v7822_v19 = vld [vmem:[#allocation2 + $0x20] sm:$0xff] }
 0x332   : > { %v2779_v59 = vmax.f32 %v2776_v47, 0.0  ;;  %2860 = vrot.lane.b32.xlu1 %v2855_v31, %s5299_s22  ;;  %2858 = vrot.lane.b32.xlu0 %v2854_v30, %s5299_s22  ;;  %v2911_v21 = vmul.f32 %v2909_v14, %v7673_v23  ;;  %v2910_v35 = vmul.f32 %v2909_v14, %v7675_v51  ;;  %v2925_v1 = vmul.f32 %v2923_v62, %v7673_v23  ;;  %s4866_s16 = sld [smem:[#allocation9 + $0x73]] }
 0x333   : > { %v2783_v11 = vsel %vm7645_vm10, %v2780_v39, 0.0  ;;  %v2924_v63 = vmul.f32 %v2923_v62, %v7675_v51  ;;  %v2963_v2 = vstv %s4851_s29  ;;  %v2977_v24 = vstv %s4852_s9  ;;  %s4867_s29 = sld [smem:[#allocation9 + $0x8]] }
 0x334   : > { %v2782_v3 = vsel %vm7595_vm7, %v2779_v59, 0.0  ;;  %2797 = vst.msk [vmem:[#allocation2 + $0x58] sm:$0x3] %vm2787_vm6, %v2783_v11  ;;  %v2965_v50 = vmul.f32 %v2963_v2, %v7750_v16  ;;  %v2964_v8 = vmul.f32 %v2963_v2, %v7748_v60  ;;  %v2979_v42 = vmul.f32 %v2977_v24, %v7750_v16  ;;  %s4868_s9 = sld [smem:[#allocation9 + $0x2c]] }
 0x335   : > { %2796 = vst.msk [vmem:[#allocation2 + $0x50] sm:$0xff] %vm2784_vm4, %v2782_v3  ;;  %v2978_v57 = vmul.f32 %v2977_v24, %v7748_v60  ;;  %v2991_v29 = vstv %s4853_s8  ;;  %v3005_v55 = vstv %s4854_s13  ;;  %v3019_v4 = vstv %s4855_s20  ;;  %s4869_s8 = sld [smem:[#allocation9 + $0x50]] }
 0x336   : > { %2874 = vrot.lane.b32.xlu1 %v2869_v41, %s5299_s22  ;;  %2872 = vrot.lane.b32.xlu0 %v2868_v56, %s5299_s22  ;;  %v2993_v18 = vmul.f32 %v2991_v29, %v7750_v16  ;;  %v2992_v22 = vmul.f32 %v2991_v29, %v7748_v60  ;;  %v3007_v33 = vmul.f32 %v3005_v55, %v7750_v16  ;;  %v3033_v12 = vstv %s4856_s15  ;;  %s4870_s13 = sld [smem:[#allocation9 + $0x74]] }
 0x337   : > { %v3006_v5 = vmul.f32 %v3005_v55, %v7748_v60  ;;  %v3021_v17 = vmul.f32 %v3019_v4, %v7750_v16  ;;  %v3020_v38 = vmul.f32 %v3019_v4, %v7748_v60  ;;  %v3035_v37 = vmul.f32 %v3033_v12, %v7750_v16  ;;  %s4875_s20 = sld [smem:[#allocation9 + $0xa]] }
 0x338   : > { %v3034_v44 = vmul.f32 %v3033_v12, %v7748_v60  ;;  %v3047_v43 = vstv %s4857_s14  ;;  %v3061_v27 = vstv %s4858_s23  ;;  %v3101_v6 = vstv %s4863_s18  ;;  %s4876_s15 = sld [smem:[#allocation9 + $0x2e]] }
 0x339   : > { %v3049_v46 = vmul.f32 %v3047_v43, %v7750_v16  ;;  %v3048_v52 = vmul.f32 %v3047_v43, %v7748_v60  ;;  %v3063_v58 = vmul.f32 %v3061_v27, %v7750_v16  ;;  %v3062_v13 = vmul.f32 %v3061_v27, %v7748_v60  ;;  %s4877_s14 = sld [smem:[#allocation9 + $0x52]] }
 0x33a   : > { %2888 = vrot.lane.b32.xlu1 %v2883_v32, %s5300_s19  ;;  %2886 = vrot.lane.b32.xlu0 %v2882_v34, %s5300_s19  ;;  %v3103_v15 = vmul.f32 %v3101_v6, %v7786_v48  ;;  %v3102_v49 = vmul.f32 %v3101_v6, %v7784_v20  ;;  %v3115_v54 = vstv %s4864_s17  ;;  %v3129_v53 = vstv %s4865_s21  ;;  %v7820_v34 = vld [vmem:[#allocation2 + $0x18] sm:$0xff]  ;;  %s4878_s23 = sld [smem:[#allocation9 + $0x76]] }
 0x33b   : > { %v3117_v28 = vmul.f32 %v3115_v54, %v7786_v48  ;;  %v3116_v36 = vmul.f32 %v3115_v54, %v7784_v20  ;;  %v3131_v61 = vmul.f32 %v3129_v53, %v7786_v48  ;;  %v3130_v26 = vmul.f32 %v3129_v53, %v7784_v20  ;;  %s4879_s18 = sld [smem:[#allocation9 + $0xb]] }
 0x33c   : > { %v3143_v0 = vstv %s4866_s16  ;;  %v3157_v47 = vstv %s4867_s29  ;;  %v3171_v45 = vstv %s4868_s9  ;;  %v3185_v11 = vstv %s4869_s8  ;;  %s4880_s17 = sld [smem:[#allocation9 + $0x2f]] }
 0x33d   : > { %v3145_v9 = vmul.f32 %v3143_v0, %v7786_v48  ;;  %v3144_v25 = vmul.f32 %v3143_v0, %v7784_v20  ;;  %v3159_v31 = vmul.f32 %v3157_v47, %v7786_v48  ;;  %v3158_v30 = vmul.f32 %v3157_v47, %v7784_v20  ;;  %s4881_s21 = sld [smem:[#allocation9 + $0x53]] }
 0x33e   : > { %2902 = vrot.lane.b32.xlu1 %v2897_v7, %s5300_s19  ;;  %2900 = vrot.lane.b32.xlu0 %v2896_v40, %s5300_s19  ;;  %v3173_v39 = vmul.f32 %v3171_v45, %v7786_v48  ;;  %v3172_v59 = vmul.f32 %v3171_v45, %v7784_v20  ;;  %v3187_v3 = vmul.f32 %v3185_v11, %v7786_v48  ;;  %v3199_v56 = vstv %s4870_s13  ;;  %s4882_s16 = sld [smem:[#allocation9 + $0x77]] }
 0x33f   : > { %v3186_v41 = vmul.f32 %v3185_v11, %v7784_v20  ;;  %v3201_v10 = vmul.f32 %v3199_v56, %v7786_v48  ;;  %v3200_v32 = vmul.f32 %v3199_v56, %v7784_v20  ;;  %v3240_v7 = vstv %s4875_s20  ;;  %s7846_s29 = sld [smem:[#allocation9]] }
 0x340   : > { %v3242_v40 = vmul.f32 %v3240_v7, %v7822_v19  ;;  %v3241_v14 = vmul.f32 %v3240_v7, %v7820_v34  ;;  %s7850_s9 = sld [smem:[#allocation9 + $0xd]] }
 0x341   : > { %s7854_s8 = sld [smem:[#allocation9 + $0x24]] }
 0x342   : > { %2916 = vrot.lane.b32.xlu1 %v2911_v21, %s5300_s19  ;;  %2914 = vrot.lane.b32.xlu0 %v2910_v35, %s5300_s19  ;;  %v3254_v21 = vstv %s4876_s15  ;;  %s7856_s13 = sld [smem:[#allocation9 + $0x48]] }
 0x343   : > { %v3256_v35 = vmul.f32 %v3254_v21, %v7822_v19  ;;  %v3255_v62 = vmul.f32 %v3254_v21, %v7820_v34  ;;  %v3324_v4 = vstv %s4881_s21  ;;  %s7860_s20 = sld [smem:[#allocation9 + $0x6c]] }
 0x344   : > { %v3326_v12 = vmul.f32 %v3324_v4, %v7822_v19  ;;  %s7862_s15 = sld [smem:[#allocation9 + $0x31]] }
 0x345   : > { %s7898_s21 = sld [smem:[#allocation9 + $0xe]] }
 0x346   : > { %2930 = vrot.lane.b32.xlu1 %v2925_v1, %s5300_s19  ;;  %2928 = vrot.lane.b32.xlu0 %v2924_v63, %s5300_s19  ;;  %v3268_v1 = vstv %s4877_s14  ;;  %s7866_s14 = sld [smem:[#allocation9 + $0x3]]  ;;  %v3378_v6 = vstv %s7850_s9 }
 0x347   : > { %v3270_v63 = vmul.f32 %v3268_v1, %v7822_v19  ;;  %v3269_v2 = vmul.f32 %v3268_v1, %v7820_v34  ;;  %s7928_s9 = sld [smem:[#allocation9 + $0x32]] }
 0x34a   : > { %2970 = vrot.lane.b32.xlu1 %v2965_v50, %s5299_s22  ;;  %2968 = vrot.lane.b32.xlu0 %v2964_v8, %s5299_s22  ;;  %v3282_v50 = vstv %s4878_s23  ;;  %s7868_s23 = sld [smem:[#allocation9 + $0x55]]  ;;  %v3392_v0 = vstv %s7862_s15 }
 0x34b   : > { %v3284_v8 = vmul.f32 %v3282_v50, %v7822_v19  ;;  %v3283_v24 = vmul.f32 %v3282_v50, %v7820_v34  ;;  %s4900_s15 = sld [smem:[#allocation9 + $0x34]] }
 0x34e   : > { %2984 = vrot.lane.b32.xlu1 %v2979_v42, %s5299_s22  ;;  %2982 = vrot.lane.b32.xlu0 %v2978_v57, %s5299_s22  ;;  %v3296_v42 = vstv %s4879_s18  ;;  %s7881_s18 = sld [smem:[#allocation9 + $0x79]] }
 0x34f   : > { %v3298_v57 = vmul.f32 %v3296_v42, %v7822_v19  ;;  %v3297_v29 = vmul.f32 %v3296_v42, %v7820_v34 }
 0x350   : > { %v3406_v45 = vstv %s7868_s23  ;;  %s7983_s23 = sld [smem:[#allocation9 + $0x58]] }
 0x352   : > { %2998 = vrot.lane.b32.xlu1 %v2993_v18, %s5299_s22  ;;  %2996 = vrot.lane.b32.xlu0 %v2992_v22, %s5299_s22  ;;  %v3310_v18 = vstv %s4880_s17  ;;  %s7886_s17 = sld [smem:[#allocation9 + $0x27]] }
 0x356   : > { %3012 = vrot.lane.b32.xlu1 %v3007_v33, %s5299_s22  ;;  %3010 = vrot.lane.b32.xlu0 %v3006_v5, %s5299_s22  ;;  %v3312_v33 = vmul.f32 %v3310_v18, %v7822_v19  ;;  %v3311_v5 = vmul.f32 %v3310_v18, %v7820_v34 }
 0x358   : > { %v2945_v21 = vstv %s7886_s17  ;;  %s7995_s17 = sld [smem:[#allocation9 + $0x7c]] }
 0x35a   : > { %3026 = vrot.lane.b32.xlu1 %v3021_v17, %s5300_s19  ;;  %3024 = vrot.lane.b32.xlu0 %v3020_v38, %s5300_s19 }
 0x35e   : > { %3040 = vrot.lane.b32.xlu1 %v3035_v37, %s5300_s19  ;;  %3038 = vrot.lane.b32.xlu0 %v3034_v44, %s5300_s19  ;;  %v3325_v37 = vmul.f32 %v3324_v4, %v7820_v34  ;;  %v3338_v44 = vstv %s4882_s16  ;;  %s7904_s16 = sld [smem:[#allocation9 + $0x4b]] }
 0x35f   : > { %v3339_v27 = vmul.f32 %v3338_v44, %v7820_v34 }
 0x362   : > { %3054 = vrot.lane.b32.xlu1 %v3049_v46, %s5300_s19  ;;  %3052 = vrot.lane.b32.xlu0 %v3048_v52, %s5300_s19  ;;  %v3340_v52 = vmul.f32 %v3338_v44, %v7822_v19 }
 0x366   : > { %3068 = vrot.lane.b32.xlu1 %v3063_v58, %s5300_s19  ;;  %3066 = vrot.lane.b32.xlu0 %v3062_v13, %s5300_s19  ;;  %v7876_v58 = vld [vmem:[#allocation2 + $0x19] sm:$0xff]  ;;  %v7878_v13 = vld [vmem:[#allocation2 + $0x21] sm:$0xff] }
 0x367   : > { %v3393_v56 = vmul.f32 %v3392_v0, %v7876_v58  ;;  %v3408_v42 = vmul.f32 %v3406_v45, %v7878_v13 }
 0x36a   : > { %3108 = vrot.lane.b32.xlu1 %v3103_v15, %s5299_s22  ;;  %3106 = vrot.lane.b32.xlu0 %v3102_v49, %s5299_s22  ;;  %v2801_v15 = vstv %s7846_s29  ;;  %s7918_s29 = sld [smem:[#allocation9 + $0x6f]] }
 0x36b   : > { %v2803_v53 = vmul.f32 %v2801_v15, %v7673_v23 }
 0x36e   : > { %3122 = vrot.lane.b32.xlu1 %v3117_v28, %s5299_s22  ;;  %3120 = vrot.lane.b32.xlu0 %v3116_v36, %s5299_s22  ;;  %v3380_v28 = vmul.f32 %v3378_v6, %v7878_v13  ;;  %v3379_v36 = vmul.f32 %v3378_v6, %v7876_v58 }
 0x372   : > { %3136 = vrot.lane.b32.xlu1 %v3131_v61, %s5299_s22  ;;  %3134 = vrot.lane.b32.xlu0 %v3130_v26, %s5299_s22  ;;  %v2802_v61 = vmul.f32 %v2801_v15, %v7675_v51  ;;  %v2807_v26 = vstv %s7854_s8  ;;  %s7946_s8 = sld [smem:[#allocation9 + $0x56]] }
 0x376   : > { %3150 = vrot.lane.b32.xlu1 %v3145_v9, %s5299_s22  ;;  %3148 = vrot.lane.b32.xlu0 %v3144_v25, %s5299_s22  ;;  %v2813_v9 = vstv %s7856_s13  ;;  %v2939_v25 = vstv %s7866_s14  ;;  %s4894_s13 = sld [smem:[#allocation9 + $0x7a]] }
 0x377   : > { %v2941_v7 = vmul.f32 %v2939_v25, %v7750_v16  ;;  %v2814_v50 = vmul.f32 %v2813_v9, %v7675_v51  ;;  %s7979_s14 = sld [smem:[#allocation9 + $0x6]] }
 0x37a   : > { %3164 = vrot.lane.b32.xlu1 %v3159_v31, %s5300_s19  ;;  %3162 = vrot.lane.b32.xlu0 %v3158_v30, %s5300_s19  ;;  %v2819_v30 = vstv %s7860_s20  ;;  %s4899_s20 = sld [smem:[#allocation9 + $0x10]] }
 0x37b   : > { %v2820_v44 = vmul.f32 %v2819_v30, %v7675_v51 }
 0x37e   : > { %3178 = vrot.lane.b32.xlu1 %v3173_v39, %s5300_s19  ;;  %3176 = vrot.lane.b32.xlu0 %v3172_v59, %s5300_s19  ;;  %v2809_v39 = vmul.f32 %v2807_v26, %v7673_v23  ;;  %v2808_v59 = vmul.f32 %v2807_v26, %v7675_v51 }
 0x382   : > { %3192 = vrot.lane.b32.xlu1 %v3187_v3, %s5300_s19  ;;  %3190 = vrot.lane.b32.xlu0 %v3186_v41, %s5300_s19  ;;  %v3394_v41 = vmul.f32 %v3392_v0, %v7878_v13 }
 0x386   : > { %3206 = vrot.lane.b32.xlu1 %v3201_v10, %s5300_s19  ;;  %3204 = vrot.lane.b32.xlu0 %v3200_v32, %s5300_s19 }
 0x38a   : > { %3247 = vrot.lane.b32.xlu1 %v3242_v40, %s5299_s22  ;;  %3245 = vrot.lane.b32.xlu0 %v3241_v14, %s5299_s22  ;;  %v2940_v40 = vmul.f32 %v2939_v25, %v7748_v60  ;;  %v3420_v14 = vstv %s7881_s18  ;;  %s7991_s18 = sld [smem:[#allocation9 + $0x2a]] }
 0x38b   : > { %v3422_v6 = vmul.f32 %v3420_v14, %v7878_v13  ;;  %v3421_v15 = vmul.f32 %v3420_v14, %v7876_v58 }
 0x38e   : > { %3261 = vrot.lane.b32.xlu1 %v3256_v35, %s5299_s22  ;;  %3259 = vrot.lane.b32.xlu0 %v3255_v62, %s5299_s22 }
 0x392   : > { %3275 = vrot.lane.b32.xlu1 %v3270_v63, %s5299_s22  ;;  %3273 = vrot.lane.b32.xlu0 %v3269_v2, %s5299_s22  ;;  %v2815_v2 = vmul.f32 %v2813_v9, %v7673_v23 }
 0x396   : > { %3289 = vrot.lane.b32.xlu1 %v3284_v8, %s5299_s22  ;;  %3287 = vrot.lane.b32.xlu0 %v3283_v24, %s5299_s22 }
 0x39a   : > { %3303 = vrot.lane.b32.xlu1 %v3298_v57, %s5300_s19  ;;  %3301 = vrot.lane.b32.xlu0 %v3297_v29, %s5300_s19  ;;  %v3407_v57 = vmul.f32 %v3406_v45, %v7876_v58 }
 0x39c   : > { %v2833_v22 = vpop.permute.xlu1 %2832  ;;  %v2831_v55 = vpop.permute.xlu0 %2830 }
 0x39d   : > { %v2837_v47 = vadd.f32 %v2833_v22, %v2803_v53  ;;  %v2836_v31 = vadd.f32 %v2831_v55, %v2802_v61  ;;  %v2947_v22 = vmul.f32 %v2945_v21, %v7750_v16  ;;  %v2946_v55 = vmul.f32 %v2945_v21, %v7748_v60 }
 0x39e   : > { %3317 = vrot.lane.b32.xlu1 %v3312_v33, %s5300_s19  ;;  %3315 = vrot.lane.b32.xlu0 %v3311_v5, %s5300_s19  ;;  %v3434_v33 = vstv %s7898_s21  ;;  %v2951_v5 = vstv %s7904_s16  ;;  %s8000_s21 = sld [smem:[#allocation9 + $0x4e]] }
 0x39f   : > { %v3436_v25 = vmul.f32 %v3434_v33, %v7878_v13  ;;  %s8007_s16 = sld [smem:[#allocation9 + $0x11]] }
 0x3a0   : > { %v2847_v17 = vpop.permute.xlu1 %2846  ;;  %v2845_v38 = vpop.permute.xlu0 %2844 }
 0x3a1   : > { %v2851_v35 = vadd.f32 %v2847_v17, %v2809_v39  ;;  %v2850_v62 = vadd.f32 %v2845_v38, %v2808_v59 }
 0x3a2   : > { %3331 = vrot.lane.b32.xlu1 %v3326_v12, %s5300_s19  ;;  %3329 = vrot.lane.b32.xlu0 %v3325_v37, %s5300_s19  ;;  %v2821_v37 = vmul.f32 %v2819_v30, %v7673_v23  ;;  %v2957_v23 = vstv %s7918_s29  ;;  %s8014_s29 = sld [smem:[#allocation9 + $0x72]] }
 0x3a3   : > { %v2959_v39 = vmul.f32 %v2957_v23, %v7750_v16 }
 0x3a4   : > { %v7870_v43 = vpop.permute.xlu1 %2860  ;;  %v7872_v46 = vpop.permute.xlu0 %2858 }
 0x3a5   : > { %v2865_v4 = vadd.f32 %v7870_v43, %v2815_v2  ;;  %v2864_v17 = vadd.f32 %v7872_v46, %v2814_v50  ;;  %v2953_v46 = vmul.f32 %v2951_v5, %v7750_v16  ;;  %v7985_v2 = vld [vmem:[#allocation2 + $0x1a] sm:$0xff]  ;;  %v7987_v50 = vld [vmem:[#allocation2 + $0x22] sm:$0xff] }
 0x3a6   : > { %3345 = vrot.lane.b32.xlu1 %v3340_v52, %s5300_s19  ;;  %3343 = vrot.lane.b32.xlu0 %v3339_v27, %s5300_s19 }
 0x3a8   : > { %v7888_v49 = vpop.permute.xlu1 %2874  ;;  %v7890_v54 = vpop.permute.xlu0 %2872 }
 0x3a9   : > { %v2879_v51 = vadd.f32 %v7888_v49, %v2821_v37  ;;  %v2878_v53 = vadd.f32 %v7890_v54, %v2820_v44  ;;  %v2958_v49 = vmul.f32 %v2957_v23, %v7748_v60  ;;  %v3544_v44 = vstv %s7983_s23  ;;  %s8078_s23 = sld [smem:[#allocation9 + $0x5b]] }
 0x3aa   : > { %3385 = vrot.lane.b32.xlu1 %v3380_v28, %s5299_s22  ;;  %3383 = vrot.lane.b32.xlu0 %v3379_v36, %s5299_s22  ;;  %v2952_v36 = vmul.f32 %v2951_v5, %v7748_v60 }
 0x3ac   : > { %v2889_v11 = vpop.permute.xlu1 %2888  ;;  %v2887_v3 = vpop.permute.xlu0 %2886 }
 0x3ad   : > { %v2893_v10 = vadd.f32 %v2889_v11, %v2837_v47  ;;  %v2892_v32 = vadd.f32 %v2887_v3, %v2836_v31  ;;  %v3435_v47 = vmul.f32 %v3434_v33, %v7876_v58  ;;  %v3448_v31 = vstv %s7928_s9  ;;  %s8025_s9 = sld [smem:[#allocation9 + $0x35]] }
 0x3ae   : > { %3399 = vrot.lane.b32.xlu1 %v3394_v41, %s5299_s22  ;;  %3397 = vrot.lane.b32.xlu0 %v3393_v56, %s5299_s22  ;;  %v3450_v41 = vmul.f32 %v3448_v31, %v7878_v13  ;;  %v3449_v56 = vmul.f32 %v3448_v31, %v7876_v58 }
 0x3af   : > { %v7920_v1 = vadd.f32 %v2941_v7, %v2893_v10  ;;  %v7922_v63 = vadd.f32 %v2940_v40, %v2892_v32  ;;  %v3462_v10 = vstv %s7946_s8  ;;  %v3476_v40 = vstv %s4894_s13  ;;  %s8041_s8 = sld [smem:[#allocation9 + $0x59]] }
 0x3b0   : > { %v2903_v8 = vpop.permute.xlu1 %2902  ;;  %v2901_v24 = vpop.permute.xlu0 %2900  ;;  %v3464_v32 = vmul.f32 %v3462_v10, %v7878_v13  ;;  %v3463_v7 = vmul.f32 %v3462_v10, %v7876_v58  ;;  %s4906_s13 = sld [smem:[#allocation9 + $0x7d]] }
 0x3b1   : > { %v2907_v29 = vadd.f32 %v2903_v8, %v2851_v35  ;;  %v2906_v18 = vadd.f32 %v2901_v24, %v2850_v62  ;;  %v3478_v35 = vmul.f32 %v3476_v40, %v7878_v13  ;;  %v3477_v62 = vmul.f32 %v3476_v40, %v7876_v58 }
 0x3b2   : > { %3413 = vrot.lane.b32.xlu1 %v3408_v42, %s5299_s22  ;;  %3411 = vrot.lane.b32.xlu0 %v3407_v57, %s5299_s22  ;;  %v3516_v8 = vstv %s4899_s20  ;;  %s4911_s20 = sld [smem:[#allocation9 + $0x13]] }
 0x3b3   : > { %v7938_v38 = vadd.f32 %v2947_v22, %v2907_v29  ;;  %v7940_v12 = vadd.f32 %v2946_v55, %v2906_v18  ;;  %v3518_v57 = vmul.f32 %v3516_v8, %v7987_v50  ;;  %v3517_v29 = vmul.f32 %v3516_v8, %v7985_v2 }
 0x3b4   : > { %v2917_v52 = vpop.permute.xlu1 %2916  ;;  %v2915_v27 = vpop.permute.xlu0 %2914  ;;  %v3530_v18 = vstv %s4900_s15  ;;  %v3077_v22 = vstv %s7979_s14  ;;  %s4912_s15 = sld [smem:[#allocation9 + $0x37]] }
 0x3b5   : > { %v2921_v28 = vadd.f32 %v2917_v52, %v2865_v4  ;;  %v2920_v43 = vadd.f32 %v2915_v27, %v2864_v17  ;;  %v3532_v17 = vmul.f32 %v3530_v18, %v7987_v50  ;;  %v3531_v37 = vmul.f32 %v3530_v18, %v7985_v2  ;;  %s8074_s14 = sld [smem:[#allocation9 + $0x9]] }
 0x3b6   : > { %3427 = vrot.lane.b32.xlu1 %v3422_v6, %s5299_s22  ;;  %3425 = vrot.lane.b32.xlu0 %v3421_v15, %s5299_s22  ;;  %v3079_v6 = vmul.f32 %v3077_v22, %v7786_v48  ;;  %v3078_v15 = vmul.f32 %v3077_v22, %v7784_v20 }
 0x3b7   : > { %v7955_v61 = vadd.f32 %v2953_v46, %v2921_v28  ;;  %v7957_v26 = vadd.f32 %v2952_v36, %v2920_v43 }
 0x3b8   : > { %v2931_v0 = vpop.permute.xlu1 %2930  ;;  %v2929_v9 = vpop.permute.xlu0 %2928 }
 0x3b9   : > { %v2935_v30 = vadd.f32 %v2931_v0, %v2879_v51  ;;  %v2934_v45 = vadd.f32 %v2929_v9, %v2878_v53  ;;  %v3546_v51 = vmul.f32 %v3544_v44, %v7987_v50  ;;  %v3545_v53 = vmul.f32 %v3544_v44, %v7985_v2 }
 0x3ba   : > { %3441 = vrot.lane.b32.xlu1 %v3436_v25, %s5300_s19  ;;  %3439 = vrot.lane.b32.xlu0 %v3435_v47, %s5300_s19  ;;  %v3558_v0 = vstv %s7995_s17  ;;  %v3089_v47 = vstv %s8000_s21  ;;  %s8090_s17 = sld [smem:[#allocation9 + $0x7f]] }
 0x3bb   : > { %v7966_v54 = vadd.f32 %v2959_v39, %v2935_v30  ;;  %v7968_v59 = vadd.f32 %v2958_v49, %v2934_v45  ;;  %v3614_v44 = vstv %s4906_s13  ;;  %s8095_s21 = sld [smem:[#allocation9 + $0x51]] }
 0x3bc   : > { %v2971_v11 = vpop.permute.xlu1 %2970  ;;  %v2969_v3 = vpop.permute.xlu0 %2968  ;;  %s4918_s13 = sld [smem:[#allocation9 + $0x80]] }
 0x3bd   : > { %v2975_v55 = vadd.f32 %v2971_v11, %v7920_v1  ;;  %v2974_v33 = vadd.f32 %v2969_v3, %v7922_v63  ;;  %v3083_v1 = vstv %s7991_s18  ;;  %v3560_v3 = vmul.f32 %v3558_v0, %v7987_v50  ;;  %s8086_s18 = sld [smem:[#allocation9 + $0x2d]] }
 0x3be   : > { %3455 = vrot.lane.b32.xlu1 %v3450_v41, %s5300_s19  ;;  %3453 = vrot.lane.b32.xlu0 %v3449_v56, %s5300_s19  ;;  %v3559_v41 = vmul.f32 %v3558_v0, %v7985_v2  ;;  %v3572_v56 = vstv %s8007_s16  ;;  %v3669_v0 = vstv %s4912_s15  ;;  %s8102_s16 = sld [smem:[#allocation9 + $0x14]] }
 0x3bf   : > { %v3573_v8 = vmul.f32 %v3572_v56, %v7985_v2  ;;  %s4924_s15 = sld [smem:[#allocation9 + $0x3a]] }
 0x3c0   : > { %v2985_v60 = vpop.permute.xlu1 %2984  ;;  %v2983_v16 = vpop.permute.xlu0 %2982 }
 0x3c1   : > { %v2989_v63 = vadd.f32 %v2985_v60, %v7938_v38  ;;  %v2988_v28 = vadd.f32 %v2983_v16, %v7940_v12  ;;  %v3085_v38 = vmul.f32 %v3083_v1, %v7786_v48  ;;  %v3084_v12 = vmul.f32 %v3083_v1, %v7784_v20  ;;  %v8080_v1 = vld [vmem:[#allocation2 + $0x38] sm:$0xff] }
 0x3c2   : > { %3469 = vrot.lane.b32.xlu1 %v3464_v32, %s5300_s19  ;;  %3467 = vrot.lane.b32.xlu0 %v3463_v7, %s5300_s19  ;;  %v3095_v16 = vstv %s8014_s29  ;;  %s8109_s29 = sld [smem:[#allocation9 + $0x75]] }
 0x3c3   : > { %v3097_v22 = vmul.f32 %v3095_v16, %v7786_v48 }
 0x3c4   : > { %v2999_v14 = vpop.permute.xlu1 %2998  ;;  %v2997_v21 = vpop.permute.xlu0 %2996 }
 0x3c5   : > { %v3003_v31 = vadd.f32 %v2999_v14, %v7955_v61  ;;  %v3002_v30 = vadd.f32 %v2997_v21, %v7957_v26  ;;  %v3091_v61 = vmul.f32 %v3089_v47, %v7786_v48  ;;  %v3090_v26 = vmul.f32 %v3089_v47, %v7784_v20 }
 0x3c6   : > { %3483 = vrot.lane.b32.xlu1 %v3478_v35, %s5300_s19  ;;  %3481 = vrot.lane.b32.xlu0 %v3477_v62, %s5300_s19  ;;  %v3574_v62 = vmul.f32 %v3572_v56, %v7987_v50 }
 0x3c8   : > { %v3013_v24 = vpop.permute.xlu1 %3012  ;;  %v3011_v42 = vpop.permute.xlu0 %3010 }
 0x3c9   : > { %v3017_v32 = vadd.f32 %v3013_v24, %v7966_v54  ;;  %v3016_v7 = vadd.f32 %v3011_v42, %v7968_v59  ;;  %v3096_v54 = vmul.f32 %v3095_v16, %v7784_v20 }
 0x3ca   : > { %3523 = vrot.lane.b32.xlu1 %v3518_v57, %s5299_s22  ;;  %3521 = vrot.lane.b32.xlu0 %v3517_v29, %s5299_s22  ;;  %v3586_v57 = vstv %s8025_s9  ;;  %s8120_s9 = sld [smem:[#allocation9 + $0x38]] }
 0x3cc   : > { %v3027_v5 = vpop.permute.xlu1 %3026  ;;  %v3025_v4 = vpop.permute.xlu0 %3024 }
 0x3cd   : > { %v3031_v52 = vadd.f32 %v3027_v5, %v2975_v55  ;;  %v3030_v27 = vadd.f32 %v3025_v4, %v2974_v33  ;;  %v3588_v33 = vmul.f32 %v3586_v57, %v7987_v50  ;;  %v3587_v5 = vmul.f32 %v3586_v57, %v7985_v2 }
 0x3ce   : > { %3537 = vrot.lane.b32.xlu1 %v3532_v17, %s5299_s22  ;;  %3535 = vrot.lane.b32.xlu0 %v3531_v37, %s5299_s22  ;;  %v3600_v4 = vstv %s8041_s8  ;;  %s8136_s8 = sld [smem:[#allocation9 + $0x5c]] }
 0x3cf   : > { %v8018_v43 = vadd.f32 %v3079_v6, %v3031_v52  ;;  %v8020_v46 = vadd.f32 %v3078_v15, %v3030_v27  ;;  %v3602_v17 = vmul.f32 %v3600_v4, %v7987_v50  ;;  %v3601_v37 = vmul.f32 %v3600_v4, %v7985_v2 }
 0x3d0   : > { %v3041_v36 = vpop.permute.xlu1 %3040  ;;  %v3039_v23 = vpop.permute.xlu0 %3038  ;;  %v3616_v6 = vmul.f32 %v3614_v44, %v7987_v50  ;;  %v3615_v15 = vmul.f32 %v3614_v44, %v7985_v2 }
 0x3d1   : > { %v3045_v9 = vadd.f32 %v3041_v36, %v2989_v63  ;;  %v3044_v25 = vadd.f32 %v3039_v23, %v2988_v28  ;;  %v8082_v63 = vld [vmem:[#allocation2 + $0x30] sm:$0xff]  ;;  %v3655_v28 = vstv %s4911_s20  ;;  %s4923_s20 = sld [smem:[#allocation9 + $0x16]] }
 0x3d2   : > { %3551 = vrot.lane.b32.xlu1 %v3546_v51, %s5299_s22  ;;  %3549 = vrot.lane.b32.xlu0 %v3545_v53, %s5299_s22  ;;  %v3657_v51 = vmul.f32 %v3655_v28, %v8080_v1  ;;  %v3656_v53 = vmul.f32 %v3655_v28, %v8082_v63 }
 0x3d3   : > { %v8034_v45 = vadd.f32 %v3085_v38, %v3045_v9  ;;  %v8036_v39 = vadd.f32 %v3084_v12, %v3044_v25  ;;  %v3216_v9 = vstv %s8074_s14  ;;  %s8169_s14 = sld [smem:[#allocation9 + $0xc]] }
 0x3d4   : > { %v3055_v49 = vpop.permute.xlu1 %3054  ;;  %v3053_v11 = vpop.permute.xlu0 %3052  ;;  %v3217_v56 = vmul.f32 %v3216_v9, %v7820_v34 }
 0x3d5   : > { %v3059_v10 = vadd.f32 %v3055_v49, %v3003_v31  ;;  %v3058_v60 = vadd.f32 %v3053_v11, %v3002_v30  ;;  %v3671_v31 = vmul.f32 %v3669_v0, %v8080_v1  ;;  %v3670_v30 = vmul.f32 %v3669_v0, %v8082_v63 }
 0x3d6   : > { %3565 = vrot.lane.b32.xlu1 %v3560_v3, %s5299_s22  ;;  %3563 = vrot.lane.b32.xlu0 %v3559_v41, %s5299_s22  ;;  %v3683_v49 = vstv %s8078_s23  ;;  %v3218_v41 = vmul.f32 %v3216_v9, %v7822_v19  ;;  %s8173_s23 = sld [smem:[#allocation9 + $0x5e]] }
 0x3d7   : > { %v8050_v40 = vadd.f32 %v3091_v61, %v3059_v10  ;;  %v8052_v14 = vadd.f32 %v3090_v26, %v3058_v60 }
 0x3d8   : > { %v3069_v21 = vpop.permute.xlu1 %3068  ;;  %v3067_v35 = vpop.permute.xlu0 %3066 }
 0x3d9   : > { %v3073_v29 = vadd.f32 %v3069_v21, %v3017_v32  ;;  %v3072_v18 = vadd.f32 %v3067_v35, %v3016_v7  ;;  %v3685_v32 = vmul.f32 %v3683_v49, %v8080_v1  ;;  %v3684_v7 = vmul.f32 %v3683_v49, %v8082_v63 }
 0x3da   : > { %3579 = vrot.lane.b32.xlu1 %v3574_v62, %s5300_s19  ;;  %3577 = vrot.lane.b32.xlu0 %v3573_v8, %s5300_s19  ;;  %v3697_v21 = vstv %s8090_s17  ;;  %v3228_v8 = vstv %s8095_s21  ;;  %s8185_s17 = sld [smem:[#allocation9 + $0x82]] }
 0x3db   : > { %v8061_v59 = vadd.f32 %v3097_v22, %v3073_v29  ;;  %v8063_v24 = vadd.f32 %v3096_v54, %v3072_v18  ;;  %v3753_v49 = vstv %s4918_s13  ;;  %s8190_s21 = sld [smem:[#allocation9 + $0x54]] }
 0x3dc   : > { %v3109_v42 = vpop.permute.xlu1 %3108  ;;  %v3107_v55 = vpop.permute.xlu0 %3106  ;;  %s4930_s13 = sld [smem:[#allocation9 + $0x83]] }
 0x3dd   : > { %v3113_v25 = vadd.f32 %v3109_v42, %v8018_v43  ;;  %v3112_v38 = vadd.f32 %v3107_v55, %v8020_v46  ;;  %v3222_v43 = vstv %s8086_s18  ;;  %v3699_v55 = vmul.f32 %v3697_v21, %v8080_v1  ;;  %s8181_s18 = sld [smem:[#allocation9 + $0x30]] }
 0x3de   : > { %3593 = vrot.lane.b32.xlu1 %v3588_v33, %s5300_s19  ;;  %3591 = vrot.lane.b32.xlu0 %v3587_v5, %s5300_s19  ;;  %v3698_v33 = vmul.f32 %v3697_v21, %v8082_v63  ;;  %v3711_v5 = vstv %s8102_s16  ;;  %v3807_v21 = vstv %s4924_s15  ;;  %s8197_s16 = sld [smem:[#allocation9 + $0x17]] }
 0x3df   : > { %v3712_v28 = vmul.f32 %v3711_v5, %v8082_v63  ;;  %s4936_s15 = sld [smem:[#allocation9 + $0x3d]] }
 0x3e0   : > { %v3123_v20 = vpop.permute.xlu1 %3122  ;;  %v3121_v48 = vpop.permute.xlu0 %3120 }
 0x3e1   : > { %v3127_v46 = vadd.f32 %v3123_v20, %v8034_v45  ;;  %v3126_v10 = vadd.f32 %v3121_v48, %v8036_v39  ;;  %v3224_v45 = vmul.f32 %v3222_v43, %v7822_v19  ;;  %v3223_v39 = vmul.f32 %v3222_v43, %v7820_v34  ;;  %v8175_v43 = vld [vmem:[#allocation2 + $0x31] sm:$0xff] }
 0x3e2   : > { %3607 = vrot.lane.b32.xlu1 %v3602_v17, %s5300_s19  ;;  %3605 = vrot.lane.b32.xlu0 %v3601_v37, %s5300_s19  ;;  %v3234_v48 = vstv %s8109_s29  ;;  %s8204_s29 = sld [smem:[#allocation9 + $0x78]] }
 0x3e3   : > { %v3236_v9 = vmul.f32 %v3234_v48, %v7822_v19 }
 0x3e4   : > { %v3137_v52 = vpop.permute.xlu1 %3136  ;;  %v3135_v27 = vpop.permute.xlu0 %3134 }
 0x3e5   : > { %v3141_v57 = vadd.f32 %v3137_v52, %v8050_v40  ;;  %v3140_v29 = vadd.f32 %v3135_v27, %v8052_v14  ;;  %v3230_v40 = vmul.f32 %v3228_v8, %v7822_v19  ;;  %v3229_v14 = vmul.f32 %v3228_v8, %v7820_v34 }
 0x3e6   : > { %3621 = vrot.lane.b32.xlu1 %v3616_v6, %s5300_s19  ;;  %3619 = vrot.lane.b32.xlu0 %v3615_v15, %s5300_s19  ;;  %v3713_v15 = vmul.f32 %v3711_v5, %v8080_v1 }
 0x3e8   : > { %v3151_v36 = vpop.permute.xlu1 %3150  ;;  %v3149_v23 = vpop.permute.xlu0 %3148 }
 0x3e9   : > { %v3155_v17 = vadd.f32 %v3151_v36, %v8061_v59  ;;  %v3154_v37 = vadd.f32 %v3149_v23, %v8063_v24  ;;  %v3235_v59 = vmul.f32 %v3234_v48, %v7820_v34 }
 0x3ea   : > { %3662 = vrot.lane.b32.xlu1 %v3657_v51, %s5299_s22  ;;  %3660 = vrot.lane.b32.xlu0 %v3656_v53, %s5299_s22  ;;  %v3725_v51 = vstv %s8120_s9  ;;  %s8215_s9 = sld [smem:[#allocation9 + $0x3b]] }
 0x3ec   : > { %v3165_v12 = vpop.permute.xlu1 %3164  ;;  %v3163_v47 = vpop.permute.xlu0 %3162 }
 0x3ed   : > { %v3169_v11 = vadd.f32 %v3165_v12, %v3113_v25  ;;  %v3168_v3 = vadd.f32 %v3163_v47, %v3112_v38  ;;  %v3727_v38 = vmul.f32 %v3725_v51, %v8080_v1  ;;  %v3726_v12 = vmul.f32 %v3725_v51, %v8082_v63 }
 0x3ee   : > { %3676 = vrot.lane.b32.xlu1 %v3671_v31, %s5299_s22  ;;  %3674 = vrot.lane.b32.xlu0 %v3670_v30, %s5299_s22  ;;  %v3739_v47 = vstv %s8136_s8  ;;  %s8231_s8 = sld [smem:[#allocation9 + $0x5f]] }
 0x3ef   : > { %v8113_v60 = vadd.f32 %v3218_v41, %v3169_v11  ;;  %v8115_v61 = vadd.f32 %v3217_v56, %v3168_v3  ;;  %v3741_v31 = vmul.f32 %v3739_v47, %v8080_v1  ;;  %v3740_v30 = vmul.f32 %v3739_v47, %v8082_v63 }
 0x3f0   : > { %v3179_v26 = vpop.permute.xlu1 %3178  ;;  %v3177_v16 = vpop.permute.xlu0 %3176  ;;  %v3755_v41 = vmul.f32 %v3753_v49, %v8080_v1  ;;  %v3754_v56 = vmul.f32 %v3753_v49, %v8082_v63 }
 0x3f1   : > { %v3183_v35 = vadd.f32 %v3179_v26, %v3127_v46  ;;  %v3182_v62 = vadd.f32 %v3177_v16, %v3126_v10  ;;  %v8177_v46 = vld [vmem:[#allocation2 + $0x39] sm:$0xff]  ;;  %v3793_v10 = vstv %s4923_s20  ;;  %s4935_s20 = sld [smem:[#allocation9 + $0x19]] }
 0x3f2   : > { %3690 = vrot.lane.b32.xlu1 %v3685_v32, %s5299_s22  ;;  %3688 = vrot.lane.b32.xlu0 %v3684_v7, %s5299_s22  ;;  %v3795_v32 = vmul.f32 %v3793_v10, %v8177_v46  ;;  %v3794_v7 = vmul.f32 %v3793_v10, %v8175_v43 }
 0x3f3   : > { %v8129_v18 = vadd.f32 %v3224_v45, %v3183_v35  ;;  %v8131_v22 = vadd.f32 %v3223_v39, %v3182_v62  ;;  %v3354_v35 = vstv %s8169_s14  ;;  %s8264_s14 = sld [smem:[#allocation9 + $0xf]] }
 0x3f4   : > { %v3193_v54 = vpop.permute.xlu1 %3192  ;;  %v3191_v42 = vpop.permute.xlu0 %3190  ;;  %v3355_v5 = vmul.f32 %v3354_v35, %v7876_v58 }
 0x3f5   : > { %v3197_v4 = vadd.f32 %v3193_v54, %v3141_v57  ;;  %v3196_v20 = vadd.f32 %v3191_v42, %v3140_v29  ;;  %v3809_v57 = vmul.f32 %v3807_v21, %v8177_v46  ;;  %v3808_v29 = vmul.f32 %v3807_v21, %v8175_v43 }
 0x3f6   : > { %3704 = vrot.lane.b32.xlu1 %v3699_v55, %s5299_s22  ;;  %3702 = vrot.lane.b32.xlu0 %v3698_v33, %s5299_s22  ;;  %v3821_v54 = vstv %s8173_s23  ;;  %v3356_v33 = vmul.f32 %v3354_v35, %v7878_v13  ;;  %s8268_s23 = sld [smem:[#allocation9 + $0x61]] }
 0x3f7   : > { %v8145_v44 = vadd.f32 %v3230_v40, %v3197_v4  ;;  %v8147_v52 = vadd.f32 %v3229_v14, %v3196_v20 }
 0x3f8   : > { %v3207_v27 = vpop.permute.xlu1 %3206  ;;  %v3205_v6 = vpop.permute.xlu0 %3204 }
 0x3f9   : > { %v3211_v53 = vadd.f32 %v3207_v27, %v3155_v17  ;;  %v3210_v0 = vadd.f32 %v3205_v6, %v3154_v37  ;;  %v3823_v17 = vmul.f32 %v3821_v54, %v8177_v46  ;;  %v3822_v37 = vmul.f32 %v3821_v54, %v8175_v43 }
 0x3fa   : > { %3718 = vrot.lane.b32.xlu1 %v3713_v15, %s5300_s19  ;;  %3716 = vrot.lane.b32.xlu0 %v3712_v28, %s5300_s19  ;;  %v3835_v27 = vstv %s8185_s17  ;;  %v3366_v28 = vstv %s8190_s21  ;;  %s8280_s17 = sld [smem:[#allocation9 + $0x85]] }
 0x3fb   : > { %v8156_v24 = vadd.f32 %v3236_v9, %v3211_v53  ;;  %v8158_v36 = vadd.f32 %v3235_v59, %v3210_v0  ;;  %v3891_v54 = vstv %s4930_s13  ;;  %s8285_s21 = sld [smem:[#allocation9 + $0x57]] }
 0x3fc   : > { %v3248_v23 = vpop.permute.xlu1 %3247  ;;  %v3246_v25 = vpop.permute.xlu0 %3245  ;;  %s4942_s13 = sld [smem:[#allocation9 + $0x86]] }
 0x3fd   : > { %v3252_v62 = vadd.f32 %v3248_v23, %v8113_v60  ;;  %v3251_v45 = vadd.f32 %v3246_v25, %v8115_v61  ;;  %v3360_v60 = vstv %s8181_s18  ;;  %v3837_v25 = vmul.f32 %v3835_v27, %v8177_v46  ;;  %s8276_s18 = sld [smem:[#allocation9 + $0x33]] }
 0x3fe   : > { %3732 = vrot.lane.b32.xlu1 %v3727_v38, %s5300_s19  ;;  %3730 = vrot.lane.b32.xlu0 %v3726_v12, %s5300_s19  ;;  %v3836_v38 = vmul.f32 %v3835_v27, %v8175_v43  ;;  %v3849_v12 = vstv %s8197_s16  ;;  %v3945_v27 = vstv %s4936_s15  ;;  %s8292_s16 = sld [smem:[#allocation9 + $0x1a]] }
 0x3ff   : > { %v3850_v10 = vmul.f32 %v3849_v12, %v8175_v43  ;;  %s4948_s15 = sld [smem:[#allocation9 + $0x40]] }
 0x400   : > { %v3262_v34 = vpop.permute.xlu1 %3261  ;;  %v3260_v19 = vpop.permute.xlu0 %3259 }
 0x401   : > { %v3266_v61 = vadd.f32 %v3262_v34, %v8129_v18  ;;  %v3265_v4 = vadd.f32 %v3260_v19, %v8131_v22  ;;  %v3362_v18 = vmul.f32 %v3360_v60, %v7878_v13  ;;  %v3361_v22 = vmul.f32 %v3360_v60, %v7876_v58  ;;  %v8270_v60 = vld [vmem:[#allocation2 + $0x32] sm:$0xff] }
 0x402   : > { %3746 = vrot.lane.b32.xlu1 %v3741_v31, %s5300_s19  ;;  %3744 = vrot.lane.b32.xlu0 %v3740_v30, %s5300_s19  ;;  %v3372_v19 = vstv %s8204_s29  ;;  %s8299_s29 = sld [smem:[#allocation9 + $0x7b]] }
 0x403   : > { %v3374_v35 = vmul.f32 %v3372_v19, %v7878_v13 }
 0x404   : > { %v3276_v11 = vpop.permute.xlu1 %3275  ;;  %v3274_v3 = vpop.permute.xlu0 %3273 }
 0x405   : > { %v3280_v51 = vadd.f32 %v3276_v11, %v8145_v44  ;;  %v3279_v53 = vadd.f32 %v3274_v3, %v8147_v52  ;;  %v3368_v44 = vmul.f32 %v3366_v28, %v7878_v13  ;;  %v3367_v52 = vmul.f32 %v3366_v28, %v7876_v58 }
 0x406   : > { %3760 = vrot.lane.b32.xlu1 %v3755_v41, %s5300_s19  ;;  %3758 = vrot.lane.b32.xlu0 %v3754_v56, %s5300_s19  ;;  %v3851_v56 = vmul.f32 %v3849_v12, %v8177_v46 }
 0x408   : > { %v3290_v26 = vpop.permute.xlu1 %3289  ;;  %v3288_v16 = vpop.permute.xlu0 %3287 }
 0x409   : > { %v3294_v31 = vadd.f32 %v3290_v26, %v8156_v24  ;;  %v3293_v30 = vadd.f32 %v3288_v16, %v8158_v36  ;;  %v3373_v24 = vmul.f32 %v3372_v19, %v7876_v58 }
 0x40a   : > { %3800 = vrot.lane.b32.xlu1 %v3795_v32, %s5299_s22  ;;  %3798 = vrot.lane.b32.xlu0 %v3794_v7, %s5299_s22  ;;  %v3863_v32 = vstv %s8215_s9  ;;  %s8310_s9 = sld [smem:[#allocation9 + $0x3e]] }
 0x40c   : > { %v3304_v39 = vpop.permute.xlu1 %3303  ;;  %v3302_v8 = vpop.permute.xlu0 %3301 }
 0x40d   : > { %v3308_v42 = vadd.f32 %v3304_v39, %v3252_v62  ;;  %v3307_v55 = vadd.f32 %v3302_v8, %v3251_v45  ;;  %v3865_v45 = vmul.f32 %v3863_v32, %v8177_v46  ;;  %v3864_v39 = vmul.f32 %v3863_v32, %v8175_v43 }
 0x40e   : > { %3814 = vrot.lane.b32.xlu1 %v3809_v57, %s5299_s22  ;;  %3812 = vrot.lane.b32.xlu0 %v3808_v29, %s5299_s22  ;;  %v3877_v8 = vstv %s8231_s8  ;;  %s8326_s8 = sld [smem:[#allocation9 + $0x62]] }
 0x40f   : > { %v8208_v20 = vadd.f32 %v3356_v33, %v3308_v42  ;;  %v8210_v40 = vadd.f32 %v3355_v5, %v3307_v55  ;;  %v3879_v57 = vmul.f32 %v3877_v8, %v8177_v46  ;;  %v3878_v29 = vmul.f32 %v3877_v8, %v8175_v43 }
 0x410   : > { %v3318_v14 = vpop.permute.xlu1 %3317  ;;  %v3316_v48 = vpop.permute.xlu0 %3315  ;;  %v3893_v33 = vmul.f32 %v3891_v54, %v8177_v46  ;;  %v3892_v5 = vmul.f32 %v3891_v54, %v8175_v43 }
 0x411   : > { %v3322_v6 = vadd.f32 %v3318_v14, %v3266_v61  ;;  %v3321_v15 = vadd.f32 %v3316_v48, %v3265_v4  ;;  %v8272_v61 = vld [vmem:[#allocation2 + $0x3a] sm:$0xff]  ;;  %v3931_v4 = vstv %s4935_s20  ;;  %s4947_s20 = sld [smem:[#allocation9 + $0x1c]] }
 0x412   : > { %3828 = vrot.lane.b32.xlu1 %v3823_v17, %s5299_s22  ;;  %3826 = vrot.lane.b32.xlu0 %v3822_v37, %s5299_s22  ;;  %v3933_v17 = vmul.f32 %v3931_v4, %v8272_v61  ;;  %v3932_v37 = vmul.f32 %v3931_v4, %v8270_v60 }
 0x413   : > { %v8224_v0 = vadd.f32 %v3362_v18, %v3322_v6  ;;  %v8226_v9 = vadd.f32 %v3361_v22, %v3321_v15  ;;  %v3492_v6 = vstv %s8264_s14  ;;  %s8359_s14 = sld [smem:[#allocation9 + $0x12]] }
 0x414   : > { %v3332_v59 = vpop.permute.xlu1 %3331  ;;  %v3330_v23 = vpop.permute.xlu0 %3329  ;;  %v3493_v12 = vmul.f32 %v3492_v6, %v7985_v2 }
 0x415   : > { %v3336_v47 = vadd.f32 %v3332_v59, %v3280_v51  ;;  %v3335_v34 = vadd.f32 %v3330_v23, %v3279_v53  ;;  %v3947_v51 = vmul.f32 %v3945_v27, %v8272_v61  ;;  %v3946_v53 = vmul.f32 %v3945_v27, %v8270_v60 }
 0x416   : > { %3842 = vrot.lane.b32.xlu1 %v3837_v25, %s5299_s22  ;;  %3840 = vrot.lane.b32.xlu0 %v3836_v38, %s5299_s22  ;;  %v3959_v59 = vstv %s8268_s23  ;;  %v3494_v38 = vmul.f32 %v3492_v6, %v7987_v50  ;;  %s8363_s23 = sld [smem:[#allocation9 + $0x64]] }
 0x417   : > { %v8240_v49 = vadd.f32 %v3368_v44, %v3336_v47  ;;  %v8242_v11 = vadd.f32 %v3367_v52, %v3335_v34 }
 0x418   : > { %v3346_v3 = vpop.permute.xlu1 %3345  ;;  %v3344_v41 = vpop.permute.xlu0 %3343 }
 0x419   : > { %v3350_v7 = vadd.f32 %v3346_v3, %v3294_v31  ;;  %v3349_v21 = vadd.f32 %v3344_v41, %v3293_v30  ;;  %v3961_v31 = vmul.f32 %v3959_v59, %v8272_v61  ;;  %v3960_v30 = vmul.f32 %v3959_v59, %v8270_v60 }
 0x41a   : > { %3856 = vrot.lane.b32.xlu1 %v3851_v56, %s5300_s19  ;;  %3854 = vrot.lane.b32.xlu0 %v3850_v10, %s5300_s19  ;;  %v3973_v3 = vstv %s8280_s17  ;;  %v3504_v10 = vstv %s8285_s21  ;;  %s8375_s17 = sld [smem:[#allocation9 + $0x88]] }
 0x41b   : > { %v8251_v36 = vadd.f32 %v3374_v35, %v3350_v7  ;;  %v8253_v26 = vadd.f32 %v3373_v24, %v3349_v21  ;;  %v4029_v59 = vstv %s4942_s13  ;;  %s8380_s21 = sld [smem:[#allocation9 + $0x5a]] }
 0x41c   : > { %v3386_v16 = vpop.permute.xlu1 %3385  ;;  %v3384_v62 = vpop.permute.xlu0 %3383  ;;  %s8425_s13 = sld [smem:[#allocation9 + $0x89]] }
 0x41d   : > { %v3390_v15 = vadd.f32 %v3386_v16, %v8208_v20  ;;  %v3389_v18 = vadd.f32 %v3384_v62, %v8210_v40  ;;  %v3498_v20 = vstv %s8276_s18  ;;  %v3975_v62 = vmul.f32 %v3973_v3, %v8272_v61  ;;  %s8371_s18 = sld [smem:[#allocation9 + $0x36]] }
 0x41e   : > { %3870 = vrot.lane.b32.xlu1 %v3865_v45, %s5300_s19  ;;  %3868 = vrot.lane.b32.xlu0 %v3864_v39, %s5300_s19  ;;  %v3974_v45 = vmul.f32 %v3973_v3, %v8270_v60  ;;  %v3987_v39 = vstv %s8292_s16  ;;  %v4084_v3 = vstv %s4948_s15  ;;  %s8387_s16 = sld [smem:[#allocation9 + $0x1d]] }
 0x41f   : > { %v3988_v4 = vmul.f32 %v3987_v39, %v8270_v60  ;;  %s8439_s15 = sld [smem:[#allocation9 + $0x43]] }
 0x420   : > { %v3400_v58 = vpop.permute.xlu1 %3399  ;;  %v3398_v13 = vpop.permute.xlu0 %3397 }
 0x421   : > { %v3404_v40 = vadd.f32 %v3400_v58, %v8224_v0  ;;  %v3403_v47 = vadd.f32 %v3398_v13, %v8226_v9  ;;  %v3500_v0 = vmul.f32 %v3498_v20, %v7987_v50  ;;  %v3499_v9 = vmul.f32 %v3498_v20, %v7985_v2  ;;  %v8365_v20 = vld [vmem:[#allocation2 + $0x48] sm:$0xff] }
 0x422   : > { %3884 = vrot.lane.b32.xlu1 %v3879_v57, %s5300_s19  ;;  %3882 = vrot.lane.b32.xlu0 %v3878_v29, %s5300_s19  ;;  %v3510_v13 = vstv %s8299_s29  ;;  %s8394_s29 = sld [smem:[#allocation9 + $0x7e]] }
 0x423   : > { %v3512_v6 = vmul.f32 %v3510_v13, %v7987_v50 }
 0x424   : > { %v3414_v42 = vpop.permute.xlu1 %3413  ;;  %v3412_v55 = vpop.permute.xlu0 %3411 }
 0x425   : > { %v3418_v32 = vadd.f32 %v3414_v42, %v8240_v49  ;;  %v3417_v7 = vadd.f32 %v3412_v55, %v8242_v11  ;;  %v3506_v49 = vmul.f32 %v3504_v10, %v7987_v50  ;;  %v3505_v11 = vmul.f32 %v3504_v10, %v7985_v2 }
 0x426   : > { %3898 = vrot.lane.b32.xlu1 %v3893_v33, %s5300_s19  ;;  %3896 = vrot.lane.b32.xlu0 %v3892_v5, %s5300_s19  ;;  %v3989_v5 = vmul.f32 %v3987_v39, %v8272_v61 }
 0x428   : > { %v3428_v14 = vpop.permute.xlu1 %3427  ;;  %v3426_v48 = vpop.permute.xlu0 %3425 }
 0x429   : > { %v3432_v57 = vadd.f32 %v3428_v14, %v8251_v36  ;;  %v3431_v29 = vadd.f32 %v3426_v48, %v8253_v26  ;;  %v3511_v36 = vmul.f32 %v3510_v13, %v7985_v2 }
 0x42a   : > { %3938 = vrot.lane.b32.xlu1 %v3933_v17, %s5299_s22  ;;  %3936 = vrot.lane.b32.xlu0 %v3932_v37, %s5299_s22  ;;  %v4001_v17 = vstv %s8310_s9  ;;  %s8401_s9 = sld [smem:[#allocation9 + $0x41]] }
 0x42c   : > { %v3442_v22 = vpop.permute.xlu1 %3441  ;;  %v3440_v28 = vpop.permute.xlu0 %3439 }
 0x42d   : > { %v3446_v23 = vadd.f32 %v3442_v22, %v3390_v15  ;;  %v3445_v25 = vadd.f32 %v3440_v28, %v3389_v18  ;;  %v4003_v18 = vmul.f32 %v4001_v17, %v8272_v61  ;;  %v4002_v22 = vmul.f32 %v4001_v17, %v8270_v60 }
 0x42e   : > { %3952 = vrot.lane.b32.xlu1 %v3947_v51, %s5299_s22  ;;  %3950 = vrot.lane.b32.xlu0 %v3946_v53, %s5299_s22  ;;  %v4015_v28 = vstv %s8326_s8  ;;  %s8413_s8 = sld [smem:[#allocation9 + $0x65]] }
 0x42f   : > { %v8303_v34 = vadd.f32 %v3494_v38, %v3446_v23  ;;  %v8305_v44 = vadd.f32 %v3493_v12, %v3445_v25  ;;  %v4017_v51 = vmul.f32 %v4015_v28, %v8272_v61  ;;  %v4016_v53 = vmul.f32 %v4015_v28, %v8270_v60 }
 0x430   : > { %v3456_v52 = vpop.permute.xlu1 %3455  ;;  %v3454_v19 = vpop.permute.xlu0 %3453  ;;  %v4031_v38 = vmul.f32 %v4029_v59, %v8272_v61  ;;  %v4030_v12 = vmul.f32 %v4029_v59, %v8270_v60 }
 0x431   : > { %v3460_v41 = vadd.f32 %v3456_v52, %v3404_v40  ;;  %v3459_v56 = vadd.f32 %v3454_v19, %v3403_v47  ;;  %v8367_v40 = vld [vmem:[#allocation2 + $0x50] sm:$0xff]  ;;  %v4070_v47 = vstv %s4947_s20  ;;  %s4959_s20 = sld [smem:[#allocation9 + $0x1f]] }
 0x432   : > { %3966 = vrot.lane.b32.xlu1 %v3961_v31, %s5299_s22  ;;  %3964 = vrot.lane.b32.xlu0 %v3960_v30, %s5299_s22  ;;  %v4072_v31 = vmul.f32 %v4070_v47, %v8367_v40  ;;  %v4071_v30 = vmul.f32 %v4070_v47, %v8365_v20 }
 0x433   : > { %v8319_v21 = vadd.f32 %v3500_v0, %v3460_v41  ;;  %v8321_v35 = vadd.f32 %v3499_v9, %v3459_v56  ;;  %v3631_v41 = vstv %s8359_s14  ;;  %s8443_s14 = sld [smem:[#allocation9 + $0x15]] }
 0x434   : > { %v3470_v24 = vpop.permute.xlu1 %3469  ;;  %v3468_v16 = vpop.permute.xlu0 %3467  ;;  %v3632_v39 = vmul.f32 %v3631_v41, %v8082_v63 }
 0x435   : > { %v3474_v8 = vadd.f32 %v3470_v24, %v3418_v32  ;;  %v3473_v58 = vadd.f32 %v3468_v16, %v3417_v7  ;;  %v4086_v32 = vmul.f32 %v4084_v3, %v8367_v40  ;;  %v4085_v7 = vmul.f32 %v4084_v3, %v8365_v20 }
 0x436   : > { %3980 = vrot.lane.b32.xlu1 %v3975_v62, %s5299_s22  ;;  %3978 = vrot.lane.b32.xlu0 %v3974_v45, %s5299_s22  ;;  %v4098_v24 = vstv %s8363_s23  ;;  %v3633_v45 = vmul.f32 %v3631_v41, %v8080_v1  ;;  %s8447_s23 = sld [smem:[#allocation9 + $0x67]] }
 0x437   : > { %v8335_v54 = vadd.f32 %v3506_v49, %v3474_v8  ;;  %v8337_v42 = vadd.f32 %v3505_v11, %v3473_v58 }
 0x438   : > { %v3484_v55 = vpop.permute.xlu1 %3483  ;;  %v3482_v33 = vpop.permute.xlu0 %3481 }
 0x439   : > { %v3488_v37 = vadd.f32 %v3484_v55, %v3432_v57  ;;  %v3487_v27 = vadd.f32 %v3482_v33, %v3431_v29  ;;  %v4100_v57 = vmul.f32 %v4098_v24, %v8367_v40  ;;  %v4099_v29 = vmul.f32 %v4098_v24, %v8365_v20 }
 0x43a   : > { %3994 = vrot.lane.b32.xlu1 %v3989_v5, %s5300_s19  ;;  %3992 = vrot.lane.b32.xlu0 %v3988_v4, %s5300_s19  ;;  %v4112_v55 = vstv %s8375_s17  ;;  %s8459_s17 = sld [smem:[#allocation9 + $0x8b]] }
 0x43b   : > { %v8346_v26 = vadd.f32 %v3512_v6, %v3488_v37  ;;  %v8348_v14 = vadd.f32 %v3511_v36, %v3487_v27 }
 0x43c   : > { %v3524_v48 = vpop.permute.xlu1 %3523  ;;  %v3522_v15 = vpop.permute.xlu0 %3521 }
 0x43d   : > { %v3528_v56 = vadd.f32 %v3524_v48, %v8303_v34  ;;  %v3527_v0 = vadd.f32 %v3522_v15, %v8305_v44  ;;  %v3637_v34 = vstv %s8371_s18  ;;  %v4114_v15 = vmul.f32 %v4112_v55, %v8367_v40  ;;  %s8455_s18 = sld [smem:[#allocation9 + $0x39]] }
 0x43e   : > { %4008 = vrot.lane.b32.xlu1 %v4003_v18, %s5300_s19  ;;  %4006 = vrot.lane.b32.xlu0 %v4002_v22, %s5300_s19  ;;  %v3639_v4 = vmul.f32 %v3637_v34, %v8080_v1  ;;  %v4113_v18 = vmul.f32 %v4112_v55, %v8365_v20  ;;  %v4126_v22 = vstv %s8387_s16  ;;  %s8470_s16 = sld [smem:[#allocation9 + $0x20]] }
 0x43f   : > { %v4127_v47 = vmul.f32 %v4126_v22, %v8365_v20 }
 0x440   : > { %v3538_v2 = vpop.permute.xlu1 %3537  ;;  %v3536_v50 = vpop.permute.xlu0 %3535 }
 0x441   : > { %v3542_v44 = vadd.f32 %v3538_v2, %v8319_v21  ;;  %v3541_v8 = vadd.f32 %v3536_v50, %v8321_v35  ;;  %v3638_v21 = vmul.f32 %v3637_v34, %v8082_v63  ;;  %v3643_v35 = vstv %s8380_s21  ;;  %s8465_s21 = sld [smem:[#allocation9 + $0x5d]] }
 0x442   : > { %4022 = vrot.lane.b32.xlu1 %v4017_v51, %s5300_s19  ;;  %4020 = vrot.lane.b32.xlu0 %v4016_v53, %s5300_s19  ;;  %v3645_v50 = vmul.f32 %v3643_v35, %v8080_v1 }
 0x444   : > { %v3552_v23 = vpop.permute.xlu1 %3551  ;;  %v3550_v25 = vpop.permute.xlu0 %3549 }
 0x445   : > { %v3556_v17 = vadd.f32 %v3552_v23, %v8335_v54  ;;  %v3555_v37 = vadd.f32 %v3550_v25, %v8337_v42  ;;  %v3644_v54 = vmul.f32 %v3643_v35, %v8082_v63  ;;  %v3649_v42 = vstv %s8394_s29  ;;  %s8477_s29 = sld [smem:[#allocation9 + $0x81]] }
 0x446   : > { %4036 = vrot.lane.b32.xlu1 %v4031_v38, %s5300_s19  ;;  %4034 = vrot.lane.b32.xlu0 %v4030_v12, %s5300_s19  ;;  %v4128_v12 = vmul.f32 %v4126_v22, %v8367_v40  ;;  %v3651_v41 = vmul.f32 %v3649_v42, %v8080_v1 }
 0x448   : > { %v3566_v52 = vpop.permute.xlu1 %3565  ;;  %v3564_v19 = vpop.permute.xlu0 %3563 }
 0x449   : > { %v3570_v51 = vadd.f32 %v3566_v52, %v8346_v26  ;;  %v3569_v53 = vadd.f32 %v3564_v19, %v8348_v14  ;;  %v3650_v26 = vmul.f32 %v3649_v42, %v8082_v63 }
 0x44a   : > { %4077 = vrot.lane.b32.xlu1 %v4072_v31, %s5299_s22  ;;  %4075 = vrot.lane.b32.xlu0 %v4071_v30, %s5299_s22  ;;  %v4140_v31 = vstv %s8401_s9  ;;  %s8482_s9 = sld [smem:[#allocation9 + $0x44]] }
 0x44c   : > { %v3580_v9 = vpop.permute.xlu1 %3579  ;;  %v3578_v10 = vpop.permute.xlu0 %3577 }
 0x44d   : > { %v3584_v16 = vadd.f32 %v3580_v9, %v3528_v56  ;;  %v3583_v62 = vadd.f32 %v3578_v10, %v3527_v0  ;;  %v4142_v0 = vmul.f32 %v4140_v31, %v8367_v40  ;;  %v4141_v9 = vmul.f32 %v4140_v31, %v8365_v20 }
 0x44e   : > { %4091 = vrot.lane.b32.xlu1 %v4086_v32, %s5299_s22  ;;  %4089 = vrot.lane.b32.xlu0 %v4085_v7, %s5299_s22  ;;  %v4154_v7 = vstv %s8413_s8  ;;  %s8492_s8 = sld [smem:[#allocation9 + $0x68]] }
 0x44f   : > { %v3635_v58 = vadd.f32 %v3633_v45, %v3584_v16  ;;  %v3634_v49 = vadd.f32 %v3632_v39, %v3583_v62  ;;  %v4156_v24 = vmul.f32 %v4154_v7, %v8367_v40  ;;  %v4155_v16 = vmul.f32 %v4154_v7, %v8365_v20 }
 0x450   : > { %v3594_v11 = vpop.permute.xlu1 %3593  ;;  %v3592_v13 = vpop.permute.xlu0 %3591  ;;  %v4168_v39 = vstv %s8425_s13  ;;  %v3787_v7 = vstv %s8477_s29  ;;  %s8502_s13 = sld [smem:[#allocation9 + $0x8c]] }
 0x451   : > { %v3598_v33 = vadd.f32 %v3594_v11, %v3542_v44  ;;  %v3597_v5 = vadd.f32 %v3592_v13, %v3541_v8  ;;  %v4170_v8 = vmul.f32 %v4168_v39, %v8367_v40  ;;  %v8451_v11 = vld [vmem:[#allocation2 + $0x51] sm:$0xff]  ;;  %s8554_s29 = sld [smem:[#allocation9 + $0x84]] }
 0x452   : > { %4105 = vrot.lane.b32.xlu1 %v4100_v57, %s5299_s22  ;;  %4103 = vrot.lane.b32.xlu0 %v4099_v29, %s5299_s22  ;;  %v4208_v29 = vstv %s4959_s20  ;;  %s4971_s20 = sld [smem:[#allocation9 + $0x22]] }
 0x453   : > { %v3641_v27 = vadd.f32 %v3639_v4, %v3598_v33  ;;  %v3640_v6 = vadd.f32 %v3638_v21, %v3597_v5  ;;  %v4210_v5 = vmul.f32 %v4208_v29, %v8451_v11 }
 0x454   : > { %v3608_v36 = vpop.permute.xlu1 %3607  ;;  %v3606_v48 = vpop.permute.xlu0 %3605 }
 0x455   : > { %v3612_v28 = vadd.f32 %v3608_v36, %v3556_v17  ;;  %v3611_v2 = vadd.f32 %v3606_v48, %v3555_v37  ;;  %v4222_v17 = vstv %s8439_s15  ;;  %v3769_v37 = vstv %s8443_s14  ;;  %s8516_s15 = sld [smem:[#allocation9 + $0x46]] }
 0x456   : > { %4119 = vrot.lane.b32.xlu1 %v4114_v15, %s5299_s22  ;;  %4117 = vrot.lane.b32.xlu0 %v4113_v18, %s5299_s22  ;;  %v4224_v36 = vmul.f32 %v4222_v17, %v8451_v11  ;;  %v4236_v15 = vstv %s8447_s23  ;;  %s8520_s14 = sld [smem:[#allocation9 + $0x18]] }
 0x457   : > { %v3647_v59 = vadd.f32 %v3645_v50, %v3612_v28  ;;  %v3646_v23 = vadd.f32 %v3644_v54, %v3611_v2  ;;  %v3771_v28 = vmul.f32 %v3769_v37, %v8177_v46  ;;  %v3770_v2 = vmul.f32 %v3769_v37, %v8175_v43  ;;  %s8524_s23 = sld [smem:[#allocation9 + $0x6a]] }
 0x458   : > { %v3622_v25 = vpop.permute.xlu1 %3621  ;;  %v3620_v38 = vpop.permute.xlu0 %3619  ;;  %v3775_v50 = vstv %s8455_s18  ;;  %s8532_s18 = sld [smem:[#allocation9 + $0x3c]] }
 0x459   : > { %v3626_v30 = vadd.f32 %v3622_v25, %v3570_v51  ;;  %v3625_v3 = vadd.f32 %v3620_v38, %v3569_v53  ;;  %v4250_v25 = vstv %s8459_s17  ;;  %v3776_v31 = vmul.f32 %v3775_v50, %v8175_v43  ;;  %s8536_s17 = sld [smem:[#allocation9 + $0x8e]] }
 0x45a   : > { %4133 = vrot.lane.b32.xlu1 %v4128_v12, %s5300_s19  ;;  %4131 = vrot.lane.b32.xlu0 %v4127_v47, %s5300_s19  ;;  %v3777_v47 = vmul.f32 %v3775_v50, %v8177_v46 }
 0x45b   : > { %v3653_v14 = vadd.f32 %v3651_v41, %v3626_v30  ;;  %v3652_v52 = vadd.f32 %v3650_v26, %v3625_v3  ;;  %v3781_v30 = vstv %s8465_s21  ;;  %s8542_s21 = sld [smem:[#allocation9 + $0x60]] }
 0x45c   : > { %v3663_v19 = vpop.permute.xlu1 %3662  ;;  %v3661_v56 = vpop.permute.xlu0 %3660 }
 0x45d   : > { %v3667_v10 = vadd.f32 %v3663_v19, %v3635_v58  ;;  %v3666_v32 = vadd.f32 %v3661_v56, %v3634_v49  ;;  %v4169_v58 = vmul.f32 %v4168_v39, %v8365_v20  ;;  %v8449_v49 = vld [vmem:[#allocation2 + $0x49] sm:$0xff]  ;;  %v4264_v56 = vstv %s8470_s16  ;;  %s8547_s16 = sld [smem:[#allocation9 + $0x23]] }
 0x45e   : > { %4147 = vrot.lane.b32.xlu1 %v4142_v0, %s5300_s19  ;;  %4145 = vrot.lane.b32.xlu0 %v4141_v9, %s5300_s19  ;;  %v4209_v4 = vmul.f32 %v4208_v29, %v8449_v49  ;;  %v4223_v48 = vmul.f32 %v4222_v17, %v8449_v49  ;;  %v4251_v19 = vmul.f32 %v4250_v25, %v8449_v49  ;;  %v4278_v39 = vstv %s8482_s9  ;;  %s8559_s9 = sld [smem:[#allocation9 + $0x47]] }
 0x460   : > { %v3677_v1 = vpop.permute.xlu1 %3676  ;;  %v3675_v63 = vpop.permute.xlu0 %3674 }
 0x461   : > { %v3681_v62 = vadd.f32 %v3677_v1, %v3641_v27  ;;  %v3680_v45 = vadd.f32 %v3675_v63, %v3640_v6 }
 0x462   : > { %4161 = vrot.lane.b32.xlu1 %v4156_v24, %s5300_s19  ;;  %4159 = vrot.lane.b32.xlu0 %v4155_v16, %s5300_s19 }
 0x464   : > { %v3691_v34 = vpop.permute.xlu1 %3690  ;;  %v3689_v44 = vpop.permute.xlu0 %3688 }
 0x465   : > { %v3695_v13 = vadd.f32 %v3691_v34, %v3647_v59  ;;  %v3694_v57 = vadd.f32 %v3689_v44, %v3646_v23  ;;  %v4238_v59 = vmul.f32 %v4236_v15, %v8451_v11  ;;  %v4237_v23 = vmul.f32 %v4236_v15, %v8449_v49 }
 0x466   : > { %4175 = vrot.lane.b32.xlu1 %v4170_v8, %s5300_s19  ;;  %4173 = vrot.lane.b32.xlu0 %v4169_v58, %s5300_s19  ;;  %v3789_v8 = vmul.f32 %v3787_v7, %v8177_v46  ;;  %v3788_v58 = vmul.f32 %v3787_v7, %v8175_v43 }
 0x468   : > { %v3705_v55 = vpop.permute.xlu1 %3704  ;;  %v3703_v33 = vpop.permute.xlu0 %3702 }
 0x469   : > { %v3709_v21 = vadd.f32 %v3705_v55, %v3653_v14  ;;  %v3708_v35 = vadd.f32 %v3703_v33, %v3652_v52  ;;  %v4252_v52 = vmul.f32 %v4250_v25, %v8451_v11  ;;  %v4280_v33 = vmul.f32 %v4278_v39, %v8451_v11 }
 0x46a   : > { %4215 = vrot.lane.b32.xlu1 %v4210_v5, %s5299_s22  ;;  %4213 = vrot.lane.b32.xlu0 %v4209_v4, %s5299_s22  ;;  %v4279_v5 = vmul.f32 %v4278_v39, %v8449_v49 }
 0x46c   : > { %v3719_v27 = vpop.permute.xlu1 %3718  ;;  %v3717_v6 = vpop.permute.xlu0 %3716 }
 0x46d   : > { %v3723_v18 = vadd.f32 %v3719_v27, %v3667_v10  ;;  %v3722_v22 = vadd.f32 %v3717_v6, %v3666_v32  ;;  %v3783_v10 = vmul.f32 %v3781_v30, %v8177_v46  ;;  %v3782_v32 = vmul.f32 %v3781_v30, %v8175_v43 }
 0x46e   : > { %4229 = vrot.lane.b32.xlu1 %v4224_v36, %s5299_s22  ;;  %4227 = vrot.lane.b32.xlu0 %v4223_v48, %s5299_s22  ;;  %v4306_v36 = vstv %s8502_s13  ;;  %s4978_s13 = sld [smem:[#allocation9 + $0x8f]] }
 0x46f   : > { %v3773_v54 = vadd.f32 %v3771_v28, %v3723_v18  ;;  %v3772_v42 = vadd.f32 %v3770_v2, %v3722_v22  ;;  %v4308_v18 = vmul.f32 %v4306_v36, %v8451_v11  ;;  %v4307_v22 = vmul.f32 %v4306_v36, %v8449_v49  ;;  %v8526_v28 = vld [vmem:[#allocation2 + $0x4a] sm:$0xff]  ;;  %v8528_v2 = vld [vmem:[#allocation2 + $0x52] sm:$0xff] }
 0x470   : > { %v3733_v51 = vpop.permute.xlu1 %3732  ;;  %v3731_v53 = vpop.permute.xlu0 %3730  ;;  %v4416_v36 = vstv %s8559_s9  ;;  %s8616_s9 = sld [smem:[#allocation9 + $0x8d]] }
 0x471   : > { %v3737_v38 = vadd.f32 %v3733_v51, %v3681_v62  ;;  %v3736_v12 = vadd.f32 %v3731_v53, %v3680_v45  ;;  %v4266_v62 = vmul.f32 %v4264_v56, %v8451_v11  ;;  %v4265_v45 = vmul.f32 %v4264_v56, %v8449_v49 }
 0x472   : > { %4243 = vrot.lane.b32.xlu1 %v4238_v59, %s5299_s22  ;;  %4241 = vrot.lane.b32.xlu0 %v4237_v23, %s5299_s22 }
 0x473   : > { %v3779_v3 = vadd.f32 %v3777_v47, %v3737_v38  ;;  %v3778_v41 = vadd.f32 %v3776_v31, %v3736_v12  ;;  %v4360_v12 = vstv %s8516_s15  ;;  %v3907_v47 = vstv %s8520_s14  ;;  %s4945_s15 = sld [smem:[#allocation9 + $0x63]] }
 0x474   : > { %v3747_v26 = vpop.permute.xlu1 %3746  ;;  %v3745_v14 = vpop.permute.xlu0 %3744  ;;  %v3908_v56 = vmul.f32 %v3907_v47, %v8270_v60  ;;  %s4946_s14 = sld [smem:[#allocation9 + $0x87]] }
 0x475   : > { %v3751_v0 = vadd.f32 %v3747_v26, %v3695_v13  ;;  %v3750_v9 = vadd.f32 %v3745_v14, %v3694_v57  ;;  %v4374_v26 = vstv %s8524_s23  ;;  %s4956_s23 = sld [smem:[#allocation9 + $0x42]] }
 0x476   : > { %4257 = vrot.lane.b32.xlu1 %v4252_v52, %s5299_s22  ;;  %4255 = vrot.lane.b32.xlu0 %v4251_v19, %s5299_s22  ;;  %v3909_v19 = vmul.f32 %v3907_v47, %v8272_v61 }
 0x477   : > { %v3785_v1 = vadd.f32 %v3783_v10, %v3751_v0  ;;  %v3784_v63 = vadd.f32 %v3782_v32, %v3750_v9  ;;  %v3913_v0 = vstv %s8532_s18  ;;  %s4957_s18 = sld [smem:[#allocation9 + $0x66]] }
 0x478   : > { %v3761_v24 = vpop.permute.xlu1 %3760  ;;  %v3759_v16 = vpop.permute.xlu0 %3758  ;;  %v3914_v39 = vmul.f32 %v3913_v0, %v8270_v60 }
 0x479   : > { %v3765_v34 = vadd.f32 %v3761_v24, %v3709_v21  ;;  %v3764_v44 = vadd.f32 %v3759_v16, %v3708_v35  ;;  %v4292_v35 = vstv %s8492_s8  ;;  %v4388_v24 = vstv %s8536_s17  ;;  %s8569_s8 = sld [smem:[#allocation9 + $0x6b]] }
 0x47a   : > { %4271 = vrot.lane.b32.xlu1 %v4266_v62, %s5300_s19  ;;  %4269 = vrot.lane.b32.xlu0 %v4265_v45, %s5300_s19  ;;  %v4294_v17 = vmul.f32 %v4292_v35, %v8451_v11  ;;  %v4293_v37 = vmul.f32 %v4292_v35, %v8449_v49  ;;  %v3915_v45 = vmul.f32 %v3913_v0, %v8272_v61  ;;  %v3925_v35 = vstv %s8554_s29  ;;  %s4958_s17 = sld [smem:[#allocation9 + $0x8a]] }
 0x47b   : > { %v3791_v13 = vadd.f32 %v3789_v8, %v3765_v34  ;;  %v3790_v57 = vadd.f32 %v3788_v58, %v3764_v44  ;;  %v3919_v34 = vstv %s8542_s21  ;;  %s4967_s21 = sld [smem:[#allocation9 + $0x21]] }
 0x47c   : > { %v3801_v29 = vpop.permute.xlu1 %3800  ;;  %v3799_v55 = vpop.permute.xlu0 %3798  ;;  %s8612_s29 = sld [smem:[#allocation9 + $0x69]] }
 0x47d   : > { %v3805_v4 = vadd.f32 %v3801_v29, %v3773_v54  ;;  %v3804_v21 = vadd.f32 %v3799_v55, %v3772_v42  ;;  %v4346_v42 = vstv %s4971_s20  ;;  %v4389_v29 = vmul.f32 %v4388_v24, %v8526_v28  ;;  %s4944_s20 = sld [smem:[#allocation9 + $0x3f]] }
 0x47e   : > { %4285 = vrot.lane.b32.xlu1 %v4280_v33, %s5300_s19  ;;  %4283 = vrot.lane.b32.xlu0 %v4279_v5, %s5300_s19  ;;  %v4348_v59 = vmul.f32 %v4346_v42, %v8528_v2  ;;  %v4347_v23 = vmul.f32 %v4346_v42, %v8526_v28  ;;  %v4402_v55 = vstv %s8547_s16  ;;  %s4968_s16 = sld [smem:[#allocation9 + $0x45]] }
 0x480   : > { %v3815_v43 = vpop.permute.xlu1 %3814  ;;  %v3813_v46 = vpop.permute.xlu0 %3812 }
 0x481   : > { %v3819_v27 = vadd.f32 %v3815_v43, %v3779_v3  ;;  %v3818_v6 = vadd.f32 %v3813_v46, %v3778_v41  ;;  %v4362_v3 = vmul.f32 %v4360_v12, %v8528_v2  ;;  %v4361_v41 = vmul.f32 %v4360_v12, %v8526_v28 }
 0x482   : > { %4299 = vrot.lane.b32.xlu1 %v4294_v17, %s5300_s19  ;;  %4297 = vrot.lane.b32.xlu0 %v4293_v37, %s5300_s19 }
 0x484   : > { %v3829_v48 = vpop.permute.xlu1 %3828  ;;  %v3827_v15 = vpop.permute.xlu0 %3826 }
 0x485   : > { %v3833_v50 = vadd.f32 %v3829_v48, %v3785_v1  ;;  %v3832_v54 = vadd.f32 %v3827_v15, %v3784_v63  ;;  %v4376_v1 = vmul.f32 %v4374_v26, %v8528_v2  ;;  %v4375_v63 = vmul.f32 %v4374_v26, %v8526_v28 }
 0x486   : > { %4313 = vrot.lane.b32.xlu1 %v4308_v18, %s5300_s19  ;;  %4311 = vrot.lane.b32.xlu0 %v4307_v22, %s5300_s19  ;;  %v3927_v18 = vmul.f32 %v3925_v35, %v8272_v61  ;;  %v3926_v22 = vmul.f32 %v3925_v35, %v8270_v60 }
 0x488   : > { %v3843_v51 = vpop.permute.xlu1 %3842  ;;  %v3841_v53 = vpop.permute.xlu0 %3840 }
 0x489   : > { %v3847_v25 = vadd.f32 %v3843_v51, %v3791_v13  ;;  %v3846_v38 = vadd.f32 %v3841_v53, %v3790_v57  ;;  %v4390_v57 = vmul.f32 %v4388_v24, %v8528_v2  ;;  %v4418_v53 = vmul.f32 %v4416_v36, %v8528_v2 }
 0x48a   : > { %4353 = vrot.lane.b32.xlu1 %v4348_v59, %s5299_s22  ;;  %4351 = vrot.lane.b32.xlu0 %v4347_v23, %s5299_s22  ;;  %v4417_v59 = vmul.f32 %v4416_v36, %v8526_v28 }
 0x48c   : > { %v3857_v31 = vpop.permute.xlu1 %3856  ;;  %v3855_v30 = vpop.permute.xlu0 %3854 }
 0x48d   : > { %v3861_v14 = vadd.f32 %v3857_v31, %v3805_v4  ;;  %v3860_v52 = vadd.f32 %v3855_v30, %v3804_v21  ;;  %v3921_v4 = vmul.f32 %v3919_v34, %v8272_v61  ;;  %v3920_v21 = vmul.f32 %v3919_v34, %v8270_v60 }
 0x48e   : > { %4367 = vrot.lane.b32.xlu1 %v4362_v3, %s5299_s22  ;;  %4365 = vrot.lane.b32.xlu0 %v4361_v41, %s5299_s22  ;;  %v4444_v3 = vstv %s4978_s13  ;;  %s4461_s13 = sld [smem:[#allocation12]] }
 0x48f   : > { %v3911_v9 = vadd.f32 %v3909_v19, %v3861_v14  ;;  %v3910_v10 = vadd.f32 %v3908_v56, %v3860_v52  ;;  %v4446_v14 = vmul.f32 %v4444_v3, %v8528_v2  ;;  %v4445_v52 = vmul.f32 %v4444_v3, %v8526_v28 }
 0x490   : > { %v3871_v32 = vpop.permute.xlu1 %3870  ;;  %v3869_v7 = vpop.permute.xlu0 %3868 }
 0x491   : > { %v3875_v16 = vadd.f32 %v3871_v32, %v3819_v27  ;;  %v3874_v62 = vadd.f32 %v3869_v7, %v3818_v6  ;;  %v4404_v27 = vmul.f32 %v4402_v55, %v8528_v2  ;;  %v4403_v6 = vmul.f32 %v4402_v55, %v8526_v28 }
 0x492   : > { %4381 = vrot.lane.b32.xlu1 %v4376_v1, %s5299_s22  ;;  %4379 = vrot.lane.b32.xlu0 %v4375_v63, %s5299_s22 }
 0x493   : > { %v3917_v44 = vadd.f32 %v3915_v45, %v3875_v16  ;;  %v3916_v8 = vadd.f32 %v3914_v39, %v3874_v62  ;;  %v4052_v39 = vstv %s4944_s20  ;;  %s8628_s20 = sld [smem:[#allocation12 + $0x1]] }
 0x494   : > { %v3885_v58 = vpop.permute.xlu1 %3884  ;;  %v3883_v13 = vpop.permute.xlu0 %3882  ;;  %v4053_v55 = vmul.f32 %v4052_v39, %v8365_v20 }
 0x495   : > { %v3889_v33 = vadd.f32 %v3885_v58, %v3833_v50  ;;  %v3888_v5 = vadd.f32 %v3883_v13, %v3832_v54 }
 0x496   : > { %4395 = vrot.lane.b32.xlu1 %v4390_v57, %s5299_s22  ;;  %4393 = vrot.lane.b32.xlu0 %v4389_v29, %s5299_s22  ;;  %s4943_s22 = sld [smem:[#allocation9 + $0x1b]]  ;;  %v4054_v29 = vmul.f32 %v4052_v39, %v8367_v40 }
 0x497   : > { %v3923_v43 = vadd.f32 %v3921_v4, %v3889_v33  ;;  %v3922_v46 = vadd.f32 %v3920_v21, %v3888_v5  ;;  %v4058_v33 = vstv %s4945_s15  ;;  %s346_s15 = sand.u32 1, %s5283_s25  }
 0x498   : > { %v3899_v17 = vpop.permute.xlu1 %3898  ;;  %v3897_v37 = vpop.permute.xlu0 %3896 }
 0x499   : > { %v3903_v48 = vadd.f32 %v3899_v17, %v3847_v25  ;;  %v3902_v15 = vadd.f32 %v3897_v37, %v3846_v38  ;;  %v4430_v38 = vstv %s8569_s8  ;;  %v4060_v17 = vmul.f32 %v4058_v33, %v8367_v40  ;;  %s4457_s8 = sld [smem:[#allocation11]] }
 0x49a   : > { %4409 = vrot.lane.b32.xlu1 %v4404_v27, %s5300_s19  ;;  %4407 = vrot.lane.b32.xlu0 %v4403_v6, %s5300_s19  ;;  %v4432_v12 = vmul.f32 %v4430_v38, %v8528_v2  ;;  %v4431_v47 = vmul.f32 %v4430_v38, %v8526_v28  ;;  %v4059_v37 = vmul.f32 %v4058_v33, %v8365_v20  ;;  %v4064_v27 = vstv %s4946_s14  ;;  %s8631_s14 = sld [smem:[#allocation11 + $0x2]] }
 0x49b   : > { %v3929_v50 = vadd.f32 %v3927_v18, %v3903_v48  ;;  %v3928_v54 = vadd.f32 %v3926_v22, %v3902_v15 }
 0x49c   : > { %v3939_v42 = vpop.permute.xlu1 %3938  ;;  %v3937_v51 = vpop.permute.xlu0 %3936  ;;  %v4046_v7 = vstv %s4943_s22  ;;  %s8626_s22 = sld [smem:[#allocation11 + $0x1]] }
 0x49d   : > { %v3943_v23 = vadd.f32 %v3939_v42, %v3911_v9  ;;  %v3942_v25 = vadd.f32 %v3937_v51, %v3910_v10  ;;  %v4048_v62 = vmul.f32 %v4046_v7, %v8367_v40  ;;  %v4047_v45 = vmul.f32 %v4046_v7, %v8365_v20 }
 0x49e   : > { %4423 = vrot.lane.b32.xlu1 %v4418_v53, %s5300_s19  ;;  %4421 = vrot.lane.b32.xlu0 %v4417_v59, %s5300_s19 }
 0x4a0   : > { %v3953_v60 = vpop.permute.xlu1 %3952  ;;  %v3951_v61 = vpop.permute.xlu0 %3950 }
 0x4a1   : > { %v3957_v31 = vadd.f32 %v3953_v60, %v3917_v44  ;;  %v3956_v30 = vadd.f32 %v3951_v61, %v3916_v8 }
 0x4a2   : > { %4437 = vrot.lane.b32.xlu1 %v4432_v12, %s5300_s19  ;;  %4435 = vrot.lane.b32.xlu0 %v4431_v47, %s5300_s19 }
 0x4a4   : > { %v3967_v41 = vpop.permute.xlu1 %3966  ;;  %v3965_v26 = vpop.permute.xlu0 %3964 }
 0x4a5   : > { %v3971_v19 = vadd.f32 %v3967_v41, %v3923_v43  ;;  %v3970_v56 = vadd.f32 %v3965_v26, %v3922_v46 }
 0x4a6   : > { %4451 = vrot.lane.b32.xlu1 %v4446_v14, %s5300_s19  ;;  %4449 = vrot.lane.b32.xlu0 %v4445_v52, %s5300_s19  ;;  %s4955_s19 = sld [smem:[#allocation9 + $0x1e]] }
 0x4a8   : > { %v3981_v0 = vpop.permute.xlu1 %3980  ;;  %v3979_v9 = vpop.permute.xlu0 %3978 }
 0x4a9   : > { %v3985_v10 = vadd.f32 %v3981_v0, %v3929_v50  ;;  %v3984_v32 = vadd.f32 %v3979_v9, %v3928_v54  ;;  %v4066_v50 = vmul.f32 %v4064_v27, %v8367_v40  ;;  %v4065_v54 = vmul.f32 %v4064_v27, %v8365_v20 }
 0x4ac   : > { %v3995_v1 = vpop.permute.xlu1 %3994  ;;  %v3993_v63 = vpop.permute.xlu0 %3992  ;;  %v4184_v14 = vstv %s4955_s19  ;;  %s8633_s19 = sld [smem:[#allocation12 + $0x2]] }
 0x4ad   : > { %v3999_v24 = vadd.f32 %v3995_v1, %v3943_v23  ;;  %v3998_v16 = vadd.f32 %v3993_v63, %v3942_v25  ;;  %v4186_v9 = vmul.f32 %v4184_v14, %v8451_v11 }
 0x4af   : > { %v4050_v34 = vadd.f32 %v4048_v62, %v3999_v24  ;;  %v4049_v44 = vadd.f32 %v4047_v45, %v3998_v16 }
 0x4b0   : > { %v4009_v8 = vpop.permute.xlu1 %4008  ;;  %v4007_v58 = vpop.permute.xlu0 %4006 }
 0x4b1   : > { %v4013_v13 = vadd.f32 %v4009_v8, %v3957_v31  ;;  %v4012_v57 = vadd.f32 %v4007_v58, %v3956_v30 }
 0x4b3   : > { %v4056_v5 = vadd.f32 %v4054_v29, %v4013_v13  ;;  %v4055_v4 = vadd.f32 %v4053_v55, %v4012_v57 }
 0x4b4   : > { %v4023_v21 = vpop.permute.xlu1 %4022  ;;  %v4021_v35 = vpop.permute.xlu0 %4020 }
 0x4b5   : > { %v4027_v43 = vadd.f32 %v4023_v21, %v3971_v19  ;;  %v4026_v46 = vadd.f32 %v4021_v35, %v3970_v56 }
 0x4b7   : > { %v4062_v6 = vadd.f32 %v4060_v17, %v4027_v43  ;;  %v4061_v36 = vadd.f32 %v4059_v37, %v4026_v46 }
 0x4b8   : > { %v4037_v48 = vpop.permute.xlu1 %4036  ;;  %v4035_v15 = vpop.permute.xlu0 %4034 }
 0x4b9   : > { %v4041_v18 = vadd.f32 %v4037_v48, %v3985_v10  ;;  %v4040_v22 = vadd.f32 %v4035_v15, %v3984_v32  ;;  %v4185_v10 = vmul.f32 %v4184_v14, %v8449_v49  ;;  %v4190_v32 = vstv %s4956_s23  ;;  %s4658_s23 = sshll.u32 %s346_s15, 6 }
 0x4ba   : > { %v4192_v45 = vmul.f32 %v4190_v32, %v8451_v11  ;;  %v4191_v39 = vmul.f32 %v4190_v32, %v8449_v49 }
 0x4bb   : > { %v4068_v42 = vadd.f32 %v4066_v50, %v4041_v18  ;;  %v4067_v51 = vadd.f32 %v4065_v54, %v4040_v22 }
 0x4bc   : > { %v4078_v53 = vpop.permute.xlu1 %4077  ;;  %v4076_v59 = vpop.permute.xlu0 %4075 }
 0x4bd   : > { %v4082_v23 = vadd.f32 %v4078_v53, %v4050_v34  ;;  %v4081_v25 = vadd.f32 %v4076_v59, %v4049_v44  ;;  %v4196_v34 = vstv %s4957_s18  ;;  %v4322_v53 = vstv %s4967_s21  ;;  %s8638_s18 = sld [smem:[#allocation11 + $0x3]]  ;;  %s8644_s21 = scalar_lea.vmem [#allocation14], %s4658_s23 }
 0x4be   : > { %v4198_v55 = vmul.f32 %v4196_v34, %v8451_v11  ;;  %v4197_v33 = vmul.f32 %v4196_v34, %v8449_v49 }
 0x4c0   : > { %v4092_v38 = vpop.permute.xlu1 %4091  ;;  %v4090_v60 = vpop.permute.xlu0 %4089 }
 0x4c1   : > { %v4096_v61 = vadd.f32 %v4092_v38, %v4056_v5  ;;  %v4095_v12 = vadd.f32 %v4090_v60, %v4055_v4  ;;  %v4202_v5 = vstv %s4958_s17  ;;  %v4324_v60 = vmul.f32 %v4322_v53, %v8528_v2  ;;  %s8641_s17 = sld [smem:[#allocation12 + $0x3]] }
 0x4c2   : > { %v4204_v37 = vmul.f32 %v4202_v5, %v8451_v11  ;;  %v4203_v27 = vmul.f32 %v4202_v5, %v8449_v49 }
 0x4c4   : > { %v4106_v47 = vpop.permute.xlu1 %4105  ;;  %v4104_v31 = vpop.permute.xlu0 %4103 }
 0x4c5   : > { %v4110_v30 = vadd.f32 %v4106_v47, %v4062_v6  ;;  %v4109_v3 = vadd.f32 %v4104_v31, %v4061_v36 }
 0x4c8   : > { %v4120_v41 = vpop.permute.xlu1 %4119  ;;  %v4118_v40 = vpop.permute.xlu0 %4117 }
 0x4c9   : > { %v4124_v26 = vadd.f32 %v4120_v41, %v4068_v42  ;;  %v4123_v20 = vadd.f32 %v4118_v40, %v4067_v51 }
 0x4cc   : > { %v4134_v52 = vpop.permute.xlu1 %4133  ;;  %v4132_v19 = vpop.permute.xlu0 %4131 }
 0x4cd   : > { %v4138_v56 = vadd.f32 %v4134_v52, %v4082_v23  ;;  %v4137_v0 = vadd.f32 %v4132_v19, %v4081_v25  ;;  %v4334_v19 = vstv %s8612_s29  ;;  %s4520_s29 = sshll.u32 %s8644_s21, 4  ;;  %s8668_s29 = int_to_ptr.vmem [resolvable:$true] %s4520_s29 }
 0x4cf   : > { %v4188_v7 = vadd.f32 %v4186_v9, %v4138_v56  ;;  %v4187_v1 = vadd.f32 %v4185_v10, %v4137_v0 }
 0x4d0   : > { %v4148_v63 = vpop.permute.xlu1 %4147  ;;  %v4146_v24 = vpop.permute.xlu0 %4145 }
 0x4d1   : > { %v4152_v16 = vadd.f32 %v4148_v63, %v4096_v61  ;;  %v4151_v62 = vadd.f32 %v4146_v24, %v4095_v12  ;;  %v4323_v61 = vmul.f32 %v4322_v53, %v8526_v28  ;;  %v4328_v12 = vstv %s4968_s16  ;;  %s4990_s16 = sshll.u32 %s5365_s28, 10  ;;  %s8676_s28 = scalar_lea.sflag [#allocation4], %s346_s15 }
 0x4d2   : > { %v4330_v14 = vmul.f32 %v4328_v12, %v8528_v2  ;;  %v4329_v52 = vmul.f32 %v4328_v12, %v8526_v28  ;;  %v4336_v24 = vmul.f32 %v4334_v19, %v8528_v2  ;;  %v4468_v53 = vstv %s8626_s22  ;;  %s5215_s22 = scalar_lea.vmem %s8668_s29, 1024 }
 0x4d3   : > { %v4194_v44 = vadd.f32 %v4192_v45, %v4152_v16  ;;  %v4193_v8 = vadd.f32 %v4191_v39, %v4151_v62  ;;  %v4335_v16 = vmul.f32 %v4334_v19, %v8526_v28  ;;  %v4340_v62 = vstv %s8616_s9  ;;  %p5216_p2 = scmp.ne.s32.totalorder %s8668_s29, %s5215_s22 }
 0x4d4   : > { %v4162_v58 = vpop.permute.xlu1 %4161  ;;  %v4160_v13 = vpop.permute.xlu0 %4159  ;;  %v4472_v12 = vstv %s8628_s20  ;;  %s5301_s20 = smov [#allocation14]  }
 0x4d5   : > { %v4166_v57 = vadd.f32 %v4162_v58, %v4110_v30  ;;  %v4165_v29 = vadd.f32 %v4160_v13, %v4109_v3  ;;  %p5217_p4 = pnand %p5216_p2, %p9222_p3 }
 0x4d7   : > { %v4200_v4 = vadd.f32 %v4198_v55, %v4166_v57  ;;  %v4199_v21 = vadd.f32 %v4197_v33, %v4165_v29  ;;  %v4342_v29 = vmul.f32 %v4340_v62, %v8528_v2  ;;  %v4341_v55 = vmul.f32 %v4340_v62, %v8526_v28  ;;  %p5218_p9 = pneg %p5217_p4 }
 0x4d8   : > { %v4176_v35 = vpop.permute.xlu1 %4175  ;;  %v4174_v43 = vpop.permute.xlu0 %4173 }
 0x4d9   : > { %v4180_v46 = vadd.f32 %v4176_v35, %v4124_v26  ;;  %v4179_v17 = vadd.f32 %v4174_v43, %v4123_v20 }
 0x4db   : > { %v4206_v6 = vadd.f32 %v4204_v37, %v4180_v46  ;;  %v4205_v36 = vadd.f32 %v4203_v27, %v4179_v17 }
 0x4dc   : > { %v4216_v48 = vpop.permute.xlu1 %4215  ;;  %v4214_v15 = vpop.permute.xlu0 %4213 }
 0x4dd   : > { %v4220_v59 = vadd.f32 %v4216_v48, %v4188_v7  ;;  %v4219_v23 = vadd.f32 %v4214_v15, %v4187_v1 }
 0x4e0   : > { %v4230_v18 = vpop.permute.xlu1 %4229  ;;  %v4228_v22 = vpop.permute.xlu0 %4227 }
 0x4e1   : > { %v4234_v47 = vadd.f32 %v4230_v18, %v4194_v44  ;;  %v4233_v31 = vadd.f32 %v4228_v22, %v4193_v8  ;;  %v4462_v22 = vstv %s4461_s13  ;;  %s8666_s13 = scalar_lea.hbm %s8723_s7, %s4990_s16 }
 0x4e4   : > { %v4244_v50 = vpop.permute.xlu1 %4243  ;;  %v4242_v54 = vpop.permute.xlu0 %4241 }
 0x4e5   : > { %v4248_v56 = vadd.f32 %v4244_v50, %v4200_v4  ;;  %v4247_v0 = vadd.f32 %v4242_v54, %v4199_v21 }
 0x4e8   : > { %v4258_v42 = vpop.permute.xlu1 %4257  ;;  %v4256_v51 = vpop.permute.xlu0 %4255 }
 0x4e9   : > { %v4262_v45 = vadd.f32 %v4258_v42, %v4206_v6  ;;  %v4261_v39 = vadd.f32 %v4256_v51, %v4205_v36  ;;  %v4458_v6 = vstv %s4457_s8 }
 0x4ec   : > { %v4272_v11 = vpop.permute.xlu1 %4271  ;;  %v4270_v25 = vpop.permute.xlu0 %4269 }
 0x4ed   : > { %v4276_v49 = vadd.f32 %v4272_v11, %v4220_v59  ;;  %v4275_v38 = vadd.f32 %v4270_v25, %v4219_v23 }
 0x4ef   : > { %v4326_v30 = vadd.f32 %v4324_v60, %v4276_v49  ;;  %v4325_v3 = vadd.f32 %v4323_v61, %v4275_v38 }
 0x4f0   : > { %v4286_v41 = vpop.permute.xlu1 %4285  ;;  %v4284_v40 = vpop.permute.xlu0 %4283 }
 0x4f1   : > { %v4290_v26 = vadd.f32 %v4286_v41, %v4234_v47  ;;  %v4289_v20 = vadd.f32 %v4284_v40, %v4233_v31  ;;  %v4478_v41 = vstv %s8631_s14  ;;  %s5219_s14 = sshll.u32 %s5301_s20, 4  ;;  %s5220_s14 = int_to_ptr.vmem [resolvable:$false] %s5219_s14 }
 0x4f2   : > { %p5222_p7 = scmp.lt.s32.totalorder %s8668_s29, %s5220_s14 }
 0x4f3   : > { %v4332_v9 = vadd.f32 %v4330_v14, %v4290_v26  ;;  %v4331_v10 = vadd.f32 %v4329_v52, %v4289_v20 }
 0x4f4   : > { %v4300_v32 = vpop.permute.xlu1 %4299  ;;  %v4298_v7 = vpop.permute.xlu0 %4297 }
 0x4f5   : > { %v4304_v1 = vadd.f32 %v4300_v32, %v4248_v56  ;;  %v4303_v63 = vadd.f32 %v4298_v7, %v4247_v0 }
 0x4f7   : > { %v4338_v34 = vadd.f32 %v4336_v24, %v4304_v1  ;;  %v4337_v44 = vadd.f32 %v4335_v16, %v4303_v63  ;;  %v4488_v63 = vstv %s8638_s18 }
 0x4f8   : > { %v4314_v8 = vpop.permute.xlu1 %4313  ;;  %v4312_v58 = vpop.permute.xlu0 %4311 }
 0x4f9   : > { %v4318_v13 = vadd.f32 %v4314_v8, %v4262_v45  ;;  %v4317_v57 = vadd.f32 %v4312_v58, %v4261_v39 }
 0x4fb   : > { %v4344_v33 = vadd.f32 %v4342_v29, %v4318_v13  ;;  %v4343_v5 = vadd.f32 %v4341_v55, %v4317_v57 }
 0x4fc   : > { %v4354_v4 = vpop.permute.xlu1 %4353  ;;  %v4352_v21 = vpop.permute.xlu0 %4351 }
 0x4fd   : > { %v4358_v2 = vadd.f32 %v4354_v4, %v4326_v30  ;;  %v4357_v28 = vadd.f32 %v4352_v21, %v4325_v3 }
 0x500   : > { %v4368_v35 = vpop.permute.xlu1 %4367  ;;  %v4366_v43 = vpop.permute.xlu0 %4365 }
 0x501   : > { %v4372_v50 = vadd.f32 %v4368_v35, %v4332_v9  ;;  %v4371_v54 = vadd.f32 %v4366_v43, %v4331_v10  ;;  %v4482_v9 = vstv %s8633_s19  ;;  %s5221_s19 = scalar_lea.vmem %s5220_s14, 2048 }
 0x502   : > { %p5223_p8 = scmp.lt.s32.totalorder %s5221_s19, %s5215_s22 }
 0x504   : > { %v4382_v46 = vpop.permute.xlu1 %4381  ;;  %v4380_v17 = vpop.permute.xlu0 %4379  ;;  %p5224_p5 = por %p5223_p8, %p5222_p7 }
 0x505   : > { %v4386_v60 = vadd.f32 %v4382_v46, %v4338_v34  ;;  %v4385_v61 = vadd.f32 %v4380_v17, %v4337_v44  ;;  %v4492_v44 = vstv %s8641_s17 }
 0x506   : > { %p5225_p0 = pnand %p5224_p5, %p5218_p9 }
 0x508   : > { %v4396_v37 = vpop.permute.xlu1 %4395  ;;  %v4394_v27 = vpop.permute.xlu0 %4393 }
 0x509   : > { %v4400_v56 = vadd.f32 %v4396_v37, %v4344_v33  ;;  %v4399_v0 = vadd.f32 %v4394_v27, %v4343_v5 }
 0x50c   : > { %v4410_v36 = vpop.permute.xlu1 %4409  ;;  %v4408_v48 = vpop.permute.xlu0 %4407 }
 0x50d   : > { %v4414_v15 = vadd.f32 %v4410_v36, %v4358_v2  ;;  %v4413_v18 = vadd.f32 %v4408_v48, %v4357_v28 }
 0x50f   : > { %v4460_v42 = vmul.f32 %v4458_v6, %v4414_v15  ;;  %v4459_v51 = vmul.f32 %v4458_v6, %v4413_v18 }
 0x510   : > { %v4424_v59 = vpop.permute.xlu1 %4423  ;;  %v4422_v23 = vpop.permute.xlu0 %4421 }
 0x511   : > { %v4464_v11 = vadd.f32 %v4462_v22, %v4460_v42  ;;  %v4463_v25 = vadd.f32 %v4462_v22, %v4459_v51  ;;  %v4428_v49 = vadd.f32 %v4424_v59, %v4372_v50  ;;  %v4427_v38 = vadd.f32 %v4422_v23, %v4371_v54 }
 0x513   : > { %v4466_v47 = vmax.f32 %v4464_v11, 0.0  ;;  %v4465_v31 = vmax.f32 %v4463_v25, 0.0  ;;  %v4470_v30 = vmul.f32 %v4468_v53, %v4428_v49  ;;  %v4469_v3 = vmul.f32 %v4468_v53, %v4427_v38 }
 0x514   : > { %v4438_v40 = vpop.permute.xlu1 %4437  ;;  %v4436_v26 = vpop.permute.xlu0 %4435 }
 0x515   : > { %4499 = vst.msk [vmem:[%s8644_s21 + $0x8] sm:$0xff] %vm4497_vm11, %v4466_v47  ;;  %4498 = vst.msk [vmem:[%s8644_s21] sm:$0xff] %vm4497_vm11, %v4465_v31  ;;  %v4474_v20 = vadd.f32 %v4472_v12, %v4470_v30  ;;  %v4473_v14 = vadd.f32 %v4472_v12, %v4469_v3  ;;  %v4442_v52 = vadd.f32 %v4438_v40, %v4386_v60 }
 0x516   : > { %v4441_v19 = vadd.f32 %v4436_v26, %v4385_v61 }
 0x517   : > { %v4476_v10 = vmax.f32 %v4474_v20, 0.0  ;;  %v4475_v32 = vmax.f32 %v4473_v14, 0.0  ;;  %v4480_v7 = vmul.f32 %v4478_v41, %v4442_v52 }
 0x518   : > { %v4479_v1 = vmul.f32 %v4478_v41, %v4441_v19  ;;  %v4452_v24 = vpop.permute.xlu1 %4451  ;;  %v4450_v16 = vpop.permute.xlu0 %4449 }
 0x519   : > { %4501 = vst.msk [vmem:[%s8644_s21 + $0x18] sm:$0xff] %vm4497_vm11, %v4476_v10  ;;  %4500 = vst.msk [vmem:[%s8644_s21 + $0x10] sm:$0xff] %vm4497_vm11, %v4475_v32  ;;  %v4484_v62 = vadd.f32 %v4482_v9, %v4480_v7  ;;  %v4456_v39 = vadd.f32 %v4452_v24, %v4400_v56  ;;  %v4455_v34 = vadd.f32 %v4450_v16, %v4399_v0 }
 0x51a   : > { %v4483_v45 = vadd.f32 %v4482_v9, %v4479_v1 }
 0x51b   : > { %v4486_v8 = vmax.f32 %v4484_v62, 0.0  ;;  %v4490_v13 = vmul.f32 %v4488_v63, %v4456_v39  ;;  %v4489_v57 = vmul.f32 %v4488_v63, %v4455_v34 }
 0x51c   : > { %v4485_v58 = vmax.f32 %v4483_v45, 0.0 }
 0x51d   : > { %4503 = vst.msk [vmem:[%s8644_s21 + $0x28] sm:$0xff] %vm4497_vm11, %v4486_v8  ;;  %v4494_v29 = vadd.f32 %v4492_v44, %v4490_v13  ;;  %v4493_v55 = vadd.f32 %v4492_v44, %v4489_v57 }
 0x51e   : > { %4502 = vst.msk [vmem:[%s8644_s21 + $0x20] sm:$0xff] %vm4497_vm11, %v4485_v58 }
 0x51f   : > { %v4496_v33 = vmax.f32 %v4494_v29, 0.0  ;;  %v4495_v5 = vmax.f32 %v4493_v55, 0.0 }
 0x521   : > { %4505 = vst.msk [vmem:[%s8644_s21 + $0x38] sm:$0xff] %vm4497_vm11, %v4496_v33  ;;  %4504 = vst.msk [vmem:[%s8644_s21 + $0x30] sm:$0xff] %vm4497_vm11, %v4495_v5 }
 0x522   : > { %5228 = shalt.err (!%p5225_p0)
}
 0x523   : > { %s5229_s15 = scalar_lea.hbm %s8666_s13, 1024  ;;  %s5233_s17 = scalar_lea.hbm %s8723_s7, 2048 }
 0x524   : > { %p5230_p6 = scmp.ne.s32.totalorder %s8666_s13, %s5229_s15  ;;  %p5234_p11 = scmp.lt.s32.totalorder %s8666_s13, %s8723_s7 }
 0x525   : > { %p5235_p13 = scmp.lt.s32.totalorder %s5233_s17, %s5229_s15 }
 0x526   : > { %p5231_p10 = pnand %p5230_p6, %p9222_p3 }
 0x527   : > { %p5236_p1 = por %p5235_p13, %p5234_p11 }
 0x528   : > { %p5232_p12 = pneg %p5231_p10 }
 0x52a   : > { %p5237_p2 = pnand %p5236_p1, %p5232_p12 }
 0x52c   : > { %5240 = shalt.err (!%p5237_p2)
}
 0x52d   : > { %s5302_s9 = smov 128   ;;  %s5303_s8 = smov 8  }
 0x52e   : > { %5016 = dma.vmem_to_hbm [thread:$0]  (%p9222_p3), %s8668_s29, 1024, %s8666_s13, %s8676_s28, %s5302_s9, %s5302_s9, %s5303_s8  }
 0x52f PF: > { %p5053_p4 = scmp.ge.s32.totalorder %s5291_s27, 2  ;;  %s4535_s22 = sand.u32 1, %s5279_s24  }
 0x530   : > { %p9223_p9 = scmp.ne.s32.totalorder %s8729_s12, 0  ;;  %s4536_s20 = scalar_lea.sflag [#allocation4], %s4535_s22 }
 0x532   : > { %p5038_p7 = pnand %p5053_p4, %p9223_p9 }
 0x534   : > { %p5039_p8 = pneg %p5038_p7 }
 0x536   : > { %5274 = dma.done.wait (%p5039_p8), %s4536_s20, 1024  }
 0x537   : > { %5276 = vsyncadd (%p5039_p8), %s4536_s20, 4294966272  ;;  %p21_p5 = scmp.ge.s32.totalorder %s5369_s30, 4   ;;  %s9224_s24 = smov %s5283_s25 }
 0x538   : > { %s9225_s25 = smov %s5287_s26  ;;  %s9226_s26 = smov %s5380_s10 }
 0x539   : > { %s9227_s27 = smov %s5369_s30  ;;  %23 = sbr.rel (!%p21_p5) target bundleno = 7 (0x7), region = 114 }
 0x53e   :  { %4541 = vsyncpa [#allocation4], 1 }
 0x53f   :  { %4543 = vsyncpa [#allocation4 + $0x1], 1 }
 0x540   :  { %4544 = vsyncpa [#allocation5], 1 }
 0x541   :  { %4546 = vsyncpa [#allocation5 + $0x1], 1 }
 0x542   :  { %4547 = vsyncpa [#allocation7], 1 }
 0x543   :  { %4548 = vsyncpa [#allocation10], 1 }
 0x544   :  { %4549 = vsyncpa [#allocation13], 1 }

</bundles_post_ra>
